<compile_context>
chip_gen: v5e
topology: v5e:2x2
jax: 0.10.0
libtpu: 0.0.40
codegen_flags: <defaults>
</compile_context>

<pallas_src>
import functools

import jax
import jax.numpy as jnp
from jax.experimental import pallas as pl
from jax.experimental.pallas import tpu as pltpu

BN_EPS = 1e-5
ACT_DTYPE = jnp.bfloat16            # storage dtype of activations / MXU operands
MM_VMEM_LIMIT = 28 * 1024 * 1024    # sized against v7x's 32 MiB scoped default


def _round_up(x, m):
    return (x + m - 1) // m * m


def _pad_rows(x2d, mp, value=0.0):
    m = x2d.shape[0]
    if mp == m:
        return x2d
    return jnp.pad(x2d, ((0, mp - m), (0, 0)), constant_values=value)


def _fused_row_plan(rows):
    """Row plan for the fused 3x3 conv (rows are in the padded spatial frame)."""
    if rows <= 1024:
        t = _round_up(rows, 8)
        return t, t
    return _round_up(rows, 512), 512


def _mm_row_plan(m, k):
    """Row plan for the generic patch matmul: keep the A block around 2 MiB."""
    cap_rows = max(256, (2 * 1024 * 1024) // (2 * k))
    if m <= cap_rows:
        t = _round_up(m, 8)
        return t, t
    for t in (2048, 1024, 512, 256):
        if t <= cap_rows:
            return _round_up(m, t), t
    return _round_up(m, 256), 256


def _ew_row_plan(m):
    """Row plan for elementwise / pooling slabs."""
    if m <= 2048:
        t = _round_up(m, 8)
        return t, t
    return _round_up(m, 512), 512


# ----------------------------- Pallas kernels -----------------------------

def _fused3x3_kernel(xm_ref, xh_ref, mask_ref, w_ref, y_ref, s_ref, buf_ref, *,
                     taps_off, cin, tm):
    """Fused 3x3 stride-1 conv: 9 tap matmuls accumulated in f32 + BN stats.

    xm_ref : (tm, cin)        main row tile of the padded-frame input slab
    xh_ref : (1, halo_pad, cin) halo rows (the first rows of the next tile)
    mask   : (tm, 1) f32      1.0 for rows that are real conv outputs
    w_ref  : (9*cin, cout)    full weight, tap-major
    y_ref  : (tm, cout)       bf16 output (padded frame)
    s_ref  : (1, 2, cout)     per-tile [sum; sum of squares] (masked)
    buf_ref: (tm + halo_pad, cin) VMEM scratch band
    """
    buf_ref[:tm, :] = xm_ref[...]
    buf_ref[tm:, :] = xh_ref[0]
    acc = None
    for t, off in enumerate(taps_off):
        a = buf_ref[off:off + tm, :]
        w = w_ref[t * cin:(t + 1) * cin, :]
        d = jnp.dot(a, w, preferred_element_type=jnp.float32)
        acc = d if acc is None else acc + d
    y_ref[...] = acc.astype(y_ref.dtype)
    m = mask_ref[...]
    ym = acc * m
    s_ref[0] = jnp.concatenate(
        [jnp.sum(ym, axis=0, keepdims=True),
         jnp.sum(acc * ym, axis=0, keepdims=True)], axis=0)


@functools.lru_cache(maxsize=None)
def _fused3x3_call(nt, tm, halo_pad, cin, cout, wp):
    taps_off = tuple(di * wp + dj for di in range(3) for dj in range(3))
    kern = functools.partial(_fused3x3_kernel, taps_off=taps_off, cin=cin, tm=tm)
    mp = nt * tm
    return pl.pallas_call(
        kern,
        out_shape=(jax.ShapeDtypeStruct((mp, cout), ACT_DTYPE),
                   jax.ShapeDtypeStruct((nt, 2, cout), jnp.float32)),
        grid=(nt,),
        in_specs=[pl.BlockSpec((tm, cin), lambda i: (i, 0)),
                  pl.BlockSpec((1, halo_pad, cin), lambda i: (i, 0, 0)),
                  pl.BlockSpec((tm, 1), lambda i: (i, 0)),
                  pl.BlockSpec((9 * cin, cout), lambda i: (0, 0))],
        out_specs=(pl.BlockSpec((tm, cout), lambda i: (i, 0)),
                   pl.BlockSpec((1, 2, cout), lambda i: (i, 0, 0))),
        scratch_shapes=[pltpu.VMEM((tm + halo_pad, cin), ACT_DTYPE)],
        compiler_params=pltpu.CompilerParams(
            dimension_semantics=("parallel",),
            vmem_limit_bytes=MM_VMEM_LIMIT),
    )


def _conv_mm_kernel(a_ref, b_ref, y_ref, s_ref):
    """Generic patch matmul (bf16 x bf16 -> f32 acc) + fused per-tile BN stats."""
    y = jnp.dot(a_ref[...], b_ref[...], preferred_element_type=jnp.float32)
    y_ref[...] = y.astype(y_ref.dtype)
    s_ref[0] = jnp.concatenate(
        [jnp.sum(y, axis=0, keepdims=True),
         jnp.sum(y * y, axis=0, keepdims=True)], axis=0)


@functools.lru_cache(maxsize=None)
def _conv_mm_call(nt, tm, k, cout):
    mp = nt * tm
    return pl.pallas_call(
        _conv_mm_kernel,
        out_shape=(jax.ShapeDtypeStruct((mp, cout), ACT_DTYPE),
                   jax.ShapeDtypeStruct((nt, 2, cout), jnp.float32)),
        grid=(nt,),
        in_specs=[pl.BlockSpec((tm, k), lambda i: (i, 0)),
                  pl.BlockSpec((k, cout), lambda i: (0, 0))],
        out_specs=(pl.BlockSpec((tm, cout), lambda i: (i, 0)),
                   pl.BlockSpec((1, 2, cout), lambda i: (i, 0, 0))),
        compiler_params=pltpu.CompilerParams(
            dimension_semantics=("parallel",),
            vmem_limit_bytes=MM_VMEM_LIMIT),
    )


def _affine_kernel(y_ref, s_ref, b_ref, o_ref, *, relu):
    v = y_ref[...].astype(jnp.float32) * s_ref[...] + b_ref[...]
    if relu:
        v = jnp.maximum(v, 0.0)
    o_ref[...] = v.astype(o_ref.dtype)


def _affine_res_kernel(y_ref, s_ref, b_ref, r_ref, o_ref, *, relu):
    v = (y_ref[...].astype(jnp.float32) * s_ref[...] + b_ref[...]
         + r_ref[...].astype(jnp.float32))
    if relu:
        v = jnp.maximum(v, 0.0)
    o_ref[...] = v.astype(o_ref.dtype)


@functools.lru_cache(maxsize=None)
def _affine_call(mp, tile, c, relu, with_res):
    row_spec = pl.BlockSpec((tile, c), lambda i: (i, 0))
    vec_spec = pl.BlockSpec((1, c), lambda i: (0, 0))
    if with_res:
        kern = functools.partial(_affine_res_kernel, relu=relu)
        in_specs = [row_spec, vec_spec, vec_spec, row_spec]
    else:
        kern = functools.partial(_affine_kernel, relu=relu)
        in_specs = [row_spec, vec_spec, vec_spec]
    return pl.pallas_call(
        kern,
        out_shape=jax.ShapeDtypeStruct((mp, c), ACT_DTYPE),
        grid=(mp // tile,),
        in_specs=in_specs,
        out_specs=row_spec,
        compiler_params=pltpu.CompilerParams(
            dimension_semantics=("parallel",)),
    )


def _max_taps_kernel(*refs):
    o_ref = refs[-1]
    acc = refs[0][...]                      # running max directly in bf16
    for r in refs[1:-1]:
        acc = jnp.maximum(acc, r[...])
    o_ref[...] = acc


@functools.lru_cache(maxsize=None)
def _max_taps_call(mp, tile, c, kk):
    row_spec = pl.BlockSpec((tile, c), lambda i: (i, 0))
    return pl.pallas_call(
        _max_taps_kernel,
        out_shape=jax.ShapeDtypeStruct((mp, c), ACT_DTYPE),
        grid=(mp // tile,),
        in_specs=[row_spec] * kk,
        out_specs=row_spec,
        compiler_params=pltpu.CompilerParams(
            dimension_semantics=("parallel",)),
    )


def _mean_kernel(x_ref, o_ref):
    o_ref[...] = jnp.mean(x_ref[...].astype(jnp.float32), axis=1)


@functools.lru_cache(maxsize=None)
def _mean_call(n, s, c):
    del s
    return pl.pallas_call(
        _mean_kernel, out_shape=jax.ShapeDtypeStruct((n, c), jnp.float32))


def _fc_kernel(a_ref, w_ref, b_ref, o_ref):
    o_ref[...] = (jnp.dot(a_ref[...], w_ref[...],
                          preferred_element_type=jnp.float32) + b_ref[...])


@functools.lru_cache(maxsize=None)
def _fc_call(mp, c, ncls):
    del c
    return pl.pallas_call(
        _fc_kernel, out_shape=jax.ShapeDtypeStruct((mp, ncls), jnp.float32))


# ----------------------------- layer ops (glue + kernels) -----------------------------

def _bn_scale_shift(stats, m, gamma, beta):
    mean = stats[0] / m
    var = jnp.maximum(stats[1] / m - mean * mean, 0.0)
    scale = gamma / jnp.sqrt(var + BN_EPS)
    shift = beta - mean * scale
    return scale, shift


def _apply_affine(y2d, scale, shift, residual, relu, n, oh, ow, cout):
    m = y2d.shape[0]
    mp, tile = _ew_row_plan(m)
    y2d = _pad_rows(y2d, mp)
    sc = scale.reshape(1, cout).astype(jnp.float32)
    sh = shift.reshape(1, cout).astype(jnp.float32)
    if residual is not None:
        r = _pad_rows(residual.astype(ACT_DTYPE).reshape(m, cout), mp)
        out = _affine_call(mp, tile, cout, relu, True)(y2d, sc, sh, r)
    else:
        out = _affine_call(mp, tile, cout, relu, False)(y2d, sc, sh)
    return out[:m].reshape(n, oh, ow, cout)


def _conv3x3_s1_bn(x, w2d, gamma, beta, residual, relu):
    """Fused-tap 3x3 stride-1 pad-1 conv + BN, no materialized patch matrix."""
    n, h, w, cin = x.shape
    cout = w2d.shape[1]
    hp, wp = h + 2, w + 2
    oh, ow = h, w
    np_rows = n * hp * wp
    m = n * oh * ow
    mp, tm = _fused_row_plan(np_rows)
    nt = mp // tm
    halo = 2 * wp + 2
    halo_pad = _round_up(halo, 8)

    xp = jnp.pad(x.astype(ACT_DTYPE),
                 ((0, 0), (1, 1), (1, 1), (0, 0))).reshape(np_rows, cin)
    slab = _pad_rows(xp, mp + tm)             # one extra tile of zeros: halo source
    xm = slab[:mp]
    xh = slab[tm:].reshape(nt, tm, cin)[:, :halo_pad, :]

    # Row-validity mask: 1.0 only for rows that are real conv outputs.
    p = jnp.arange(mp, dtype=jnp.int32)
    hh = (p // wp) % hp
    ww = p % wp
    mask = ((hh < oh) & (ww < ow) & (p < np_rows)).astype(jnp.float32)
    mask = mask.reshape(mp, 1)

    y_p, part = _fused3x3_call(nt, tm, halo_pad, cin, cout, wp)(xm, xh, mask, w2d)
    scale, shift = _bn_scale_shift(jnp.sum(part, axis=0), m, gamma, beta)

    y = y_p[:np_rows].reshape(n, hp, wp, cout)[:, :oh, :ow, :].reshape(m, cout)
    return _apply_affine(y, scale, shift, residual, relu, n, oh, ow, cout)


def _im2col(x, kh, kw, stride, pad):
    n, h, w, c = x.shape
    oh = (h + 2 * pad - kh) // stride + 1
    ow = (w + 2 * pad - kw) // stride + 1
    xp = jnp.pad(x, ((0, 0), (pad, pad), (pad, pad), (0, 0)))
    cols = []
    for i in range(kh):
        for j in range(kw):
            cols.append(xp[:, i::stride, j::stride, :][:, :oh, :ow, :])
    patches = cols[0] if len(cols) == 1 else jnp.concatenate(cols, axis=-1)
    return patches.reshape(n * oh * ow, kh * kw * c), oh, ow


def _conv_generic_bn(x, w2d, gamma, beta, residual, kh, kw, stride, pad, relu):
    """Stem / stride-2 / 1x1 convs via (small) im2col + full-cout matmul."""
    n = x.shape[0]
    k, cout = w2d.shape
    patches, oh, ow = _im2col(x.astype(ACT_DTYPE), kh, kw, stride, pad)
    m = n * oh * ow
    mp, tm = _mm_row_plan(m, k)
    nt = mp // tm
    patches = _pad_rows(patches, mp)          # padded rows are exact zeros
    y, part = _conv_mm_call(nt, tm, k, cout)(patches, w2d)
    scale, shift = _bn_scale_shift(jnp.sum(part, axis=0), m, gamma, beta)
    return _apply_affine(y[:m], scale, shift, residual, relu, n, oh, ow, cout)


@functools.partial(jax.jit, static_argnames=("kh", "kw", "stride", "pad", "relu"))
def conv_bn(x, w2d, gamma, beta, residual=None, *, kh, kw, stride, pad, relu):
    """Conv2d(bias=False) -> BatchNorm2d (batch stats) -> [+residual] -> [ReLU]."""
    if kh == 3 and kw == 3 and stride == 1 and pad == 1:
        return _conv3x3_s1_bn(x, w2d, gamma, beta, residual, relu)
    return _conv_generic_bn(x, w2d, gamma, beta, residual, kh, kw, stride, pad, relu)


@functools.partial(jax.jit, static_argnames=("k", "stride", "pad"))
def max_pool2d(x, *, k=3, stride=2, pad=1):
    n, h, w, c = x.shape
    oh = (h + 2 * pad - k) // stride + 1
    ow = (w + 2 * pad - k) // stride + 1
    xp = jnp.pad(x, ((0, 0), (pad, pad), (pad, pad), (0, 0)),
                 constant_values=-jnp.inf)
    m = n * oh * ow
    mp, tile = _ew_row_plan(m)
    taps = []
    for i in range(k):
        for j in range(k):
            t = xp[:, i::stride, j::stride, :][:, :oh, :ow, :].reshape(m, c)
            taps.append(_pad_rows(t, mp))
    out = _max_taps_call(mp, tile, c, k * k)(*taps)
    return out[:m].reshape(n, oh, ow, c)


@jax.jit
def head(x, fc_w, fc_b):
    """Global 7x7 avg pool + Linear."""
    n, h, w, c = x.shape
    pooled = _mean_call(n, h * w, c)(x.reshape(n, h * w, c))      # (N, C) f32
    mp = _round_up(max(n, 8), 8)
    a = _pad_rows(pooled.astype(ACT_DTYPE), mp)
    ncls = fc_w.shape[1]
    logits = _fc_call(mp, c, ncls)(a, fc_w, fc_b.reshape(1, ncls))
    return logits[:n]


def residual_block(x, p):
    out = conv_bn(x, p["w1"], p["g1"], p["b1"],
                  kh=3, kw=3, stride=p["stride"], pad=1, relu=True)
    if "ws" in p:   # projection shortcut (first block of each layer)
        res = conv_bn(x, p["ws"], p["gs"], p["bs"],
                      kh=1, kw=1, stride=p["stride"], pad=0, relu=False)
    else:
        res = x
    # out = relu(bn2(conv2(out)) + residual)
    return conv_bn(out, p["w2"], p["g2"], p["b2"], residual=res,
                   kh=3, kw=3, stride=1, pad=1, relu=True)


# ----------------------------- parameters & model -----------------------------

def _conv_w(key, kh, kw, cin, cout):
    # Pre-reshaped to (K, cout) and pre-cast to bf16 at init (per perf review).
    fan_in = kh * kw * cin
    w = jax.random.normal(key, (kh, kw, cin, cout), jnp.float32) * (2.0 / fan_in) ** 0.5
    return w.reshape(kh * kw * cin, cout).astype(ACT_DTYPE)


def _bn(c):
    return jnp.ones((c,), jnp.float32), jnp.zeros((c,), jnp.float32)


def init_params(key, numclasses=512):
    keys = iter(jax.random.split(key, 64))
    params = {"pre_w": _conv_w(next(keys), 7, 7, 3, 64)}
    params["pre_g"], params["pre_b"] = _bn(64)

    def make_layer(inc, outc, n_blocks, stride):
        blocks = []
        for b in range(n_blocks):
            cin = inc if b == 0 else outc
            s = stride if b == 0 else 1
            blk = {"stride": s,
                   "w1": _conv_w(next(keys), 3, 3, cin, outc),
                   "w2": _conv_w(next(keys), 3, 3, outc, outc)}
            blk["g1"], blk["b1"] = _bn(outc)
            blk["g2"], blk["b2"] = _bn(outc)
            if b == 0:
                blk["ws"] = _conv_w(next(keys), 1, 1, cin, outc)
                blk["gs"], blk["bs"] = _bn(outc)
            blocks.append(blk)
        return blocks

    params["layer1"] = make_layer(64, 128, 4, 1)
    params["layer2"] = make_layer(128, 256, 4, 2)
    params["layer3"] = make_layer(256, 256, 6, 2)
    params["layer4"] = make_layer(256, 512, 3, 2)
    params["fc_w"] = (jax.random.normal(next(keys), (512, numclasses), jnp.float32)
                      * (1.0 / 512) ** 0.5).astype(ACT_DTYPE)
    params["fc_b"] = jnp.zeros((numclasses,), jnp.float32)
    return params


def resnet_forward(params, x_nchw):
    x = jnp.transpose(x_nchw, (0, 2, 3, 1)).astype(ACT_DTYPE)      # NCHW -> NHWC
    # pre: Conv7x7/2 -> BN -> ReLU -> MaxPool3x3/2
    x = conv_bn(x, params["pre_w"], params["pre_g"], params["pre_b"],
                kh=7, kw=7, stride=2, pad=3, relu=True)
    x = max_pool2d(x)
    for name in ("layer1", "layer2", "layer3", "layer4"):
        for blk in params[name]:
            x = residual_block(x, blk)
    n, h, w, c = x.shape
    assert h == 7 and w == 7, (h, w)   # F.avg_pool2d(x, 7) => single 7x7 window
    return head(x, params["fc_w"], params["fc_b"])


if __name__ == "__main__":
    key = jax.random.PRNGKey(0)
    pkey, xkey = jax.random.split(key)
    params = init_params(pkey, numclasses=512)
    # Smallest input consistent with the forward pass (5 stride-2 stages -> 7x7).
    x = jax.random.normal(xkey, (2, 3, 224, 224), jnp.float32)
    out = resnet_forward(params, x)
    out = jax.block_until_ready(out)
    assert out.shape == (2, 512), out.shape
    assert bool(jnp.all(jnp.isfinite(out)))
    print("KERNEL_OK")
</pallas_src>

<mosaic_0001>
module attributes {stable_mosaic.version = 11 : i64} {
  func.func @_conv_mm_kernel(%arg0: i32, %arg1: memref<2048x147xbf16, #tpu.memory_space<vmem>>, %arg2: memref<147x64xbf16, #tpu.memory_space<vmem>>, %arg3: memref<2048x64xbf16, #tpu.memory_space<vmem>>, %arg4: memref<1x2x64xf32, #tpu.memory_space<vmem>>) attributes {dimension_semantics = [#tpu.dimension_semantics<parallel>], iteration_bounds = array<i64: 13>, scalar_prefetch = 0 : i64, scratch_operands = 0 : i64, tpu.core_type = #tpu.core_type<tc>, window_params = [{transform_indices = @transform_0, window_bounds = array<i64: 2048, 147>}, {pipeline_mode = #tpu.pipeline_mode<synchronous>, transform_indices = @transform_1, window_bounds = array<i64: 147, 64>}, {transform_indices = @transform_2, window_bounds = array<i64: 2048, 64>}, {transform_indices = @transform_3, window_bounds = array<i64: 1, 2, 64>}]} {
    %c0 = arith.constant 0 : index
    %c0_0 = arith.constant 0 : index
    %0 = vector.load %arg1[%c0, %c0_0] : memref<2048x147xbf16, #tpu.memory_space<vmem>>, vector<2048x147xbf16>
    %c0_1 = arith.constant 0 : index
    %c0_2 = arith.constant 0 : index
    %1 = vector.load %arg2[%c0_1, %c0_2] : memref<147x64xbf16, #tpu.memory_space<vmem>>, vector<147x64xbf16>
    %cst = arith.constant dense<0.000000e+00> : vector<2048x64xf32>
    %2 = tpu.matmul %0, %1, %cst {dimension_numbers = #tpu.dot_dimension_numbers<[1], [0], [0], [1], [0, 0, 1, 1], [], []>} : vector<2048x147xbf16>, vector<147x64xbf16>, vector<2048x64xf32> -> vector<2048x64xf32>
    %3 = arith.truncf %2 : vector<2048x64xf32> to vector<2048x64xbf16>
    %c0_3 = arith.constant 0 : index
    %c0_4 = arith.constant 0 : index
    %4 = vector.load %arg3[%c0_3, %c0_4] : memref<2048x64xbf16, #tpu.memory_space<vmem>>, vector<2048x64xbf16>
    tpu.vector_store %arg3[%c0_3, %c0_4], %3 {strides = array<i32>} : memref<2048x64xbf16, #tpu.memory_space<vmem>>, vector<2048x64xbf16>,
    %cst_5 = arith.constant dense<0.000000e+00> : vector<64xf32>
    %5 = vector.multi_reduction <add>, %2, %cst_5 [0] : vector<2048x64xf32> to vector<64xf32>
    %6 = vector.shape_cast %5 : vector<64xf32> to vector<1x64xf32>
    %7 = arith.mulf %2, %2 : vector<2048x64xf32>
    %cst_6 = arith.constant dense<0.000000e+00> : vector<64xf32>
    %8 = vector.multi_reduction <add>, %7, %cst_6 [0] : vector<2048x64xf32> to vector<64xf32>
    %9 = vector.shape_cast %8 : vector<64xf32> to vector<1x64xf32>
    %10 = tpu.concatenate %6, %9 in 0 : vector<1x64xf32>, vector<1x64xf32> -> vector<2x64xf32>
    %c0_7 = arith.constant 0 : index
    %c0_8 = arith.constant 0 : index
    %c0_9 = arith.constant 0 : index
    %11 = vector.load %arg4[%c0_7, %c0_8, %c0_9] : memref<1x2x64xf32, #tpu.memory_space<vmem>>, vector<1x2x64xf32>
    %12 = vector.shape_cast %11 : vector<1x2x64xf32> to vector<2x64xf32>
    %13 = vector.shape_cast %10 : vector<2x64xf32> to vector<1x2x64xf32>
    tpu.vector_store %arg4[%c0_7, %c0_8, %c0_9], %13 {strides = array<i32>} : memref<1x2x64xf32, #tpu.memory_space<vmem>>, vector<1x2x64xf32>,
    return
  }
  func.func @transform_0(%arg0: i32) -> (i32, i32) {
    %c0_i32 = arith.constant 0 : i32
    %c0_i32_0 = arith.constant 0 : i32
    return %arg0, %c0_i32 : i32, i32
  }
  func.func @transform_1(%arg0: i32) -> (i32, i32) {
    %c0_i32 = arith.constant 0 : i32
    %c0_i32_0 = arith.constant 0 : i32
    %c0_i32_1 = arith.constant 0 : i32
    return %c0_i32, %c0_i32_0 : i32, i32
  }
  func.func @transform_2(%arg0: i32) -> (i32, i32) {
    %c0_i32 = arith.constant 0 : i32
    %c0_i32_0 = arith.constant 0 : i32
    return %arg0, %c0_i32 : i32, i32
  }
  func.func @transform_3(%arg0: i32) -> (i32, i32, i32) {
    %c0_i32 = arith.constant 0 : i32
    %c0_i32_0 = arith.constant 0 : i32
    %c0_i32_1 = arith.constant 0 : i32
    return %arg0, %c0_i32, %c0_i32_0 : i32, i32, i32
  }
}

module attributes {stable_mosaic.version = 11 : i64} {
  func.func @_affine_kernel(%arg0: i32, %arg1: memref<512x64xbf16, #tpu.memory_space<vmem>>, %arg2: memref<1x64xf32, #tpu.memory_space<vmem>>, %arg3: memref<1x64xf32, #tpu.memory_space<vmem>>, %arg4: memref<512x64xbf16, #tpu.memory_space<vmem>>) attributes {dimension_semantics = [#tpu.dimension_semantics<parallel>], iteration_bounds = array<i64: 49>, scalar_prefetch = 0 : i64, scratch_operands = 0 : i64, tpu.core_type = #tpu.core_type<tc>, window_params = [{transform_indices = @transform_0, window_bounds = array<i64: 512, 64>}, {pipeline_mode = #tpu.pipeline_mode<synchronous>, transform_indices = @transform_1, window_bounds = array<i64: 1, 64>}, {pipeline_mode = #tpu.pipeline_mode<synchronous>, transform_indices = @transform_2, window_bounds = array<i64: 1, 64>}, {transform_indices = @transform_3, window_bounds = array<i64: 512, 64>}]} {
    %c0 = arith.constant 0 : index
    %c0_0 = arith.constant 0 : index
    %0 = vector.load %arg1[%c0, %c0_0] : memref<512x64xbf16, #tpu.memory_space<vmem>>, vector<512x64xbf16>
    %1 = arith.extf %0 : vector<512x64xbf16> to vector<512x64xf32>
    %c0_1 = arith.constant 0 : index
    %c0_2 = arith.constant 0 : index
    %2 = vector.load %arg2[%c0_1, %c0_2] : memref<1x64xf32, #tpu.memory_space<vmem>>, vector<1x64xf32>
    %3 = vector.broadcast %2 : vector<1x64xf32> to vector<512x64xf32>
    %4 = arith.mulf %1, %3 : vector<512x64xf32>
    %c0_3 = arith.constant 0 : index
    %c0_4 = arith.constant 0 : index
    %5 = vector.load %arg3[%c0_3, %c0_4] : memref<1x64xf32, #tpu.memory_space<vmem>>, vector<1x64xf32>
    %6 = vector.broadcast %5 : vector<1x64xf32> to vector<512x64xf32>
    %7 = arith.addf %4, %6 : vector<512x64xf32>
    %cst = arith.constant 0.000000e+00 : f32
    %8 = vector.broadcast %cst : f32 to vector<512x64xf32>
    %9 = arith.maximumf %7, %8 : vector<512x64xf32>
    %10 = arith.truncf %9 : vector<512x64xf32> to vector<512x64xbf16>
    %c0_5 = arith.constant 0 : index
    %c0_6 = arith.constant 0 : index
    %11 = vector.load %arg4[%c0_5, %c0_6] : memref<512x64xbf16, #tpu.memory_space<vmem>>, vector<512x64xbf16>
    tpu.vector_store %arg4[%c0_5, %c0_6], %10 {strides = array<i32>} : memref<512x64xbf16, #tpu.memory_space<vmem>>, vector<512x64xbf16>,
    return
  }
  func.func @transform_0(%arg0: i32) -> (i32, i32) {
    %c0_i32 = arith.constant 0 : i32
    %c0_i32_0 = arith.constant 0 : i32
    return %arg0, %c0_i32 : i32, i32
  }
  func.func @transform_1(%arg0: i32) -> (i32, i32) {
    %c0_i32 = arith.constant 0 : i32
    %c0_i32_0 = arith.constant 0 : i32
    %c0_i32_1 = arith.constant 0 : i32
    return %c0_i32, %c0_i32_0 : i32, i32
  }
  func.func @transform_2(%arg0: i32) -> (i32, i32) {
    %c0_i32 = arith.constant 0 : i32
    %c0_i32_0 = arith.constant 0 : i32
    %c0_i32_1 = arith.constant 0 : i32
    return %c0_i32, %c0_i32_0 : i32, i32
  }
  func.func @transform_3(%arg0: i32) -> (i32, i32) {
    %c0_i32 = arith.constant 0 : i32
    %c0_i32_0 = arith.constant 0 : i32
    return %arg0, %c0_i32 : i32, i32
  }
}

</mosaic_0001>

<bundles_post_ra>
// kernel: conv_bn.3
= control target key start
LH: loop header
LB: loop body
LE: loop exit
PB: predicated region body
PF: predicated region fallthrough
CT: control target
= control target key end

     0   :  { %s895_s12 = smov 0   ;;  %s1221_s0 = inlined_call_operand.vmem [shape: bf16[25088,64], index: 0, kind: input, shape index: {}]   ;;  %s1222_s1 = inlined_call_operand.vmem [shape: f32[1,64], index: 1, kind: input, shape index: {}]   ;;  %s1223_s2 = inlined_call_operand.vmem [shape: f32[1,64], index: 2, kind: input, shape index: {}]   ;;  %s1224_s3 = inlined_call_operand.vmem [shape: bf16[25088,64], index: 3, kind: output, shape index: {}]  }
   0x1 LB: > { %s687_s13 = sadd.s32 4294967295, %s873_s12   ;;  %p691_p0 = scmp.ge.s32.totalorder %s873_s12, 1  ;;  %s873_s12 = sphi %s895_s12, %s13_s12  }
   0x2   : > { %p138_p1 = scmp.lt.s32.totalorder %s873_s12, 50 }
   0x4   : > { %p139_p2 = pnand %p691_p0, %p138_p1 }
   0x5   : > { %s692_s14 = sshll.u32 (!%p139_p2), %s687_s13, 6 }
   0x6   : > { %142 = sbr.rel (%p139_p2) target bundleno = 103 (0x67), region = 32  ;;  %p163_p3 = scmp.lt.s32.totalorder (!%p139_p2), %s692_s14, 3135 }
   0xb   : > { %s1226_s14 = smov (!%p163_p3, %s692_s14), 3135  ;;  %v916_v0 = vld [vmem:[%s1222_s1] ss:$0 sm:$0xff]  ;;  %vm566_vm0 = vcmask 519168  }
   0xc   : > { %s693_s15 = sshll.u32 %s1226_s14, 2  ;;  %v924_v5 = vld [vmem:[%s1223_s2] ss:$0 sm:$0xff] }
   0xd   : > { %s911_s18 = scalar_lea.vmem %s1221_s0, %s693_s15  ;;  %s948_s25 = scalar_lea.vmem %s1224_s3, %s693_s15 }
   0xe   : > { %v699_v1 = vld [vmem:[%s911_s18] sm:$0xff]   ;;  %v826_v2 = vld [vmem:[%s911_s18 + $0x8] sm:$0xff]   ;;  %v827_v3 = vld [vmem:[%s911_s18 + $0x10] sm:$0xff]  }
   0xf   : > { %v700_v4 = vunpack.c.l.bf16 %v699_v1  ;;  %v701_v6 = vunpack.c.h.bf16 %v699_v1  ;;  %v704_v7 = vunpack.c.l.bf16 %v826_v2  ;;  %v705_v8 = vunpack.c.h.bf16 %v826_v2  ;;  %v828_v9 = vld [vmem:[%s911_s18 + $0x18] sm:$0xff]   ;;  %v829_v38 = vld [vmem:[%s911_s18 + $0x20] sm:$0xff]   ;;  %v830_v39 = vld [vmem:[%s911_s18 + $0x28] sm:$0xff]  }
  0x10   : > { %v708_v10 = vunpack.c.l.bf16 %v827_v3  ;;  %v709_v11 = vunpack.c.h.bf16 %v827_v3  ;;  %v712_v12 = vunpack.c.l.bf16 %v828_v9  ;;  %v713_v13 = vunpack.c.h.bf16 %v828_v9  ;;  %v831_v44 = vld [vmem:[%s911_s18 + $0x30] sm:$0xff]   ;;  %v832_v45 = vld [vmem:[%s911_s18 + $0x38] sm:$0xff]  }
  0x11   : > { %v306_v14 = vmul.f32 %v916_v0, %v700_v4  ;;  %v307_v15 = vmul.f32 %v916_v0, %v701_v6  ;;  %v308_v16 = vmul.f32 %v916_v0, %v704_v7  ;;  %v309_v17 = vmul.f32 %v916_v0, %v705_v8 }
  0x12   : > { %v310_v18 = vmul.f32 %v916_v0, %v708_v10  ;;  %v311_v19 = vmul.f32 %v916_v0, %v709_v11  ;;  %v312_v20 = vmul.f32 %v916_v0, %v712_v12  ;;  %v313_v21 = vmul.f32 %v916_v0, %v713_v13  ;;  %v833_v12 = vld [vmem:[%s911_s18 + $0x40] sm:$0xff]   ;;  %v834_v13 = vld [vmem:[%s911_s18 + $0x48] sm:$0xff]  }
  0x13   : > { %v374_v22 = vadd.f32 %v924_v5, %v306_v14  ;;  %v375_v23 = vadd.f32 %v924_v5, %v307_v15  ;;  %v376_v24 = vadd.f32 %v924_v5, %v308_v16  ;;  %v377_v25 = vadd.f32 %v924_v5, %v309_v17 }
  0x14   : > { %v378_v26 = vadd.f32 %v924_v5, %v310_v18  ;;  %v379_v27 = vadd.f32 %v924_v5, %v311_v19  ;;  %v380_v28 = vadd.f32 %v924_v5, %v312_v20  ;;  %v381_v29 = vadd.f32 %v924_v5, %v313_v21 }
  0x15   : > { %v438_v30 = vmax.f32 %v374_v22, 0.0  ;;  %v439_v31 = vmax.f32 %v375_v23, 0.0  ;;  %v440_v32 = vmax.f32 %v376_v24, 0.0  ;;  %v441_v33 = vmax.f32 %v377_v25, 0.0 }
  0x16   : > { %v442_v34 = vmax.f32 %v378_v26, 0.0  ;;  %v443_v35 = vmax.f32 %v379_v27, 0.0  ;;  %v444_v36 = vmax.f32 %v380_v28, 0.0  ;;  %v445_v37 = vmax.f32 %v381_v29, 0.0  ;;  %v835_v26 = vld [vmem:[%s911_s18 + $0x50] sm:$0xff]   ;;  %v836_v27 = vld [vmem:[%s911_s18 + $0x58] sm:$0xff]  }
  0x17   : > { %v502_v40 = vpack.c.bf16 %v438_v30, %v438_v30  ;;  %v503_v41 = vpack.c.bf16 %v439_v31, %v439_v31  ;;  %v504_v42 = vpack.c.bf16 %v440_v32, %v440_v32  ;;  %v505_v43 = vpack.c.bf16 %v441_v33, %v441_v33 }
  0x18   : > { %v506_v46 = vpack.c.bf16 %v442_v34, %v442_v34  ;;  %v507_v47 = vpack.c.bf16 %v443_v35, %v443_v35  ;;  %v508_v48 = vpack.c.bf16 %v444_v36, %v444_v36  ;;  %v509_v49 = vpack.c.bf16 %v445_v37, %v445_v37 }
  0x19   : > { %567 = vst.msk [vmem:[%s948_s25] sm:$0xf] %vm566_vm0, %v502_v40  ;;  %v716_v50 = vunpack.c.l.bf16 %v829_v38  ;;  %v717_v51 = vunpack.c.h.bf16 %v829_v38  ;;  %v720_v52 = vunpack.c.l.bf16 %v830_v39  ;;  %v721_v53 = vunpack.c.h.bf16 %v830_v39 }
  0x1a   : > { %568 = vst.msk [vmem:[%s948_s25 + $0x4] sm:$0xf] %vm566_vm0, %v503_v41  ;;  %v724_v54 = vunpack.c.l.bf16 %v831_v44  ;;  %v725_v55 = vunpack.c.h.bf16 %v831_v44  ;;  %v728_v56 = vunpack.c.l.bf16 %v832_v45  ;;  %v729_v57 = vunpack.c.h.bf16 %v832_v45 }
  0x1b   : > { %569 = vst.msk [vmem:[%s948_s25 + $0x8] sm:$0xf] %vm566_vm0, %v504_v42  ;;  %v314_v58 = vmul.f32 %v916_v0, %v716_v50  ;;  %v315_v59 = vmul.f32 %v916_v0, %v717_v51  ;;  %v316_v60 = vmul.f32 %v916_v0, %v720_v52  ;;  %v317_v61 = vmul.f32 %v916_v0, %v721_v53 }
  0x1c   : > { %570 = vst.msk [vmem:[%s948_s25 + $0xc] sm:$0xf] %vm566_vm0, %v505_v43  ;;  %v318_v62 = vmul.f32 %v916_v0, %v724_v54  ;;  %v319_v63 = vmul.f32 %v916_v0, %v725_v55  ;;  %v320_v1 = vmul.f32 %v916_v0, %v728_v56  ;;  %v321_v2 = vmul.f32 %v916_v0, %v729_v57  ;;  %v837_v56 = vld [vmem:[%s911_s18 + $0x60] sm:$0xff]   ;;  %v838_v57 = vld [vmem:[%s911_s18 + $0x68] sm:$0xff]  }
  0x1d   : > { %571 = vst.msk [vmem:[%s948_s25 + $0x10] sm:$0xf] %vm566_vm0, %v506_v46  ;;  %v382_v3 = vadd.f32 %v924_v5, %v314_v58  ;;  %v383_v4 = vadd.f32 %v924_v5, %v315_v59  ;;  %v384_v6 = vadd.f32 %v924_v5, %v316_v60  ;;  %v385_v7 = vadd.f32 %v924_v5, %v317_v61 }
  0x1e   : > { %572 = vst.msk [vmem:[%s948_s25 + $0x14] sm:$0xf] %vm566_vm0, %v507_v47  ;;  %v386_v8 = vadd.f32 %v924_v5, %v318_v62  ;;  %v387_v9 = vadd.f32 %v924_v5, %v319_v63  ;;  %v388_v10 = vadd.f32 %v924_v5, %v320_v1  ;;  %v389_v11 = vadd.f32 %v924_v5, %v321_v2 }
  0x1f   : > { %573 = vst.msk [vmem:[%s948_s25 + $0x18] sm:$0xf] %vm566_vm0, %v508_v48  ;;  %v446_v14 = vmax.f32 %v382_v3, 0.0  ;;  %v447_v15 = vmax.f32 %v383_v4, 0.0  ;;  %v448_v16 = vmax.f32 %v384_v6, 0.0  ;;  %v449_v17 = vmax.f32 %v385_v7, 0.0 }
  0x20   : > { %574 = vst.msk [vmem:[%s948_s25 + $0x1c] sm:$0xf] %vm566_vm0, %v509_v49  ;;  %v450_v18 = vmax.f32 %v386_v8, 0.0  ;;  %v451_v19 = vmax.f32 %v387_v9, 0.0  ;;  %v452_v20 = vmax.f32 %v388_v10, 0.0  ;;  %v453_v21 = vmax.f32 %v389_v11, 0.0 }
  0x21   : > { %v510_v22 = vpack.c.bf16 %v446_v14, %v446_v14  ;;  %v511_v23 = vpack.c.bf16 %v447_v15, %v447_v15  ;;  %v512_v24 = vpack.c.bf16 %v448_v16, %v448_v16  ;;  %v513_v25 = vpack.c.bf16 %v449_v17, %v449_v17  ;;  %v839_v8 = vld [vmem:[%s911_s18 + $0x70] sm:$0xff]   ;;  %v840_v9 = vld [vmem:[%s911_s18 + $0x78] sm:$0xff]  }
  0x22   : > { %v514_v28 = vpack.c.bf16 %v450_v18, %v450_v18  ;;  %v515_v29 = vpack.c.bf16 %v451_v19, %v451_v19  ;;  %v516_v30 = vpack.c.bf16 %v452_v20, %v452_v20  ;;  %v517_v31 = vpack.c.bf16 %v453_v21, %v453_v21 }
  0x23   : > { %575 = vst.msk [vmem:[%s948_s25 + $0x20] sm:$0xf] %vm566_vm0, %v510_v22  ;;  %v732_v32 = vunpack.c.l.bf16 %v833_v12  ;;  %v733_v33 = vunpack.c.h.bf16 %v833_v12  ;;  %v736_v34 = vunpack.c.l.bf16 %v834_v13  ;;  %v737_v35 = vunpack.c.h.bf16 %v834_v13 }
  0x24   : > { %576 = vst.msk [vmem:[%s948_s25 + $0x24] sm:$0xf] %vm566_vm0, %v511_v23  ;;  %v740_v36 = vunpack.c.l.bf16 %v835_v26  ;;  %v741_v37 = vunpack.c.h.bf16 %v835_v26  ;;  %v744_v38 = vunpack.c.l.bf16 %v836_v27  ;;  %v745_v39 = vunpack.c.h.bf16 %v836_v27 }
  0x25   : > { %577 = vst.msk [vmem:[%s948_s25 + $0x28] sm:$0xf] %vm566_vm0, %v512_v24  ;;  %v322_v40 = vmul.f32 %v916_v0, %v732_v32  ;;  %v323_v41 = vmul.f32 %v916_v0, %v733_v33  ;;  %v324_v42 = vmul.f32 %v916_v0, %v736_v34  ;;  %v325_v43 = vmul.f32 %v916_v0, %v737_v35 }
  0x26   : > { %578 = vst.msk [vmem:[%s948_s25 + $0x2c] sm:$0xf] %vm566_vm0, %v513_v25  ;;  %v326_v44 = vmul.f32 %v916_v0, %v740_v36  ;;  %v327_v45 = vmul.f32 %v916_v0, %v741_v37  ;;  %v328_v46 = vmul.f32 %v916_v0, %v744_v38  ;;  %v329_v47 = vmul.f32 %v916_v0, %v745_v39  ;;  %v841_v38 = vld [vmem:[%s911_s18 + $0x80] sm:$0xff]   ;;  %v842_v39 = vld [vmem:[%s911_s18 + $0x88] sm:$0xff]  }
  0x27   : > { %579 = vst.msk [vmem:[%s948_s25 + $0x30] sm:$0xf] %vm566_vm0, %v514_v28  ;;  %v390_v48 = vadd.f32 %v924_v5, %v322_v40  ;;  %v391_v49 = vadd.f32 %v924_v5, %v323_v41  ;;  %v392_v50 = vadd.f32 %v924_v5, %v324_v42  ;;  %v393_v51 = vadd.f32 %v924_v5, %v325_v43 }
  0x28   : > { %580 = vst.msk [vmem:[%s948_s25 + $0x34] sm:$0xf] %vm566_vm0, %v515_v29  ;;  %v394_v52 = vadd.f32 %v924_v5, %v326_v44  ;;  %v395_v53 = vadd.f32 %v924_v5, %v327_v45  ;;  %v396_v54 = vadd.f32 %v924_v5, %v328_v46  ;;  %v397_v55 = vadd.f32 %v924_v5, %v329_v47 }
  0x29   : > { %581 = vst.msk [vmem:[%s948_s25 + $0x38] sm:$0xf] %vm566_vm0, %v516_v30  ;;  %v454_v58 = vmax.f32 %v390_v48, 0.0  ;;  %v455_v59 = vmax.f32 %v391_v49, 0.0  ;;  %v456_v60 = vmax.f32 %v392_v50, 0.0  ;;  %v457_v61 = vmax.f32 %v393_v51, 0.0 }
  0x2a   : > { %582 = vst.msk [vmem:[%s948_s25 + $0x3c] sm:$0xf] %vm566_vm0, %v517_v31  ;;  %v458_v62 = vmax.f32 %v394_v52, 0.0  ;;  %v459_v63 = vmax.f32 %v395_v53, 0.0  ;;  %v460_v1 = vmax.f32 %v396_v54, 0.0  ;;  %v461_v2 = vmax.f32 %v397_v55, 0.0 }
  0x2b   : > { %v518_v3 = vpack.c.bf16 %v454_v58, %v454_v58  ;;  %v519_v4 = vpack.c.bf16 %v455_v59, %v455_v59  ;;  %v520_v6 = vpack.c.bf16 %v456_v60, %v456_v60  ;;  %v521_v7 = vpack.c.bf16 %v457_v61, %v457_v61  ;;  %v843_v52 = vld [vmem:[%s911_s18 + $0x90] sm:$0xff]   ;;  %v844_v53 = vld [vmem:[%s911_s18 + $0x98] sm:$0xff]  }
  0x2c   : > { %v522_v10 = vpack.c.bf16 %v458_v62, %v458_v62  ;;  %v523_v11 = vpack.c.bf16 %v459_v63, %v459_v63  ;;  %v524_v12 = vpack.c.bf16 %v460_v1, %v460_v1  ;;  %v525_v13 = vpack.c.bf16 %v461_v2, %v461_v2 }
  0x2d   : > { %583 = vst.msk [vmem:[%s948_s25 + $0x40] sm:$0xf] %vm566_vm0, %v518_v3  ;;  %v748_v14 = vunpack.c.l.bf16 %v837_v56  ;;  %v749_v15 = vunpack.c.h.bf16 %v837_v56  ;;  %v752_v16 = vunpack.c.l.bf16 %v838_v57  ;;  %v753_v17 = vunpack.c.h.bf16 %v838_v57 }
  0x2e   : > { %584 = vst.msk [vmem:[%s948_s25 + $0x44] sm:$0xf] %vm566_vm0, %v519_v4  ;;  %v756_v18 = vunpack.c.l.bf16 %v839_v8  ;;  %v757_v19 = vunpack.c.h.bf16 %v839_v8  ;;  %v760_v20 = vunpack.c.l.bf16 %v840_v9  ;;  %v761_v21 = vunpack.c.h.bf16 %v840_v9 }
  0x2f   : > { %585 = vst.msk [vmem:[%s948_s25 + $0x48] sm:$0xf] %vm566_vm0, %v520_v6  ;;  %v330_v22 = vmul.f32 %v916_v0, %v748_v14  ;;  %v331_v23 = vmul.f32 %v916_v0, %v749_v15  ;;  %v332_v24 = vmul.f32 %v916_v0, %v752_v16  ;;  %v333_v25 = vmul.f32 %v916_v0, %v753_v17 }
  0x30   : > { %586 = vst.msk [vmem:[%s948_s25 + $0x4c] sm:$0xf] %vm566_vm0, %v521_v7  ;;  %v334_v26 = vmul.f32 %v916_v0, %v756_v18  ;;  %v335_v27 = vmul.f32 %v916_v0, %v757_v19  ;;  %v336_v28 = vmul.f32 %v916_v0, %v760_v20  ;;  %v337_v29 = vmul.f32 %v916_v0, %v761_v21  ;;  %v845_v20 = vld [vmem:[%s911_s18 + $0xa0] sm:$0xff]   ;;  %v846_v21 = vld [vmem:[%s911_s18 + $0xa8] sm:$0xff]  }
  0x31   : > { %587 = vst.msk [vmem:[%s948_s25 + $0x50] sm:$0xf] %vm566_vm0, %v522_v10  ;;  %v398_v30 = vadd.f32 %v924_v5, %v330_v22  ;;  %v399_v31 = vadd.f32 %v924_v5, %v331_v23  ;;  %v400_v32 = vadd.f32 %v924_v5, %v332_v24  ;;  %v401_v33 = vadd.f32 %v924_v5, %v333_v25 }
  0x32   : > { %588 = vst.msk [vmem:[%s948_s25 + $0x54] sm:$0xf] %vm566_vm0, %v523_v11  ;;  %v402_v34 = vadd.f32 %v924_v5, %v334_v26  ;;  %v403_v35 = vadd.f32 %v924_v5, %v335_v27  ;;  %v404_v36 = vadd.f32 %v924_v5, %v336_v28  ;;  %v405_v37 = vadd.f32 %v924_v5, %v337_v29 }
  0x33   : > { %589 = vst.msk [vmem:[%s948_s25 + $0x58] sm:$0xf] %vm566_vm0, %v524_v12  ;;  %v462_v40 = vmax.f32 %v398_v30, 0.0  ;;  %v463_v41 = vmax.f32 %v399_v31, 0.0  ;;  %v464_v42 = vmax.f32 %v400_v32, 0.0  ;;  %v465_v43 = vmax.f32 %v401_v33, 0.0 }
  0x34   : > { %590 = vst.msk [vmem:[%s948_s25 + $0x5c] sm:$0xf] %vm566_vm0, %v525_v13  ;;  %v466_v44 = vmax.f32 %v402_v34, 0.0  ;;  %v467_v45 = vmax.f32 %v403_v35, 0.0  ;;  %v468_v46 = vmax.f32 %v404_v36, 0.0  ;;  %v469_v47 = vmax.f32 %v405_v37, 0.0 }
  0x35   : > { %v526_v48 = vpack.c.bf16 %v462_v40, %v462_v40  ;;  %v527_v49 = vpack.c.bf16 %v463_v41, %v463_v41  ;;  %v528_v50 = vpack.c.bf16 %v464_v42, %v464_v42  ;;  %v529_v51 = vpack.c.bf16 %v465_v43, %v465_v43  ;;  %v847_v34 = vld [vmem:[%s911_s18 + $0xb0] sm:$0xff]   ;;  %v848_v35 = vld [vmem:[%s911_s18 + $0xb8] sm:$0xff]  }
  0x36   : > { %v530_v54 = vpack.c.bf16 %v466_v44, %v466_v44  ;;  %v531_v55 = vpack.c.bf16 %v467_v45, %v467_v45  ;;  %v532_v56 = vpack.c.bf16 %v468_v46, %v468_v46  ;;  %v533_v57 = vpack.c.bf16 %v469_v47, %v469_v47 }
  0x37   : > { %591 = vst.msk [vmem:[%s948_s25 + $0x60] sm:$0xf] %vm566_vm0, %v526_v48  ;;  %v764_v58 = vunpack.c.l.bf16 %v841_v38  ;;  %v765_v59 = vunpack.c.h.bf16 %v841_v38  ;;  %v768_v60 = vunpack.c.l.bf16 %v842_v39  ;;  %v769_v61 = vunpack.c.h.bf16 %v842_v39 }
  0x38   : > { %592 = vst.msk [vmem:[%s948_s25 + $0x64] sm:$0xf] %vm566_vm0, %v527_v49  ;;  %v772_v62 = vunpack.c.l.bf16 %v843_v52  ;;  %v773_v63 = vunpack.c.h.bf16 %v843_v52  ;;  %v776_v1 = vunpack.c.l.bf16 %v844_v53  ;;  %v777_v2 = vunpack.c.h.bf16 %v844_v53 }
  0x39   : > { %593 = vst.msk [vmem:[%s948_s25 + $0x68] sm:$0xf] %vm566_vm0, %v528_v50  ;;  %v338_v3 = vmul.f32 %v916_v0, %v764_v58  ;;  %v339_v4 = vmul.f32 %v916_v0, %v765_v59  ;;  %v340_v6 = vmul.f32 %v916_v0, %v768_v60  ;;  %v341_v7 = vmul.f32 %v916_v0, %v769_v61 }
  0x3a   : > { %594 = vst.msk [vmem:[%s948_s25 + $0x6c] sm:$0xf] %vm566_vm0, %v529_v51  ;;  %v342_v8 = vmul.f32 %v916_v0, %v772_v62  ;;  %v343_v9 = vmul.f32 %v916_v0, %v773_v63  ;;  %v344_v10 = vmul.f32 %v916_v0, %v776_v1  ;;  %v345_v11 = vmul.f32 %v916_v0, %v777_v2  ;;  %v849_v1 = vld [vmem:[%s911_s18 + $0xc0] sm:$0xff]   ;;  %v850_v2 = vld [vmem:[%s911_s18 + $0xc8] sm:$0xff]  }
  0x3b   : > { %595 = vst.msk [vmem:[%s948_s25 + $0x70] sm:$0xf] %vm566_vm0, %v530_v54  ;;  %v406_v12 = vadd.f32 %v924_v5, %v338_v3  ;;  %v407_v13 = vadd.f32 %v924_v5, %v339_v4  ;;  %v408_v14 = vadd.f32 %v924_v5, %v340_v6  ;;  %v409_v15 = vadd.f32 %v924_v5, %v341_v7 }
  0x3c   : > { %596 = vst.msk [vmem:[%s948_s25 + $0x74] sm:$0xf] %vm566_vm0, %v531_v55  ;;  %v410_v16 = vadd.f32 %v924_v5, %v342_v8  ;;  %v411_v17 = vadd.f32 %v924_v5, %v343_v9  ;;  %v412_v18 = vadd.f32 %v924_v5, %v344_v10  ;;  %v413_v19 = vadd.f32 %v924_v5, %v345_v11 }
  0x3d   : > { %597 = vst.msk [vmem:[%s948_s25 + $0x78] sm:$0xf] %vm566_vm0, %v532_v56  ;;  %v470_v22 = vmax.f32 %v406_v12, 0.0  ;;  %v471_v23 = vmax.f32 %v407_v13, 0.0  ;;  %v472_v24 = vmax.f32 %v408_v14, 0.0  ;;  %v473_v25 = vmax.f32 %v409_v15, 0.0 }
  0x3e   : > { %598 = vst.msk [vmem:[%s948_s25 + $0x7c] sm:$0xf] %vm566_vm0, %v533_v57  ;;  %v474_v26 = vmax.f32 %v410_v16, 0.0  ;;  %v475_v27 = vmax.f32 %v411_v17, 0.0  ;;  %v476_v28 = vmax.f32 %v412_v18, 0.0  ;;  %v477_v29 = vmax.f32 %v413_v19, 0.0 }
  0x3f   : > { %v534_v30 = vpack.c.bf16 %v470_v22, %v470_v22  ;;  %v535_v31 = vpack.c.bf16 %v471_v23, %v471_v23  ;;  %v536_v32 = vpack.c.bf16 %v472_v24, %v472_v24  ;;  %v537_v33 = vpack.c.bf16 %v473_v25, %v473_v25  ;;  %v851_v16 = vld [vmem:[%s911_s18 + $0xd0] sm:$0xff]   ;;  %v852_v17 = vld [vmem:[%s911_s18 + $0xd8] sm:$0xff]  }
  0x40   : > { %v538_v36 = vpack.c.bf16 %v474_v26, %v474_v26  ;;  %v539_v37 = vpack.c.bf16 %v475_v27, %v475_v27  ;;  %v540_v38 = vpack.c.bf16 %v476_v28, %v476_v28  ;;  %v541_v39 = vpack.c.bf16 %v477_v29, %v477_v29 }
  0x41   : > { %599 = vst.msk [vmem:[%s948_s25 + $0x80] sm:$0xf] %vm566_vm0, %v534_v30  ;;  %v780_v40 = vunpack.c.l.bf16 %v845_v20  ;;  %v781_v41 = vunpack.c.h.bf16 %v845_v20  ;;  %v784_v42 = vunpack.c.l.bf16 %v846_v21  ;;  %v785_v43 = vunpack.c.h.bf16 %v846_v21 }
  0x42   : > { %600 = vst.msk [vmem:[%s948_s25 + $0x84] sm:$0xf] %vm566_vm0, %v535_v31  ;;  %v788_v44 = vunpack.c.l.bf16 %v847_v34  ;;  %v789_v45 = vunpack.c.h.bf16 %v847_v34  ;;  %v792_v46 = vunpack.c.l.bf16 %v848_v35  ;;  %v793_v47 = vunpack.c.h.bf16 %v848_v35 }
  0x43   : > { %601 = vst.msk [vmem:[%s948_s25 + $0x88] sm:$0xf] %vm566_vm0, %v536_v32  ;;  %v346_v48 = vmul.f32 %v916_v0, %v780_v40  ;;  %v347_v49 = vmul.f32 %v916_v0, %v781_v41  ;;  %v348_v50 = vmul.f32 %v916_v0, %v784_v42  ;;  %v349_v51 = vmul.f32 %v916_v0, %v785_v43 }
  0x44   : > { %602 = vst.msk [vmem:[%s948_s25 + $0x8c] sm:$0xf] %vm566_vm0, %v537_v33  ;;  %v350_v52 = vmul.f32 %v916_v0, %v788_v44  ;;  %v351_v53 = vmul.f32 %v916_v0, %v789_v45  ;;  %v352_v54 = vmul.f32 %v916_v0, %v792_v46  ;;  %v353_v55 = vmul.f32 %v916_v0, %v793_v47  ;;  %v853_v46 = vld [vmem:[%s911_s18 + $0xe0] sm:$0xff]   ;;  %v854_v47 = vld [vmem:[%s911_s18 + $0xe8] sm:$0xff]  }
  0x45   : > { %603 = vst.msk [vmem:[%s948_s25 + $0x90] sm:$0xf] %vm566_vm0, %v538_v36  ;;  %v414_v56 = vadd.f32 %v924_v5, %v346_v48  ;;  %v415_v57 = vadd.f32 %v924_v5, %v347_v49  ;;  %v416_v58 = vadd.f32 %v924_v5, %v348_v50  ;;  %v417_v59 = vadd.f32 %v924_v5, %v349_v51 }
  0x46   : > { %604 = vst.msk [vmem:[%s948_s25 + $0x94] sm:$0xf] %vm566_vm0, %v539_v37  ;;  %v418_v60 = vadd.f32 %v924_v5, %v350_v52  ;;  %v419_v61 = vadd.f32 %v924_v5, %v351_v53  ;;  %v420_v62 = vadd.f32 %v924_v5, %v352_v54  ;;  %v421_v63 = vadd.f32 %v924_v5, %v353_v55 }
  0x47   : > { %605 = vst.msk [vmem:[%s948_s25 + $0x98] sm:$0xf] %vm566_vm0, %v540_v38  ;;  %v478_v3 = vmax.f32 %v414_v56, 0.0  ;;  %v479_v4 = vmax.f32 %v415_v57, 0.0  ;;  %v480_v6 = vmax.f32 %v416_v58, 0.0  ;;  %v481_v7 = vmax.f32 %v417_v59, 0.0 }
  0x48   : > { %606 = vst.msk [vmem:[%s948_s25 + $0x9c] sm:$0xf] %vm566_vm0, %v541_v39  ;;  %v482_v8 = vmax.f32 %v418_v60, 0.0  ;;  %v483_v9 = vmax.f32 %v419_v61, 0.0  ;;  %v484_v10 = vmax.f32 %v420_v62, 0.0  ;;  %v485_v11 = vmax.f32 %v421_v63, 0.0 }
  0x49   : > { %v542_v12 = vpack.c.bf16 %v478_v3, %v478_v3  ;;  %v543_v13 = vpack.c.bf16 %v479_v4, %v479_v4  ;;  %v544_v14 = vpack.c.bf16 %v480_v6, %v480_v6  ;;  %v545_v15 = vpack.c.bf16 %v481_v7, %v481_v7  ;;  %v855_v60 = vld [vmem:[%s911_s18 + $0xf0] sm:$0xff]   ;;  %v856_v61 = vld [vmem:[%s911_s18 + $0xf8] sm:$0xff]  }
  0x4a   : > { %v546_v18 = vpack.c.bf16 %v482_v8, %v482_v8  ;;  %v547_v19 = vpack.c.bf16 %v483_v9, %v483_v9  ;;  %v548_v20 = vpack.c.bf16 %v484_v10, %v484_v10  ;;  %v549_v21 = vpack.c.bf16 %v485_v11, %v485_v11 }
  0x4b   : > { %607 = vst.msk [vmem:[%s948_s25 + $0xa0] sm:$0xf] %vm566_vm0, %v542_v12  ;;  %v796_v22 = vunpack.c.l.bf16 %v849_v1  ;;  %v797_v23 = vunpack.c.h.bf16 %v849_v1  ;;  %v800_v24 = vunpack.c.l.bf16 %v850_v2  ;;  %v801_v25 = vunpack.c.h.bf16 %v850_v2 }
  0x4c   : > { %608 = vst.msk [vmem:[%s948_s25 + $0xa4] sm:$0xf] %vm566_vm0, %v543_v13  ;;  %v804_v26 = vunpack.c.l.bf16 %v851_v16  ;;  %v805_v27 = vunpack.c.h.bf16 %v851_v16  ;;  %v808_v28 = vunpack.c.l.bf16 %v852_v17  ;;  %v809_v29 = vunpack.c.h.bf16 %v852_v17 }
  0x4d   : > { %609 = vst.msk [vmem:[%s948_s25 + $0xa8] sm:$0xf] %vm566_vm0, %v544_v14  ;;  %v354_v30 = vmul.f32 %v916_v0, %v796_v22  ;;  %v355_v31 = vmul.f32 %v916_v0, %v797_v23  ;;  %v356_v32 = vmul.f32 %v916_v0, %v800_v24  ;;  %v357_v33 = vmul.f32 %v916_v0, %v801_v25 }
  0x4e   : > { %610 = vst.msk [vmem:[%s948_s25 + $0xac] sm:$0xf] %vm566_vm0, %v545_v15  ;;  %v358_v34 = vmul.f32 %v916_v0, %v804_v26  ;;  %v359_v35 = vmul.f32 %v916_v0, %v805_v27  ;;  %v360_v36 = vmul.f32 %v916_v0, %v808_v28  ;;  %v361_v37 = vmul.f32 %v916_v0, %v809_v29 }
  0x4f   : > { %611 = vst.msk [vmem:[%s948_s25 + $0xb0] sm:$0xf] %vm566_vm0, %v546_v18  ;;  %v422_v38 = vadd.f32 %v924_v5, %v354_v30  ;;  %v423_v39 = vadd.f32 %v924_v5, %v355_v31  ;;  %v424_v40 = vadd.f32 %v924_v5, %v356_v32  ;;  %v425_v41 = vadd.f32 %v924_v5, %v357_v33 }
  0x50   : > { %612 = vst.msk [vmem:[%s948_s25 + $0xb4] sm:$0xf] %vm566_vm0, %v547_v19  ;;  %v426_v42 = vadd.f32 %v924_v5, %v358_v34  ;;  %v427_v43 = vadd.f32 %v924_v5, %v359_v35  ;;  %v428_v44 = vadd.f32 %v924_v5, %v360_v36  ;;  %v429_v45 = vadd.f32 %v924_v5, %v361_v37 }
  0x51   : > { %613 = vst.msk [vmem:[%s948_s25 + $0xb8] sm:$0xf] %vm566_vm0, %v548_v20  ;;  %v486_v48 = vmax.f32 %v422_v38, 0.0  ;;  %v487_v49 = vmax.f32 %v423_v39, 0.0  ;;  %v488_v50 = vmax.f32 %v424_v40, 0.0  ;;  %v489_v51 = vmax.f32 %v425_v41, 0.0 }
  0x52   : > { %614 = vst.msk [vmem:[%s948_s25 + $0xbc] sm:$0xf] %vm566_vm0, %v549_v21  ;;  %v490_v52 = vmax.f32 %v426_v42, 0.0  ;;  %v491_v53 = vmax.f32 %v427_v43, 0.0  ;;  %v492_v54 = vmax.f32 %v428_v44, 0.0  ;;  %v493_v55 = vmax.f32 %v429_v45, 0.0 }
  0x53   : > { %v550_v56 = vpack.c.bf16 %v486_v48, %v486_v48  ;;  %v551_v57 = vpack.c.bf16 %v487_v49, %v487_v49  ;;  %v552_v58 = vpack.c.bf16 %v488_v50, %v488_v50  ;;  %v553_v59 = vpack.c.bf16 %v489_v51, %v489_v51 }
  0x54   : > { %v554_v62 = vpack.c.bf16 %v490_v52, %v490_v52  ;;  %v555_v63 = vpack.c.bf16 %v491_v53, %v491_v53  ;;  %v556_v1 = vpack.c.bf16 %v492_v54, %v492_v54  ;;  %v557_v2 = vpack.c.bf16 %v493_v55, %v493_v55 }
  0x55   : > { %615 = vst.msk [vmem:[%s948_s25 + $0xc0] sm:$0xf] %vm566_vm0, %v550_v56  ;;  %v812_v3 = vunpack.c.l.bf16 %v853_v46  ;;  %v813_v4 = vunpack.c.h.bf16 %v853_v46  ;;  %v816_v6 = vunpack.c.l.bf16 %v854_v47  ;;  %v817_v7 = vunpack.c.h.bf16 %v854_v47 }
  0x56   : > { %616 = vst.msk [vmem:[%s948_s25 + $0xc4] sm:$0xf] %vm566_vm0, %v551_v57  ;;  %v820_v8 = vunpack.c.l.bf16 %v855_v60  ;;  %v821_v9 = vunpack.c.h.bf16 %v855_v60  ;;  %v824_v10 = vunpack.c.l.bf16 %v856_v61  ;;  %v825_v11 = vunpack.c.h.bf16 %v856_v61 }
  0x57   : > { %617 = vst.msk [vmem:[%s948_s25 + $0xc8] sm:$0xf] %vm566_vm0, %v552_v58  ;;  %v362_v12 = vmul.f32 %v916_v0, %v812_v3  ;;  %v363_v13 = vmul.f32 %v916_v0, %v813_v4  ;;  %v364_v14 = vmul.f32 %v916_v0, %v816_v6  ;;  %v365_v15 = vmul.f32 %v916_v0, %v817_v7 }
  0x58   : > { %618 = vst.msk [vmem:[%s948_s25 + $0xcc] sm:$0xf] %vm566_vm0, %v553_v59  ;;  %v366_v16 = vmul.f32 %v916_v0, %v820_v8  ;;  %v367_v17 = vmul.f32 %v916_v0, %v821_v9  ;;  %v368_v18 = vmul.f32 %v916_v0, %v824_v10  ;;  %v369_v19 = vmul.f32 %v916_v0, %v825_v11 }
  0x59   : > { %619 = vst.msk [vmem:[%s948_s25 + $0xd0] sm:$0xf] %vm566_vm0, %v554_v62  ;;  %v430_v20 = vadd.f32 %v924_v5, %v362_v12  ;;  %v431_v21 = vadd.f32 %v924_v5, %v363_v13  ;;  %v432_v22 = vadd.f32 %v924_v5, %v364_v14  ;;  %v433_v23 = vadd.f32 %v924_v5, %v365_v15 }
  0x5a   : > { %620 = vst.msk [vmem:[%s948_s25 + $0xd4] sm:$0xf] %vm566_vm0, %v555_v63  ;;  %v434_v24 = vadd.f32 %v924_v5, %v366_v16  ;;  %v435_v25 = vadd.f32 %v924_v5, %v367_v17  ;;  %v436_v26 = vadd.f32 %v924_v5, %v368_v18  ;;  %v437_v0 = vadd.f32 %v924_v5, %v369_v19 }
  0x5b   : > { %621 = vst.msk [vmem:[%s948_s25 + $0xd8] sm:$0xf] %vm566_vm0, %v556_v1  ;;  %v494_v27 = vmax.f32 %v430_v20, 0.0  ;;  %v495_v28 = vmax.f32 %v431_v21, 0.0  ;;  %v496_v29 = vmax.f32 %v432_v22, 0.0  ;;  %v497_v30 = vmax.f32 %v433_v23, 0.0 }
  0x5c   : > { %622 = vst.msk [vmem:[%s948_s25 + $0xdc] sm:$0xf] %vm566_vm0, %v557_v2  ;;  %v498_v31 = vmax.f32 %v434_v24, 0.0  ;;  %v499_v32 = vmax.f32 %v435_v25, 0.0  ;;  %v500_v35 = vmax.f32 %v436_v26, 0.0  ;;  %v501_v37 = vmax.f32 %v437_v0, 0.0 }
  0x5d   : > { %v558_v33 = vpack.c.bf16 %v494_v27, %v494_v27  ;;  %v559_v34 = vpack.c.bf16 %v495_v28, %v495_v28  ;;  %v560_v5 = vpack.c.bf16 %v496_v29, %v496_v29  ;;  %v561_v36 = vpack.c.bf16 %v497_v30, %v497_v30 }
  0x5e   : > { %v562_v38 = vpack.c.bf16 %v498_v31, %v498_v31  ;;  %v563_v39 = vpack.c.bf16 %v499_v32, %v499_v32  ;;  %v564_v40 = vpack.c.bf16 %v500_v35, %v500_v35  ;;  %v565_v41 = vpack.c.bf16 %v501_v37, %v501_v37 }
  0x5f   : > { %623 = vst.msk [vmem:[%s948_s25 + $0xe0] sm:$0xf] %vm566_vm0, %v558_v33 }
  0x60   : > { %624 = vst.msk [vmem:[%s948_s25 + $0xe4] sm:$0xf] %vm566_vm0, %v559_v34 }
  0x61   : > { %625 = vst.msk [vmem:[%s948_s25 + $0xe8] sm:$0xf] %vm566_vm0, %v560_v5 }
  0x62   : > { %626 = vst.msk [vmem:[%s948_s25 + $0xec] sm:$0xf] %vm566_vm0, %v561_v36 }
  0x63   : > { %627 = vst.msk [vmem:[%s948_s25 + $0xf0] sm:$0xf] %vm566_vm0, %v562_v38 }
  0x64   : > { %628 = vst.msk [vmem:[%s948_s25 + $0xf4] sm:$0xf] %vm566_vm0, %v563_v39 }
  0x65   : > { %629 = vst.msk [vmem:[%s948_s25 + $0xf8] sm:$0xf] %vm566_vm0, %v564_v40 }
  0x66   : > { %630 = vst.msk [vmem:[%s948_s25 + $0xfc] sm:$0xf] %vm566_vm0, %v565_v41 }
  0x67 PF: > { %s13_s12 = sadd.s32 1, %s873_s12  }
  0x68   : > { %p10_p4 = scmp.ge.s32.totalorder %s13_s12, 51  }
  0x6a   :  { %12 = sbr.rel (!%p10_p4) target bundleno = 1 (0x1), region = 62 }

// kernel: conv_bn.2
= control target key start
LH: loop header
LB: loop body
LE: loop exit
PB: predicated region body
PF: predicated region fallthrough
CT: control target
= control target key end

     0   :  { %s6772_s12 = smov 0   ;;  %s9461_s0 = inlined_call_operand.vmem [shape: bf16[26624,147], index: 0, kind: input, shape index: {}]   ;;  %s9462_s1 = inlined_call_operand.vmem [shape: bf16[147,64], index: 1, kind: input, shape index: {}]   ;;  %s9463_s2 = inlined_call_operand.vmem [shape: bf16[26624,64], index: 2, kind: output, shape index: {0}]   ;;  %s9464_s3 = inlined_call_operand.vmem [shape: f32[13,2,64], index: 3, kind: output, shape index: {1}]  }
   0x1 LB: > { %s6778_s13 = sadd.s32 4294967295, %s6749_s12   ;;  %p5261_p0 = scmp.ge.s32.totalorder %s6749_s12, 1  ;;  %s6749_s12 = sphi %s6772_s12, %s14_s12  }
   0x2   : > { %p142_p1 = scmp.lt.s32.totalorder %s6749_s12, 14 }
   0x4   : > { %p143_p2 = pnand %p5261_p0, %p142_p1 }
   0x6   : > { %146 = sbr.rel (%p143_p2) target bundleno = 1462 (0x5b6), region = 28 }
   0xb   : > { %v6722_v0 = vld [vmem:[%s9462_s1 + $0x38] sm:$0xff]  ;;  %v463_v1 = vld [vmem:[%s9462_s1 + $0x48] sm:$0x3]  ;;  %vm2058_vm0 = vcmask 1040384   ;;  %vm2059_vm1 = vcmask 1041408   ;;  %s5262_s18 = sshll.u32 %s6778_s13, 8 }
   0xc   : > { %v1653_v2 = vunpack.c.l.b16 %v463_v1  ;;  %2065 = vmatpush.bf16.msra.mxu0 %v6722_v0  ;;  %v6721_v3 = vld [vmem:[%s9462_s1 + $0x30] sm:$0xff]  ;;  %v6751_v4 = vmov 65535   ;;  %p172_p3 = scmp.lt.s32.totalorder %s5262_s18, 3327  ;;  %6724 = vmatpush.bf16.msra.mxu2 %v6722_v0  ;;  %v6720_v9 = vld [vmem:[%s9462_s1 + $0x28] sm:$0xff]  ;;  %v6723_v10 = vld [vmem:[%s9462_s1 + $0x40] sm:$0xff]  ;;  %vm1673_vm2 = vcmask 154624  }
   0xd   : > { %v2060_v5 = vsel %vm2058_vm0, 4294967295, %v6751_v4  ;;  %v6719_v14 = vld [vmem:[%s9462_s1 + $0x20] sm:$0xff]  ;;  %v6718_v15 = vld [vmem:[%s9462_s1 + $0x18] sm:$0xff]  ;;  %v6717_v16 = vld [vmem:[%s9462_s1 + $0x10] sm:$0xff]  ;;  %vm3619_vm3 = vcmask 519168   ;;  %vm3876_vm4 = vcmask 523264  }
   0xe   : > { %v1663_v6 = vpack.c.b16 %v1653_v2, %v1653_v2  ;;  %v2061_v7 = vsel %vm2059_vm1, %v2060_v5, 0  ;;  %s9730_s18 = smov (!%p172_p3, %s5262_s18), 3327  ;;  %v6716_v17 = vld [vmem:[%s9462_s1 + $0x8] sm:$0xff]  ;;  %v6715_v21 = vld [vmem:[%s9462_s1] sm:$0xff]  ;;  %p184_p4 = scmp.lt.s32.totalorder %s6778_s13, 12  ;;  %vm5168_vm5 = vcmask 517120  }
   0xf   : > { %s6458_s23 = sshll.u32 %s9730_s18, 3  ;;  %s5266_s14 = sshll.u32 %s9730_s18, 2 }
  0x10   : > { %v2063_v8 = vand.u32 %v2061_v7, %v1663_v6  ;;  %2066 = vmatpush.bf16.msra.mxu0 %v6721_v3  ;;  %6725 = vmatpush.bf16.msra.mxu2 %v6721_v3  ;;  %s6805_s28 = scalar_lea.vmem %s9461_s0, %s6458_s23  ;;  %s6874_s17 = scalar_lea.vmem %s9463_s2, %s5266_s14 }
  0x11   : > { %v6459_v11 = vld [vmem:[%s6805_s28 + $0x4] sm:$0xf]  ;;  %v5272_v12 = vld [vmem:[%s6805_s28 + $0x8] sm:$0xf0]  ;;  %v6461_v18 = vld [vmem:[%s6805_s28 + $0x14] sm:$0xf] }
  0x12   : > { %2720 = vmatpush.bf16.msra.mxu1 %v2063_v8  ;;  %6732 = vmatpush.bf16.msra.mxu3 %v2063_v8  ;;  %v5275_v13 = vor.u32 %v6459_v11, %v5272_v12  ;;  %v5280_v19 = vld [vmem:[%s6805_s28 + $0x18] sm:$0xf0]  ;;  %v5270_v22 = vld [vmem:[%s6805_s28] sm:$0xf]  ;;  %v6460_v23 = vld [vmem:[%s6805_s28 + $0x4] sm:$0xf0] }
  0x13   : > { %v5283_v20 = vor.u32 %v6461_v18, %v5280_v19  ;;  %v5271_v24 = vor.u32 %v6460_v23, %v5270_v22  ;;  %v6463_v25 = vld [vmem:[%s6805_s28 + $0x24] sm:$0xf]  ;;  %v5288_v26 = vld [vmem:[%s6805_s28 + $0x28] sm:$0xf0]  ;;  %v5278_v28 = vld [vmem:[%s6805_s28 + $0x10] sm:$0xf] }
  0x14   : > { %2067 = vmatpush.bf16.msra.mxu0 %v6720_v9  ;;  %6726 = vmatpush.bf16.msra.mxu2 %v6720_v9  ;;  %v5291_v27 = vor.u32 %v6463_v25, %v5288_v26  ;;  %v6462_v29 = vld [vmem:[%s6805_s28 + $0x14] sm:$0xf0]  ;;  %v6465_v31 = vld [vmem:[%s6805_s28 + $0x34] sm:$0xf]  ;;  %v5296_v32 = vld [vmem:[%s6805_s28 + $0x38] sm:$0xf0] }
  0x15   : > { %v5279_v30 = vor.u32 %v6462_v29, %v5278_v28  ;;  %v5299_v33 = vor.u32 %v6465_v31, %v5296_v32  ;;  %v5286_v34 = vld [vmem:[%s6805_s28 + $0x20] sm:$0xf]  ;;  %v6464_v35 = vld [vmem:[%s6805_s28 + $0x24] sm:$0xf0]  ;;  %v6467_v37 = vld [vmem:[%s6805_s28 + $0x44] sm:$0xf] }
  0x16   : > { %2721 = vmatpush.bf16.msra.mxu1 %v6723_v10  ;;  %6733 = vmatpush.bf16.msra.mxu3 %v6723_v10  ;;  %v5287_v36 = vor.u32 %v6464_v35, %v5286_v34  ;;  %v5304_v38 = vld [vmem:[%s6805_s28 + $0x48] sm:$0xf0]  ;;  %v5294_v40 = vld [vmem:[%s6805_s28 + $0x30] sm:$0xf]  ;;  %v6466_v41 = vld [vmem:[%s6805_s28 + $0x34] sm:$0xf0] }
  0x17   : > { %v5307_v39 = vor.u32 %v6467_v37, %v5304_v38  ;;  %v5295_v42 = vor.u32 %v6466_v41, %v5294_v40  ;;  %v6469_v43 = vld [vmem:[%s6805_s28 + $0x54] sm:$0xf]  ;;  %v5312_v44 = vld [vmem:[%s6805_s28 + $0x58] sm:$0xf0]  ;;  %v5302_v46 = vld [vmem:[%s6805_s28 + $0x40] sm:$0xf] }
  0x18   : > { %2068 = vmatpush.bf16.msra.mxu0 %v6719_v14  ;;  %6727 = vmatpush.bf16.msra.mxu2 %v6719_v14  ;;  %v5315_v45 = vor.u32 %v6469_v43, %v5312_v44  ;;  %v6468_v47 = vld [vmem:[%s6805_s28 + $0x44] sm:$0xf0]  ;;  %v6471_v49 = vld [vmem:[%s6805_s28 + $0x64] sm:$0xf]  ;;  %v5320_v50 = vld [vmem:[%s6805_s28 + $0x68] sm:$0xf0] }
  0x19   : > { %6328 = vmatmul.msk.bf16.vlgmr.msra.gmra.mxu1 %vm1673_vm2, %v5275_v13  ;;  %v5303_v48 = vor.u32 %v6468_v47, %v5302_v46  ;;  %v5323_v51 = vor.u32 %v6471_v49, %v5320_v50  ;;  %v5310_v52 = vld [vmem:[%s6805_s28 + $0x50] sm:$0xf]  ;;  %v6470_v53 = vld [vmem:[%s6805_s28 + $0x54] sm:$0xf0]  ;;  %v6473_v55 = vld [vmem:[%s6805_s28 + $0x74] sm:$0xf] }
  0x1a   : > { %v5311_v54 = vor.u32 %v6470_v53, %v5310_v52  ;;  %v5328_v56 = vld [vmem:[%s6805_s28 + $0x78] sm:$0xf0]  ;;  %v5318_v58 = vld [vmem:[%s6805_s28 + $0x60] sm:$0xf]  ;;  %v6472_v59 = vld [vmem:[%s6805_s28 + $0x64] sm:$0xf0] }
  0x1b   : > { %v5331_v57 = vor.u32 %v6473_v55, %v5328_v56  ;;  %v5319_v60 = vor.u32 %v6472_v59, %v5318_v58  ;;  %v6475_v61 = vld [vmem:[%s6805_s28 + $0x84] sm:$0xf]  ;;  %v5336_v62 = vld [vmem:[%s6805_s28 + $0x88] sm:$0xf0]  ;;  %v5326_v0 = vld [vmem:[%s6805_s28 + $0x70] sm:$0xf] }
  0x1c   : > { %2069 = vmatpush.bf16.msra.mxu0 %v6718_v15  ;;  %6728 = vmatpush.bf16.msra.mxu2 %v6718_v15  ;;  %v5339_v63 = vor.u32 %v6475_v61, %v5336_v62  ;;  %v6474_v1 = vld [vmem:[%s6805_s28 + $0x74] sm:$0xf0]  ;;  %v6477_v5 = vld [vmem:[%s6805_s28 + $0x94] sm:$0xf]  ;;  %v5344_v6 = vld [vmem:[%s6805_s28 + $0x98] sm:$0xf0] }
  0x1d   : > { %v5327_v3 = vor.u32 %v6474_v1, %v5326_v0  ;;  %v5347_v7 = vor.u32 %v6477_v5, %v5344_v6  ;;  %v5334_v8 = vld [vmem:[%s6805_s28 + $0x80] sm:$0xf]  ;;  %v6476_v9 = vld [vmem:[%s6805_s28 + $0x84] sm:$0xf0]  ;;  %v6479_v19 = vld [vmem:[%s6805_s28 + $0xa4] sm:$0xf] }
  0x1e   : > { %v5335_v11 = vor.u32 %v6476_v9, %v5334_v8  ;;  %v6478_v28 = vld [vmem:[%s6805_s28 + $0x94] sm:$0xf0]  ;;  %v5360_v46 = vld [vmem:[%s6805_s28 + $0xb8] sm:$0xf0]  ;;  %v5350_v52 = vld [vmem:[%s6805_s28 + $0xa0] sm:$0xf] }
  0x1f   : > { %v6480_v53 = vld [vmem:[%s6805_s28 + $0xa4] sm:$0xf0]  ;;  %v6483_v5 = vld [vmem:[%s6805_s28 + $0xc4] sm:$0xf]  ;;  %v5368_v6 = vld [vmem:[%s6805_s28 + $0xc8] sm:$0xf0] }
  0x20   : > { %2070 = vmatpush.bf16.msra.mxu0 %v6717_v16  ;;  %6729 = vmatpush.bf16.msra.mxu2 %v6717_v16  ;;  %s9732_s13 = smov (!%p184_p4, %s6778_s13), 12 }
  0x21   : > { %s5267_s18 = sshll.u32 %s9732_s13, 1 }
  0x22   : > { %s187_s21 = scalar_lea.vmem %s9464_s3, %s5267_s18 }
  0x24   : > { %2071 = vmatpush.bf16.msra.mxu0 %v6716_v17  ;;  %6730 = vmatpush.bf16.msra.mxu2 %v6716_v17 }
  0x28   : > { %2072 = vmatpush.bf16.msra.mxu0 %v6715_v21  ;;  %6731 = vmatpush.bf16.msra.mxu2 %v6715_v21 }
  0x29   : > { %6329 = vmatmul.msk.bf16.gmra.mxu1 %vm1673_vm2, %v5283_v20  ;;  %v5352_v20 = vld [vmem:[%s6805_s28 + $0xa8] sm:$0xf0] }
  0x2a   : > { %v5355_v26 = vor.u32 %v6479_v19, %v5352_v20 }
  0x2b   : > { %2073 = vmatmul.bf16.vlgmr.msra.gmra.mxu0 %v5271_v24 }
  0x39   : > { %6330 = vmatmul.msk.bf16.gmra.mxu1 %vm1673_vm2, %v5291_v27  ;;  %v5342_v27 = vld [vmem:[%s6805_s28 + $0x90] sm:$0xf] }
  0x3b   : > { %2078 = vmatmul.bf16.gmra.mxu0 %v5279_v30 }
  0x49   : > { %6331 = vmatmul.msk.bf16.gmra.mxu1 %vm1673_vm2, %v5299_v33  ;;  %v5343_v33 = vor.u32 %v6478_v28, %v5342_v27 }
  0x4b   : > { %2083 = vmatmul.bf16.gmra.mxu0 %v5287_v36 }
  0x59   : > { %6332 = vmatmul.msk.bf16.gmra.mxu1 %vm1673_vm2, %v5307_v39 }
  0x5b   : > { %2088 = vmatmul.bf16.gmra.mxu0 %v5295_v42 }
  0x69   : > { %6333 = vmatmul.msk.bf16.gmra.mxu1 %vm1673_vm2, %v5315_v45  ;;  %v6481_v45 = vld [vmem:[%s6805_s28 + $0xb4] sm:$0xf] }
  0x6b   : > { %2093 = vmatmul.bf16.gmra.mxu0 %v5303_v48 }
  0x79   : > { %6334 = vmatmul.msk.bf16.gmra.mxu1 %vm1673_vm2, %v5323_v51  ;;  %v5363_v51 = vor.u32 %v6481_v45, %v5360_v46 }
  0x7b   : > { %2098 = vmatmul.bf16.gmra.mxu0 %v5311_v54 }
  0x89   : > { %6335 = vmatmul.msk.bf16.gmra.mxu1 %vm1673_vm2, %v5331_v57  ;;  %v5351_v57 = vor.u32 %v6480_v53, %v5350_v52  ;;  %v6487_v53 = vld [vmem:[%s6805_s28 + $0xe4] sm:$0xf] }
  0x8b   : > { %2103 = vmatmul.bf16.gmra.mxu0 %v5319_v60 }
  0x96   : > { %v2723_v2 = vpop.f32.mrf.mxu1 }
  0x99   : > { %6336 = vmatmul.msk.bf16.gmra.mxu1 %vm1673_vm2, %v5339_v63 }
  0x9b   : > { %2108 = vmatmul.bf16.gmra.mxu0 %v5327_v3 }
  0x9e   : > { %v2725_v4 = vpop.f32.mrf.mxu1 }
  0xa6   : > { %v2728_v10 = vpop.f32.mrf.mxu1 }
  0xa8   : > { %v2074_v12 = vpop.f32.mrf.mxu0 }
  0xa9   : > { %6337 = vmatmul.msk.bf16.gmra.mxu1 %vm1673_vm2, %v5347_v7  ;;  %v2724_v13 = vadd.f32 %v2723_v2, %v2074_v12  ;;  %v5358_v12 = vld [vmem:[%s6805_s28 + $0xb0] sm:$0xf] }
  0xab   : > { %v3363_v14 = vpack.c.bf16 %v2724_v13, %v2724_v13  ;;  %2113 = vmatmul.bf16.gmra.mxu0 %v5335_v11  ;;  %v4394_v17 = vmul.f32 %v2724_v13, %v2724_v13  ;;  %v3877_v21 = vsel %vm3876_vm4, %v2724_v13, 0.0  ;;  %v5371_v11 = vor.u32 %v6483_v5, %v5368_v6  ;;  %v6482_v13 = vld [vmem:[%s6805_s28 + $0xb4] sm:$0xf0]  ;;  %v6588_v5 = vld [vmem:[%s6805_s28 + $0x404] sm:$0xf0] }
  0xad   : > { %3620 = vst.msk [vmem:[%s6874_s17] sm:$0xf] %vm3619_vm3, %v3363_v14  ;;  %v4650_v29 = vsel %vm3876_vm4, %v4394_v17, 0.0  ;;  %v5359_v17 = vor.u32 %v6482_v13, %v5358_v12 }
  0xae   : > { %v2730_v15 = vpop.f32.mrf.mxu1 }
  0xb0   : > { %v2076_v16 = vpop.f32.mrf.mxu0 }
  0xb1   : > { %v2726_v18 = vadd.f32 %v2725_v4, %v2076_v16 }
  0xb3   : > { %v3364_v22 = vpack.c.bf16 %v2726_v18, %v2726_v18  ;;  %v3878_v23 = vsel %vm3876_vm4, %v2726_v18, 0.0  ;;  %v4395_v24 = vmul.f32 %v2726_v18, %v2726_v18 }
  0xb4   : > { %v3879_v25 = vadd.f32 %v3878_v23, %v3877_v21 }
  0xb5   : > { %3621 = vst.msk [vmem:[%s6874_s17 + $0x4] sm:$0xf] %vm3619_vm3, %v3364_v22  ;;  %v4651_v30 = vsel %vm3876_vm4, %v4395_v24, 0.0 }
  0xb6   : > { %v2733_v31 = vpop.f32.mrf.mxu1  ;;  %v4652_v32 = vadd.f32 %v4651_v30, %v4650_v29  ;;  %v6485_v29 = vld [vmem:[%s6805_s28 + $0xd4] sm:$0xf]  ;;  %v5376_v30 = vld [vmem:[%s6805_s28 + $0xd8] sm:$0xf0] }
  0xb8   : > { %v2079_v34 = vpop.f32.mrf.mxu0 }
  0xb9   : > { %6338 = vmatmul.msk.bf16.gmra.mxu1 %vm1673_vm2, %v5355_v26  ;;  %v2729_v35 = vadd.f32 %v2728_v10, %v2079_v34 }
  0xbb   : > { %v3365_v36 = vpack.c.bf16 %v2729_v35, %v2729_v35  ;;  %v3880_v37 = vsel %vm3876_vm4, %v2729_v35, 0.0  ;;  %v4396_v38 = vmul.f32 %v2729_v35, %v2729_v35  ;;  %2118 = vmatmul.bf16.gmra.mxu0 %v5343_v33  ;;  %v5379_v35 = vor.u32 %v6485_v29, %v5376_v30 }
  0xbc   : > { %v3881_v39 = vadd.f32 %v3880_v37, %v3879_v25  ;;  %v6484_v37 = vld [vmem:[%s6805_s28 + $0xc4] sm:$0xf0] }
  0xbd   : > { %3622 = vst.msk [vmem:[%s6874_s17 + $0x8] sm:$0xf] %vm3619_vm3, %v3365_v36  ;;  %v4653_v40 = vsel %vm3876_vm4, %v4396_v38, 0.0  ;;  %v5366_v36 = vld [vmem:[%s6805_s28 + $0xc0] sm:$0xf] }
  0xbe   : > { %v2735_v41 = vpop.f32.mrf.mxu1  ;;  %v4654_v42 = vadd.f32 %v4653_v40, %v4652_v32 }
  0xc0   : > { %v2081_v43 = vpop.f32.mrf.mxu0 }
  0xc1   : > { %v2731_v44 = vadd.f32 %v2730_v15, %v2081_v43 }
  0xc3   : > { %v3366_v47 = vpack.c.bf16 %v2731_v44, %v2731_v44  ;;  %v3882_v48 = vsel %vm3876_vm4, %v2731_v44, 0.0  ;;  %v4397_v49 = vmul.f32 %v2731_v44, %v2731_v44 }
  0xc4   : > { %v3883_v50 = vadd.f32 %v3882_v48, %v3881_v39 }
  0xc5   : > { %3623 = vst.msk [vmem:[%s6874_s17 + $0xc] sm:$0xf] %vm3619_vm3, %v3366_v47  ;;  %v4655_v54 = vsel %vm3876_vm4, %v4397_v49, 0.0 }
  0xc6   : > { %v2738_v55 = vpop.f32.mrf.mxu1  ;;  %v4656_v56 = vadd.f32 %v4655_v54, %v4654_v42  ;;  %v5384_v54 = vld [vmem:[%s6805_s28 + $0xe8] sm:$0xf0] }
  0xc8   : > { %v2084_v58 = vpop.f32.mrf.mxu0 }
  0xc9   : > { %6339 = vmatmul.msk.bf16.gmra.mxu1 %vm1673_vm2, %v5363_v51  ;;  %v2734_v59 = vadd.f32 %v2733_v31, %v2084_v58 }
  0xcb   : > { %v3367_v60 = vpack.c.bf16 %v2734_v59, %v2734_v59  ;;  %v3884_v61 = vsel %vm3876_vm4, %v2734_v59, 0.0  ;;  %v4398_v62 = vmul.f32 %v2734_v59, %v2734_v59  ;;  %2123 = vmatmul.bf16.gmra.mxu0 %v5351_v57  ;;  %v5387_v59 = vor.u32 %v6487_v53, %v5384_v54  ;;  %v5390_v53 = vld [vmem:[%s6805_s28 + $0xf0] sm:$0xf]  ;;  %v6490_v54 = vld [vmem:[%s6805_s28 + $0xf4] sm:$0xf0] }
  0xcc   : > { %v3885_v63 = vadd.f32 %v3884_v61, %v3883_v50  ;;  %v6486_v61 = vld [vmem:[%s6805_s28 + $0xd4] sm:$0xf0] }
  0xcd   : > { %3624 = vst.msk [vmem:[%s6874_s17 + $0x10] sm:$0xf] %vm3619_vm3, %v3367_v60  ;;  %v4657_v0 = vsel %vm3876_vm4, %v4398_v62, 0.0  ;;  %v5374_v60 = vld [vmem:[%s6805_s28 + $0xd0] sm:$0xf] }
  0xce   : > { %v2740_v1 = vpop.f32.mrf.mxu1  ;;  %v4658_v2 = vadd.f32 %v4657_v0, %v4656_v56 }
  0xd0   : > { %v2086_v3 = vpop.f32.mrf.mxu0 }
  0xd1   : > { %v2736_v4 = vadd.f32 %v2735_v41, %v2086_v3  ;;  %v5367_v41 = vor.u32 %v6484_v37, %v5366_v36 }
  0xd3   : > { %v3368_v7 = vpack.c.bf16 %v2736_v4, %v2736_v4  ;;  %v3886_v8 = vsel %vm3876_vm4, %v2736_v4, 0.0  ;;  %v4399_v9 = vmul.f32 %v2736_v4, %v2736_v4  ;;  %v5782_v4 = vld [vmem:[%s6805_s28 + $0x400] sm:$0xf] }
  0xd4   : > { %v3887_v10 = vadd.f32 %v3886_v8, %v3885_v63 }
  0xd5   : > { %3625 = vst.msk [vmem:[%s6874_s17 + $0x14] sm:$0xf] %vm3619_vm3, %v3368_v7  ;;  %v4659_v14 = vsel %vm3876_vm4, %v4399_v9, 0.0  ;;  %v5783_v9 = vor.u32 %v6588_v5, %v5782_v4  ;;  %v5800_v4 = vld [vmem:[%s6805_s28 + $0x428] sm:$0xf0] }
  0xd6   : > { %v2743_v15 = vpop.f32.mrf.mxu1  ;;  %v4660_v16 = vadd.f32 %v4659_v14, %v4658_v2 }
  0xd7   : > { %2393 = vmatmul.bf16.vlgmr.msra.gmra.mxu2 %v5783_v9 }
  0xd8   : > { %v2089_v18 = vpop.f32.mrf.mxu0 }
  0xd9   : > { %6340 = vmatmul.msk.bf16.gmra.mxu1 %vm1673_vm2, %v5371_v11  ;;  %v2739_v19 = vadd.f32 %v2738_v55, %v2089_v18 }
  0xdb   : > { %v3369_v20 = vpack.c.bf16 %v2739_v19, %v2739_v19  ;;  %v3888_v21 = vsel %vm3876_vm4, %v2739_v19, 0.0  ;;  %v4400_v22 = vmul.f32 %v2739_v19, %v2739_v19  ;;  %2128 = vmatmul.bf16.gmra.mxu0 %v5359_v17  ;;  %v5392_v17 = vld [vmem:[%s6805_s28 + $0xf8] sm:$0xf0] }
  0xdc   : > { %v3889_v23 = vadd.f32 %v3888_v21, %v3887_v10 }
  0xdd   : > { %3626 = vst.msk [vmem:[%s6874_s17 + $0x18] sm:$0xf] %vm3619_vm3, %v3369_v20  ;;  %v4661_v24 = vsel %vm3876_vm4, %v4400_v22, 0.0 }
  0xde   : > { %v2745_v25 = vpop.f32.mrf.mxu1  ;;  %v4662_v26 = vadd.f32 %v4661_v24, %v4660_v16  ;;  %v6489_v16 = vld [vmem:[%s6805_s28 + $0xf4] sm:$0xf]  ;;  %v6488_v24 = vld [vmem:[%s6805_s28 + $0xe4] sm:$0xf0] }
  0xdf   : > { %v5395_v22 = vor.u32 %v6489_v16, %v5392_v17 }
  0xe0   : > { %v2091_v27 = vpop.f32.mrf.mxu0 }
  0xe1   : > { %v2741_v28 = vadd.f32 %v2740_v1, %v2091_v27  ;;  %v5375_v1 = vor.u32 %v6486_v61, %v5374_v60  ;;  %v5798_v61 = vld [vmem:[%s6805_s28 + $0x420] sm:$0xf] }
  0xe3   : > { %v3370_v31 = vpack.c.bf16 %v2741_v28, %v2741_v28  ;;  %v3890_v32 = vsel %vm3876_vm4, %v2741_v28, 0.0  ;;  %v4401_v33 = vmul.f32 %v2741_v28, %v2741_v28 }
  0xe4   : > { %v3891_v34 = vadd.f32 %v3890_v32, %v3889_v23  ;;  %v5382_v23 = vld [vmem:[%s6805_s28 + $0xe0] sm:$0xf]  ;;  %v6590_v32 = vld [vmem:[%s6805_s28 + $0x414] sm:$0xf0] }
  0xe5   : > { %3627 = vst.msk [vmem:[%s6874_s17 + $0x1c] sm:$0xf] %vm3619_vm3, %v3370_v31  ;;  %v4663_v38 = vsel %vm3876_vm4, %v4401_v33, 0.0  ;;  %v5383_v28 = vor.u32 %v6488_v24, %v5382_v23  ;;  %v5790_v31 = vld [vmem:[%s6805_s28 + $0x410] sm:$0xf] }
  0xe6   : > { %v2748_v39 = vpop.f32.mrf.mxu1  ;;  %v4664_v40 = vadd.f32 %v4663_v38, %v4662_v26  ;;  %v6589_v33 = vld [vmem:[%s6805_s28 + $0x414] sm:$0xf]  ;;  %v5791_v37 = vor.u32 %v6590_v32, %v5790_v31  ;;  %v5792_v38 = vld [vmem:[%s6805_s28 + $0x418] sm:$0xf0] }
  0xe8   : > { %v2094_v42 = vpop.f32.mrf.mxu0  ;;  %2398 = vmatmul.bf16.gmra.mxu2 %v5791_v37 }
  0xe9   : > { %6341 = vmatmul.msk.bf16.gmra.mxu1 %vm1673_vm2, %v5379_v35  ;;  %v2744_v43 = vadd.f32 %v2743_v15, %v2094_v42 }
  0xeb   : > { %v3371_v44 = vpack.c.bf16 %v2744_v43, %v2744_v43  ;;  %v3892_v45 = vsel %vm3876_vm4, %v2744_v43, 0.0  ;;  %v4402_v46 = vmul.f32 %v2744_v43, %v2744_v43  ;;  %2133 = vmatmul.bf16.gmra.mxu0 %v5367_v41 }
  0xec   : > { %v3893_v47 = vadd.f32 %v3892_v45, %v3891_v34 }
  0xed   : > { %3628 = vst.msk [vmem:[%s6874_s17 + $0x20] sm:$0xf] %vm3619_vm3, %v3371_v44  ;;  %v4665_v48 = vsel %vm3876_vm4, %v4402_v46, 0.0  ;;  %v6491_v46 = vld [vmem:[%s6805_s28 + $0x104] sm:$0xf] }
  0xee   : > { %v2750_v49 = vpop.f32.mrf.mxu1  ;;  %v4666_v50 = vadd.f32 %v4665_v48, %v4664_v40  ;;  %v5795_v40 = vor.u32 %v6589_v33, %v5792_v38 }
  0xf0   : > { %v2096_v51 = vpop.f32.mrf.mxu0  ;;  %6393 = vmatmul.msk.bf16.vlgmr.msra.gmra.mxu3 %vm1673_vm2, %v5795_v40 }
  0xf1   : > { %v2746_v52 = vadd.f32 %v2745_v25, %v2096_v51 }
  0xf3   : > { %v3372_v55 = vpack.c.bf16 %v2746_v52, %v2746_v52  ;;  %v3894_v56 = vsel %vm3876_vm4, %v2746_v52, 0.0  ;;  %v4403_v57 = vmul.f32 %v2746_v52, %v2746_v52 }
  0xf4   : > { %v3895_v58 = vadd.f32 %v3894_v56, %v3893_v47  ;;  %v5400_v47 = vld [vmem:[%s6805_s28 + $0x108] sm:$0xf0] }
  0xf5   : > { %3629 = vst.msk [vmem:[%s6874_s17 + $0x24] sm:$0xf] %vm3619_vm3, %v3372_v55  ;;  %v4667_v62 = vsel %vm3876_vm4, %v4403_v57, 0.0  ;;  %v5403_v52 = vor.u32 %v6491_v46, %v5400_v47 }
  0xf6   : > { %v2753_v63 = vpop.f32.mrf.mxu1  ;;  %v4668_v0 = vadd.f32 %v4667_v62, %v4666_v50  ;;  %v6592_v62 = vld [vmem:[%s6805_s28 + $0x424] sm:$0xf0] }
  0xf8   : > { %v2099_v2 = vpop.f32.mrf.mxu0 }
  0xf9   : > { %6342 = vmatmul.msk.bf16.gmra.mxu1 %vm1673_vm2, %v5387_v59  ;;  %v2749_v3 = vadd.f32 %v2748_v39, %v2099_v2 }
  0xfb   : > { %v3373_v6 = vpack.c.bf16 %v2749_v3, %v2749_v3  ;;  %v3896_v7 = vsel %vm3876_vm4, %v2749_v3, 0.0  ;;  %v4404_v8 = vmul.f32 %v2749_v3, %v2749_v3  ;;  %2138 = vmatmul.bf16.gmra.mxu0 %v5375_v1  ;;  %v5799_v3 = vor.u32 %v6592_v62, %v5798_v61 }
  0xfc   : > { %v3897_v10 = vadd.f32 %v3896_v7, %v3895_v58  ;;  %v5391_v58 = vor.u32 %v6490_v54, %v5390_v53 }
  0xfd   : > { %3630 = vst.msk [vmem:[%s6874_s17 + $0x28] sm:$0xf] %vm3619_vm3, %v3373_v6  ;;  %v4669_v11 = vsel %vm3876_vm4, %v4404_v8, 0.0  ;;  %2403 = vmatmul.bf16.gmra.mxu2 %v5799_v3 }
  0xfe   : > { %v2755_v12 = vpop.f32.mrf.mxu1  ;;  %v4670_v13 = vadd.f32 %v4669_v11, %v4668_v0 }
 0x100   : > { %v2101_v14 = vpop.f32.mrf.mxu0 }
 0x101   : > { %v2751_v15 = vadd.f32 %v2750_v49, %v2101_v14 }
 0x103   : > { %v3374_v18 = vpack.c.bf16 %v2751_v15, %v2751_v15  ;;  %v3898_v19 = vsel %vm3876_vm4, %v2751_v15, 0.0  ;;  %v4405_v20 = vmul.f32 %v2751_v15, %v2751_v15 }
 0x104   : > { %v3899_v21 = vadd.f32 %v3898_v19, %v3897_v10  ;;  %v5398_v19 = vld [vmem:[%s6805_s28 + $0x100] sm:$0xf] }
 0x105   : > { %3631 = vst.msk [vmem:[%s6874_s17 + $0x2c] sm:$0xf] %vm3619_vm3, %v3374_v18  ;;  %v4671_v25 = vsel %vm3876_vm4, %v4405_v20, 0.0  ;;  %v6492_v20 = vld [vmem:[%s6805_s28 + $0x104] sm:$0xf0] }
 0x106   : > { %v2758_v26 = vpop.f32.mrf.mxu1  ;;  %v4672_v27 = vadd.f32 %v4671_v25, %v4670_v13  ;;  %v5408_v13 = vld [vmem:[%s6805_s28 + $0x118] sm:$0xf0]  ;;  %v5399_v24 = vor.u32 %v6492_v20, %v5398_v19 }
 0x108   : > { %v2104_v29 = vpop.f32.mrf.mxu0 }
 0x109   : > { %6343 = vmatmul.msk.bf16.gmra.mxu1 %vm1673_vm2, %v5395_v22  ;;  %v2754_v30 = vadd.f32 %v2753_v63, %v2104_v29  ;;  %v6591_v63 = vld [vmem:[%s6805_s28 + $0x424] sm:$0xf]  ;;  %v6593_v29 = vld [vmem:[%s6805_s28 + $0x434] sm:$0xf] }
 0x10a   : > { %v5803_v6 = vor.u32 %v6591_v63, %v5800_v4 }
 0x10b   : > { %v3375_v34 = vpack.c.bf16 %v2754_v30, %v2754_v30  ;;  %v3900_v35 = vsel %vm3876_vm4, %v2754_v30, 0.0  ;;  %v4406_v36 = vmul.f32 %v2754_v30, %v2754_v30  ;;  %2143 = vmatmul.bf16.gmra.mxu0 %v5383_v28  ;;  %v6594_v28 = vld [vmem:[%s6805_s28 + $0x434] sm:$0xf0] }
 0x10c   : > { %v3901_v39 = vadd.f32 %v3900_v35, %v3899_v21  ;;  %6394 = vmatmul.msk.bf16.gmra.mxu3 %vm1673_vm2, %v5803_v6 }
 0x10d   : > { %3632 = vst.msk [vmem:[%s6874_s17 + $0x30] sm:$0xf] %vm3619_vm3, %v3375_v34  ;;  %v4673_v41 = vsel %vm3876_vm4, %v4406_v36, 0.0  ;;  %v5808_v34 = vld [vmem:[%s6805_s28 + $0x438] sm:$0xf0] }
 0x10e   : > { %v2760_v42 = vpop.f32.mrf.mxu1  ;;  %v4674_v43 = vadd.f32 %v4673_v41, %v4672_v27  ;;  %v5806_v27 = vld [vmem:[%s6805_s28 + $0x430] sm:$0xf]  ;;  %v5811_v36 = vor.u32 %v6593_v29, %v5808_v34 }
 0x10f   : > { %v5807_v33 = vor.u32 %v6594_v28, %v5806_v27 }
 0x110   : > { %v2106_v44 = vpop.f32.mrf.mxu0 }
 0x111   : > { %v2756_v45 = vadd.f32 %v2755_v12, %v2106_v44  ;;  %v6493_v12 = vld [vmem:[%s6805_s28 + $0x114] sm:$0xf]  ;;  %2408 = vmatmul.bf16.gmra.mxu2 %v5807_v33 }
 0x112   : > { %v5411_v18 = vor.u32 %v6493_v12, %v5408_v13 }
 0x113   : > { %v3376_v48 = vpack.c.bf16 %v2756_v45, %v2756_v45  ;;  %v3902_v49 = vsel %vm3876_vm4, %v2756_v45, 0.0  ;;  %v4407_v50 = vmul.f32 %v2756_v45, %v2756_v45 }
 0x114   : > { %v3903_v51 = vadd.f32 %v3902_v49, %v3901_v39  ;;  %v5406_v49 = vld [vmem:[%s6805_s28 + $0x110] sm:$0xf] }
 0x115   : > { %3633 = vst.msk [vmem:[%s6874_s17 + $0x34] sm:$0xf] %vm3619_vm3, %v3376_v48  ;;  %v4675_v55 = vsel %vm3876_vm4, %v4407_v50, 0.0  ;;  %v6494_v50 = vld [vmem:[%s6805_s28 + $0x114] sm:$0xf0] }
 0x116   : > { %v2763_v56 = vpop.f32.mrf.mxu1  ;;  %v4676_v57 = vadd.f32 %v4675_v55, %v4674_v43  ;;  %v5416_v43 = vld [vmem:[%s6805_s28 + $0x128] sm:$0xf0]  ;;  %v5407_v54 = vor.u32 %v6494_v50, %v5406_v49 }
 0x118   : > { %v2109_v59 = vpop.f32.mrf.mxu0 }
 0x119   : > { %6344 = vmatmul.msk.bf16.gmra.mxu1 %vm1673_vm2, %v5403_v52  ;;  %v2759_v60 = vadd.f32 %v2758_v26, %v2109_v59  ;;  %v6595_v59 = vld [vmem:[%s6805_s28 + $0x444] sm:$0xf] }
 0x11b   : > { %v3377_v0 = vpack.c.bf16 %v2759_v60, %v2759_v60  ;;  %v3904_v1 = vsel %vm3876_vm4, %v2759_v60, 0.0  ;;  %v4408_v2 = vmul.f32 %v2759_v60, %v2759_v60  ;;  %2148 = vmatmul.bf16.gmra.mxu0 %v5391_v58  ;;  %v6596_v58 = vld [vmem:[%s6805_s28 + $0x444] sm:$0xf0] }
 0x11c   : > { %v3905_v5 = vadd.f32 %v3904_v1, %v3903_v51  ;;  %6395 = vmatmul.msk.bf16.gmra.mxu3 %vm1673_vm2, %v5811_v36 }
 0x11d   : > { %3634 = vst.msk [vmem:[%s6874_s17 + $0x38] sm:$0xf] %vm3619_vm3, %v3377_v0  ;;  %v4677_v7 = vsel %vm3876_vm4, %v4408_v2, 0.0  ;;  %v5816_v0 = vld [vmem:[%s6805_s28 + $0x448] sm:$0xf0] }
 0x11e   : > { %v2765_v8 = vpop.f32.mrf.mxu1  ;;  %v4678_v9 = vadd.f32 %v4677_v7, %v4676_v57  ;;  %v5814_v57 = vld [vmem:[%s6805_s28 + $0x440] sm:$0xf]  ;;  %v5819_v2 = vor.u32 %v6595_v59, %v5816_v0 }
 0x11f   : > { %v5815_v63 = vor.u32 %v6596_v58, %v5814_v57 }
 0x120   : > { %v2111_v10 = vpop.f32.mrf.mxu0 }
 0x121   : > { %v2761_v11 = vadd.f32 %v2760_v42, %v2111_v10  ;;  %v6495_v42 = vld [vmem:[%s6805_s28 + $0x124] sm:$0xf]  ;;  %2413 = vmatmul.bf16.gmra.mxu2 %v5815_v63 }
 0x122   : > { %v5419_v48 = vor.u32 %v6495_v42, %v5416_v43 }
 0x123   : > { %v3378_v14 = vpack.c.bf16 %v2761_v11, %v2761_v11  ;;  %v3906_v15 = vsel %vm3876_vm4, %v2761_v11, 0.0  ;;  %v4409_v16 = vmul.f32 %v2761_v11, %v2761_v11 }
 0x124   : > { %v3907_v17 = vadd.f32 %v3906_v15, %v3905_v5  ;;  %v5414_v15 = vld [vmem:[%s6805_s28 + $0x120] sm:$0xf] }
 0x125   : > { %3635 = vst.msk [vmem:[%s6874_s17 + $0x3c] sm:$0xf] %vm3619_vm3, %v3378_v14  ;;  %v4679_v21 = vsel %vm3876_vm4, %v4409_v16, 0.0  ;;  %v6496_v16 = vld [vmem:[%s6805_s28 + $0x124] sm:$0xf0] }
 0x126   : > { %v2768_v22 = vpop.f32.mrf.mxu1  ;;  %v4680_v23 = vadd.f32 %v4679_v21, %v4678_v9  ;;  %v5424_v9 = vld [vmem:[%s6805_s28 + $0x138] sm:$0xf0]  ;;  %v5415_v20 = vor.u32 %v6496_v16, %v5414_v15 }
 0x128   : > { %v2114_v25 = vpop.f32.mrf.mxu0 }
 0x129   : > { %6345 = vmatmul.msk.bf16.gmra.mxu1 %vm1673_vm2, %v5411_v18  ;;  %v2764_v26 = vadd.f32 %v2763_v56, %v2114_v25  ;;  %v6597_v25 = vld [vmem:[%s6805_s28 + $0x454] sm:$0xf] }
 0x12b   : > { %v3379_v30 = vpack.c.bf16 %v2764_v26, %v2764_v26  ;;  %v3908_v31 = vsel %vm3876_vm4, %v2764_v26, 0.0  ;;  %v4410_v32 = vmul.f32 %v2764_v26, %v2764_v26  ;;  %2153 = vmatmul.bf16.gmra.mxu0 %v5399_v24  ;;  %v6598_v24 = vld [vmem:[%s6805_s28 + $0x454] sm:$0xf0] }
 0x12c   : > { %v3909_v35 = vadd.f32 %v3908_v31, %v3907_v17  ;;  %6396 = vmatmul.msk.bf16.gmra.mxu3 %vm1673_vm2, %v5819_v2 }
 0x12d   : > { %3636 = vst.msk [vmem:[%s6874_s17 + $0x40] sm:$0xf] %vm3619_vm3, %v3379_v30  ;;  %v4681_v37 = vsel %vm3876_vm4, %v4410_v32, 0.0  ;;  %v5824_v30 = vld [vmem:[%s6805_s28 + $0x458] sm:$0xf0] }
 0x12e   : > { %v2770_v38 = vpop.f32.mrf.mxu1  ;;  %v4682_v39 = vadd.f32 %v4681_v37, %v4680_v23  ;;  %v5822_v23 = vld [vmem:[%s6805_s28 + $0x450] sm:$0xf]  ;;  %v5827_v32 = vor.u32 %v6597_v25, %v5824_v30 }
 0x12f   : > { %v5823_v29 = vor.u32 %v6598_v24, %v5822_v23 }
 0x130   : > { %v2116_v40 = vpop.f32.mrf.mxu0 }
 0x131   : > { %v2766_v41 = vadd.f32 %v2765_v8, %v2116_v40  ;;  %v6497_v8 = vld [vmem:[%s6805_s28 + $0x134] sm:$0xf]  ;;  %2418 = vmatmul.bf16.gmra.mxu2 %v5823_v29 }
 0x132   : > { %v5427_v14 = vor.u32 %v6497_v8, %v5424_v9 }
 0x133   : > { %v3380_v44 = vpack.c.bf16 %v2766_v41, %v2766_v41  ;;  %v3910_v45 = vsel %vm3876_vm4, %v2766_v41, 0.0  ;;  %v4411_v46 = vmul.f32 %v2766_v41, %v2766_v41 }
 0x134   : > { %v3911_v47 = vadd.f32 %v3910_v45, %v3909_v35  ;;  %v5422_v45 = vld [vmem:[%s6805_s28 + $0x130] sm:$0xf] }
 0x135   : > { %3637 = vst.msk [vmem:[%s6874_s17 + $0x44] sm:$0xf] %vm3619_vm3, %v3380_v44  ;;  %v4683_v51 = vsel %vm3876_vm4, %v4411_v46, 0.0  ;;  %v6498_v46 = vld [vmem:[%s6805_s28 + $0x134] sm:$0xf0] }
 0x136   : > { %v2773_v52 = vpop.f32.mrf.mxu1  ;;  %v4684_v53 = vadd.f32 %v4683_v51, %v4682_v39  ;;  %v5432_v39 = vld [vmem:[%s6805_s28 + $0x148] sm:$0xf0]  ;;  %v5423_v50 = vor.u32 %v6498_v46, %v5422_v45 }
 0x138   : > { %v2119_v55 = vpop.f32.mrf.mxu0 }
 0x139   : > { %6346 = vmatmul.msk.bf16.gmra.mxu1 %vm1673_vm2, %v5419_v48  ;;  %v2769_v56 = vadd.f32 %v2768_v22, %v2119_v55  ;;  %v6599_v55 = vld [vmem:[%s6805_s28 + $0x464] sm:$0xf] }
 0x13b   : > { %v3381_v60 = vpack.c.bf16 %v2769_v56, %v2769_v56  ;;  %v3912_v61 = vsel %vm3876_vm4, %v2769_v56, 0.0  ;;  %v4412_v62 = vmul.f32 %v2769_v56, %v2769_v56  ;;  %2158 = vmatmul.bf16.gmra.mxu0 %v5407_v54  ;;  %v6600_v54 = vld [vmem:[%s6805_s28 + $0x464] sm:$0xf0] }
 0x13c   : > { %v3913_v1 = vadd.f32 %v3912_v61, %v3911_v47  ;;  %6397 = vmatmul.msk.bf16.gmra.mxu3 %vm1673_vm2, %v5827_v32 }
 0x13d   : > { %3638 = vst.msk [vmem:[%s6874_s17 + $0x48] sm:$0xf] %vm3619_vm3, %v3381_v60  ;;  %v4685_v3 = vsel %vm3876_vm4, %v4412_v62, 0.0  ;;  %v5832_v60 = vld [vmem:[%s6805_s28 + $0x468] sm:$0xf0] }
 0x13e   : > { %v2775_v4 = vpop.f32.mrf.mxu1  ;;  %v4686_v5 = vadd.f32 %v4685_v3, %v4684_v53  ;;  %v5830_v53 = vld [vmem:[%s6805_s28 + $0x460] sm:$0xf]  ;;  %v5835_v62 = vor.u32 %v6599_v55, %v5832_v60 }
 0x13f   : > { %v5831_v59 = vor.u32 %v6600_v54, %v5830_v53 }
 0x140   : > { %v2121_v6 = vpop.f32.mrf.mxu0 }
 0x141   : > { %v2771_v7 = vadd.f32 %v2770_v38, %v2121_v6  ;;  %v6499_v38 = vld [vmem:[%s6805_s28 + $0x144] sm:$0xf]  ;;  %2423 = vmatmul.bf16.gmra.mxu2 %v5831_v59 }
 0x142   : > { %v5435_v44 = vor.u32 %v6499_v38, %v5432_v39 }
 0x143   : > { %v3382_v10 = vpack.c.bf16 %v2771_v7, %v2771_v7  ;;  %v3914_v11 = vsel %vm3876_vm4, %v2771_v7, 0.0  ;;  %v4413_v12 = vmul.f32 %v2771_v7, %v2771_v7 }
 0x144   : > { %v3915_v13 = vadd.f32 %v3914_v11, %v3913_v1  ;;  %v5430_v11 = vld [vmem:[%s6805_s28 + $0x140] sm:$0xf] }
 0x145   : > { %3639 = vst.msk [vmem:[%s6874_s17 + $0x4c] sm:$0xf] %vm3619_vm3, %v3382_v10  ;;  %v4687_v17 = vsel %vm3876_vm4, %v4413_v12, 0.0  ;;  %v6500_v12 = vld [vmem:[%s6805_s28 + $0x144] sm:$0xf0] }
 0x146   : > { %v2778_v18 = vpop.f32.mrf.mxu1  ;;  %v4688_v19 = vadd.f32 %v4687_v17, %v4686_v5  ;;  %v5440_v5 = vld [vmem:[%s6805_s28 + $0x158] sm:$0xf0]  ;;  %v5431_v16 = vor.u32 %v6500_v12, %v5430_v11 }
 0x148   : > { %v2124_v21 = vpop.f32.mrf.mxu0 }
 0x149   : > { %6347 = vmatmul.msk.bf16.gmra.mxu1 %vm1673_vm2, %v5427_v14  ;;  %v2774_v22 = vadd.f32 %v2773_v52, %v2124_v21  ;;  %v6601_v21 = vld [vmem:[%s6805_s28 + $0x474] sm:$0xf] }
 0x14b   : > { %v3383_v26 = vpack.c.bf16 %v2774_v22, %v2774_v22  ;;  %v3916_v27 = vsel %vm3876_vm4, %v2774_v22, 0.0  ;;  %v4414_v28 = vmul.f32 %v2774_v22, %v2774_v22  ;;  %2163 = vmatmul.bf16.gmra.mxu0 %v5415_v20  ;;  %v6602_v20 = vld [vmem:[%s6805_s28 + $0x474] sm:$0xf0] }
 0x14c   : > { %v3917_v31 = vadd.f32 %v3916_v27, %v3915_v13  ;;  %6398 = vmatmul.msk.bf16.gmra.mxu3 %vm1673_vm2, %v5835_v62 }
 0x14d   : > { %3640 = vst.msk [vmem:[%s6874_s17 + $0x50] sm:$0xf] %vm3619_vm3, %v3383_v26  ;;  %v4689_v33 = vsel %vm3876_vm4, %v4414_v28, 0.0  ;;  %v5840_v26 = vld [vmem:[%s6805_s28 + $0x478] sm:$0xf0] }
 0x14e   : > { %v2780_v34 = vpop.f32.mrf.mxu1  ;;  %v4690_v35 = vadd.f32 %v4689_v33, %v4688_v19  ;;  %v5838_v19 = vld [vmem:[%s6805_s28 + $0x470] sm:$0xf]  ;;  %v5843_v28 = vor.u32 %v6601_v21, %v5840_v26 }
 0x14f   : > { %v5839_v25 = vor.u32 %v6602_v20, %v5838_v19  ;;  %v6605_v19 = vld [vmem:[%s6805_s28 + $0x494] sm:$0xf] }
 0x150   : > { %v2126_v36 = vpop.f32.mrf.mxu0 }
 0x151   : > { %v2776_v37 = vadd.f32 %v2775_v4, %v2126_v36  ;;  %v6501_v4 = vld [vmem:[%s6805_s28 + $0x154] sm:$0xf]  ;;  %2428 = vmatmul.bf16.gmra.mxu2 %v5839_v25 }
 0x152   : > { %v5443_v10 = vor.u32 %v6501_v4, %v5440_v5 }
 0x153   : > { %v3384_v40 = vpack.c.bf16 %v2776_v37, %v2776_v37  ;;  %v3918_v41 = vsel %vm3876_vm4, %v2776_v37, 0.0  ;;  %v4415_v42 = vmul.f32 %v2776_v37, %v2776_v37 }
 0x154   : > { %v3919_v43 = vadd.f32 %v3918_v41, %v3917_v31  ;;  %v5438_v41 = vld [vmem:[%s6805_s28 + $0x150] sm:$0xf] }
 0x155   : > { %3641 = vst.msk [vmem:[%s6874_s17 + $0x54] sm:$0xf] %vm3619_vm3, %v3384_v40  ;;  %v4691_v47 = vsel %vm3876_vm4, %v4415_v42, 0.0  ;;  %v6502_v42 = vld [vmem:[%s6805_s28 + $0x154] sm:$0xf0] }
 0x156   : > { %v2783_v48 = vpop.f32.mrf.mxu1  ;;  %v4692_v49 = vadd.f32 %v4691_v47, %v4690_v35  ;;  %v5448_v35 = vld [vmem:[%s6805_s28 + $0x168] sm:$0xf0]  ;;  %v5439_v46 = vor.u32 %v6502_v42, %v5438_v41  ;;  %v5454_v41 = vld [vmem:[%s6805_s28 + $0x170] sm:$0xf]  ;;  %v6506_v42 = vld [vmem:[%s6805_s28 + $0x174] sm:$0xf0] }
 0x158   : > { %v2129_v51 = vpop.f32.mrf.mxu0 }
 0x159   : > { %6348 = vmatmul.msk.bf16.gmra.mxu1 %vm1673_vm2, %v5435_v44  ;;  %v2779_v52 = vadd.f32 %v2778_v18, %v2129_v51  ;;  %v6603_v51 = vld [vmem:[%s6805_s28 + $0x484] sm:$0xf] }
 0x15b   : > { %v3385_v56 = vpack.c.bf16 %v2779_v52, %v2779_v52  ;;  %v3920_v57 = vsel %vm3876_vm4, %v2779_v52, 0.0  ;;  %v4416_v58 = vmul.f32 %v2779_v52, %v2779_v52  ;;  %2168 = vmatmul.bf16.gmra.mxu0 %v5423_v50  ;;  %v6604_v50 = vld [vmem:[%s6805_s28 + $0x484] sm:$0xf0] }
 0x15c   : > { %v3921_v61 = vadd.f32 %v3920_v57, %v3919_v43  ;;  %6399 = vmatmul.msk.bf16.gmra.mxu3 %vm1673_vm2, %v5843_v28 }
 0x15d   : > { %3642 = vst.msk [vmem:[%s6874_s17 + $0x58] sm:$0xf] %vm3619_vm3, %v3385_v56  ;;  %v4693_v63 = vsel %vm3876_vm4, %v4416_v58, 0.0  ;;  %v5848_v56 = vld [vmem:[%s6805_s28 + $0x488] sm:$0xf0] }
 0x15e   : > { %v2785_v0 = vpop.f32.mrf.mxu1  ;;  %v4694_v1 = vadd.f32 %v4693_v63, %v4692_v49  ;;  %v5846_v49 = vld [vmem:[%s6805_s28 + $0x480] sm:$0xf]  ;;  %v5851_v58 = vor.u32 %v6603_v51, %v5848_v56  ;;  %v7091_v63 = vpop.f32.mrf.mxu2 }
 0x15f   : > { %v5847_v55 = vor.u32 %v6604_v50, %v5846_v49 }
 0x160   : > { %v2131_v2 = vpop.f32.mrf.mxu0 }
 0x161   : > { %v2781_v3 = vadd.f32 %v2780_v34, %v2131_v2  ;;  %v6503_v34 = vld [vmem:[%s6805_s28 + $0x164] sm:$0xf]  ;;  %2433 = vmatmul.bf16.gmra.mxu2 %v5847_v55  ;;  %v5456_v2 = vld [vmem:[%s6805_s28 + $0x178] sm:$0xf0] }
 0x162   : > { %v5451_v40 = vor.u32 %v6503_v34, %v5448_v35  ;;  %v5464_v34 = vld [vmem:[%s6805_s28 + $0x188] sm:$0xf0] }
 0x163   : > { %v3386_v6 = vpack.c.bf16 %v2781_v3, %v2781_v3  ;;  %v3922_v7 = vsel %vm3876_vm4, %v2781_v3, 0.0  ;;  %v4417_v8 = vmul.f32 %v2781_v3, %v2781_v3 }
 0x164   : > { %v3923_v9 = vadd.f32 %v3922_v7, %v3921_v61 }
 0x165   : > { %3643 = vst.msk [vmem:[%s6874_s17 + $0x5c] sm:$0xf] %vm3619_vm3, %v3386_v6  ;;  %v4695_v13 = vsel %vm3876_vm4, %v4417_v8, 0.0  ;;  %v5446_v8 = vld [vmem:[%s6805_s28 + $0x160] sm:$0xf] }
 0x166   : > { %v2788_v14 = vpop.f32.mrf.mxu1  ;;  %v4696_v15 = vadd.f32 %v4695_v13, %v4694_v1  ;;  %v6505_v1 = vld [vmem:[%s6805_s28 + $0x174] sm:$0xf] }
 0x167   : > { %v5459_v7 = vor.u32 %v6505_v1, %v5456_v2 }
 0x168   : > { %v2134_v17 = vpop.f32.mrf.mxu0 }
 0x169   : > { %6349 = vmatmul.msk.bf16.gmra.mxu1 %vm1673_vm2, %v5443_v10  ;;  %v2784_v18 = vadd.f32 %v2783_v48, %v2134_v17  ;;  %v5854_v17 = vld [vmem:[%s6805_s28 + $0x490] sm:$0xf] }
 0x16b   : > { %v3387_v22 = vpack.c.bf16 %v2784_v18, %v2784_v18  ;;  %v3924_v23 = vsel %vm3876_vm4, %v2784_v18, 0.0  ;;  %v4418_v24 = vmul.f32 %v2784_v18, %v2784_v18  ;;  %2173 = vmatmul.bf16.gmra.mxu0 %v5431_v16  ;;  %v6606_v18 = vld [vmem:[%s6805_s28 + $0x494] sm:$0xf0] }
 0x16c   : > { %v3925_v27 = vadd.f32 %v3924_v23, %v3923_v9  ;;  %6400 = vmatmul.msk.bf16.gmra.mxu3 %vm1673_vm2, %v5851_v58  ;;  %v6504_v9 = vld [vmem:[%s6805_s28 + $0x164] sm:$0xf0]  ;;  %v5855_v23 = vor.u32 %v6606_v18, %v5854_v17  ;;  %v5462_v17 = vld [vmem:[%s6805_s28 + $0x180] sm:$0xf] }
 0x16d   : > { %3644 = vst.msk [vmem:[%s6874_s17 + $0x60] sm:$0xf] %vm3619_vm3, %v3387_v22  ;;  %v4697_v29 = vsel %vm3876_vm4, %v4418_v24, 0.0  ;;  %v5447_v13 = vor.u32 %v6504_v9, %v5446_v8  ;;  %v5856_v24 = vld [vmem:[%s6805_s28 + $0x498] sm:$0xf0] }
 0x16e   : > { %v2790_v30 = vpop.f32.mrf.mxu1  ;;  %v4698_v31 = vadd.f32 %v4697_v29, %v4696_v15  ;;  %v7102_v15 = vpop.f32.mrf.mxu2  ;;  %v5859_v26 = vor.u32 %v6605_v19, %v5856_v24  ;;  %v6608_v58 = vld [vmem:[%s6805_s28 + $0x4a4] sm:$0xf0]  ;;  %v6509_v8 = vld [vmem:[%s6805_s28 + $0x194] sm:$0xf]  ;;  %v5472_v9 = vld [vmem:[%s6805_s28 + $0x198] sm:$0xf0] }
 0x16f   : > { %v6508_v18 = vld [vmem:[%s6805_s28 + $0x184] sm:$0xf0] }
 0x170   : > { %v2136_v32 = vpop.f32.mrf.mxu0 }
 0x171   : > { %v2786_v33 = vadd.f32 %v2785_v0, %v2136_v32  ;;  %2438 = vmatmul.bf16.gmra.mxu2 %v5855_v23  ;;  %v5463_v23 = vor.u32 %v6508_v18, %v5462_v17 }
 0x173   : > { %v3388_v36 = vpack.c.bf16 %v2786_v33, %v2786_v33  ;;  %v3926_v37 = vsel %vm3876_vm4, %v2786_v33, 0.0  ;;  %v4419_v38 = vmul.f32 %v2786_v33, %v2786_v33  ;;  %v6507_v33 = vld [vmem:[%s6805_s28 + $0x184] sm:$0xf]  ;;  %v3048_v35 = vpop.f32.mrf.mxu3 }
 0x174   : > { %v3927_v39 = vadd.f32 %v3926_v37, %v3925_v27 }
 0x175   : > { %3645 = vst.msk [vmem:[%s6874_s17 + $0x64] sm:$0xf] %vm3619_vm3, %v3388_v36  ;;  %v4699_v43 = vsel %vm3876_vm4, %v4419_v38, 0.0 }
 0x176   : > { %v2793_v44 = vpop.f32.mrf.mxu1  ;;  %v4700_v45 = vadd.f32 %v4699_v43, %v4698_v31  ;;  %v2399_v31 = vpop.f32.mrf.mxu2 }
 0x178   : > { %v2139_v47 = vpop.f32.mrf.mxu0 }
 0x179   : > { %6350 = vmatmul.msk.bf16.gmra.mxu1 %vm1673_vm2, %v5451_v40  ;;  %v2789_v48 = vadd.f32 %v2788_v14, %v2139_v47  ;;  %v5467_v40 = vor.u32 %v6507_v33, %v5464_v34  ;;  %v5455_v47 = vor.u32 %v6506_v42, %v5454_v41  ;;  %v6610_v34 = vld [vmem:[%s6805_s28 + $0x4b4] sm:$0xf0] }
 0x17b   : > { %v3389_v52 = vpack.c.bf16 %v2789_v48, %v2789_v48  ;;  %v3928_v53 = vsel %vm3876_vm4, %v2789_v48, 0.0  ;;  %v4420_v54 = vmul.f32 %v2789_v48, %v2789_v48  ;;  %2178 = vmatmul.bf16.gmra.mxu0 %v5439_v46  ;;  %v7121_v46 = vadd.f32 %v3048_v35, %v2399_v31  ;;  %v6609_v35 = vld [vmem:[%s6805_s28 + $0x4b4] sm:$0xf] }
 0x17c   : > { %v3929_v57 = vadd.f32 %v3928_v53, %v3927_v39  ;;  %6401 = vmatmul.msk.bf16.gmra.mxu3 %vm1673_vm2, %v5859_v26 }
 0x17d   : > { %3646 = vst.msk [vmem:[%s6874_s17 + $0x68] sm:$0xf] %vm3619_vm3, %v3389_v52  ;;  %v4701_v59 = vsel %vm3876_vm4, %v4420_v54, 0.0  ;;  %v3493_v49 = vpack.c.bf16 %v7121_v46, %v7121_v46  ;;  %v3050_v52 = vpop.f32.mrf.mxu3  ;;  %v5862_v54 = vld [vmem:[%s6805_s28 + $0x4a0] sm:$0xf] }
 0x17e   : > { %v2795_v60 = vpop.f32.mrf.mxu1  ;;  %v4702_v61 = vadd.f32 %v4701_v59, %v4700_v45  ;;  %v2401_v50 = vpop.f32.mrf.mxu2  ;;  %v6607_v59 = vld [vmem:[%s6805_s28 + $0x4a4] sm:$0xf]  ;;  %v5863_v2 = vor.u32 %v6608_v58, %v5862_v54  ;;  %v6510_v58 = vld [vmem:[%s6805_s28 + $0x194] sm:$0xf0] }
 0x17f   : > { %3750 = vst.msk [vmem:[%s6874_s17 + $0x208] sm:$0xf] %vm3619_vm3, %v3493_v49  ;;  %v7128_v53 = vadd.f32 %v3050_v52, %v2401_v50  ;;  %v5480_v49 = vld [vmem:[%s6805_s28 + $0x1a8] sm:$0xf0] }
 0x180   : > { %v2141_v62 = vpop.f32.mrf.mxu0 }
 0x181   : > { %v2791_v0 = vadd.f32 %v2790_v30, %v2141_v62  ;;  %v5864_v62 = vld [vmem:[%s6805_s28 + $0x4a8] sm:$0xf0]  ;;  %2443 = vmatmul.bf16.gmra.mxu2 %v5863_v2 }
 0x183   : > { %v3390_v3 = vpack.c.bf16 %v2791_v0, %v2791_v0  ;;  %v3930_v4 = vsel %vm3876_vm4, %v2791_v0, 0.0  ;;  %v4421_v5 = vmul.f32 %v2791_v0, %v2791_v0 }
 0x184   : > { %v3931_v6 = vadd.f32 %v3930_v4, %v3929_v57 }
 0x185   : > { %3647 = vst.msk [vmem:[%s6874_s17 + $0x6c] sm:$0xf] %vm3619_vm3, %v3390_v3  ;;  %v4703_v10 = vsel %vm3876_vm4, %v4421_v5, 0.0  ;;  %v5867_v3 = vor.u32 %v6607_v59, %v5864_v62 }
 0x186   : > { %v2798_v11 = vpop.f32.mrf.mxu1  ;;  %v4704_v12 = vadd.f32 %v4703_v10, %v4702_v61  ;;  %v3494_v61 = vpack.c.bf16 %v7128_v53, %v7128_v53 }
 0x188   : > { %v2144_v14 = vpop.f32.mrf.mxu0  ;;  %3751 = vst.msk [vmem:[%s6874_s17 + $0x20c] sm:$0xf] %vm3619_vm3, %v3494_v61 }
 0x189   : > { %6351 = vmatmul.msk.bf16.gmra.mxu1 %vm1673_vm2, %v5459_v7  ;;  %v2794_v16 = vadd.f32 %v2793_v44, %v2144_v14 }
 0x18b   : > { %v3391_v20 = vpack.c.bf16 %v2794_v16, %v2794_v16  ;;  %v3932_v21 = vsel %vm3876_vm4, %v2794_v16, 0.0  ;;  %v4422_v22 = vmul.f32 %v2794_v16, %v2794_v16  ;;  %2183 = vmatmul.bf16.gmra.mxu0 %v5447_v13  ;;  %v5475_v16 = vor.u32 %v6509_v8, %v5472_v9 }
 0x18c   : > { %v3933_v25 = vadd.f32 %v3932_v21, %v3931_v6  ;;  %6402 = vmatmul.msk.bf16.gmra.mxu3 %vm1673_vm2, %v5867_v3  ;;  %v2404_v6 = vpop.f32.mrf.mxu2 }
 0x18d   : > { %3648 = vst.msk [vmem:[%s6874_s17 + $0x70] sm:$0xf] %vm3619_vm3, %v3391_v20  ;;  %v4705_v27 = vsel %vm3876_vm4, %v4422_v22, 0.0 }
 0x18e   : > { %v2800_v28 = vpop.f32.mrf.mxu1  ;;  %v4706_v29 = vadd.f32 %v4705_v27, %v4704_v12 }
 0x18f   : > { %v3053_v10 = vpop.f32.mrf.mxu3 }
 0x190   : > { %v2146_v30 = vpop.f32.mrf.mxu0  ;;  %v7151_v22 = vadd.f32 %v3053_v10, %v2404_v6 }
 0x191   : > { %v2796_v32 = vadd.f32 %v2795_v60, %v2146_v30  ;;  %v5870_v30 = vld [vmem:[%s6805_s28 + $0x4b0] sm:$0xf] }
 0x192   : > { %v5871_v41 = vor.u32 %v6610_v34, %v5870_v30 }
 0x193   : > { %v3392_v36 = vpack.c.bf16 %v2796_v32, %v2796_v32  ;;  %v3934_v37 = vsel %vm3876_vm4, %v2796_v32, 0.0  ;;  %v4423_v38 = vmul.f32 %v2796_v32, %v2796_v32 }
 0x194   : > { %v3935_v39 = vadd.f32 %v3934_v37, %v3933_v25  ;;  %v3495_v25 = vpack.c.bf16 %v7151_v22, %v7151_v22  ;;  %v2406_v26 = vpop.f32.mrf.mxu2  ;;  %2448 = vmatmul.bf16.gmra.mxu2 %v5871_v41 }
 0x195   : > { %3649 = vst.msk [vmem:[%s6874_s17 + $0x74] sm:$0xf] %vm3619_vm3, %v3392_v36  ;;  %v4707_v43 = vsel %vm3876_vm4, %v4423_v38, 0.0  ;;  %v5872_v38 = vld [vmem:[%s6805_s28 + $0x4b8] sm:$0xf0] }
 0x196   : > { %v2803_v44 = vpop.f32.mrf.mxu1  ;;  %v4708_v45 = vadd.f32 %v4707_v43, %v4706_v29  ;;  %3752 = vst.msk [vmem:[%s6874_s17 + $0x210] sm:$0xf] %vm3619_vm3, %v3495_v25  ;;  %v5875_v42 = vor.u32 %v6609_v35, %v5872_v38  ;;  %v5478_v35 = vld [vmem:[%s6805_s28 + $0x1a0] sm:$0xf] }
 0x198   : > { %v2149_v48 = vpop.f32.mrf.mxu0 }
 0x199   : > { %6352 = vmatmul.msk.bf16.gmra.mxu1 %vm1673_vm2, %v5467_v40  ;;  %v2799_v51 = vadd.f32 %v2798_v11, %v2149_v48  ;;  %v6511_v48 = vld [vmem:[%s6805_s28 + $0x1a4] sm:$0xf] }
 0x19b   : > { %v3393_v55 = vpack.c.bf16 %v2799_v51, %v2799_v51  ;;  %v3936_v56 = vsel %vm3876_vm4, %v2799_v51, 0.0  ;;  %v4424_v57 = vmul.f32 %v2799_v51, %v2799_v51  ;;  %2188 = vmatmul.bf16.gmra.mxu0 %v5455_v47 }
 0x19c   : > { %v3937_v60 = vadd.f32 %v3936_v56, %v3935_v39  ;;  %6403 = vmatmul.msk.bf16.gmra.mxu3 %vm1673_vm2, %v5875_v42  ;;  %v5483_v56 = vor.u32 %v6511_v48, %v5480_v49  ;;  %v5886_v49 = vld [vmem:[%s6805_s28 + $0x4d0] sm:$0xf] }
 0x19d   : > { %3650 = vst.msk [vmem:[%s6874_s17 + $0x78] sm:$0xf] %vm3619_vm3, %v3393_v55  ;;  %v4709_v0 = vsel %vm3876_vm4, %v4424_v57, 0.0  ;;  %v5470_v57 = vld [vmem:[%s6805_s28 + $0x190] sm:$0xf] }
 0x19e   : > { %v2805_v1 = vpop.f32.mrf.mxu1  ;;  %v4710_v4 = vadd.f32 %v4709_v0, %v4708_v45  ;;  %v2409_v45 = vpop.f32.mrf.mxu2  ;;  %v5471_v0 = vor.u32 %v6510_v58, %v5470_v57  ;;  %v5888_v58 = vld [vmem:[%s6805_s28 + $0x4d8] sm:$0xf0] }
 0x1a0   : > { %v2151_v5 = vpop.f32.mrf.mxu0 }
 0x1a1   : > { %v2801_v7 = vadd.f32 %v2800_v28, %v2151_v5  ;;  %v3055_v28 = vpop.f32.mrf.mxu3 }
 0x1a2   : > { %v7158_v29 = vadd.f32 %v3055_v28, %v2406_v26  ;;  %v6513_v26 = vld [vmem:[%s6805_s28 + $0x1b4] sm:$0xf] }
 0x1a3   : > { %v3394_v11 = vpack.c.bf16 %v2801_v7, %v2801_v7  ;;  %v3938_v12 = vsel %vm3876_vm4, %v2801_v7, 0.0  ;;  %v4425_v13 = vmul.f32 %v2801_v7, %v2801_v7  ;;  %v5878_v7 = vld [vmem:[%s6805_s28 + $0x4c0] sm:$0xf] }
 0x1a4   : > { %v3939_v14 = vadd.f32 %v3938_v12, %v3937_v60  ;;  %v3496_v37 = vpack.c.bf16 %v7158_v29, %v7158_v29  ;;  %v6611_v12 = vld [vmem:[%s6805_s28 + $0x4c4] sm:$0xf] }
 0x1a5   : > { %3651 = vst.msk [vmem:[%s6874_s17 + $0x7c] sm:$0xf] %vm3619_vm3, %v3394_v11  ;;  %v4711_v19 = vsel %vm3876_vm4, %v4425_v13, 0.0  ;;  %v6612_v11 = vld [vmem:[%s6805_s28 + $0x4c4] sm:$0xf0] }
 0x1a6   : > { %v2808_v20 = vpop.f32.mrf.mxu1  ;;  %v4712_v21 = vadd.f32 %v4711_v19, %v4710_v4  ;;  %3753 = vst.msk [vmem:[%s6874_s17 + $0x214] sm:$0xf] %vm3619_vm3, %v3496_v37  ;;  %v2411_v3 = vpop.f32.mrf.mxu2  ;;  %v5879_v19 = vor.u32 %v6612_v11, %v5878_v7  ;;  %v5496_v7 = vld [vmem:[%s6805_s28 + $0x1c8] sm:$0xf0] }
 0x1a8   : > { %v2154_v24 = vpop.f32.mrf.mxu0  ;;  %2453 = vmatmul.bf16.gmra.mxu2 %v5879_v19 }
 0x1a9   : > { %6353 = vmatmul.msk.bf16.gmra.mxu1 %vm1673_vm2, %v5475_v16  ;;  %v2804_v27 = vadd.f32 %v2803_v44, %v2154_v24  ;;  %v3058_v50 = vpop.f32.mrf.mxu3  ;;  %v5880_v16 = vld [vmem:[%s6805_s28 + $0x4c8] sm:$0xf0] }
 0x1aa   : > { %v7181_v62 = vadd.f32 %v3058_v50, %v2409_v45 }
 0x1ab   : > { %v3395_v31 = vpack.c.bf16 %v2804_v27, %v2804_v27  ;;  %v3940_v32 = vsel %vm3876_vm4, %v2804_v27, 0.0  ;;  %v4426_v33 = vmul.f32 %v2804_v27, %v2804_v27  ;;  %2193 = vmatmul.bf16.gmra.mxu0 %v5463_v23  ;;  %v5488_v27 = vld [vmem:[%s6805_s28 + $0x1b8] sm:$0xf0] }
 0x1ac   : > { %v3941_v36 = vadd.f32 %v3940_v32, %v3939_v14  ;;  %v3497_v2 = vpack.c.bf16 %v7181_v62, %v7181_v62  ;;  %v5491_v34 = vor.u32 %v6513_v26, %v5488_v27 }
 0x1ad   : > { %3652 = vst.msk [vmem:[%s6874_s17 + $0x80] sm:$0xf] %vm3619_vm3, %v3395_v31  ;;  %v4713_v39 = vsel %vm3876_vm4, %v4426_v33, 0.0 }
 0x1ae   : > { %v2810_v40 = vpop.f32.mrf.mxu1  ;;  %v4714_v43 = vadd.f32 %v4713_v39, %v4712_v21  ;;  %3754 = vst.msk [vmem:[%s6874_s17 + $0x218] sm:$0xf] %vm3619_vm3, %v3497_v2  ;;  %v2414_v24 = vpop.f32.mrf.mxu2 }
 0x1b0   : > { %v2156_v44 = vpop.f32.mrf.mxu0 }
 0x1b1   : > { %v2806_v47 = vadd.f32 %v2805_v1, %v2156_v44  ;;  %v3060_v5 = vpop.f32.mrf.mxu3 }
 0x1b2   : > { %v7188_v6 = vadd.f32 %v3060_v5, %v2411_v3  ;;  %v6515_v5 = vld [vmem:[%s6805_s28 + $0x1c4] sm:$0xf] }
 0x1b3   : > { %v3396_v51 = vpack.c.bf16 %v2806_v47, %v2806_v47  ;;  %v3942_v52 = vsel %vm3876_vm4, %v2806_v47, 0.0  ;;  %v4427_v54 = vmul.f32 %v2806_v47, %v2806_v47 }
 0x1b4   : > { %v3943_v55 = vadd.f32 %v3942_v52, %v3941_v36  ;;  %v3498_v14 = vpack.c.bf16 %v7188_v6, %v7188_v6  ;;  %v6512_v36 = vld [vmem:[%s6805_s28 + $0x1a4] sm:$0xf0] }
 0x1b5   : > { %3653 = vst.msk [vmem:[%s6874_s17 + $0x84] sm:$0xf] %vm3619_vm3, %v3396_v51  ;;  %v4715_v59 = vsel %vm3876_vm4, %v4427_v54, 0.0  ;;  %v5479_v41 = vor.u32 %v6512_v36, %v5478_v35  ;;  %v6614_v54 = vld [vmem:[%s6805_s28 + $0x4d4] sm:$0xf0] }
 0x1b6   : > { %v2813_v60 = vpop.f32.mrf.mxu1  ;;  %v4716_v61 = vadd.f32 %v4715_v59, %v4714_v43  ;;  %3755 = vst.msk [vmem:[%s6874_s17 + $0x21c] sm:$0xf] %vm3619_vm3, %v3498_v14  ;;  %v2416_v44 = vpop.f32.mrf.mxu2  ;;  %v5486_v14 = vld [vmem:[%s6805_s28 + $0x1b0] sm:$0xf]  ;;  %v6615_v35 = vld [vmem:[%s6805_s28 + $0x4e4] sm:$0xf] }
 0x1b8   : > { %v2159_v1 = vpop.f32.mrf.mxu0 }
 0x1b9   : > { %6354 = vmatmul.msk.bf16.gmra.mxu1 %vm1673_vm2, %v5483_v56  ;;  %v2809_v4 = vadd.f32 %v2808_v20, %v2159_v1  ;;  %v5883_v20 = vor.u32 %v6611_v12, %v5880_v16  ;;  %v3063_v28 = vpop.f32.mrf.mxu3  ;;  %v6514_v16 = vld [vmem:[%s6805_s28 + $0x1b4] sm:$0xf0] }
 0x1bb   : > { %v3397_v8 = vpack.c.bf16 %v2809_v4, %v2809_v4  ;;  %v3944_v9 = vsel %vm3876_vm4, %v2809_v4, 0.0  ;;  %v4428_v10 = vmul.f32 %v2809_v4, %v2809_v4  ;;  %2198 = vmatmul.bf16.gmra.mxu0 %v5471_v0  ;;  %6404 = vmatmul.msk.bf16.gmra.mxu3 %vm1673_vm2, %v5883_v20 }
 0x1bc   : > { %v3945_v13 = vadd.f32 %v3944_v9, %v3943_v55  ;;  %v6613_v55 = vld [vmem:[%s6805_s28 + $0x4d4] sm:$0xf] }
 0x1bd   : > { %3654 = vst.msk [vmem:[%s6874_s17 + $0x88] sm:$0xf] %vm3619_vm3, %v3397_v8  ;;  %v4717_v17 = vsel %vm3876_vm4, %v4428_v10, 0.0  ;;  %v5891_v0 = vor.u32 %v6613_v55, %v5888_v58 }
 0x1be   : > { %v2815_v18 = vpop.f32.mrf.mxu1  ;;  %v4718_v21 = vadd.f32 %v4717_v17, %v4716_v61  ;;  %v5887_v61 = vor.u32 %v6614_v54, %v5886_v49  ;;  %v2419_v3 = vpop.f32.mrf.mxu2 }
 0x1c0   : > { %v2161_v23 = vpop.f32.mrf.mxu0  ;;  %2458 = vmatmul.bf16.gmra.mxu2 %v5887_v61  ;;  %v6516_v61 = vld [vmem:[%s6805_s28 + $0x1c4] sm:$0xf0] }
 0x1c1   : > { %v2811_v25 = vadd.f32 %v2810_v40, %v2161_v23  ;;  %v7211_v40 = vadd.f32 %v3063_v28, %v2414_v24  ;;  %v3065_v47 = vpop.f32.mrf.mxu3 }
 0x1c2   : > { %v7218_v48 = vadd.f32 %v3065_v47, %v2416_v44 }
 0x1c3   : > { %v3398_v30 = vpack.c.bf16 %v2811_v25, %v2811_v25  ;;  %v3946_v31 = vsel %vm3876_vm4, %v2811_v25, 0.0  ;;  %v4429_v32 = vmul.f32 %v2811_v25, %v2811_v25  ;;  %v3499_v43 = vpack.c.bf16 %v7211_v40, %v7211_v40 }
 0x1c4   : > { %v3947_v33 = vadd.f32 %v3946_v31, %v3945_v13  ;;  %v3500_v57 = vpack.c.bf16 %v7218_v48, %v7218_v48  ;;  %v5499_v13 = vor.u32 %v6515_v5, %v5496_v7 }
 0x1c5   : > { %3655 = vst.msk [vmem:[%s6874_s17 + $0x8c] sm:$0xf] %vm3619_vm3, %v3398_v30  ;;  %v4719_v37 = vsel %vm3876_vm4, %v4429_v32, 0.0  ;;  %v5894_v30 = vld [vmem:[%s6805_s28 + $0x4e0] sm:$0xf] }
 0x1c6   : > { %v2818_v38 = vpop.f32.mrf.mxu1  ;;  %v4720_v39 = vadd.f32 %v4719_v37, %v4718_v21  ;;  %3756 = vst.msk [vmem:[%s6874_s17 + $0x220] sm:$0xf] %vm3619_vm3, %v3499_v43  ;;  %v5487_v21 = vor.u32 %v6514_v16, %v5486_v14  ;;  %v2421_v25 = vpop.f32.mrf.mxu2  ;;  %v6618_v16 = vld [vmem:[%s6805_s28 + $0x4f4] sm:$0xf0] }
 0x1c7   : > { %3757 = vst.msk [vmem:[%s6874_s17 + $0x224] sm:$0xf] %vm3619_vm3, %v3500_v57 }
 0x1c8   : > { %v2164_v42 = vpop.f32.mrf.mxu0 }
 0x1c9   : > { %6355 = vmatmul.msk.bf16.gmra.mxu1 %vm1673_vm2, %v5491_v34  ;;  %v2814_v45 = vadd.f32 %v2813_v60, %v2164_v42  ;;  %v3068_v8 = vpop.f32.mrf.mxu3  ;;  %v6616_v34 = vld [vmem:[%s6805_s28 + $0x4e4] sm:$0xf0] }
 0x1ca   : > { %v5895_v42 = vor.u32 %v6616_v34, %v5894_v30  ;;  %v5512_v34 = vld [vmem:[%s6805_s28 + $0x1e8] sm:$0xf0] }
 0x1cb   : > { %v3399_v50 = vpack.c.bf16 %v2814_v45, %v2814_v45  ;;  %v3948_v51 = vsel %vm3876_vm4, %v2814_v45, 0.0  ;;  %v4430_v52 = vmul.f32 %v2814_v45, %v2814_v45  ;;  %2203 = vmatmul.bf16.gmra.mxu0 %v5479_v41  ;;  %6405 = vmatmul.msk.bf16.gmra.mxu3 %vm1673_vm2, %v5891_v0 }
 0x1cc   : > { %v3949_v56 = vadd.f32 %v3948_v51, %v3947_v33  ;;  %v5504_v51 = vld [vmem:[%s6805_s28 + $0x1d8] sm:$0xf0] }
 0x1cd   : > { %3656 = vst.msk [vmem:[%s6874_s17 + $0x90] sm:$0xf] %vm3619_vm3, %v3399_v50  ;;  %v4721_v59 = vsel %vm3876_vm4, %v4430_v52, 0.0  ;;  %v6517_v50 = vld [vmem:[%s6805_s28 + $0x1d4] sm:$0xf] }
 0x1ce   : > { %v2820_v60 = vpop.f32.mrf.mxu1  ;;  %v4722_v1 = vadd.f32 %v4721_v59, %v4720_v39  ;;  %v2424_v47 = vpop.f32.mrf.mxu2  ;;  %v5507_v58 = vor.u32 %v6517_v50, %v5504_v51  ;;  %v5494_v59 = vld [vmem:[%s6805_s28 + $0x1c0] sm:$0xf] }
 0x1d0   : > { %v2166_v2 = vpop.f32.mrf.mxu0  ;;  %2463 = vmatmul.bf16.gmra.mxu2 %v5895_v42 }
 0x1d1   : > { %v2816_v4 = vadd.f32 %v2815_v18, %v2166_v2  ;;  %v7241_v18 = vadd.f32 %v3068_v8, %v2419_v3  ;;  %v3070_v27 = vpop.f32.mrf.mxu3  ;;  %v5495_v3 = vor.u32 %v6516_v61, %v5494_v59 }
 0x1d2   : > { %v7248_v28 = vadd.f32 %v3070_v27, %v2421_v25 }
 0x1d3   : > { %v3400_v9 = vpack.c.bf16 %v2816_v4, %v2816_v4  ;;  %v3950_v10 = vsel %vm3876_vm4, %v2816_v4, 0.0  ;;  %v4431_v11 = vmul.f32 %v2816_v4, %v2816_v4  ;;  %v3501_v24 = vpack.c.bf16 %v7241_v18, %v7241_v18 }
 0x1d4   : > { %v3951_v12 = vadd.f32 %v3950_v10, %v3949_v56  ;;  %v3502_v37 = vpack.c.bf16 %v7248_v28, %v7248_v28 }
 0x1d5   : > { %3657 = vst.msk [vmem:[%s6874_s17 + $0x94] sm:$0xf] %vm3619_vm3, %v3400_v9  ;;  %v4723_v17 = vsel %vm3876_vm4, %v4431_v11, 0.0  ;;  %v5902_v11 = vld [vmem:[%s6805_s28 + $0x4f0] sm:$0xf] }
 0x1d6   : > { %v2823_v19 = vpop.f32.mrf.mxu1  ;;  %v4724_v20 = vadd.f32 %v4723_v17, %v4722_v1  ;;  %3758 = vst.msk [vmem:[%s6874_s17 + $0x228] sm:$0xf] %vm3619_vm3, %v3501_v24  ;;  %v2426_v7 = vpop.f32.mrf.mxu2  ;;  %v6617_v17 = vld [vmem:[%s6805_s28 + $0x4f4] sm:$0xf]  ;;  %v5903_v25 = vor.u32 %v6618_v16, %v5902_v11 }
 0x1d7   : > { %3759 = vst.msk [vmem:[%s6874_s17 + $0x22c] sm:$0xf] %vm3619_vm3, %v3502_v37 }
 0x1d8   : > { %v2169_v23 = vpop.f32.mrf.mxu0 }
 0x1d9   : > { %6356 = vmatmul.msk.bf16.gmra.mxu1 %vm1673_vm2, %v5499_v13  ;;  %v2819_v26 = vadd.f32 %v2818_v38, %v2169_v23  ;;  %v5896_v38 = vld [vmem:[%s6805_s28 + $0x4e8] sm:$0xf0]  ;;  %v3073_v52 = vpop.f32.mrf.mxu3 }
 0x1da   : > { %v5899_v43 = vor.u32 %v6615_v35, %v5896_v38 }
 0x1db   : > { %v3401_v31 = vpack.c.bf16 %v2819_v26, %v2819_v26  ;;  %v3952_v32 = vsel %vm3876_vm4, %v2819_v26, 0.0  ;;  %v4432_v33 = vmul.f32 %v2819_v26, %v2819_v26  ;;  %2208 = vmatmul.bf16.gmra.mxu0 %v5487_v21  ;;  %v5904_v21 = vld [vmem:[%s6805_s28 + $0x4f8] sm:$0xf0] }
 0x1dc   : > { %v3953_v36 = vadd.f32 %v3952_v32, %v3951_v12  ;;  %6406 = vmatmul.msk.bf16.gmra.mxu3 %vm1673_vm2, %v5899_v43  ;;  %v5907_v26 = vor.u32 %v6617_v17, %v5904_v21  ;;  %v5502_v43 = vld [vmem:[%s6805_s28 + $0x1d0] sm:$0xf]  ;;  %v6521_v17 = vld [vmem:[%s6805_s28 + $0x1f4] sm:$0xf] }
 0x1dd   : > { %3658 = vst.msk [vmem:[%s6874_s17 + $0x98] sm:$0xf] %vm3619_vm3, %v3401_v31  ;;  %v4725_v39 = vsel %vm3876_vm4, %v4432_v33, 0.0  ;;  %v6519_v33 = vld [vmem:[%s6805_s28 + $0x1e4] sm:$0xf] }
 0x1de   : > { %v2825_v41 = vpop.f32.mrf.mxu1  ;;  %v4726_v44 = vadd.f32 %v4725_v39, %v4724_v20  ;;  %v2429_v31 = vpop.f32.mrf.mxu2  ;;  %v5515_v42 = vor.u32 %v6519_v33, %v5512_v34 }
 0x1e0   : > { %v2171_v45 = vpop.f32.mrf.mxu0  ;;  %2468 = vmatmul.bf16.gmra.mxu2 %v5903_v25 }
 0x1e1   : > { %v2821_v49 = vadd.f32 %v2820_v60, %v2171_v45  ;;  %v7271_v60 = vadd.f32 %v3073_v52, %v2424_v47  ;;  %v3075_v9 = vpop.f32.mrf.mxu3 }
 0x1e2   : > { %v7278_v10 = vadd.f32 %v3075_v9, %v2426_v7 }
 0x1e3   : > { %v3402_v54 = vpack.c.bf16 %v2821_v49, %v2821_v49  ;;  %v3954_v55 = vsel %vm3876_vm4, %v2821_v49, 0.0  ;;  %v4433_v56 = vmul.f32 %v2821_v49, %v2821_v49  ;;  %v3503_v5 = vpack.c.bf16 %v7271_v60, %v7271_v60 }
 0x1e4   : > { %v3955_v57 = vadd.f32 %v3954_v55, %v3953_v36 }
 0x1e5   : > { %3659 = vst.msk [vmem:[%s6874_s17 + $0x9c] sm:$0xf] %vm3619_vm3, %v3402_v54  ;;  %v4727_v0 = vsel %vm3876_vm4, %v4433_v56, 0.0 }
 0x1e6   : > { %v2828_v1 = vpop.f32.mrf.mxu1  ;;  %v4728_v2 = vadd.f32 %v4727_v0, %v4726_v44  ;;  %3760 = vst.msk [vmem:[%s6874_s17 + $0x230] sm:$0xf] %vm3619_vm3, %v3503_v5  ;;  %v6518_v44 = vld [vmem:[%s6805_s28 + $0x1d4] sm:$0xf0]  ;;  %v2431_v54 = vpop.f32.mrf.mxu2  ;;  %v5912_v5 = vld [vmem:[%s6805_s28 + $0x508] sm:$0xf0] }
 0x1e7   : > { %v5503_v50 = vor.u32 %v6518_v44, %v5502_v43  ;;  %v5918_v44 = vld [vmem:[%s6805_s28 + $0x510] sm:$0xf] }
 0x1e8   : > { %v2174_v4 = vpop.f32.mrf.mxu0 }
 0x1e9   : > { %6357 = vmatmul.msk.bf16.gmra.mxu1 %vm1673_vm2, %v5507_v58  ;;  %v2824_v8 = vadd.f32 %v2823_v19, %v2174_v4  ;;  %v3504_v19 = vpack.c.bf16 %v7278_v10, %v7278_v10  ;;  %v3078_v35 = vpop.f32.mrf.mxu3  ;;  %v5910_v58 = vld [vmem:[%s6805_s28 + $0x500] sm:$0xf] }
 0x1eb   : > { %v3403_v12 = vpack.c.bf16 %v2824_v8, %v2824_v8  ;;  %v3956_v13 = vsel %vm3876_vm4, %v2824_v8, 0.0  ;;  %v4434_v14 = vmul.f32 %v2824_v8, %v2824_v8  ;;  %2213 = vmatmul.bf16.gmra.mxu0 %v5495_v3  ;;  %3761 = vst.msk [vmem:[%s6874_s17 + $0x234] sm:$0xf] %vm3619_vm3, %v3504_v19  ;;  %v6619_v3 = vld [vmem:[%s6805_s28 + $0x504] sm:$0xf] }
 0x1ec   : > { %v3957_v20 = vadd.f32 %v3956_v13, %v3955_v57  ;;  %6407 = vmatmul.msk.bf16.gmra.mxu3 %vm1673_vm2, %v5907_v26  ;;  %v5915_v11 = vor.u32 %v6619_v3, %v5912_v5  ;;  %v5528_v5 = vld [vmem:[%s6805_s28 + $0x208] sm:$0xf0] }
 0x1ed   : > { %3660 = vst.msk [vmem:[%s6874_s17 + $0xa0] sm:$0xf] %vm3619_vm3, %v3403_v12  ;;  %v4729_v23 = vsel %vm3876_vm4, %v4434_v14, 0.0 }
 0x1ee   : > { %v2830_v24 = vpop.f32.mrf.mxu1  ;;  %v4730_v27 = vadd.f32 %v4729_v23, %v4728_v2  ;;  %v6620_v2 = vld [vmem:[%s6805_s28 + $0x504] sm:$0xf0]  ;;  %v2434_v14 = vpop.f32.mrf.mxu2 }
 0x1ef   : > { %v5911_v9 = vor.u32 %v6620_v2, %v5910_v58 }
 0x1f0   : > { %v2176_v30 = vpop.f32.mrf.mxu0 }
 0x1f1   : > { %v2826_v32 = vadd.f32 %v2825_v41, %v2176_v30  ;;  %v7301_v41 = vadd.f32 %v3078_v35, %v2429_v31  ;;  %v3080_v56 = vpop.f32.mrf.mxu3  ;;  %2473 = vmatmul.bf16.gmra.mxu2 %v5911_v9  ;;  %v5510_v30 = vld [vmem:[%s6805_s28 + $0x1e0] sm:$0xf]  ;;  %v6520_v31 = vld [vmem:[%s6805_s28 + $0x1e4] sm:$0xf0] }
 0x1f2   : > { %v7308_v57 = vadd.f32 %v3080_v56, %v2431_v54  ;;  %v5511_v35 = vor.u32 %v6520_v31, %v5510_v30 }
 0x1f3   : > { %v3404_v36 = vpack.c.bf16 %v2826_v32, %v2826_v32  ;;  %v3958_v37 = vsel %vm3876_vm4, %v2826_v32, 0.0  ;;  %v4435_v38 = vmul.f32 %v2826_v32, %v2826_v32  ;;  %v3505_v52 = vpack.c.bf16 %v7301_v41, %v7301_v41 }
 0x1f4   : > { %v3959_v39 = vadd.f32 %v3958_v37, %v3957_v20  ;;  %v5520_v20 = vld [vmem:[%s6805_s28 + $0x1f8] sm:$0xf0] }
 0x1f5   : > { %3661 = vst.msk [vmem:[%s6874_s17 + $0xa4] sm:$0xf] %vm3619_vm3, %v3404_v36  ;;  %v4731_v45 = vsel %vm3876_vm4, %v4435_v38, 0.0 }
 0x1f6   : > { %v2833_v47 = vpop.f32.mrf.mxu1  ;;  %v4732_v49 = vadd.f32 %v4731_v45, %v4730_v27  ;;  %3762 = vst.msk [vmem:[%s6874_s17 + $0x238] sm:$0xf] %vm3619_vm3, %v3505_v52  ;;  %v5523_v27 = vor.u32 %v6521_v17, %v5520_v20  ;;  %v2436_v38 = vpop.f32.mrf.mxu2  ;;  %v6621_v52 = vld [vmem:[%s6805_s28 + $0x514] sm:$0xf]  ;;  %v6522_v17 = vld [vmem:[%s6805_s28 + $0x1f4] sm:$0xf0] }
 0x1f8   : > { %v2179_v51 = vpop.f32.mrf.mxu0 }
 0x1f9   : > { %6358 = vmatmul.msk.bf16.gmra.mxu1 %vm1673_vm2, %v5515_v42  ;;  %v2829_v55 = vadd.f32 %v2828_v1, %v2179_v51  ;;  %v3506_v1 = vpack.c.bf16 %v7308_v57, %v7308_v57  ;;  %v3083_v19 = vpop.f32.mrf.mxu3  ;;  %v6622_v51 = vld [vmem:[%s6805_s28 + $0x514] sm:$0xf0] }
 0x1fb   : > { %v3405_v59 = vpack.c.bf16 %v2829_v55, %v2829_v55  ;;  %v3960_v61 = vsel %vm3876_vm4, %v2829_v55, 0.0  ;;  %v4436_v0 = vmul.f32 %v2829_v55, %v2829_v55  ;;  %2218 = vmatmul.bf16.gmra.mxu0 %v5503_v50  ;;  %3763 = vst.msk [vmem:[%s6874_s17 + $0x23c] sm:$0xf] %vm3619_vm3, %v3506_v1  ;;  %v5920_v55 = vld [vmem:[%s6805_s28 + $0x518] sm:$0xf0] }
 0x1fc   : > { %v3961_v4 = vadd.f32 %v3960_v61, %v3959_v39  ;;  %6408 = vmatmul.msk.bf16.gmra.mxu3 %vm1673_vm2, %v5915_v11  ;;  %v5923_v61 = vor.u32 %v6621_v52, %v5920_v55  ;;  %v6523_v1 = vld [vmem:[%s6805_s28 + $0x204] sm:$0xf]  ;;  %v6525_v55 = vld [vmem:[%s6805_s28 + $0x214] sm:$0xf] }
 0x1fd   : > { %3662 = vst.msk [vmem:[%s6874_s17 + $0xa8] sm:$0xf] %vm3619_vm3, %v3405_v59  ;;  %v4733_v7 = vsel %vm3876_vm4, %v4436_v0, 0.0  ;;  %v5919_v59 = vor.u32 %v6622_v51, %v5918_v44  ;;  %v5928_v44 = vld [vmem:[%s6805_s28 + $0x528] sm:$0xf0] }
 0x1fe   : > { %v2835_v8 = vpop.f32.mrf.mxu1  ;;  %v4734_v12 = vadd.f32 %v4733_v7, %v4732_v49  ;;  %v2439_v3 = vpop.f32.mrf.mxu2 }
 0x200   : > { %v2181_v13 = vpop.f32.mrf.mxu0 }
 0x201   : > { %v2831_v16 = vadd.f32 %v2830_v24, %v2181_v13  ;;  %v7331_v24 = vadd.f32 %v3083_v19, %v2434_v14  ;;  %v3085_v42 = vpop.f32.mrf.mxu3  ;;  %2478 = vmatmul.bf16.gmra.mxu2 %v5919_v59  ;;  %v5531_v14 = vor.u32 %v6523_v1, %v5528_v5  ;;  %v5526_v5 = vld [vmem:[%s6805_s28 + $0x200] sm:$0xf] }
 0x202   : > { %v7338_v43 = vadd.f32 %v3085_v42, %v2436_v38  ;;  %v6624_v38 = vld [vmem:[%s6805_s28 + $0x524] sm:$0xf0] }
 0x203   : > { %v3406_v21 = vpack.c.bf16 %v2831_v16, %v2831_v16  ;;  %v3962_v23 = vsel %vm3876_vm4, %v2831_v16, 0.0  ;;  %v4437_v25 = vmul.f32 %v2831_v16, %v2831_v16  ;;  %v3507_v37 = vpack.c.bf16 %v7331_v24, %v7331_v24  ;;  %v5518_v16 = vld [vmem:[%s6805_s28 + $0x1f0] sm:$0xf] }
 0x204   : > { %v3963_v26 = vadd.f32 %v3962_v23, %v3961_v4  ;;  %v5519_v23 = vor.u32 %v6522_v17, %v5518_v16 }
 0x205   : > { %3663 = vst.msk [vmem:[%s6874_s17 + $0xac] sm:$0xf] %vm3619_vm3, %v3406_v21  ;;  %v4735_v32 = vsel %vm3876_vm4, %v4437_v25, 0.0 }
 0x206   : > { %v2838_v33 = vpop.f32.mrf.mxu1  ;;  %v4736_v34 = vadd.f32 %v4735_v32, %v4734_v12  ;;  %3764 = vst.msk [vmem:[%s6874_s17 + $0x240] sm:$0xf] %vm3619_vm3, %v3507_v37 }
 0x208   : > { %v2184_v36 = vpop.f32.mrf.mxu0 }
 0x209   : > { %6359 = vmatmul.msk.bf16.gmra.mxu1 %vm1673_vm2, %v5523_v27  ;;  %v2834_v39 = vadd.f32 %v2833_v47, %v2184_v36  ;;  %v3508_v47 = vpack.c.bf16 %v7338_v43, %v7338_v43  ;;  %v3088_v7 = vpop.f32.mrf.mxu3  ;;  %v2441_v27 = vpop.f32.mrf.mxu2 }
 0x20b   : > { %v3407_v45 = vpack.c.bf16 %v2834_v39, %v2834_v39  ;;  %v3964_v49 = vsel %vm3876_vm4, %v2834_v39, 0.0  ;;  %v4438_v50 = vmul.f32 %v2834_v39, %v2834_v39  ;;  %2223 = vmatmul.bf16.gmra.mxu0 %v5511_v35  ;;  %3765 = vst.msk [vmem:[%s6874_s17 + $0x244] sm:$0xf] %vm3619_vm3, %v3508_v47  ;;  %v6623_v39 = vld [vmem:[%s6805_s28 + $0x524] sm:$0xf] }
 0x20c   : > { %v3965_v54 = vadd.f32 %v3964_v49, %v3963_v26  ;;  %6409 = vmatmul.msk.bf16.gmra.mxu3 %vm1673_vm2, %v5923_v61  ;;  %v5931_v51 = vor.u32 %v6623_v39, %v5928_v44 }
 0x20d   : > { %3664 = vst.msk [vmem:[%s6874_s17 + $0xb0] sm:$0xf] %vm3619_vm3, %v3407_v45  ;;  %v4737_v56 = vsel %vm3876_vm4, %v4438_v50, 0.0 }
 0x20e   : > { %v2840_v58 = vpop.f32.mrf.mxu1  ;;  %v4738_v0 = vadd.f32 %v4737_v56, %v4736_v34  ;;  %v5926_v34 = vld [vmem:[%s6805_s28 + $0x520] sm:$0xf]  ;;  %v5536_v56 = vld [vmem:[%s6805_s28 + $0x218] sm:$0xf0] }
 0x20f   : > { %v5927_v50 = vor.u32 %v6624_v38, %v5926_v34  ;;  %v5539_v1 = vor.u32 %v6525_v55, %v5536_v56  ;;  %v6625_v34 = vld [vmem:[%s6805_s28 + $0x534] sm:$0xf] }
 0x210   : > { %v2186_v2 = vpop.f32.mrf.mxu0 }
 0x211   : > { %v2836_v4 = vadd.f32 %v2835_v8, %v2186_v2  ;;  %v7361_v8 = vadd.f32 %v3088_v7, %v2439_v3  ;;  %v3090_v31 = vpop.f32.mrf.mxu3  ;;  %2483 = vmatmul.bf16.gmra.mxu2 %v5927_v50  ;;  %v2444_v59 = vpop.f32.mrf.mxu2  ;;  %v6524_v7 = vld [vmem:[%s6805_s28 + $0x204] sm:$0xf0]  ;;  %v6527_v50 = vld [vmem:[%s6805_s28 + $0x224] sm:$0xf] }
 0x212   : > { %v7368_v32 = vadd.f32 %v3090_v31, %v2441_v27  ;;  %v6626_v31 = vld [vmem:[%s6805_s28 + $0x534] sm:$0xf0] }
 0x213   : > { %v3408_v9 = vpack.c.bf16 %v2836_v4, %v2836_v4  ;;  %v3966_v11 = vsel %vm3876_vm4, %v2836_v4, 0.0  ;;  %v4439_v12 = vmul.f32 %v2836_v4, %v2836_v4  ;;  %v3509_v26 = vpack.c.bf16 %v7361_v8, %v7361_v8 }
 0x214   : > { %v3967_v13 = vadd.f32 %v3966_v11, %v3965_v54 }
 0x215   : > { %3665 = vst.msk [vmem:[%s6874_s17 + $0xb4] sm:$0xf] %vm3619_vm3, %v3408_v9  ;;  %v4739_v20 = vsel %vm3876_vm4, %v4439_v12, 0.0 }
 0x216   : > { %v2843_v19 = vpop.f32.mrf.mxu1  ;;  %v4740_v21 = vadd.f32 %v4739_v20, %v4738_v0  ;;  %3766 = vst.msk [vmem:[%s6874_s17 + $0x248] sm:$0xf] %vm3619_vm3, %v3509_v26 }
 0x218   : > { %v2189_v25 = vpop.f32.mrf.mxu0 }
 0x219   : > { %6360 = vmatmul.msk.bf16.gmra.mxu1 %vm1673_vm2, %v5531_v14  ;;  %v2839_v30 = vadd.f32 %v2838_v33, %v2189_v25  ;;  %v3510_v33 = vpack.c.bf16 %v7368_v32, %v7368_v32  ;;  %v3093_v61 = vpop.f32.mrf.mxu3  ;;  %v2446_v20 = vpop.f32.mrf.mxu2 }
 0x21a   : > { %v7391_v12 = vadd.f32 %v3093_v61, %v2444_v59 }
 0x21b   : > { %v3409_v35 = vpack.c.bf16 %v2839_v30, %v2839_v30  ;;  %v3968_v36 = vsel %vm3876_vm4, %v2839_v30, 0.0  ;;  %v4440_v37 = vmul.f32 %v2839_v30, %v2839_v30  ;;  %2228 = vmatmul.bf16.gmra.mxu0 %v5519_v23  ;;  %3767 = vst.msk [vmem:[%s6874_s17 + $0x24c] sm:$0xf] %vm3619_vm3, %v3510_v33  ;;  %v5934_v23 = vld [vmem:[%s6805_s28 + $0x530] sm:$0xf] }
 0x21c   : > { %v3969_v42 = vadd.f32 %v3968_v36, %v3967_v13  ;;  %6410 = vmatmul.msk.bf16.gmra.mxu3 %vm1673_vm2, %v5931_v51  ;;  %v5527_v13 = vor.u32 %v6524_v7, %v5526_v5  ;;  %v3511_v16 = vpack.c.bf16 %v7391_v12, %v7391_v12  ;;  %v5935_v36 = vor.u32 %v6626_v31, %v5934_v23  ;;  %v5544_v51 = vld [vmem:[%s6805_s28 + $0x228] sm:$0xf0] }
 0x21d   : > { %3666 = vst.msk [vmem:[%s6874_s17 + $0xb8] sm:$0xf] %vm3619_vm3, %v3409_v35  ;;  %v4741_v45 = vsel %vm3876_vm4, %v4440_v37, 0.0  ;;  %v5547_v61 = vor.u32 %v6527_v50, %v5544_v51 }
 0x21e   : > { %v2845_v49 = vpop.f32.mrf.mxu1  ;;  %v4742_v52 = vadd.f32 %v4741_v45, %v4740_v21  ;;  %3768 = vst.msk [vmem:[%s6874_s17 + $0x250] sm:$0xf] %vm3619_vm3, %v3511_v16  ;;  %v5942_v16 = vld [vmem:[%s6805_s28 + $0x540] sm:$0xf] }
 0x220   : > { %v2191_v54 = vpop.f32.mrf.mxu0 }
 0x221   : > { %v2841_v47 = vadd.f32 %v2840_v58, %v2191_v54  ;;  %v3095_v21 = vpop.f32.mrf.mxu3  ;;  %2488 = vmatmul.bf16.gmra.mxu2 %v5935_v36 }
 0x222   : > { %v7400_v30 = vadd.f32 %v3095_v21, %v2446_v20 }
 0x223   : > { %v3410_v0 = vpack.c.bf16 %v2841_v47, %v2841_v47  ;;  %v3970_v2 = vsel %vm3876_vm4, %v2841_v47, 0.0  ;;  %v4441_v3 = vmul.f32 %v2841_v47, %v2841_v47 }
 0x224   : > { %v3971_v4 = vadd.f32 %v3970_v2, %v3969_v42  ;;  %v3512_v39 = vpack.c.bf16 %v7400_v30, %v7400_v30  ;;  %v6526_v2 = vld [vmem:[%s6805_s28 + $0x214] sm:$0xf0] }
 0x225   : > { %3667 = vst.msk [vmem:[%s6874_s17 + $0xbc] sm:$0xf] %vm3619_vm3, %v3410_v0  ;;  %v4743_v9 = vsel %vm3876_vm4, %v4441_v3, 0.0  ;;  %v5534_v0 = vld [vmem:[%s6805_s28 + $0x210] sm:$0xf] }
 0x226   : > { %v2848_v11 = vpop.f32.mrf.mxu1  ;;  %v4744_v58 = vadd.f32 %v4743_v9, %v4742_v52  ;;  %3769 = vst.msk [vmem:[%s6874_s17 + $0x254] sm:$0xf] %vm3619_vm3, %v3512_v39  ;;  %v2449_v52 = vpop.f32.mrf.mxu2  ;;  %v5535_v5 = vor.u32 %v6526_v2, %v5534_v0 }
 0x228   : > { %v2194_v14 = vpop.f32.mrf.mxu0 }
 0x229   : > { %6361 = vmatmul.msk.bf16.gmra.mxu1 %vm1673_vm2, %v5539_v1  ;;  %v2844_v17 = vadd.f32 %v2843_v19, %v2194_v14  ;;  %v5936_v19 = vld [vmem:[%s6805_s28 + $0x538] sm:$0xf0]  ;;  %v3098_v54 = vpop.f32.mrf.mxu3 }
 0x22a   : > { %v5939_v33 = vor.u32 %v6625_v34, %v5936_v19  ;;  %v7421_v1 = vadd.f32 %v3098_v54, %v2449_v52 }
 0x22b   : > { %v3411_v25 = vpack.c.bf16 %v2844_v17, %v2844_v17  ;;  %v3972_v26 = vsel %vm3876_vm4, %v2844_v17, 0.0  ;;  %v4442_v27 = vmul.f32 %v2844_v17, %v2844_v17  ;;  %2233 = vmatmul.bf16.gmra.mxu0 %v5527_v13 }
 0x22c   : > { %v3973_v35 = vadd.f32 %v3972_v26, %v3971_v4  ;;  %6411 = vmatmul.msk.bf16.gmra.mxu3 %vm1673_vm2, %v5939_v33  ;;  %v3513_v9 = vpack.c.bf16 %v7421_v1, %v7421_v1  ;;  %v6627_v26 = vld [vmem:[%s6805_s28 + $0x544] sm:$0xf]  ;;  %v6529_v33 = vld [vmem:[%s6805_s28 + $0x234] sm:$0xf] }
 0x22d   : > { %3668 = vst.msk [vmem:[%s6874_s17 + $0xc0] sm:$0xf] %vm3619_vm3, %v3411_v25  ;;  %v4745_v37 = vsel %vm3876_vm4, %v4442_v27, 0.0  ;;  %v6628_v25 = vld [vmem:[%s6805_s28 + $0x544] sm:$0xf0] }
 0x22e   : > { %v2850_v38 = vpop.f32.mrf.mxu1  ;;  %v4746_v42 = vadd.f32 %v4745_v37, %v4744_v58  ;;  %3770 = vst.msk [vmem:[%s6874_s17 + $0x258] sm:$0xf] %vm3619_vm3, %v3513_v9  ;;  %v2451_v13 = vpop.f32.mrf.mxu2  ;;  %v5943_v31 = vor.u32 %v6628_v25, %v5942_v16  ;;  %v6629_v25 = vld [vmem:[%s6805_s28 + $0x554] sm:$0xf] }
 0x230   : > { %v2196_v44 = vpop.f32.mrf.mxu0 }
 0x231   : > { %v2846_v45 = vadd.f32 %v2845_v49, %v2196_v44  ;;  %v3100_v14 = vpop.f32.mrf.mxu3  ;;  %2493 = vmatmul.bf16.gmra.mxu2 %v5943_v31  ;;  %v5552_v44 = vld [vmem:[%s6805_s28 + $0x238] sm:$0xf0] }
 0x232   : > { %v7430_v23 = vadd.f32 %v3100_v14, %v2451_v13  ;;  %v5950_v13 = vld [vmem:[%s6805_s28 + $0x550] sm:$0xf] }
 0x233   : > { %v3412_v47 = vpack.c.bf16 %v2846_v45, %v2846_v45  ;;  %v3974_v55 = vsel %vm3876_vm4, %v2846_v45, 0.0  ;;  %v4443_v56 = vmul.f32 %v2846_v45, %v2846_v45 }
 0x234   : > { %v3975_v59 = vadd.f32 %v3974_v55, %v3973_v35  ;;  %v3514_v36 = vpack.c.bf16 %v7430_v23, %v7430_v23  ;;  %v5555_v55 = vor.u32 %v6529_v33, %v5552_v44  ;;  %v5560_v33 = vld [vmem:[%s6805_s28 + $0x248] sm:$0xf0] }
 0x235   : > { %3669 = vst.msk [vmem:[%s6874_s17 + $0xc4] sm:$0xf] %vm3619_vm3, %v3412_v47  ;;  %v4747_v3 = vsel %vm3876_vm4, %v4443_v56, 0.0  ;;  %v5542_v56 = vld [vmem:[%s6805_s28 + $0x220] sm:$0xf] }
 0x236   : > { %v2853_v4 = vpop.f32.mrf.mxu1  ;;  %v4748_v49 = vadd.f32 %v4747_v3, %v4746_v42  ;;  %3771 = vst.msk [vmem:[%s6874_s17 + $0x25c] sm:$0xf] %vm3619_vm3, %v3514_v36  ;;  %v2454_v45 = vpop.f32.mrf.mxu2 }
 0x238   : > { %v2199_v7 = vpop.f32.mrf.mxu0 }
 0x239   : > { %6362 = vmatmul.msk.bf16.gmra.mxu1 %vm1673_vm2, %v5547_v61  ;;  %v2849_v58 = vadd.f32 %v2848_v11, %v2199_v7  ;;  %v5944_v11 = vld [vmem:[%s6805_s28 + $0x548] sm:$0xf0] }
 0x23a   : > { %v5947_v37 = vor.u32 %v6627_v26, %v5944_v11 }
 0x23b   : > { %v3413_v17 = vpack.c.bf16 %v2849_v58, %v2849_v58  ;;  %v3976_v20 = vsel %vm3876_vm4, %v2849_v58, 0.0  ;;  %v4444_v21 = vmul.f32 %v2849_v58, %v2849_v58  ;;  %2238 = vmatmul.bf16.gmra.mxu0 %v5535_v5 }
 0x23c   : > { %v3977_v27 = vadd.f32 %v3976_v20, %v3975_v59  ;;  %6412 = vmatmul.msk.bf16.gmra.mxu3 %vm1673_vm2, %v5947_v37  ;;  %v6528_v59 = vld [vmem:[%s6805_s28 + $0x224] sm:$0xf0] }
 0x23d   : > { %3670 = vst.msk [vmem:[%s6874_s17 + $0xc8] sm:$0xf] %vm3619_vm3, %v3413_v17  ;;  %v4749_v34 = vsel %vm3876_vm4, %v4444_v21, 0.0  ;;  %v5543_v3 = vor.u32 %v6528_v59, %v5542_v56  ;;  %v6630_v21 = vld [vmem:[%s6805_s28 + $0x554] sm:$0xf0] }
 0x23e   : > { %v2855_v35 = vpop.f32.mrf.mxu1  ;;  %v4750_v19 = vadd.f32 %v4749_v34, %v4748_v49  ;;  %v3103_v50 = vpop.f32.mrf.mxu3  ;;  %v6530_v56 = vld [vmem:[%s6805_s28 + $0x234] sm:$0xf0] }
 0x23f   : > { %v7451_v2 = vadd.f32 %v3103_v50, %v2454_v45  ;;  %v2456_v9 = vpop.f32.mrf.mxu2 }
 0x240   : > { %v2201_v39 = vpop.f32.mrf.mxu0 }
 0x241   : > { %v2851_v42 = vadd.f32 %v2850_v38, %v2201_v39  ;;  %v3515_v5 = vpack.c.bf16 %v7451_v2, %v7451_v2 }
 0x243   : > { %v3414_v51 = vpack.c.bf16 %v2851_v42, %v2851_v42  ;;  %v3978_v52 = vsel %vm3876_vm4, %v2851_v42, 0.0  ;;  %v4445_v54 = vmul.f32 %v2851_v42, %v2851_v42  ;;  %3772 = vst.msk [vmem:[%s6874_s17 + $0x260] sm:$0xf] %vm3619_vm3, %v3515_v5  ;;  %v6531_v42 = vld [vmem:[%s6805_s28 + $0x244] sm:$0xf] }
 0x244   : > { %v3979_v47 = vadd.f32 %v3978_v52, %v3977_v27  ;;  %v5951_v27 = vor.u32 %v6630_v21, %v5950_v13  ;;  %v5958_v13 = vld [vmem:[%s6805_s28 + $0x560] sm:$0xf] }
 0x245   : > { %3671 = vst.msk [vmem:[%s6874_s17 + $0xcc] sm:$0xf] %vm3619_vm3, %v3414_v51  ;;  %v4751_v61 = vsel %vm3876_vm4, %v4445_v54, 0.0 }
 0x246   : > { %v2858_v0 = vpop.f32.mrf.mxu1  ;;  %v4752_v38 = vadd.f32 %v4751_v61, %v4750_v19  ;;  %v3105_v58 = vpop.f32.mrf.mxu3  ;;  %2498 = vmatmul.bf16.gmra.mxu2 %v5951_v27 }
 0x247   : > { %v7460_v20 = vadd.f32 %v3105_v58, %v2456_v9  ;;  %v2459_v44 = vpop.f32.mrf.mxu2 }
 0x248   : > { %v2204_v49 = vpop.f32.mrf.mxu0 }
 0x249   : > { %6363 = vmatmul.msk.bf16.gmra.mxu1 %vm1673_vm2, %v5555_v55  ;;  %v2854_v7 = vadd.f32 %v2853_v4, %v2204_v49  ;;  %v5952_v4 = vld [vmem:[%s6805_s28 + $0x558] sm:$0xf0]  ;;  %v3516_v34 = vpack.c.bf16 %v7460_v20, %v7460_v20  ;;  %v5550_v55 = vld [vmem:[%s6805_s28 + $0x230] sm:$0xf] }
 0x24a   : > { %v5955_v19 = vor.u32 %v6629_v25, %v5952_v4  ;;  %v6632_v25 = vld [vmem:[%s6805_s28 + $0x564] sm:$0xf0] }
 0x24b   : > { %v3415_v14 = vpack.c.bf16 %v2854_v7, %v2854_v7  ;;  %v3980_v16 = vsel %vm3876_vm4, %v2854_v7, 0.0  ;;  %v4446_v17 = vmul.f32 %v2854_v7, %v2854_v7  ;;  %2243 = vmatmul.bf16.gmra.mxu0 %v5543_v3  ;;  %3773 = vst.msk [vmem:[%s6874_s17 + $0x264] sm:$0xf] %vm3619_vm3, %v3516_v34  ;;  %v5551_v3 = vor.u32 %v6530_v56, %v5550_v55  ;;  %v5558_v56 = vld [vmem:[%s6805_s28 + $0x240] sm:$0xf] }
 0x24c   : > { %v3981_v26 = vadd.f32 %v3980_v16, %v3979_v47  ;;  %6413 = vmatmul.msk.bf16.gmra.mxu3 %vm1673_vm2, %v5955_v19  ;;  %v5563_v47 = vor.u32 %v6531_v42, %v5560_v33  ;;  %v5959_v4 = vor.u32 %v6632_v25, %v5958_v13  ;;  %v6533_v33 = vld [vmem:[%s6805_s28 + $0x254] sm:$0xf] }
 0x24d   : > { %3672 = vst.msk [vmem:[%s6874_s17 + $0xd0] sm:$0xf] %vm3619_vm3, %v3415_v14  ;;  %v4753_v31 = vsel %vm3876_vm4, %v4446_v17, 0.0 }
 0x24e   : > { %v2860_v11 = vpop.f32.mrf.mxu1  ;;  %v4754_v36 = vadd.f32 %v4753_v31, %v4752_v38  ;;  %v3108_v45 = vpop.f32.mrf.mxu3 }
 0x24f   : > { %v7481_v38 = vadd.f32 %v3108_v45, %v2459_v44  ;;  %v2461_v9 = vpop.f32.mrf.mxu2  ;;  %v5568_v44 = vld [vmem:[%s6805_s28 + $0x258] sm:$0xf0] }
 0x250   : > { %v2206_v37 = vpop.f32.mrf.mxu0  ;;  %v5571_v55 = vor.u32 %v6533_v33, %v5568_v44 }
 0x251   : > { %v2856_v39 = vadd.f32 %v2855_v35, %v2206_v37  ;;  %v3517_v5 = vpack.c.bf16 %v7481_v38, %v7481_v38 }
 0x253   : > { %v3416_v50 = vpack.c.bf16 %v2856_v39, %v2856_v39  ;;  %v3982_v51 = vsel %vm3876_vm4, %v2856_v39, 0.0  ;;  %v4447_v52 = vmul.f32 %v2856_v39, %v2856_v39  ;;  %3774 = vst.msk [vmem:[%s6874_s17 + $0x268] sm:$0xf] %vm3619_vm3, %v3517_v5 }
 0x254   : > { %v3983_v54 = vadd.f32 %v3982_v51, %v3981_v26  ;;  %v6631_v26 = vld [vmem:[%s6805_s28 + $0x564] sm:$0xf] }
 0x255   : > { %3673 = vst.msk [vmem:[%s6874_s17 + $0xd4] sm:$0xf] %vm3619_vm3, %v3416_v50  ;;  %v4755_v59 = vsel %vm3876_vm4, %v4447_v52, 0.0 }
 0x256   : > { %v2863_v61 = vpop.f32.mrf.mxu1  ;;  %v4756_v35 = vadd.f32 %v4755_v59, %v4754_v36  ;;  %v3110_v58 = vpop.f32.mrf.mxu3  ;;  %2503 = vmatmul.bf16.gmra.mxu2 %v5959_v4  ;;  %v6532_v59 = vld [vmem:[%s6805_s28 + $0x244] sm:$0xf0]  ;;  %v6634_v4 = vld [vmem:[%s6805_s28 + $0x574] sm:$0xf0] }
 0x257   : > { %v7490_v21 = vadd.f32 %v3110_v58, %v2461_v9  ;;  %v2464_v45 = vpop.f32.mrf.mxu2  ;;  %v5559_v5 = vor.u32 %v6532_v59, %v5558_v56 }
 0x258   : > { %v2209_v49 = vpop.f32.mrf.mxu0 }
 0x259   : > { %6364 = vmatmul.msk.bf16.gmra.mxu1 %vm1673_vm2, %v5563_v47  ;;  %v2859_v7 = vadd.f32 %v2858_v0, %v2209_v49  ;;  %v5960_v0 = vld [vmem:[%s6805_s28 + $0x568] sm:$0xf0]  ;;  %v3518_v36 = vpack.c.bf16 %v7490_v21, %v7490_v21 }
 0x25a   : > { %v5963_v37 = vor.u32 %v6631_v26, %v5960_v0  ;;  %v6633_v0 = vld [vmem:[%s6805_s28 + $0x574] sm:$0xf] }
 0x25b   : > { %v3417_v14 = vpack.c.bf16 %v2859_v7, %v2859_v7  ;;  %v3984_v16 = vsel %vm3876_vm4, %v2859_v7, 0.0  ;;  %v4448_v17 = vmul.f32 %v2859_v7, %v2859_v7  ;;  %2248 = vmatmul.bf16.gmra.mxu0 %v5551_v3  ;;  %3775 = vst.msk [vmem:[%s6874_s17 + $0x26c] sm:$0xf] %vm3619_vm3, %v3518_v36 }
 0x25c   : > { %v3985_v27 = vadd.f32 %v3984_v16, %v3983_v54  ;;  %6414 = vmatmul.msk.bf16.gmra.mxu3 %vm1673_vm2, %v5963_v37  ;;  %v5966_v16 = vld [vmem:[%s6805_s28 + $0x570] sm:$0xf] }
 0x25d   : > { %3674 = vst.msk [vmem:[%s6874_s17 + $0xd8] sm:$0xf] %vm3619_vm3, %v3417_v14  ;;  %v4757_v31 = vsel %vm3876_vm4, %v4448_v17, 0.0  ;;  %v5967_v36 = vor.u32 %v6634_v4, %v5966_v16  ;;  %v5974_v4 = vld [vmem:[%s6805_s28 + $0x580] sm:$0xf] }
 0x25e   : > { %v2865_v34 = vpop.f32.mrf.mxu1  ;;  %v4758_v19 = vadd.f32 %v4757_v31, %v4756_v35 }
 0x25f   : > { %v3113_v50 = vpop.f32.mrf.mxu3  ;;  %v2466_v13 = vpop.f32.mrf.mxu2 }
 0x260   : > { %v2211_v39 = vpop.f32.mrf.mxu0  ;;  %v7511_v49 = vadd.f32 %v3113_v50, %v2464_v45  ;;  %v6535_v50 = vld [vmem:[%s6805_s28 + $0x264] sm:$0xf] }
 0x261   : > { %v2861_v42 = vadd.f32 %v2860_v11, %v2211_v39 }
 0x262   : > { %v3519_v9 = vpack.c.bf16 %v7511_v49, %v7511_v49 }
 0x263   : > { %v3418_v51 = vpack.c.bf16 %v2861_v42, %v2861_v42  ;;  %v3986_v52 = vsel %vm3876_vm4, %v2861_v42, 0.0  ;;  %v4449_v54 = vmul.f32 %v2861_v42, %v2861_v42 }
 0x264   : > { %v3987_v47 = vadd.f32 %v3986_v52, %v3985_v27  ;;  %3776 = vst.msk [vmem:[%s6874_s17 + $0x270] sm:$0xf] %vm3619_vm3, %v3519_v9 }
 0x265   : > { %3675 = vst.msk [vmem:[%s6874_s17 + $0xdc] sm:$0xf] %vm3619_vm3, %v3418_v51  ;;  %v4759_v35 = vsel %vm3876_vm4, %v4449_v54, 0.0  ;;  %v5576_v51 = vld [vmem:[%s6805_s28 + $0x268] sm:$0xf0] }
 0x266   : > { %v2868_v3 = vpop.f32.mrf.mxu1  ;;  %v4760_v11 = vadd.f32 %v4759_v35, %v4758_v19  ;;  %2508 = vmatmul.bf16.gmra.mxu2 %v5967_v36  ;;  %v5579_v35 = vor.u32 %v6535_v50, %v5576_v51 }
 0x267   : > { %v3115_v14 = vpop.f32.mrf.mxu3  ;;  %v2469_v52 = vpop.f32.mrf.mxu2 }
 0x268   : > { %v2214_v7 = vpop.f32.mrf.mxu0  ;;  %v7520_v27 = vadd.f32 %v3115_v14, %v2466_v13 }
 0x269   : > { %6365 = vmatmul.msk.bf16.gmra.mxu1 %vm1673_vm2, %v5571_v55  ;;  %v2864_v58 = vadd.f32 %v2863_v61, %v2214_v7  ;;  %v5968_v61 = vld [vmem:[%s6805_s28 + $0x578] sm:$0xf0] }
 0x26a   : > { %v3520_v39 = vpack.c.bf16 %v7520_v27, %v7520_v27  ;;  %v5971_v33 = vor.u32 %v6633_v0, %v5968_v61 }
 0x26b   : > { %v3419_v17 = vpack.c.bf16 %v2864_v58, %v2864_v58  ;;  %v3988_v25 = vsel %vm3876_vm4, %v2864_v58, 0.0  ;;  %v4450_v26 = vmul.f32 %v2864_v58, %v2864_v58  ;;  %2253 = vmatmul.bf16.gmra.mxu0 %v5559_v5  ;;  %v6534_v5 = vld [vmem:[%s6805_s28 + $0x254] sm:$0xf0] }
 0x26c   : > { %v3989_v31 = vadd.f32 %v3988_v25, %v3987_v47  ;;  %3777 = vst.msk [vmem:[%s6874_s17 + $0x274] sm:$0xf] %vm3619_vm3, %v3520_v39  ;;  %6415 = vmatmul.msk.bf16.gmra.mxu3 %vm1673_vm2, %v5971_v33  ;;  %v6635_v39 = vld [vmem:[%s6805_s28 + $0x584] sm:$0xf] }
 0x26d   : > { %3676 = vst.msk [vmem:[%s6874_s17 + $0xe0] sm:$0xf] %vm3619_vm3, %v3419_v17  ;;  %v4761_v19 = vsel %vm3876_vm4, %v4450_v26, 0.0 }
 0x26e   : > { %v2870_v37 = vpop.f32.mrf.mxu1  ;;  %v4762_v42 = vadd.f32 %v4761_v19, %v4760_v11  ;;  %v5566_v11 = vld [vmem:[%s6805_s28 + $0x250] sm:$0xf]  ;;  %v6636_v19 = vld [vmem:[%s6805_s28 + $0x584] sm:$0xf0] }
 0x26f   : > { %v3118_v54 = vpop.f32.mrf.mxu3  ;;  %v5567_v13 = vor.u32 %v6534_v5, %v5566_v11  ;;  %v2471_v25 = vpop.f32.mrf.mxu2  ;;  %v5975_v33 = vor.u32 %v6636_v19, %v5974_v4 }
 0x270   : > { %v2216_v44 = vpop.f32.mrf.mxu0  ;;  %v7541_v58 = vadd.f32 %v3118_v54, %v2469_v52 }
 0x271   : > { %v2866_v45 = vadd.f32 %v2865_v34, %v2216_v44 }
 0x272   : > { %v3521_v16 = vpack.c.bf16 %v7541_v58, %v7541_v58 }
 0x273   : > { %v3420_v47 = vpack.c.bf16 %v2866_v45, %v2866_v45  ;;  %v3990_v55 = vsel %vm3876_vm4, %v2866_v45, 0.0  ;;  %v4451_v56 = vmul.f32 %v2866_v45, %v2866_v45 }
 0x274   : > { %v3991_v59 = vadd.f32 %v3990_v55, %v3989_v31  ;;  %3778 = vst.msk [vmem:[%s6874_s17 + $0x278] sm:$0xf] %vm3619_vm3, %v3521_v16  ;;  %v6537_v55 = vld [vmem:[%s6805_s28 + $0x274] sm:$0xf]  ;;  %v6536_v16 = vld [vmem:[%s6805_s28 + $0x264] sm:$0xf0] }
 0x275   : > { %3677 = vst.msk [vmem:[%s6874_s17 + $0xe4] sm:$0xf] %vm3619_vm3, %v3420_v47  ;;  %v4763_v7 = vsel %vm3876_vm4, %v4451_v56, 0.0  ;;  %v5584_v56 = vld [vmem:[%s6805_s28 + $0x278] sm:$0xf0] }
 0x276   : > { %v2873_v9 = vpop.f32.mrf.mxu1  ;;  %v4764_v34 = vadd.f32 %v4763_v7, %v4762_v42  ;;  %2513 = vmatmul.bf16.gmra.mxu2 %v5975_v33 }
 0x277   : > { %v3120_v26 = vpop.f32.mrf.mxu3 }
 0x278   : > { %v2219_v14 = vpop.f32.mrf.mxu0  ;;  %v7550_v61 = vadd.f32 %v3120_v26, %v2471_v25 }
 0x279   : > { %6366 = vmatmul.msk.bf16.gmra.mxu1 %vm1673_vm2, %v5579_v35  ;;  %v2869_v17 = vadd.f32 %v2868_v3, %v2219_v14  ;;  %v5976_v3 = vld [vmem:[%s6805_s28 + $0x588] sm:$0xf0]  ;;  %v5574_v14 = vld [vmem:[%s6805_s28 + $0x260] sm:$0xf] }
 0x27a   : > { %v3522_v50 = vpack.c.bf16 %v7550_v61, %v7550_v61  ;;  %v5979_v52 = vor.u32 %v6635_v39, %v5976_v3  ;;  %v5575_v4 = vor.u32 %v6536_v16, %v5574_v14 }
 0x27b   : > { %v3421_v0 = vpack.c.bf16 %v2869_v17, %v2869_v17  ;;  %v3992_v31 = vsel %vm3876_vm4, %v2869_v17, 0.0  ;;  %v4452_v36 = vmul.f32 %v2869_v17, %v2869_v17  ;;  %2258 = vmatmul.bf16.gmra.mxu0 %v5567_v13  ;;  %v5587_v13 = vor.u32 %v6537_v55, %v5584_v56 }
 0x27c   : > { %v3993_v42 = vadd.f32 %v3992_v31, %v3991_v59  ;;  %3779 = vst.msk [vmem:[%s6874_s17 + $0x27c] sm:$0xf] %vm3619_vm3, %v3522_v50  ;;  %6416 = vmatmul.msk.bf16.gmra.mxu3 %vm1673_vm2, %v5979_v52  ;;  %v2474_v59 = vpop.f32.mrf.mxu2  ;;  %v6637_v52 = vld [vmem:[%s6805_s28 + $0x594] sm:$0xf] }
 0x27d   : > { %3678 = vst.msk [vmem:[%s6874_s17 + $0xe8] sm:$0xf] %vm3619_vm3, %v3421_v0  ;;  %v4765_v44 = vsel %vm3876_vm4, %v4452_v36, 0.0 }
 0x27e   : > { %v2875_v45 = vpop.f32.mrf.mxu1  ;;  %v4766_v51 = vadd.f32 %v4765_v44, %v4764_v34 }
 0x27f   : > { %v3123_v35 = vpop.f32.mrf.mxu3 }
 0x280   : > { %v2221_v54 = vpop.f32.mrf.mxu0  ;;  %v7571_v26 = vadd.f32 %v3123_v35, %v2474_v59 }
 0x281   : > { %v2871_v47 = vadd.f32 %v2870_v37, %v2221_v54 }
 0x282   : > { %v3523_v31 = vpack.c.bf16 %v7571_v26, %v7571_v26 }
 0x283   : > { %v3422_v11 = vpack.c.bf16 %v2871_v47, %v2871_v47  ;;  %v3994_v5 = vsel %vm3876_vm4, %v2871_v47, 0.0  ;;  %v4453_v7 = vmul.f32 %v2871_v47, %v2871_v47 }
 0x284   : > { %v3995_v34 = vadd.f32 %v3994_v5, %v3993_v42  ;;  %3780 = vst.msk [vmem:[%s6874_s17 + $0x280] sm:$0xf] %vm3619_vm3, %v3523_v31  ;;  %v2476_v19 = vpop.f32.mrf.mxu2  ;;  %v5982_v42 = vld [vmem:[%s6805_s28 + $0x590] sm:$0xf] }
 0x285   : > { %3679 = vst.msk [vmem:[%s6874_s17 + $0xec] sm:$0xf] %vm3619_vm3, %v3422_v11  ;;  %v4767_v17 = vsel %vm3876_vm4, %v4453_v7, 0.0 }
 0x286   : > { %v2878_v25 = vpop.f32.mrf.mxu1  ;;  %v4768_v37 = vadd.f32 %v4767_v17, %v4766_v51  ;;  %v6638_v51 = vld [vmem:[%s6805_s28 + $0x594] sm:$0xf0] }
 0x287   : > { %v3125_v39 = vpop.f32.mrf.mxu3  ;;  %v5983_v47 = vor.u32 %v6638_v51, %v5982_v42 }
 0x288   : > { %v2224_v0 = vpop.f32.mrf.mxu0  ;;  %v7580_v50 = vadd.f32 %v3125_v39, %v2476_v19  ;;  %v6538_v19 = vld [vmem:[%s6805_s28 + $0x274] sm:$0xf0] }
 0x289   : > { %6367 = vmatmul.msk.bf16.gmra.mxu1 %vm1673_vm2, %v5587_v13  ;;  %v2874_v36 = vadd.f32 %v2873_v9, %v2224_v0  ;;  %v5984_v9 = vld [vmem:[%s6805_s28 + $0x598] sm:$0xf0]  ;;  %2518 = vmatmul.bf16.gmra.mxu2 %v5983_v47  ;;  %v5592_v13 = vld [vmem:[%s6805_s28 + $0x288] sm:$0xf0] }
 0x28a   : > { %9597 = vst [vmem:[#allocation2_spill] sm:$0xff] %v7580_v50  ;;  %v3524_v59 = vpack.c.bf16 %v7580_v50, %v7580_v50  ;;  %v5987_v11 = vor.u32 %v6637_v52, %v5984_v9  ;;  %v5990_v9 = vld [vmem:[%s6805_s28 + $0x5a0] sm:$0xf] }
 0x28b   : > { %v3423_v33 = vpack.c.bf16 %v2874_v36, %v2874_v36  ;;  %v3996_v3 = vsel %vm3876_vm4, %v2874_v36, 0.0  ;;  %v4454_v44 = vmul.f32 %v2874_v36, %v2874_v36  ;;  %2263 = vmatmul.bf16.gmra.mxu0 %v5575_v4  ;;  %v5582_v36 = vld [vmem:[%s6805_s28 + $0x270] sm:$0xf] }
 0x28c   : > { %v3997_v54 = vadd.f32 %v3996_v3, %v3995_v34  ;;  %3781 = vst.msk [vmem:[%s6874_s17 + $0x284] sm:$0xf] %vm3619_vm3, %v3524_v59  ;;  %6417 = vmatmul.msk.bf16.gmra.mxu3 %vm1673_vm2, %v5987_v11  ;;  %v6539_v34 = vld [vmem:[%s6805_s28 + $0x284] sm:$0xf]  ;;  %v2479_v14 = vpop.f32.mrf.mxu2  ;;  %v5583_v3 = vor.u32 %v6538_v19, %v5582_v36  ;;  %v6541_v36 = vld [vmem:[%s6805_s28 + $0x294] sm:$0xf] }
 0x28d   : > { %3680 = vst.msk [vmem:[%s6874_s17 + $0xf0] sm:$0xf] %vm3619_vm3, %v3423_v33  ;;  %v4769_v55 = vsel %vm3876_vm4, %v4454_v44, 0.0  ;;  %v5595_v31 = vor.u32 %v6539_v34, %v5592_v13  ;;  %v5600_v19 = vld [vmem:[%s6805_s28 + $0x298] sm:$0xf0] }
 0x28e   : > { %v2880_v56 = vpop.f32.mrf.mxu1  ;;  %v4770_v35 = vadd.f32 %v4769_v55, %v4768_v37 }
 0x28f   : > { %v3128_v16 = vpop.f32.mrf.mxu3 }
 0x290   : > { %v2226_v5 = vpop.f32.mrf.mxu0  ;;  %v7601_v33 = vadd.f32 %v3128_v16, %v2479_v14 }
 0x291   : > { %v2876_v7 = vadd.f32 %v2875_v45, %v2226_v5  ;;  %v6640_v5 = vld [vmem:[%s6805_s28 + $0x5a4] sm:$0xf0] }
 0x292   : > { %9598 = vst [vmem:[#allocation3_spill] sm:$0xff] %v7601_v33  ;;  %v3525_v51 = vpack.c.bf16 %v7601_v33, %v7601_v33  ;;  %v5991_v13 = vor.u32 %v6640_v5, %v5990_v9  ;;  %v6540_v9 = vld [vmem:[%s6805_s28 + $0x284] sm:$0xf0] }
 0x293   : > { %v3424_v17 = vpack.c.bf16 %v2876_v7, %v2876_v7  ;;  %v3998_v4 = vsel %vm3876_vm4, %v2876_v7, 0.0  ;;  %v4455_v37 = vmul.f32 %v2876_v7, %v2876_v7  ;;  %v6639_v7 = vld [vmem:[%s6805_s28 + $0x5a4] sm:$0xf] }
 0x294   : > { %v3999_v0 = vadd.f32 %v3998_v4, %v3997_v54  ;;  %3782 = vst.msk [vmem:[%s6874_s17 + $0x288] sm:$0xf] %vm3619_vm3, %v3525_v51  ;;  %v2481_v54 = vpop.f32.mrf.mxu2 }
 0x295   : > { %3681 = vst.msk [vmem:[%s6874_s17 + $0xf4] sm:$0xf] %vm3619_vm3, %v3424_v17  ;;  %v4771_v39 = vsel %vm3876_vm4, %v4455_v37, 0.0 }
 0x296   : > { %v2883_v42 = vpop.f32.mrf.mxu1  ;;  %v4772_v45 = vadd.f32 %v4771_v39, %v4770_v35 }
 0x297   : > { %v3130_v47 = vpop.f32.mrf.mxu3 }
 0x298   : > { %v2229_v44 = vpop.f32.mrf.mxu0  ;;  %v7610_v11 = vadd.f32 %v3130_v47, %v2481_v54  ;;  %v5603_v54 = vor.u32 %v6541_v36, %v5600_v19  ;;  %v5590_v47 = vld [vmem:[%s6805_s28 + $0x280] sm:$0xf]  ;;  %v6642_v36 = vld [vmem:[%s6805_s28 + $0x5b4] sm:$0xf0]  ;;  %v6641_v19 = vld [vmem:[%s6805_s28 + $0x5b4] sm:$0xf] }
 0x299   : > { %6368 = vmatmul.msk.bf16.gmra.mxu1 %vm1673_vm2, %v5595_v31  ;;  %v2879_v52 = vadd.f32 %v2878_v25, %v2229_v44  ;;  %v5992_v25 = vld [vmem:[%s6805_s28 + $0x5a8] sm:$0xf0]  ;;  %2523 = vmatmul.bf16.gmra.mxu2 %v5991_v13  ;;  %v5591_v5 = vor.u32 %v6540_v9, %v5590_v47 }
 0x29a   : > { %9599 = vst [vmem:[#allocation4_spill] sm:$0xff] %v7610_v11  ;;  %v3526_v17 = vpack.c.bf16 %v7610_v11, %v7610_v11  ;;  %v5995_v37 = vor.u32 %v6639_v7, %v5992_v25 }
 0x29b   : > { %v3425_v55 = vpack.c.bf16 %v2879_v52, %v2879_v52  ;;  %v4000_v59 = vsel %vm3876_vm4, %v2879_v52, 0.0  ;;  %v4456_v35 = vmul.f32 %v2879_v52, %v2879_v52  ;;  %2268 = vmatmul.bf16.gmra.mxu0 %v5583_v3 }
 0x29c   : > { %v4001_v34 = vadd.f32 %v4000_v59, %v3999_v0  ;;  %3783 = vst.msk [vmem:[%s6874_s17 + $0x28c] sm:$0xf] %vm3619_vm3, %v3526_v17  ;;  %6418 = vmatmul.msk.bf16.gmra.mxu3 %vm1673_vm2, %v5995_v37  ;;  %v2484_v39 = vpop.f32.mrf.mxu2  ;;  %v5998_v17 = vld [vmem:[%s6805_s28 + $0x5b0] sm:$0xf] }
 0x29d   : > { %3682 = vst.msk [vmem:[%s6874_s17 + $0xf8] sm:$0xf] %vm3619_vm3, %v3425_v55  ;;  %v4773_v14 = vsel %vm3876_vm4, %v4456_v35, 0.0 }
 0x29e   : > { %v2885_v16 = vpop.f32.mrf.mxu1  ;;  %v4774_v4 = vadd.f32 %v4773_v14, %v4772_v45 }
 0x29f   : > { %v3133_v3 = vpop.f32.mrf.mxu3 }
 0x2a0   : > { %v2231_v31 = vpop.f32.mrf.mxu0  ;;  %v7631_v35 = vadd.f32 %v3133_v3, %v2484_v39  ;;  %v5999_v3 = vor.u32 %v6642_v36, %v5998_v17 }
 0x2a1   : > { %v2881_v0 = vadd.f32 %v2880_v56, %v2231_v31 }
 0x2a2   : > { %9600 = vst [vmem:[#allocation5_spill] sm:$0xff] %v7631_v35 }
 0x2a3   : > { %v3426_v44 = vpack.c.bf16 %v2881_v0, %v2881_v0  ;;  %v4002_v51 = vsel %vm3876_vm4, %v2881_v0, 0.0  ;;  %v4457_v45 = vmul.f32 %v2881_v0, %v2881_v0 }
 0x2a4   : > { %v4003_v52 = vadd.f32 %v4002_v51, %v4001_v34  ;;  %v3527_v34 = vpack.c.bf16 %v7631_v35, %v7631_v35  ;;  %v2486_v25 = vpop.f32.mrf.mxu2 }
 0x2a5   : > { %3683 = vst.msk [vmem:[%s6874_s17 + $0xfc] sm:$0xf] %vm3619_vm3, %v3426_v44  ;;  %v4775_v55 = vsel %vm3876_vm4, %v4457_v45, 0.0 }
 0x2a6   : > { %v2888_v59 = vpop.f32.mrf.mxu1  ;;  %v4776_v56 = vadd.f32 %v4775_v55, %v4774_v4  ;;  %3784 = vst.msk [vmem:[%s6874_s17 + $0x290] sm:$0xf] %vm3619_vm3, %v3527_v34  ;;  %v6543_v55 = vld [vmem:[%s6805_s28 + $0x2a4] sm:$0xf] }
 0x2a7   : > { %v3135_v14 = vpop.f32.mrf.mxu3 }
 0x2a8   : > { %v2234_v7 = vpop.f32.mrf.mxu0  ;;  %v7640_v0 = vadd.f32 %v3135_v14, %v2486_v25 }
 0x2a9   : > { %6369 = vmatmul.msk.bf16.gmra.mxu1 %vm1673_vm2, %v5603_v54  ;;  %v2884_v13 = vadd.f32 %v2883_v42, %v2234_v7  ;;  %v6000_v42 = vld [vmem:[%s6805_s28 + $0x5b8] sm:$0xf0]  ;;  %2528 = vmatmul.bf16.gmra.mxu2 %v5999_v3 }
 0x2aa   : > { %9601 = vst [vmem:[#allocation6_spill] sm:$0xff] %v7640_v0  ;;  %v3528_v45 = vpack.c.bf16 %v7640_v0, %v7640_v0  ;;  %v6003_v47 = vor.u32 %v6641_v19, %v6000_v42 }
 0x2ab   : > { %v3427_v4 = vpack.c.bf16 %v2884_v13, %v2884_v13  ;;  %v4004_v37 = vsel %vm3876_vm4, %v2884_v13, 0.0  ;;  %v4458_v31 = vmul.f32 %v2884_v13, %v2884_v13  ;;  %2273 = vmatmul.bf16.gmra.mxu0 %v5591_v5  ;;  %v5608_v5 = vld [vmem:[%s6805_s28 + $0x2a8] sm:$0xf0] }
 0x2ac   : > { %v4005_v39 = vadd.f32 %v4004_v37, %v4003_v52  ;;  %3785 = vst.msk [vmem:[%s6874_s17 + $0x294] sm:$0xf] %vm3619_vm3, %v3528_v45  ;;  %6419 = vmatmul.msk.bf16.gmra.mxu3 %vm1673_vm2, %v6003_v47  ;;  %v2489_v7 = vpop.f32.mrf.mxu2  ;;  %v5611_v17 = vor.u32 %v6543_v55, %v5608_v5  ;;  %v6542_v37 = vld [vmem:[%s6805_s28 + $0x294] sm:$0xf0]  ;;  %v6006_v47 = vld [vmem:[%s6805_s28 + $0x5c0] sm:$0xf] }
 0x2ad   : > { %3684 = vst.msk [vmem:[%s6874_s17 + $0x100] sm:$0xf] %vm3619_vm3, %v3427_v4  ;;  %v4777_v44 = vsel %vm3876_vm4, %v4458_v31, 0.0  ;;  %v5598_v4 = vld [vmem:[%s6805_s28 + $0x290] sm:$0xf] }
 0x2ae   : > { %v2890_v51 = vpop.f32.mrf.mxu1  ;;  %v4778_v54 = vadd.f32 %v4777_v44, %v4776_v56  ;;  %v5599_v3 = vor.u32 %v6542_v37, %v5598_v4  ;;  %v6644_v5 = vld [vmem:[%s6805_s28 + $0x5c4] sm:$0xf0] }
 0x2af   : > { %v3138_v56 = vpop.f32.mrf.mxu3 }
 0x2b0   : > { %v2236_v9 = vpop.f32.mrf.mxu0  ;;  %v7661_v19 = vadd.f32 %v3138_v56, %v2489_v7  ;;  %v6643_v7 = vld [vmem:[%s6805_s28 + $0x5c4] sm:$0xf] }
 0x2b1   : > { %v2886_v52 = vadd.f32 %v2885_v16, %v2236_v9 }
 0x2b2   : > { %9602 = vst [vmem:[#allocation7_spill] sm:$0xff] %v7661_v19 }
 0x2b3   : > { %v3428_v34 = vpack.c.bf16 %v2886_v52, %v2886_v52  ;;  %v4006_v13 = vsel %vm3876_vm4, %v2886_v52, 0.0  ;;  %v4459_v25 = vmul.f32 %v2886_v52, %v2886_v52 }
 0x2b4   : > { %v4007_v14 = vadd.f32 %v4006_v13, %v4005_v39  ;;  %v3529_v39 = vpack.c.bf16 %v7661_v19, %v7661_v19  ;;  %v2491_v45 = vpop.f32.mrf.mxu2  ;;  %v6240_v19 = vld [vmem:[%s6805_s28 + $0x798] sm:$0xf0] }
 0x2b5   : > { %3685 = vst.msk [vmem:[%s6874_s17 + $0x104] sm:$0xf] %vm3619_vm3, %v3428_v34  ;;  %v4779_v31 = vsel %vm3876_vm4, %v4459_v25, 0.0  ;;  %v6007_v25 = vor.u32 %v6644_v5, %v6006_v47  ;;  %v6544_v5 = vld [vmem:[%s6805_s28 + $0x2a4] sm:$0xf0] }
 0x2b6   : > { %v2893_v36 = vpop.f32.mrf.mxu1  ;;  %v4780_v16 = vadd.f32 %v4779_v31, %v4778_v54  ;;  %3786 = vst.msk [vmem:[%s6874_s17 + $0x298] sm:$0xf] %vm3619_vm3, %v3529_v39  ;;  %v5616_v39 = vld [vmem:[%s6805_s28 + $0x2b8] sm:$0xf0] }
 0x2b7   : > { %v3140_v55 = vpop.f32.mrf.mxu3 }
 0x2b8   : > { %v2239_v42 = vpop.f32.mrf.mxu0  ;;  %v7672_v13 = vadd.f32 %v3140_v55, %v2491_v45  ;;  %v5606_v55 = vld [vmem:[%s6805_s28 + $0x2a0] sm:$0xf] }
 0x2b9   : > { %6370 = vmatmul.msk.bf16.gmra.mxu1 %vm1673_vm2, %v5611_v17  ;;  %v2889_v44 = vadd.f32 %v2888_v59, %v2239_v42  ;;  %v6008_v59 = vld [vmem:[%s6805_s28 + $0x5c8] sm:$0xf0]  ;;  %2533 = vmatmul.bf16.gmra.mxu2 %v6007_v25  ;;  %v6545_v42 = vld [vmem:[%s6805_s28 + $0x2b4] sm:$0xf] }
 0x2ba   : > { %9603 = vst [vmem:[#allocation8_spill] sm:$0xff] %v7672_v13  ;;  %v6011_v4 = vor.u32 %v6643_v7, %v6008_v59  ;;  %v3530_v31 = vpack.c.bf16 %v7672_v13, %v7672_v13 }
 0x2bb   : > { %v3429_v9 = vpack.c.bf16 %v2889_v44, %v2889_v44  ;;  %v4008_v54 = vsel %vm3876_vm4, %v2889_v44, 0.0  ;;  %v4460_v52 = vmul.f32 %v2889_v44, %v2889_v44  ;;  %2278 = vmatmul.bf16.gmra.mxu0 %v5599_v3 }
 0x2bc   : > { %v4009_v34 = vadd.f32 %v4008_v54, %v4007_v14  ;;  %3787 = vst.msk [vmem:[%s6874_s17 + $0x29c] sm:$0xf] %vm3619_vm3, %v3530_v31  ;;  %6420 = vmatmul.msk.bf16.gmra.mxu3 %vm1673_vm2, %v6011_v4  ;;  %v2494_v44 = vpop.f32.mrf.mxu2 }
 0x2bd   : > { %3686 = vst.msk [vmem:[%s6874_s17 + $0x108] sm:$0xf] %vm3619_vm3, %v3429_v9  ;;  %v4781_v56 = vsel %vm3876_vm4, %v4460_v52, 0.0  ;;  %v5619_v52 = vor.u32 %v6545_v42, %v5616_v39 }
 0x2be   : > { %v2895_v17 = vpop.f32.mrf.mxu1  ;;  %v4782_v37 = vadd.f32 %v4781_v56, %v4780_v16  ;;  %v5607_v56 = vor.u32 %v6544_v5, %v5606_v55 }
 0x2bf   : > { %v3143_v9 = vpop.f32.mrf.mxu3 }
 0x2c0   : > { %v2241_v14 = vpop.f32.mrf.mxu0  ;;  %v7691_v59 = vadd.f32 %v3143_v9, %v2494_v44 }
 0x2c1   : > { %v2891_v3 = vadd.f32 %v2890_v51, %v2241_v14 }
 0x2c2   : > { %9604 = vst [vmem:[#allocation9_spill] sm:$0xff] %v7691_v59 }
 0x2c3   : > { %v3430_v45 = vpack.c.bf16 %v2891_v3, %v2891_v3  ;;  %v4010_v47 = vsel %vm3876_vm4, %v2891_v3, 0.0  ;;  %v4461_v16 = vmul.f32 %v2891_v3, %v2891_v3  ;;  %v6014_v3 = vld [vmem:[%s6805_s28 + $0x5d0] sm:$0xf] }
 0x2c4   : > { %v4011_v54 = vadd.f32 %v4010_v47, %v4009_v34  ;;  %v3531_v34 = vpack.c.bf16 %v7691_v59, %v7691_v59  ;;  %v2496_v14 = vpop.f32.mrf.mxu2  ;;  %v6645_v47 = vld [vmem:[%s6805_s28 + $0x5d4] sm:$0xf] }
 0x2c5   : > { %3687 = vst.msk [vmem:[%s6874_s17 + $0x10c] sm:$0xf] %vm3619_vm3, %v3430_v45  ;;  %v4783_v7 = vsel %vm3876_vm4, %v4461_v16, 0.0  ;;  %v6646_v45 = vld [vmem:[%s6805_s28 + $0x5d4] sm:$0xf0] }
 0x2c6   : > { %v2898_v25 = vpop.f32.mrf.mxu1  ;;  %v4784_v51 = vadd.f32 %v4783_v7, %v4782_v37  ;;  %3788 = vst.msk [vmem:[%s6874_s17 + $0x2a0] sm:$0xf] %vm3619_vm3, %v3531_v34 }
 0x2c7   : > { %v3145_v44 = vpop.f32.mrf.mxu3 }
 0x2c8   : > { %v2244_v4 = vpop.f32.mrf.mxu0  ;;  %v7702_v9 = vadd.f32 %v3145_v44, %v2496_v14  ;;  %v5624_v14 = vld [vmem:[%s6805_s28 + $0x2c8] sm:$0xf0] }
 0x2c9   : > { %6371 = vmatmul.msk.bf16.gmra.mxu1 %vm1673_vm2, %v5619_v52  ;;  %v2894_v31 = vadd.f32 %v2893_v36, %v2244_v4  ;;  %v6015_v52 = vor.u32 %v6646_v45, %v6014_v3  ;;  %v6016_v36 = vld [vmem:[%s6805_s28 + $0x5d8] sm:$0xf0] }
 0x2ca   : > { %9605 = vst [vmem:[#allocation10_spill] sm:$0xff] %v7702_v9  ;;  %v6019_v7 = vor.u32 %v6645_v47, %v6016_v36  ;;  %v5614_v47 = vld [vmem:[%s6805_s28 + $0x2b0] sm:$0xf] }
 0x2cb   : > { %v3431_v42 = vpack.c.bf16 %v2894_v31, %v2894_v31  ;;  %v4012_v37 = vsel %vm3876_vm4, %v2894_v31, 0.0  ;;  %v4462_v39 = vmul.f32 %v2894_v31, %v2894_v31  ;;  %2283 = vmatmul.bf16.gmra.mxu0 %v5607_v56  ;;  %v3532_v56 = vpack.c.bf16 %v7702_v9, %v7702_v9  ;;  %2538 = vmatmul.bf16.gmra.mxu2 %v6015_v52  ;;  %v6547_v31 = vld [vmem:[%s6805_s28 + $0x2c4] sm:$0xf]  ;;  %v6546_v52 = vld [vmem:[%s6805_s28 + $0x2b4] sm:$0xf0] }
 0x2cc   : > { %v4013_v16 = vadd.f32 %v4012_v37, %v4011_v54  ;;  %6421 = vmatmul.msk.bf16.gmra.mxu3 %vm1673_vm2, %v6019_v7  ;;  %v2499_v3 = vpop.f32.mrf.mxu2  ;;  %v5627_v45 = vor.u32 %v6547_v31, %v5624_v14  ;;  %v6022_v14 = vld [vmem:[%s6805_s28 + $0x5e0] sm:$0xf]  ;;  %v6232_v9 = vld [vmem:[%s6805_s28 + $0x788] sm:$0xf0] }
 0x2cd   : > { %3688 = vst.msk [vmem:[%s6874_s17 + $0x110] sm:$0xf] %vm3619_vm3, %v3431_v42  ;;  %v4785_v55 = vsel %vm3876_vm4, %v4462_v39, 0.0 }
 0x2ce   : > { %v2900_v5 = vpop.f32.mrf.mxu1  ;;  %v4786_v4 = vadd.f32 %v4785_v55, %v4784_v51  ;;  %3789 = vst.msk [vmem:[%s6874_s17 + $0x2a4] sm:$0xf] %vm3619_vm3, %v3532_v56  ;;  %v5615_v56 = vor.u32 %v6546_v52, %v5614_v47 }
 0x2cf   : > { %v3148_v39 = vpop.f32.mrf.mxu3 }
 0x2d0   : > { %v2246_v54 = vpop.f32.mrf.mxu0  ;;  %v7721_v7 = vadd.f32 %v3148_v39, %v2499_v3  ;;  %v6647_v39 = vld [vmem:[%s6805_s28 + $0x5e4] sm:$0xf] }
 0x2d1   : > { %v2896_v34 = vadd.f32 %v2895_v17, %v2246_v54 }
 0x2d2   : > { %9606 = vst [vmem:[#allocation11_spill] sm:$0xff] %v7721_v7 }
 0x2d3   : > { %v3432_v42 = vpack.c.bf16 %v2896_v34, %v2896_v34  ;;  %v4014_v37 = vsel %vm3876_vm4, %v2896_v34, 0.0  ;;  %v4463_v51 = vmul.f32 %v2896_v34, %v2896_v34 }
 0x2d4   : > { %v4015_v44 = vadd.f32 %v4014_v37, %v4013_v16  ;;  %v3533_v16 = vpack.c.bf16 %v7721_v7, %v7721_v7  ;;  %v2501_v31 = vpop.f32.mrf.mxu2 }
 0x2d5   : > { %3689 = vst.msk [vmem:[%s6874_s17 + $0x114] sm:$0xf] %vm3619_vm3, %v3432_v42  ;;  %v4787_v36 = vsel %vm3876_vm4, %v4463_v51, 0.0  ;;  %v6648_v51 = vld [vmem:[%s6805_s28 + $0x5e4] sm:$0xf0] }
 0x2d6   : > { %v2903_v55 = vpop.f32.mrf.mxu1  ;;  %v4788_v17 = vadd.f32 %v4787_v36, %v4786_v4  ;;  %3790 = vst.msk [vmem:[%s6874_s17 + $0x2a8] sm:$0xf] %vm3619_vm3, %v3533_v16  ;;  %v6023_v52 = vor.u32 %v6648_v51, %v6022_v14  ;;  %v5632_v14 = vld [vmem:[%s6805_s28 + $0x2d8] sm:$0xf0] }
 0x2d7   : > { %v3150_v3 = vpop.f32.mrf.mxu3 }
 0x2d8   : > { %v2249_v54 = vpop.f32.mrf.mxu0  ;;  %v7732_v47 = vadd.f32 %v3150_v3, %v2501_v31  ;;  %v6549_v31 = vld [vmem:[%s6805_s28 + $0x2d4] sm:$0xf] }
 0x2d9   : > { %6372 = vmatmul.msk.bf16.gmra.mxu1 %vm1673_vm2, %v5627_v45  ;;  %v2899_v34 = vadd.f32 %v2898_v25, %v2249_v54  ;;  %v6024_v25 = vld [vmem:[%s6805_s28 + $0x5e8] sm:$0xf0] }
 0x2da   : > { %9607 = vst [vmem:[#allocation12_spill] sm:$0xff] %v7732_v47  ;;  %v6027_v16 = vor.u32 %v6647_v39, %v6024_v25  ;;  %v5635_v39 = vor.u32 %v6549_v31, %v5632_v14  ;;  %v6548_v25 = vld [vmem:[%s6805_s28 + $0x2c4] sm:$0xf0] }
 0x2db   : > { %v3433_v42 = vpack.c.bf16 %v2899_v34, %v2899_v34  ;;  %v4016_v4 = vsel %vm3876_vm4, %v2899_v34, 0.0  ;;  %v4464_v37 = vmul.f32 %v2899_v34, %v2899_v34  ;;  %2288 = vmatmul.bf16.gmra.mxu0 %v5615_v56  ;;  %v3534_v56 = vpack.c.bf16 %v7732_v47, %v7732_v47  ;;  %2543 = vmatmul.bf16.gmra.mxu2 %v6023_v52  ;;  %v5622_v52 = vld [vmem:[%s6805_s28 + $0x2c0] sm:$0xf] }
 0x2dc   : > { %v4017_v45 = vadd.f32 %v4016_v4, %v4015_v44  ;;  %6422 = vmatmul.msk.bf16.gmra.mxu3 %vm1673_vm2, %v6027_v16 }
 0x2dd   : > { %3690 = vst.msk [vmem:[%s6874_s17 + $0x118] sm:$0xf] %vm3619_vm3, %v3433_v42  ;;  %v4789_v36 = vsel %vm3876_vm4, %v4464_v37, 0.0  ;;  %v2504_v42 = vpop.f32.mrf.mxu2 }
 0x2de   : > { %v2905_v54 = vpop.f32.mrf.mxu1  ;;  %v4790_v7 = vadd.f32 %v4789_v36, %v4788_v17  ;;  %3791 = vst.msk [vmem:[%s6874_s17 + $0x2ac] sm:$0xf] %vm3619_vm3, %v3534_v56 }
 0x2df   : > { %v3153_v3 = vpop.f32.mrf.mxu3 }
 0x2e0   : > { %v2251_v44 = vpop.f32.mrf.mxu0  ;;  %v7751_v56 = vadd.f32 %v3153_v3, %v2504_v42  ;;  %v6650_v3 = vld [vmem:[%s6805_s28 + $0x5f4] sm:$0xf0] }
 0x2e1   : > { %v2901_v34 = vadd.f32 %v2900_v5, %v2251_v44  ;;  %v5623_v44 = vor.u32 %v6548_v25, %v5622_v52 }
 0x2e2   : > { %9608 = vst [vmem:[#allocation13_spill] sm:$0xff] %v7751_v56 }
 0x2e3   : > { %v3434_v4 = vpack.c.bf16 %v2901_v34, %v2901_v34  ;;  %v4018_v37 = vsel %vm3876_vm4, %v2901_v34, 0.0  ;;  %v4465_v17 = vmul.f32 %v2901_v34, %v2901_v34 }
 0x2e4   : > { %v4019_v51 = vadd.f32 %v4018_v37, %v4017_v45  ;;  %v3535_v45 = vpack.c.bf16 %v7751_v56, %v7751_v56 }
 0x2e5   : > { %3691 = vst.msk [vmem:[%s6874_s17 + $0x11c] sm:$0xf] %vm3619_vm3, %v3434_v4  ;;  %v4791_v36 = vsel %vm3876_vm4, %v4465_v17, 0.0  ;;  %v2506_v14 = vpop.f32.mrf.mxu2  ;;  %v6030_v4 = vld [vmem:[%s6805_s28 + $0x5f0] sm:$0xf] }
 0x2e6   : > { %v2908_v16 = vpop.f32.mrf.mxu1  ;;  %v4792_v5 = vadd.f32 %v4791_v36, %v4790_v7  ;;  %3792 = vst.msk [vmem:[%s6874_s17 + $0x2b0] sm:$0xf] %vm3619_vm3, %v3535_v45  ;;  %v6031_v36 = vor.u32 %v6650_v3, %v6030_v4  ;;  %v5640_v4 = vld [vmem:[%s6805_s28 + $0x2e8] sm:$0xf0] }
 0x2e7   : > { %v3155_v42 = vpop.f32.mrf.mxu3 }
 0x2e8   : > { %v2254_v34 = vpop.f32.mrf.mxu0  ;;  %v7762_v25 = vadd.f32 %v3155_v42, %v2506_v14  ;;  %v6551_v14 = vld [vmem:[%s6805_s28 + $0x2e4] sm:$0xf] }
 0x2e9   : > { %6373 = vmatmul.msk.bf16.gmra.mxu1 %vm1673_vm2, %v5635_v39  ;;  %v2904_v31 = vadd.f32 %v2903_v55, %v2254_v34  ;;  %v6649_v39 = vld [vmem:[%s6805_s28 + $0x5f4] sm:$0xf]  ;;  %v6032_v55 = vld [vmem:[%s6805_s28 + $0x5f8] sm:$0xf0] }
 0x2ea   : > { %9609 = vst [vmem:[#allocation14_spill] sm:$0xff] %v7762_v25  ;;  %v6035_v56 = vor.u32 %v6649_v39, %v6032_v55  ;;  %v5643_v39 = vor.u32 %v6551_v14, %v5640_v4  ;;  %v6550_v55 = vld [vmem:[%s6805_s28 + $0x2d4] sm:$0xf0] }
 0x2eb   : > { %v3435_v37 = vpack.c.bf16 %v2904_v31, %v2904_v31  ;;  %v4020_v7 = vsel %vm3876_vm4, %v2904_v31, 0.0  ;;  %v4466_v17 = vmul.f32 %v2904_v31, %v2904_v31  ;;  %2293 = vmatmul.bf16.gmra.mxu0 %v5623_v44  ;;  %v3536_v44 = vpack.c.bf16 %v7762_v25, %v7762_v25  ;;  %2548 = vmatmul.bf16.gmra.mxu2 %v6031_v36  ;;  %v5630_v36 = vld [vmem:[%s6805_s28 + $0x2d0] sm:$0xf] }
 0x2ec   : > { %v4021_v52 = vadd.f32 %v4020_v7, %v4019_v51  ;;  %6423 = vmatmul.msk.bf16.gmra.mxu3 %vm1673_vm2, %v6035_v56 }
 0x2ed   : > { %3692 = vst.msk [vmem:[%s6874_s17 + $0x120] sm:$0xf] %vm3619_vm3, %v3435_v37  ;;  %v4793_v34 = vsel %vm3876_vm4, %v4466_v17, 0.0  ;;  %v2509_v37 = vpop.f32.mrf.mxu2 }
 0x2ee   : > { %v2910_v45 = vpop.f32.mrf.mxu1  ;;  %v4794_v47 = vadd.f32 %v4793_v34, %v4792_v5  ;;  %3793 = vst.msk [vmem:[%s6874_s17 + $0x2b4] sm:$0xf] %vm3619_vm3, %v3536_v44 }
 0x2ef   : > { %v3158_v42 = vpop.f32.mrf.mxu3 }
 0x2f0   : > { %v2256_v51 = vpop.f32.mrf.mxu0  ;;  %v7781_v44 = vadd.f32 %v3158_v42, %v2509_v37  ;;  %v6652_v42 = vld [vmem:[%s6805_s28 + $0x604] sm:$0xf0] }
 0x2f1   : > { %v2906_v31 = vadd.f32 %v2905_v54, %v2256_v51  ;;  %v5631_v51 = vor.u32 %v6550_v55, %v5630_v36 }
 0x2f2   : > { %9610 = vst [vmem:[#allocation15_spill] sm:$0xff] %v7781_v44 }
 0x2f3   : > { %v3436_v7 = vpack.c.bf16 %v2906_v31, %v2906_v31  ;;  %v4022_v17 = vsel %vm3876_vm4, %v2906_v31, 0.0  ;;  %v4467_v5 = vmul.f32 %v2906_v31, %v2906_v31 }
 0x2f4   : > { %v4023_v3 = vadd.f32 %v4022_v17, %v4021_v52  ;;  %v3537_v52 = vpack.c.bf16 %v7781_v44, %v7781_v44 }
 0x2f5   : > { %3693 = vst.msk [vmem:[%s6874_s17 + $0x124] sm:$0xf] %vm3619_vm3, %v3436_v7  ;;  %v4795_v34 = vsel %vm3876_vm4, %v4467_v5, 0.0  ;;  %v2511_v4 = vpop.f32.mrf.mxu2  ;;  %v6038_v7 = vld [vmem:[%s6805_s28 + $0x600] sm:$0xf] }
 0x2f6   : > { %v2913_v56 = vpop.f32.mrf.mxu1  ;;  %v4796_v54 = vadd.f32 %v4795_v34, %v4794_v47  ;;  %3794 = vst.msk [vmem:[%s6874_s17 + $0x2b8] sm:$0xf] %vm3619_vm3, %v3537_v52  ;;  %v6039_v34 = vor.u32 %v6652_v42, %v6038_v7  ;;  %v5648_v7 = vld [vmem:[%s6805_s28 + $0x2f8] sm:$0xf0] }
 0x2f7   : > { %v3160_v37 = vpop.f32.mrf.mxu3 }
 0x2f8   : > { %v2259_v31 = vpop.f32.mrf.mxu0  ;;  %v7792_v55 = vadd.f32 %v3160_v37, %v2511_v4  ;;  %v6553_v4 = vld [vmem:[%s6805_s28 + $0x2f4] sm:$0xf] }
 0x2f9   : > { %6374 = vmatmul.msk.bf16.gmra.mxu1 %vm1673_vm2, %v5643_v39  ;;  %v2909_v14 = vadd.f32 %v2908_v16, %v2259_v31  ;;  %v6651_v39 = vld [vmem:[%s6805_s28 + $0x604] sm:$0xf]  ;;  %v6040_v16 = vld [vmem:[%s6805_s28 + $0x608] sm:$0xf0] }
 0x2fa   : > { %9611 = vst [vmem:[#allocation16_spill] sm:$0xff] %v7792_v55  ;;  %v6043_v44 = vor.u32 %v6651_v39, %v6040_v16  ;;  %v5651_v39 = vor.u32 %v6553_v4, %v5648_v7  ;;  %v6552_v16 = vld [vmem:[%s6805_s28 + $0x2e4] sm:$0xf0] }
 0x2fb   : > { %v3437_v17 = vpack.c.bf16 %v2909_v14, %v2909_v14  ;;  %v4024_v47 = vsel %vm3876_vm4, %v2909_v14, 0.0  ;;  %v4468_v5 = vmul.f32 %v2909_v14, %v2909_v14  ;;  %2298 = vmatmul.bf16.gmra.mxu0 %v5631_v51  ;;  %v3538_v51 = vpack.c.bf16 %v7792_v55, %v7792_v55  ;;  %2553 = vmatmul.bf16.gmra.mxu2 %v6039_v34  ;;  %v5638_v34 = vld [vmem:[%s6805_s28 + $0x2e0] sm:$0xf] }
 0x2fc   : > { %v4025_v36 = vadd.f32 %v4024_v47, %v4023_v3  ;;  %6424 = vmatmul.msk.bf16.gmra.mxu3 %vm1673_vm2, %v6043_v44 }
 0x2fd   : > { %3694 = vst.msk [vmem:[%s6874_s17 + $0x128] sm:$0xf] %vm3619_vm3, %v3437_v17  ;;  %v4797_v31 = vsel %vm3876_vm4, %v4468_v5, 0.0  ;;  %v2514_v17 = vpop.f32.mrf.mxu2 }
 0x2fe   : > { %v2915_v52 = vpop.f32.mrf.mxu1  ;;  %v4798_v25 = vadd.f32 %v4797_v31, %v4796_v54  ;;  %3795 = vst.msk [vmem:[%s6874_s17 + $0x2bc] sm:$0xf] %vm3619_vm3, %v3538_v51 }
 0x2ff   : > { %v3163_v37 = vpop.f32.mrf.mxu3 }
 0x300   : > { %v2261_v3 = vpop.f32.mrf.mxu0  ;;  %v7811_v51 = vadd.f32 %v3163_v37, %v2514_v17  ;;  %v6654_v37 = vld [vmem:[%s6805_s28 + $0x614] sm:$0xf0] }
 0x301   : > { %v2911_v14 = vadd.f32 %v2910_v45, %v2261_v3  ;;  %v5639_v3 = vor.u32 %v6552_v16, %v5638_v34 }
 0x302   : > { %9612 = vst [vmem:[#allocation17_spill] sm:$0xff] %v7811_v51 }
 0x303   : > { %v3438_v47 = vpack.c.bf16 %v2911_v14, %v2911_v14  ;;  %v4026_v5 = vsel %vm3876_vm4, %v2911_v14, 0.0  ;;  %v4469_v54 = vmul.f32 %v2911_v14, %v2911_v14 }
 0x304   : > { %v4027_v42 = vadd.f32 %v4026_v5, %v4025_v36  ;;  %v3539_v36 = vpack.c.bf16 %v7811_v51, %v7811_v51 }
 0x305   : > { %3695 = vst.msk [vmem:[%s6874_s17 + $0x12c] sm:$0xf] %vm3619_vm3, %v3438_v47  ;;  %v4799_v31 = vsel %vm3876_vm4, %v4469_v54, 0.0  ;;  %v2516_v7 = vpop.f32.mrf.mxu2  ;;  %v6046_v47 = vld [vmem:[%s6805_s28 + $0x610] sm:$0xf] }
 0x306   : > { %v2918_v44 = vpop.f32.mrf.mxu1  ;;  %v4800_v45 = vadd.f32 %v4799_v31, %v4798_v25  ;;  %3796 = vst.msk [vmem:[%s6874_s17 + $0x2c0] sm:$0xf] %vm3619_vm3, %v3539_v36  ;;  %v6047_v31 = vor.u32 %v6654_v37, %v6046_v47  ;;  %v5656_v47 = vld [vmem:[%s6805_s28 + $0x308] sm:$0xf0] }
 0x307   : > { %v3165_v17 = vpop.f32.mrf.mxu3 }
 0x308   : > { %v2264_v14 = vpop.f32.mrf.mxu0  ;;  %v7822_v16 = vadd.f32 %v3165_v17, %v2516_v7  ;;  %v6555_v7 = vld [vmem:[%s6805_s28 + $0x304] sm:$0xf] }
 0x309   : > { %6375 = vmatmul.msk.bf16.gmra.mxu1 %vm1673_vm2, %v5651_v39  ;;  %v2914_v4 = vadd.f32 %v2913_v56, %v2264_v14  ;;  %v6653_v39 = vld [vmem:[%s6805_s28 + $0x614] sm:$0xf]  ;;  %v6048_v56 = vld [vmem:[%s6805_s28 + $0x618] sm:$0xf0] }
 0x30a   : > { %9613 = vst [vmem:[#allocation18_spill] sm:$0xff] %v7822_v16  ;;  %v6051_v51 = vor.u32 %v6653_v39, %v6048_v56  ;;  %v5659_v39 = vor.u32 %v6555_v7, %v5656_v47  ;;  %v6554_v56 = vld [vmem:[%s6805_s28 + $0x2f4] sm:$0xf0] }
 0x30b   : > { %v3439_v5 = vpack.c.bf16 %v2914_v4, %v2914_v4  ;;  %v4028_v25 = vsel %vm3876_vm4, %v2914_v4, 0.0  ;;  %v4470_v54 = vmul.f32 %v2914_v4, %v2914_v4  ;;  %2303 = vmatmul.bf16.gmra.mxu0 %v5639_v3  ;;  %v3540_v3 = vpack.c.bf16 %v7822_v16, %v7822_v16  ;;  %2558 = vmatmul.bf16.gmra.mxu2 %v6047_v31  ;;  %v5646_v31 = vld [vmem:[%s6805_s28 + $0x2f0] sm:$0xf] }
 0x30c   : > { %v4029_v34 = vadd.f32 %v4028_v25, %v4027_v42  ;;  %6425 = vmatmul.msk.bf16.gmra.mxu3 %vm1673_vm2, %v6051_v51 }
 0x30d   : > { %3696 = vst.msk [vmem:[%s6874_s17 + $0x130] sm:$0xf] %vm3619_vm3, %v3439_v5  ;;  %v4801_v14 = vsel %vm3876_vm4, %v4470_v54, 0.0  ;;  %v2519_v5 = vpop.f32.mrf.mxu2 }
 0x30e   : > { %v2920_v36 = vpop.f32.mrf.mxu1  ;;  %v4802_v55 = vadd.f32 %v4801_v14, %v4800_v45  ;;  %3797 = vst.msk [vmem:[%s6874_s17 + $0x2c4] sm:$0xf] %vm3619_vm3, %v3540_v3 }
 0x30f   : > { %v3168_v17 = vpop.f32.mrf.mxu3 }
 0x310   : > { %v2266_v42 = vpop.f32.mrf.mxu0  ;;  %v7841_v3 = vadd.f32 %v3168_v17, %v2519_v5  ;;  %v6656_v17 = vld [vmem:[%s6805_s28 + $0x624] sm:$0xf0] }
 0x311   : > { %v2916_v4 = vadd.f32 %v2915_v52, %v2266_v42  ;;  %v5647_v42 = vor.u32 %v6554_v56, %v5646_v31 }
 0x312   : > { %9614 = vst [vmem:[#allocation19_spill] sm:$0xff] %v7841_v3 }
 0x313   : > { %v3440_v25 = vpack.c.bf16 %v2916_v4, %v2916_v4  ;;  %v4030_v54 = vsel %vm3876_vm4, %v2916_v4, 0.0  ;;  %v4471_v45 = vmul.f32 %v2916_v4, %v2916_v4 }
 0x314   : > { %v4031_v37 = vadd.f32 %v4030_v54, %v4029_v34  ;;  %v3541_v34 = vpack.c.bf16 %v7841_v3, %v7841_v3 }
 0x315   : > { %3697 = vst.msk [vmem:[%s6874_s17 + $0x134] sm:$0xf] %vm3619_vm3, %v3440_v25  ;;  %v4803_v14 = vsel %vm3876_vm4, %v4471_v45, 0.0  ;;  %v2521_v47 = vpop.f32.mrf.mxu2  ;;  %v6054_v25 = vld [vmem:[%s6805_s28 + $0x620] sm:$0xf] }
 0x316   : > { %v2923_v51 = vpop.f32.mrf.mxu1  ;;  %v4804_v52 = vadd.f32 %v4803_v14, %v4802_v55  ;;  %3798 = vst.msk [vmem:[%s6874_s17 + $0x2c8] sm:$0xf] %vm3619_vm3, %v3541_v34  ;;  %v6055_v14 = vor.u32 %v6656_v17, %v6054_v25  ;;  %v5664_v25 = vld [vmem:[%s6805_s28 + $0x318] sm:$0xf0] }
 0x317   : > { %v3170_v5 = vpop.f32.mrf.mxu3 }
 0x318   : > { %v2269_v4 = vpop.f32.mrf.mxu0  ;;  %v7852_v56 = vadd.f32 %v3170_v5, %v2521_v47  ;;  %v6557_v47 = vld [vmem:[%s6805_s28 + $0x314] sm:$0xf] }
 0x319   : > { %6376 = vmatmul.msk.bf16.gmra.mxu1 %vm1673_vm2, %v5659_v39  ;;  %v2919_v7 = vadd.f32 %v2918_v44, %v2269_v4  ;;  %v6655_v39 = vld [vmem:[%s6805_s28 + $0x624] sm:$0xf]  ;;  %v6056_v44 = vld [vmem:[%s6805_s28 + $0x628] sm:$0xf0] }
 0x31a   : > { %9615 = vst [vmem:[#allocation20_spill] sm:$0xff] %v7852_v56  ;;  %v6059_v3 = vor.u32 %v6655_v39, %v6056_v44  ;;  %v5667_v39 = vor.u32 %v6557_v47, %v5664_v25  ;;  %v6556_v44 = vld [vmem:[%s6805_s28 + $0x304] sm:$0xf0] }
 0x31b   : > { %v3441_v54 = vpack.c.bf16 %v2919_v7, %v2919_v7  ;;  %v4032_v55 = vsel %vm3876_vm4, %v2919_v7, 0.0  ;;  %v4472_v45 = vmul.f32 %v2919_v7, %v2919_v7  ;;  %2308 = vmatmul.bf16.gmra.mxu0 %v5647_v42  ;;  %v3542_v42 = vpack.c.bf16 %v7852_v56, %v7852_v56  ;;  %2563 = vmatmul.bf16.gmra.mxu2 %v6055_v14  ;;  %v5654_v14 = vld [vmem:[%s6805_s28 + $0x300] sm:$0xf] }
 0x31c   : > { %v4033_v31 = vadd.f32 %v4032_v55, %v4031_v37  ;;  %6426 = vmatmul.msk.bf16.gmra.mxu3 %vm1673_vm2, %v6059_v3 }
 0x31d   : > { %3698 = vst.msk [vmem:[%s6874_s17 + $0x138] sm:$0xf] %vm3619_vm3, %v3441_v54  ;;  %v4805_v4 = vsel %vm3876_vm4, %v4472_v45, 0.0  ;;  %v2524_v54 = vpop.f32.mrf.mxu2 }
 0x31e   : > { %v2925_v34 = vpop.f32.mrf.mxu1  ;;  %v4806_v16 = vadd.f32 %v4805_v4, %v4804_v52  ;;  %3799 = vst.msk [vmem:[%s6874_s17 + $0x2cc] sm:$0xf] %vm3619_vm3, %v3542_v42 }
 0x31f   : > { %v3173_v5 = vpop.f32.mrf.mxu3 }
 0x320   : > { %v2271_v37 = vpop.f32.mrf.mxu0  ;;  %v7871_v42 = vadd.f32 %v3173_v5, %v2524_v54  ;;  %v6658_v5 = vld [vmem:[%s6805_s28 + $0x634] sm:$0xf0] }
 0x321   : > { %v2921_v7 = vadd.f32 %v2920_v36, %v2271_v37  ;;  %v5655_v37 = vor.u32 %v6556_v44, %v5654_v14 }
 0x322   : > { %9616 = vst [vmem:[#allocation21_spill] sm:$0xff] %v7871_v42 }
 0x323   : > { %v3442_v55 = vpack.c.bf16 %v2921_v7, %v2921_v7  ;;  %v4034_v45 = vsel %vm3876_vm4, %v2921_v7, 0.0  ;;  %v4473_v52 = vmul.f32 %v2921_v7, %v2921_v7 }
 0x324   : > { %v4035_v17 = vadd.f32 %v4034_v45, %v4033_v31  ;;  %v3543_v31 = vpack.c.bf16 %v7871_v42, %v7871_v42 }
 0x325   : > { %3699 = vst.msk [vmem:[%s6874_s17 + $0x13c] sm:$0xf] %vm3619_vm3, %v3442_v55  ;;  %v4807_v4 = vsel %vm3876_vm4, %v4473_v52, 0.0  ;;  %v2526_v25 = vpop.f32.mrf.mxu2  ;;  %v6062_v55 = vld [vmem:[%s6805_s28 + $0x630] sm:$0xf] }
 0x326   : > { %v2928_v3 = vpop.f32.mrf.mxu1  ;;  %v4808_v36 = vadd.f32 %v4807_v4, %v4806_v16  ;;  %3800 = vst.msk [vmem:[%s6874_s17 + $0x2d0] sm:$0xf] %vm3619_vm3, %v3543_v31  ;;  %v6063_v4 = vor.u32 %v6658_v5, %v6062_v55  ;;  %v5672_v55 = vld [vmem:[%s6805_s28 + $0x328] sm:$0xf0] }
 0x327   : > { %v3175_v54 = vpop.f32.mrf.mxu3 }
 0x328   : > { %v2274_v7 = vpop.f32.mrf.mxu0  ;;  %v7882_v44 = vadd.f32 %v3175_v54, %v2526_v25  ;;  %v6559_v25 = vld [vmem:[%s6805_s28 + $0x324] sm:$0xf] }
 0x329   : > { %6377 = vmatmul.msk.bf16.gmra.mxu1 %vm1673_vm2, %v5667_v39  ;;  %v2924_v47 = vadd.f32 %v2923_v51, %v2274_v7  ;;  %v6657_v39 = vld [vmem:[%s6805_s28 + $0x634] sm:$0xf]  ;;  %v6064_v51 = vld [vmem:[%s6805_s28 + $0x638] sm:$0xf0] }
 0x32a   : > { %9617 = vst [vmem:[#allocation22_spill] sm:$0xff] %v7882_v44  ;;  %v6067_v42 = vor.u32 %v6657_v39, %v6064_v51  ;;  %v5675_v39 = vor.u32 %v6559_v25, %v5672_v55  ;;  %v6558_v51 = vld [vmem:[%s6805_s28 + $0x314] sm:$0xf0] }
 0x32b   : > { %v3443_v45 = vpack.c.bf16 %v2924_v47, %v2924_v47  ;;  %v4036_v16 = vsel %vm3876_vm4, %v2924_v47, 0.0  ;;  %v4474_v52 = vmul.f32 %v2924_v47, %v2924_v47  ;;  %2313 = vmatmul.bf16.gmra.mxu0 %v5655_v37  ;;  %v3544_v37 = vpack.c.bf16 %v7882_v44, %v7882_v44  ;;  %2568 = vmatmul.bf16.gmra.mxu2 %v6063_v4  ;;  %v5662_v4 = vld [vmem:[%s6805_s28 + $0x310] sm:$0xf] }
 0x32c   : > { %v4037_v14 = vadd.f32 %v4036_v16, %v4035_v17  ;;  %6427 = vmatmul.msk.bf16.gmra.mxu3 %vm1673_vm2, %v6067_v42 }
 0x32d   : > { %3700 = vst.msk [vmem:[%s6874_s17 + $0x140] sm:$0xf] %vm3619_vm3, %v3443_v45  ;;  %v4809_v7 = vsel %vm3876_vm4, %v4474_v52, 0.0  ;;  %v2529_v45 = vpop.f32.mrf.mxu2 }
 0x32e   : > { %v2930_v31 = vpop.f32.mrf.mxu1  ;;  %v4810_v56 = vadd.f32 %v4809_v7, %v4808_v36  ;;  %3801 = vst.msk [vmem:[%s6874_s17 + $0x2d4] sm:$0xf] %vm3619_vm3, %v3544_v37 }
 0x32f   : > { %v3178_v54 = vpop.f32.mrf.mxu3 }
 0x330   : > { %v2276_v17 = vpop.f32.mrf.mxu0  ;;  %v7901_v37 = vadd.f32 %v3178_v54, %v2529_v45  ;;  %v6660_v54 = vld [vmem:[%s6805_s28 + $0x644] sm:$0xf0] }
 0x331   : > { %v2926_v47 = vadd.f32 %v2925_v34, %v2276_v17  ;;  %v5663_v17 = vor.u32 %v6558_v51, %v5662_v4 }
 0x332   : > { %9618 = vst [vmem:[#allocation23_spill] sm:$0xff] %v7901_v37 }
 0x333   : > { %v3444_v16 = vpack.c.bf16 %v2926_v47, %v2926_v47  ;;  %v4038_v52 = vsel %vm3876_vm4, %v2926_v47, 0.0  ;;  %v4475_v36 = vmul.f32 %v2926_v47, %v2926_v47 }
 0x334   : > { %v4039_v5 = vadd.f32 %v4038_v52, %v4037_v14  ;;  %v3545_v14 = vpack.c.bf16 %v7901_v37, %v7901_v37 }
 0x335   : > { %3701 = vst.msk [vmem:[%s6874_s17 + $0x144] sm:$0xf] %vm3619_vm3, %v3444_v16  ;;  %v4811_v7 = vsel %vm3876_vm4, %v4475_v36, 0.0  ;;  %v2531_v55 = vpop.f32.mrf.mxu2  ;;  %v6070_v16 = vld [vmem:[%s6805_s28 + $0x640] sm:$0xf] }
 0x336   : > { %v2933_v42 = vpop.f32.mrf.mxu1  ;;  %v4812_v34 = vadd.f32 %v4811_v7, %v4810_v56  ;;  %3802 = vst.msk [vmem:[%s6874_s17 + $0x2d8] sm:$0xf] %vm3619_vm3, %v3545_v14  ;;  %v6071_v7 = vor.u32 %v6660_v54, %v6070_v16  ;;  %v5680_v16 = vld [vmem:[%s6805_s28 + $0x338] sm:$0xf0] }
 0x337   : > { %v3180_v45 = vpop.f32.mrf.mxu3 }
 0x338   : > { %v2279_v47 = vpop.f32.mrf.mxu0  ;;  %v7912_v51 = vadd.f32 %v3180_v45, %v2531_v55  ;;  %v6561_v55 = vld [vmem:[%s6805_s28 + $0x334] sm:$0xf] }
 0x339   : > { %6378 = vmatmul.msk.bf16.gmra.mxu1 %vm1673_vm2, %v5675_v39  ;;  %v2929_v25 = vadd.f32 %v2928_v3, %v2279_v47  ;;  %v6659_v39 = vld [vmem:[%s6805_s28 + $0x644] sm:$0xf]  ;;  %v6072_v3 = vld [vmem:[%s6805_s28 + $0x648] sm:$0xf0] }
 0x33a   : > { %9619 = vst [vmem:[#allocation24_spill] sm:$0xff] %v7912_v51  ;;  %v6075_v37 = vor.u32 %v6659_v39, %v6072_v3  ;;  %v5683_v39 = vor.u32 %v6561_v55, %v5680_v16  ;;  %v6560_v3 = vld [vmem:[%s6805_s28 + $0x324] sm:$0xf0] }
 0x33b   : > { %v3445_v52 = vpack.c.bf16 %v2929_v25, %v2929_v25  ;;  %v4040_v56 = vsel %vm3876_vm4, %v2929_v25, 0.0  ;;  %v4476_v36 = vmul.f32 %v2929_v25, %v2929_v25  ;;  %2318 = vmatmul.bf16.gmra.mxu0 %v5663_v17  ;;  %v3546_v17 = vpack.c.bf16 %v7912_v51, %v7912_v51  ;;  %2573 = vmatmul.bf16.gmra.mxu2 %v6071_v7  ;;  %v5670_v7 = vld [vmem:[%s6805_s28 + $0x320] sm:$0xf] }
 0x33c   : > { %v4041_v4 = vadd.f32 %v4040_v56, %v4039_v5  ;;  %6428 = vmatmul.msk.bf16.gmra.mxu3 %vm1673_vm2, %v6075_v37 }
 0x33d   : > { %3702 = vst.msk [vmem:[%s6874_s17 + $0x148] sm:$0xf] %vm3619_vm3, %v3445_v52  ;;  %v4813_v47 = vsel %vm3876_vm4, %v4476_v36, 0.0  ;;  %v2534_v52 = vpop.f32.mrf.mxu2 }
 0x33e   : > { %v2935_v14 = vpop.f32.mrf.mxu1  ;;  %v4814_v44 = vadd.f32 %v4813_v47, %v4812_v34  ;;  %3803 = vst.msk [vmem:[%s6874_s17 + $0x2dc] sm:$0xf] %vm3619_vm3, %v3546_v17 }
 0x33f   : > { %v3183_v45 = vpop.f32.mrf.mxu3 }
 0x340   : > { %v2281_v5 = vpop.f32.mrf.mxu0  ;;  %v7931_v17 = vadd.f32 %v3183_v45, %v2534_v52  ;;  %v6662_v45 = vld [vmem:[%s6805_s28 + $0x654] sm:$0xf0] }
 0x341   : > { %v2931_v25 = vadd.f32 %v2930_v31, %v2281_v5  ;;  %v5671_v5 = vor.u32 %v6560_v3, %v5670_v7 }
 0x342   : > { %9620 = vst [vmem:[#allocation25_spill] sm:$0xff] %v7931_v17 }
 0x343   : > { %v3446_v56 = vpack.c.bf16 %v2931_v25, %v2931_v25  ;;  %v4042_v36 = vsel %vm3876_vm4, %v2931_v25, 0.0  ;;  %v4477_v34 = vmul.f32 %v2931_v25, %v2931_v25 }
 0x344   : > { %v4043_v54 = vadd.f32 %v4042_v36, %v4041_v4  ;;  %v3547_v4 = vpack.c.bf16 %v7931_v17, %v7931_v17 }
 0x345   : > { %3703 = vst.msk [vmem:[%s6874_s17 + $0x14c] sm:$0xf] %vm3619_vm3, %v3446_v56  ;;  %v4815_v47 = vsel %vm3876_vm4, %v4477_v34, 0.0  ;;  %v2536_v16 = vpop.f32.mrf.mxu2  ;;  %v6078_v56 = vld [vmem:[%s6805_s28 + $0x650] sm:$0xf] }
 0x346   : > { %v2938_v37 = vpop.f32.mrf.mxu1  ;;  %v4816_v31 = vadd.f32 %v4815_v47, %v4814_v44  ;;  %3804 = vst.msk [vmem:[%s6874_s17 + $0x2e0] sm:$0xf] %vm3619_vm3, %v3547_v4  ;;  %v6079_v47 = vor.u32 %v6662_v45, %v6078_v56  ;;  %v5688_v56 = vld [vmem:[%s6805_s28 + $0x348] sm:$0xf0] }
 0x347   : > { %v3185_v52 = vpop.f32.mrf.mxu3 }
 0x348   : > { %v2284_v25 = vpop.f32.mrf.mxu0  ;;  %v7942_v3 = vadd.f32 %v3185_v52, %v2536_v16  ;;  %v6563_v16 = vld [vmem:[%s6805_s28 + $0x344] sm:$0xf] }
 0x349   : > { %6379 = vmatmul.msk.bf16.gmra.mxu1 %vm1673_vm2, %v5683_v39  ;;  %v2934_v55 = vadd.f32 %v2933_v42, %v2284_v25  ;;  %v6661_v39 = vld [vmem:[%s6805_s28 + $0x654] sm:$0xf]  ;;  %v6080_v42 = vld [vmem:[%s6805_s28 + $0x658] sm:$0xf0] }
 0x34a   : > { %9621 = vst [vmem:[#allocation26_spill] sm:$0xff] %v7942_v3  ;;  %v6083_v17 = vor.u32 %v6661_v39, %v6080_v42  ;;  %v5691_v39 = vor.u32 %v6563_v16, %v5688_v56  ;;  %v6562_v42 = vld [vmem:[%s6805_s28 + $0x334] sm:$0xf0] }
 0x34b   : > { %v3447_v36 = vpack.c.bf16 %v2934_v55, %v2934_v55  ;;  %v4044_v44 = vsel %vm3876_vm4, %v2934_v55, 0.0  ;;  %v4478_v34 = vmul.f32 %v2934_v55, %v2934_v55  ;;  %2323 = vmatmul.bf16.gmra.mxu0 %v5671_v5  ;;  %v3548_v5 = vpack.c.bf16 %v7942_v3, %v7942_v3  ;;  %2578 = vmatmul.bf16.gmra.mxu2 %v6079_v47  ;;  %v5678_v47 = vld [vmem:[%s6805_s28 + $0x330] sm:$0xf] }
 0x34c   : > { %v4045_v7 = vadd.f32 %v4044_v44, %v4043_v54  ;;  %6429 = vmatmul.msk.bf16.gmra.mxu3 %vm1673_vm2, %v6083_v17 }
 0x34d   : > { %3704 = vst.msk [vmem:[%s6874_s17 + $0x150] sm:$0xf] %vm3619_vm3, %v3447_v36  ;;  %v4817_v25 = vsel %vm3876_vm4, %v4478_v34, 0.0 }
 0x34e   : > { %v2940_v4 = vpop.f32.mrf.mxu1  ;;  %v4818_v51 = vadd.f32 %v4817_v25, %v4816_v31  ;;  %3805 = vst.msk [vmem:[%s6874_s17 + $0x2e4] sm:$0xf] %vm3619_vm3, %v3548_v5  ;;  %v2539_v36 = vpop.f32.mrf.mxu2 }
 0x34f   : > { %v3188_v52 = vpop.f32.mrf.mxu3 }
 0x350   : > { %v2286_v54 = vpop.f32.mrf.mxu0  ;;  %v7961_v5 = vadd.f32 %v3188_v52, %v2539_v36  ;;  %v6664_v52 = vld [vmem:[%s6805_s28 + $0x664] sm:$0xf0] }
 0x351   : > { %v2936_v55 = vadd.f32 %v2935_v14, %v2286_v54  ;;  %v5679_v54 = vor.u32 %v6562_v42, %v5678_v47 }
 0x352   : > { %9622 = vst [vmem:[#allocation27_spill] sm:$0xff] %v7961_v5 }
 0x353   : > { %v3448_v44 = vpack.c.bf16 %v2936_v55, %v2936_v55  ;;  %v4046_v34 = vsel %vm3876_vm4, %v2936_v55, 0.0  ;;  %v4479_v31 = vmul.f32 %v2936_v55, %v2936_v55 }
 0x354   : > { %v4047_v45 = vadd.f32 %v4046_v34, %v4045_v7  ;;  %v3549_v7 = vpack.c.bf16 %v7961_v5, %v7961_v5 }
 0x355   : > { %3705 = vst.msk [vmem:[%s6874_s17 + $0x154] sm:$0xf] %vm3619_vm3, %v3448_v44  ;;  %v4819_v25 = vsel %vm3876_vm4, %v4479_v31, 0.0  ;;  %v6086_v44 = vld [vmem:[%s6805_s28 + $0x660] sm:$0xf] }
 0x356   : > { %v2943_v17 = vpop.f32.mrf.mxu1  ;;  %v4820_v14 = vadd.f32 %v4819_v25, %v4818_v51  ;;  %3806 = vst.msk [vmem:[%s6874_s17 + $0x2e8] sm:$0xf] %vm3619_vm3, %v3549_v7  ;;  %v2541_v56 = vpop.f32.mrf.mxu2  ;;  %v6087_v25 = vor.u32 %v6664_v52, %v6086_v44  ;;  %v5696_v44 = vld [vmem:[%s6805_s28 + $0x358] sm:$0xf0] }
 0x357   : > { %v3190_v36 = vpop.f32.mrf.mxu3 }
 0x358   : > { %v2289_v55 = vpop.f32.mrf.mxu0  ;;  %v7972_v42 = vadd.f32 %v3190_v36, %v2541_v56  ;;  %v6565_v56 = vld [vmem:[%s6805_s28 + $0x354] sm:$0xf] }
 0x359   : > { %6380 = vmatmul.msk.bf16.gmra.mxu1 %vm1673_vm2, %v5691_v39  ;;  %v2939_v16 = vadd.f32 %v2938_v37, %v2289_v55  ;;  %v6663_v39 = vld [vmem:[%s6805_s28 + $0x664] sm:$0xf]  ;;  %v6088_v37 = vld [vmem:[%s6805_s28 + $0x668] sm:$0xf0] }
 0x35a   : > { %9623 = vst [vmem:[#allocation28_spill] sm:$0xff] %v7972_v42  ;;  %v6091_v5 = vor.u32 %v6663_v39, %v6088_v37  ;;  %v5699_v39 = vor.u32 %v6565_v56, %v5696_v44  ;;  %v6564_v37 = vld [vmem:[%s6805_s28 + $0x344] sm:$0xf0] }
 0x35b   : > { %v3449_v34 = vpack.c.bf16 %v2939_v16, %v2939_v16  ;;  %v4048_v51 = vsel %vm3876_vm4, %v2939_v16, 0.0  ;;  %v4480_v31 = vmul.f32 %v2939_v16, %v2939_v16  ;;  %2328 = vmatmul.bf16.gmra.mxu0 %v5679_v54  ;;  %v3550_v54 = vpack.c.bf16 %v7972_v42, %v7972_v42  ;;  %2583 = vmatmul.bf16.gmra.mxu2 %v6087_v25  ;;  %v5686_v25 = vld [vmem:[%s6805_s28 + $0x340] sm:$0xf] }
 0x35c   : > { %v4049_v47 = vadd.f32 %v4048_v51, %v4047_v45  ;;  %6430 = vmatmul.msk.bf16.gmra.mxu3 %vm1673_vm2, %v6091_v5 }
 0x35d   : > { %3706 = vst.msk [vmem:[%s6874_s17 + $0x158] sm:$0xf] %vm3619_vm3, %v3449_v34  ;;  %v4821_v55 = vsel %vm3876_vm4, %v4480_v31, 0.0 }
 0x35e   : > { %v2945_v7 = vpop.f32.mrf.mxu1  ;;  %v4822_v3 = vadd.f32 %v4821_v55, %v4820_v14  ;;  %3807 = vst.msk [vmem:[%s6874_s17 + $0x2ec] sm:$0xf] %vm3619_vm3, %v3550_v54  ;;  %v2544_v34 = vpop.f32.mrf.mxu2 }
 0x35f   : > { %v3193_v36 = vpop.f32.mrf.mxu3 }
 0x360   : > { %v2291_v45 = vpop.f32.mrf.mxu0  ;;  %v7991_v54 = vadd.f32 %v3193_v36, %v2544_v34  ;;  %v6666_v36 = vld [vmem:[%s6805_s28 + $0x674] sm:$0xf0] }
 0x361   : > { %v2941_v16 = vadd.f32 %v2940_v4, %v2291_v45  ;;  %v5687_v45 = vor.u32 %v6564_v37, %v5686_v25 }
 0x362   : > { %9624 = vst [vmem:[#allocation29_spill] sm:$0xff] %v7991_v54 }
 0x363   : > { %v3450_v51 = vpack.c.bf16 %v2941_v16, %v2941_v16  ;;  %v4050_v31 = vsel %vm3876_vm4, %v2941_v16, 0.0  ;;  %v4481_v14 = vmul.f32 %v2941_v16, %v2941_v16 }
 0x364   : > { %v4051_v52 = vadd.f32 %v4050_v31, %v4049_v47  ;;  %v3551_v47 = vpack.c.bf16 %v7991_v54, %v7991_v54 }
 0x365   : > { %3707 = vst.msk [vmem:[%s6874_s17 + $0x15c] sm:$0xf] %vm3619_vm3, %v3450_v51  ;;  %v4823_v55 = vsel %vm3876_vm4, %v4481_v14, 0.0  ;;  %v6094_v51 = vld [vmem:[%s6805_s28 + $0x670] sm:$0xf] }
 0x366   : > { %v2948_v5 = vpop.f32.mrf.mxu1  ;;  %v4824_v4 = vadd.f32 %v4823_v55, %v4822_v3  ;;  %3808 = vst.msk [vmem:[%s6874_s17 + $0x2f0] sm:$0xf] %vm3619_vm3, %v3551_v47  ;;  %v2546_v44 = vpop.f32.mrf.mxu2  ;;  %v6095_v55 = vor.u32 %v6666_v36, %v6094_v51  ;;  %v5704_v51 = vld [vmem:[%s6805_s28 + $0x368] sm:$0xf0] }
 0x367   : > { %v3195_v34 = vpop.f32.mrf.mxu3 }
 0x368   : > { %v2294_v16 = vpop.f32.mrf.mxu0  ;;  %v8002_v37 = vadd.f32 %v3195_v34, %v2546_v44  ;;  %v6567_v44 = vld [vmem:[%s6805_s28 + $0x364] sm:$0xf] }
 0x369   : > { %6381 = vmatmul.msk.bf16.gmra.mxu1 %vm1673_vm2, %v5699_v39  ;;  %v2944_v56 = vadd.f32 %v2943_v17, %v2294_v16  ;;  %v6665_v39 = vld [vmem:[%s6805_s28 + $0x674] sm:$0xf]  ;;  %v6096_v17 = vld [vmem:[%s6805_s28 + $0x678] sm:$0xf0] }
 0x36a   : > { %9625 = vst [vmem:[#allocation30_spill] sm:$0xff] %v8002_v37  ;;  %v6099_v54 = vor.u32 %v6665_v39, %v6096_v17  ;;  %v5707_v39 = vor.u32 %v6567_v44, %v5704_v51  ;;  %v6566_v17 = vld [vmem:[%s6805_s28 + $0x354] sm:$0xf0] }
 0x36b   : > { %v3451_v31 = vpack.c.bf16 %v2944_v56, %v2944_v56  ;;  %v4052_v3 = vsel %vm3876_vm4, %v2944_v56, 0.0  ;;  %v4482_v14 = vmul.f32 %v2944_v56, %v2944_v56  ;;  %2333 = vmatmul.bf16.gmra.mxu0 %v5687_v45  ;;  %v3552_v45 = vpack.c.bf16 %v8002_v37, %v8002_v37  ;;  %2588 = vmatmul.bf16.gmra.mxu2 %v6095_v55  ;;  %v5694_v55 = vld [vmem:[%s6805_s28 + $0x350] sm:$0xf] }
 0x36c   : > { %v4053_v25 = vadd.f32 %v4052_v3, %v4051_v52  ;;  %6431 = vmatmul.msk.bf16.gmra.mxu3 %vm1673_vm2, %v6099_v54 }
 0x36d   : > { %3708 = vst.msk [vmem:[%s6874_s17 + $0x160] sm:$0xf] %vm3619_vm3, %v3451_v31  ;;  %v4825_v16 = vsel %vm3876_vm4, %v4482_v14, 0.0 }
 0x36e   : > { %v2950_v47 = vpop.f32.mrf.mxu1  ;;  %v4826_v42 = vadd.f32 %v4825_v16, %v4824_v4  ;;  %3809 = vst.msk [vmem:[%s6874_s17 + $0x2f4] sm:$0xf] %vm3619_vm3, %v3552_v45  ;;  %v2549_v31 = vpop.f32.mrf.mxu2 }
 0x36f   : > { %v3198_v34 = vpop.f32.mrf.mxu3 }
 0x370   : > { %v2296_v52 = vpop.f32.mrf.mxu0  ;;  %v8021_v45 = vadd.f32 %v3198_v34, %v2549_v31  ;;  %v6668_v34 = vld [vmem:[%s6805_s28 + $0x684] sm:$0xf0] }
 0x371   : > { %v2946_v56 = vadd.f32 %v2945_v7, %v2296_v52  ;;  %v5695_v52 = vor.u32 %v6566_v17, %v5694_v55 }
 0x372   : > { %9626 = vst [vmem:[#allocation31_spill] sm:$0xff] %v8021_v45 }
 0x373   : > { %v3452_v3 = vpack.c.bf16 %v2946_v56, %v2946_v56  ;;  %v4054_v14 = vsel %vm3876_vm4, %v2946_v56, 0.0  ;;  %v4483_v4 = vmul.f32 %v2946_v56, %v2946_v56 }
 0x374   : > { %v4055_v36 = vadd.f32 %v4054_v14, %v4053_v25  ;;  %v3553_v25 = vpack.c.bf16 %v8021_v45, %v8021_v45 }
 0x375   : > { %3709 = vst.msk [vmem:[%s6874_s17 + $0x164] sm:$0xf] %vm3619_vm3, %v3452_v3  ;;  %v4827_v16 = vsel %vm3876_vm4, %v4483_v4, 0.0  ;;  %v6102_v3 = vld [vmem:[%s6805_s28 + $0x680] sm:$0xf] }
 0x376   : > { %v2953_v54 = vpop.f32.mrf.mxu1  ;;  %v4828_v7 = vadd.f32 %v4827_v16, %v4826_v42  ;;  %3810 = vst.msk [vmem:[%s6874_s17 + $0x2f8] sm:$0xf] %vm3619_vm3, %v3553_v25  ;;  %v2551_v51 = vpop.f32.mrf.mxu2  ;;  %v6103_v16 = vor.u32 %v6668_v34, %v6102_v3  ;;  %v5712_v3 = vld [vmem:[%s6805_s28 + $0x378] sm:$0xf0] }
 0x377   : > { %v3200_v31 = vpop.f32.mrf.mxu3 }
 0x378   : > { %v2299_v56 = vpop.f32.mrf.mxu0  ;;  %v8032_v17 = vadd.f32 %v3200_v31, %v2551_v51  ;;  %v6569_v51 = vld [vmem:[%s6805_s28 + $0x374] sm:$0xf] }
 0x379   : > { %6382 = vmatmul.msk.bf16.gmra.mxu1 %vm1673_vm2, %v5707_v39  ;;  %v2949_v44 = vadd.f32 %v2948_v5, %v2299_v56  ;;  %v6667_v39 = vld [vmem:[%s6805_s28 + $0x684] sm:$0xf]  ;;  %v6104_v5 = vld [vmem:[%s6805_s28 + $0x688] sm:$0xf0] }
 0x37a   : > { %9627 = vst [vmem:[#allocation32_spill] sm:$0xff] %v8032_v17  ;;  %v6107_v45 = vor.u32 %v6667_v39, %v6104_v5  ;;  %v5715_v39 = vor.u32 %v6569_v51, %v5712_v3  ;;  %v6568_v5 = vld [vmem:[%s6805_s28 + $0x364] sm:$0xf0] }
 0x37b   : > { %v3453_v14 = vpack.c.bf16 %v2949_v44, %v2949_v44  ;;  %v4056_v42 = vsel %vm3876_vm4, %v2949_v44, 0.0  ;;  %v4484_v4 = vmul.f32 %v2949_v44, %v2949_v44  ;;  %2338 = vmatmul.bf16.gmra.mxu0 %v5695_v52  ;;  %v3554_v52 = vpack.c.bf16 %v8032_v17, %v8032_v17  ;;  %2593 = vmatmul.bf16.gmra.mxu2 %v6103_v16  ;;  %v5702_v16 = vld [vmem:[%s6805_s28 + $0x360] sm:$0xf] }
 0x37c   : > { %v4057_v55 = vadd.f32 %v4056_v42, %v4055_v36  ;;  %6432 = vmatmul.msk.bf16.gmra.mxu3 %vm1673_vm2, %v6107_v45 }
 0x37d   : > { %3710 = vst.msk [vmem:[%s6874_s17 + $0x168] sm:$0xf] %vm3619_vm3, %v3453_v14  ;;  %v4829_v56 = vsel %vm3876_vm4, %v4484_v4, 0.0 }
 0x37e   : > { %v2955_v25 = vpop.f32.mrf.mxu1  ;;  %v4830_v37 = vadd.f32 %v4829_v56, %v4828_v7  ;;  %3811 = vst.msk [vmem:[%s6874_s17 + $0x2fc] sm:$0xf] %vm3619_vm3, %v3554_v52  ;;  %v2554_v14 = vpop.f32.mrf.mxu2 }
 0x37f   : > { %v3203_v31 = vpop.f32.mrf.mxu3 }
 0x380   : > { %v2301_v36 = vpop.f32.mrf.mxu0  ;;  %v8051_v52 = vadd.f32 %v3203_v31, %v2554_v14  ;;  %v6670_v31 = vld [vmem:[%s6805_s28 + $0x694] sm:$0xf0] }
 0x381   : > { %v2951_v44 = vadd.f32 %v2950_v47, %v2301_v36  ;;  %v5703_v36 = vor.u32 %v6568_v5, %v5702_v16 }
 0x382   : > { %9628 = vst [vmem:[#allocation33_spill] sm:$0xff] %v8051_v52 }
 0x383   : > { %v3454_v42 = vpack.c.bf16 %v2951_v44, %v2951_v44  ;;  %v4058_v4 = vsel %vm3876_vm4, %v2951_v44, 0.0  ;;  %v4485_v7 = vmul.f32 %v2951_v44, %v2951_v44 }
 0x384   : > { %v4059_v34 = vadd.f32 %v4058_v4, %v4057_v55  ;;  %v3555_v55 = vpack.c.bf16 %v8051_v52, %v8051_v52 }
 0x385   : > { %3711 = vst.msk [vmem:[%s6874_s17 + $0x16c] sm:$0xf] %vm3619_vm3, %v3454_v42  ;;  %v4831_v56 = vsel %vm3876_vm4, %v4485_v7, 0.0  ;;  %v6110_v42 = vld [vmem:[%s6805_s28 + $0x690] sm:$0xf] }
 0x386   : > { %v2958_v45 = vpop.f32.mrf.mxu1  ;;  %v4832_v47 = vadd.f32 %v4831_v56, %v4830_v37  ;;  %3812 = vst.msk [vmem:[%s6874_s17 + $0x300] sm:$0xf] %vm3619_vm3, %v3555_v55  ;;  %v2556_v3 = vpop.f32.mrf.mxu2  ;;  %v6111_v56 = vor.u32 %v6670_v31, %v6110_v42  ;;  %v5720_v42 = vld [vmem:[%s6805_s28 + $0x388] sm:$0xf0] }
 0x387   : > { %v3205_v14 = vpop.f32.mrf.mxu3 }
 0x388   : > { %v2304_v44 = vpop.f32.mrf.mxu0  ;;  %v8062_v5 = vadd.f32 %v3205_v14, %v2556_v3  ;;  %v6571_v3 = vld [vmem:[%s6805_s28 + $0x384] sm:$0xf] }
 0x389   : > { %6383 = vmatmul.msk.bf16.gmra.mxu1 %vm1673_vm2, %v5715_v39  ;;  %v2954_v51 = vadd.f32 %v2953_v54, %v2304_v44  ;;  %v6669_v39 = vld [vmem:[%s6805_s28 + $0x694] sm:$0xf]  ;;  %v6112_v54 = vld [vmem:[%s6805_s28 + $0x698] sm:$0xf0] }
 0x38a   : > { %9629 = vst [vmem:[#allocation34_spill] sm:$0xff] %v8062_v5  ;;  %v6115_v52 = vor.u32 %v6669_v39, %v6112_v54  ;;  %v5723_v39 = vor.u32 %v6571_v3, %v5720_v42  ;;  %v6570_v54 = vld [vmem:[%s6805_s28 + $0x374] sm:$0xf0] }
 0x38b   : > { %v3455_v4 = vpack.c.bf16 %v2954_v51, %v2954_v51  ;;  %v4060_v37 = vsel %vm3876_vm4, %v2954_v51, 0.0  ;;  %v4486_v7 = vmul.f32 %v2954_v51, %v2954_v51  ;;  %2343 = vmatmul.bf16.gmra.mxu0 %v5703_v36  ;;  %v3556_v36 = vpack.c.bf16 %v8062_v5, %v8062_v5  ;;  %2598 = vmatmul.bf16.gmra.mxu2 %v6111_v56  ;;  %v5710_v56 = vld [vmem:[%s6805_s28 + $0x370] sm:$0xf] }
 0x38c   : > { %v4061_v16 = vadd.f32 %v4060_v37, %v4059_v34  ;;  %6433 = vmatmul.msk.bf16.gmra.mxu3 %vm1673_vm2, %v6115_v52 }
 0x38d   : > { %3712 = vst.msk [vmem:[%s6874_s17 + $0x170] sm:$0xf] %vm3619_vm3, %v3455_v4  ;;  %v4833_v44 = vsel %vm3876_vm4, %v4486_v7, 0.0 }
 0x38e   : > { %v2960_v55 = vpop.f32.mrf.mxu1  ;;  %v4834_v17 = vadd.f32 %v4833_v44, %v4832_v47  ;;  %3813 = vst.msk [vmem:[%s6874_s17 + $0x304] sm:$0xf] %vm3619_vm3, %v3556_v36  ;;  %v2559_v4 = vpop.f32.mrf.mxu2 }
 0x38f   : > { %v3208_v14 = vpop.f32.mrf.mxu3 }
 0x390   : > { %v2306_v34 = vpop.f32.mrf.mxu0  ;;  %v8081_v36 = vadd.f32 %v3208_v14, %v2559_v4  ;;  %v6672_v14 = vld [vmem:[%s6805_s28 + $0x6a4] sm:$0xf0] }
 0x391   : > { %v2956_v51 = vadd.f32 %v2955_v25, %v2306_v34  ;;  %v5711_v34 = vor.u32 %v6570_v54, %v5710_v56 }
 0x392   : > { %9630 = vst [vmem:[#allocation35_spill] sm:$0xff] %v8081_v36 }
 0x393   : > { %v3456_v37 = vpack.c.bf16 %v2956_v51, %v2956_v51  ;;  %v4062_v7 = vsel %vm3876_vm4, %v2956_v51, 0.0  ;;  %v4487_v47 = vmul.f32 %v2956_v51, %v2956_v51 }
 0x394   : > { %v4063_v31 = vadd.f32 %v4062_v7, %v4061_v16  ;;  %v3557_v16 = vpack.c.bf16 %v8081_v36, %v8081_v36 }
 0x395   : > { %3713 = vst.msk [vmem:[%s6874_s17 + $0x174] sm:$0xf] %vm3619_vm3, %v3456_v37  ;;  %v4835_v44 = vsel %vm3876_vm4, %v4487_v47, 0.0  ;;  %v6118_v37 = vld [vmem:[%s6805_s28 + $0x6a0] sm:$0xf] }
 0x396   : > { %v2963_v52 = vpop.f32.mrf.mxu1  ;;  %v4836_v25 = vadd.f32 %v4835_v44, %v4834_v17  ;;  %3814 = vst.msk [vmem:[%s6874_s17 + $0x308] sm:$0xf] %vm3619_vm3, %v3557_v16  ;;  %v2561_v42 = vpop.f32.mrf.mxu2  ;;  %v6119_v44 = vor.u32 %v6672_v14, %v6118_v37  ;;  %v5728_v37 = vld [vmem:[%s6805_s28 + $0x398] sm:$0xf0] }
 0x397   : > { %v3210_v4 = vpop.f32.mrf.mxu3 }
 0x398   : > { %v2309_v51 = vpop.f32.mrf.mxu0  ;;  %v8092_v54 = vadd.f32 %v3210_v4, %v2561_v42  ;;  %v6573_v42 = vld [vmem:[%s6805_s28 + $0x394] sm:$0xf] }
 0x399   : > { %6384 = vmatmul.msk.bf16.gmra.mxu1 %vm1673_vm2, %v5723_v39  ;;  %v2959_v3 = vadd.f32 %v2958_v45, %v2309_v51  ;;  %v6671_v39 = vld [vmem:[%s6805_s28 + $0x6a4] sm:$0xf]  ;;  %v6120_v45 = vld [vmem:[%s6805_s28 + $0x6a8] sm:$0xf0] }
 0x39a   : > { %9631 = vst [vmem:[#allocation36_spill] sm:$0xff] %v8092_v54  ;;  %v6123_v36 = vor.u32 %v6671_v39, %v6120_v45  ;;  %v5731_v39 = vor.u32 %v6573_v42, %v5728_v37  ;;  %v6572_v45 = vld [vmem:[%s6805_s28 + $0x384] sm:$0xf0] }
 0x39b   : > { %v3457_v7 = vpack.c.bf16 %v2959_v3, %v2959_v3  ;;  %v4064_v17 = vsel %vm3876_vm4, %v2959_v3, 0.0  ;;  %v4488_v47 = vmul.f32 %v2959_v3, %v2959_v3  ;;  %2348 = vmatmul.bf16.gmra.mxu0 %v5711_v34  ;;  %v3558_v34 = vpack.c.bf16 %v8092_v54, %v8092_v54  ;;  %2603 = vmatmul.bf16.gmra.mxu2 %v6119_v44  ;;  %v5718_v44 = vld [vmem:[%s6805_s28 + $0x380] sm:$0xf] }
 0x39c   : > { %v4065_v56 = vadd.f32 %v4064_v17, %v4063_v31  ;;  %6434 = vmatmul.msk.bf16.gmra.mxu3 %vm1673_vm2, %v6123_v36 }
 0x39d   : > { %3714 = vst.msk [vmem:[%s6874_s17 + $0x178] sm:$0xf] %vm3619_vm3, %v3457_v7  ;;  %v4837_v51 = vsel %vm3876_vm4, %v4488_v47, 0.0 }
 0x39e   : > { %v2965_v16 = vpop.f32.mrf.mxu1  ;;  %v4838_v5 = vadd.f32 %v4837_v51, %v4836_v25  ;;  %3815 = vst.msk [vmem:[%s6874_s17 + $0x30c] sm:$0xf] %vm3619_vm3, %v3558_v34  ;;  %v2564_v7 = vpop.f32.mrf.mxu2 }
 0x39f   : > { %v3213_v4 = vpop.f32.mrf.mxu3 }
 0x3a0   : > { %v2311_v31 = vpop.f32.mrf.mxu0  ;;  %v8111_v34 = vadd.f32 %v3213_v4, %v2564_v7  ;;  %v6674_v4 = vld [vmem:[%s6805_s28 + $0x6b4] sm:$0xf0] }
 0x3a1   : > { %v2961_v3 = vadd.f32 %v2960_v55, %v2311_v31  ;;  %v5719_v31 = vor.u32 %v6572_v45, %v5718_v44 }
 0x3a2   : > { %9632 = vst [vmem:[#allocation37_spill] sm:$0xff] %v8111_v34 }
 0x3a3   : > { %v3458_v17 = vpack.c.bf16 %v2961_v3, %v2961_v3  ;;  %v4066_v47 = vsel %vm3876_vm4, %v2961_v3, 0.0  ;;  %v4489_v25 = vmul.f32 %v2961_v3, %v2961_v3 }
 0x3a4   : > { %v4067_v14 = vadd.f32 %v4066_v47, %v4065_v56  ;;  %v3559_v56 = vpack.c.bf16 %v8111_v34, %v8111_v34 }
 0x3a5   : > { %3715 = vst.msk [vmem:[%s6874_s17 + $0x17c] sm:$0xf] %vm3619_vm3, %v3458_v17  ;;  %v4839_v51 = vsel %vm3876_vm4, %v4489_v25, 0.0  ;;  %v6126_v17 = vld [vmem:[%s6805_s28 + $0x6b0] sm:$0xf] }
 0x3a6   : > { %v2968_v36 = vpop.f32.mrf.mxu1  ;;  %v4840_v55 = vadd.f32 %v4839_v51, %v4838_v5  ;;  %3816 = vst.msk [vmem:[%s6874_s17 + $0x310] sm:$0xf] %vm3619_vm3, %v3559_v56  ;;  %v2566_v37 = vpop.f32.mrf.mxu2  ;;  %v6127_v51 = vor.u32 %v6674_v4, %v6126_v17  ;;  %v5736_v17 = vld [vmem:[%s6805_s28 + $0x3a8] sm:$0xf0] }
 0x3a7   : > { %v3215_v7 = vpop.f32.mrf.mxu3 }
 0x3a8   : > { %v2314_v3 = vpop.f32.mrf.mxu0  ;;  %v8122_v45 = vadd.f32 %v3215_v7, %v2566_v37  ;;  %v6575_v37 = vld [vmem:[%s6805_s28 + $0x3a4] sm:$0xf] }
 0x3a9   : > { %6385 = vmatmul.msk.bf16.gmra.mxu1 %vm1673_vm2, %v5731_v39  ;;  %v2964_v42 = vadd.f32 %v2963_v52, %v2314_v3  ;;  %v6673_v39 = vld [vmem:[%s6805_s28 + $0x6b4] sm:$0xf]  ;;  %v6128_v52 = vld [vmem:[%s6805_s28 + $0x6b8] sm:$0xf0] }
 0x3aa   : > { %9633 = vst [vmem:[#allocation38_spill] sm:$0xff] %v8122_v45  ;;  %v6131_v34 = vor.u32 %v6673_v39, %v6128_v52  ;;  %v5739_v39 = vor.u32 %v6575_v37, %v5736_v17  ;;  %v6574_v52 = vld [vmem:[%s6805_s28 + $0x394] sm:$0xf0] }
 0x3ab   : > { %v3459_v47 = vpack.c.bf16 %v2964_v42, %v2964_v42  ;;  %v4068_v5 = vsel %vm3876_vm4, %v2964_v42, 0.0  ;;  %v4490_v25 = vmul.f32 %v2964_v42, %v2964_v42  ;;  %2353 = vmatmul.bf16.gmra.mxu0 %v5719_v31  ;;  %v3560_v31 = vpack.c.bf16 %v8122_v45, %v8122_v45  ;;  %2608 = vmatmul.bf16.gmra.mxu2 %v6127_v51  ;;  %v5726_v51 = vld [vmem:[%s6805_s28 + $0x390] sm:$0xf] }
 0x3ac   : > { %v4069_v44 = vadd.f32 %v4068_v5, %v4067_v14  ;;  %6435 = vmatmul.msk.bf16.gmra.mxu3 %vm1673_vm2, %v6131_v34 }
 0x3ad   : > { %3716 = vst.msk [vmem:[%s6874_s17 + $0x180] sm:$0xf] %vm3619_vm3, %v3459_v47  ;;  %v4841_v3 = vsel %vm3876_vm4, %v4490_v25, 0.0 }
 0x3ae   : > { %v2970_v56 = vpop.f32.mrf.mxu1  ;;  %v4842_v54 = vadd.f32 %v4841_v3, %v4840_v55  ;;  %3817 = vst.msk [vmem:[%s6874_s17 + $0x314] sm:$0xf] %vm3619_vm3, %v3560_v31  ;;  %v2569_v47 = vpop.f32.mrf.mxu2 }
 0x3af   : > { %v3218_v7 = vpop.f32.mrf.mxu3 }
 0x3b0   : > { %v2316_v14 = vpop.f32.mrf.mxu0  ;;  %v8141_v31 = vadd.f32 %v3218_v7, %v2569_v47  ;;  %v6676_v7 = vld [vmem:[%s6805_s28 + $0x6c4] sm:$0xf0] }
 0x3b1   : > { %v2966_v42 = vadd.f32 %v2965_v16, %v2316_v14  ;;  %v5727_v14 = vor.u32 %v6574_v52, %v5726_v51 }
 0x3b2   : > { %9634 = vst [vmem:[#allocation39_spill] sm:$0xff] %v8141_v31 }
 0x3b3   : > { %v3460_v5 = vpack.c.bf16 %v2966_v42, %v2966_v42  ;;  %v4070_v25 = vsel %vm3876_vm4, %v2966_v42, 0.0  ;;  %v4491_v55 = vmul.f32 %v2966_v42, %v2966_v42 }
 0x3b4   : > { %v4071_v4 = vadd.f32 %v4070_v25, %v4069_v44  ;;  %v3561_v44 = vpack.c.bf16 %v8141_v31, %v8141_v31 }
 0x3b5   : > { %3717 = vst.msk [vmem:[%s6874_s17 + $0x184] sm:$0xf] %vm3619_vm3, %v3460_v5  ;;  %v4843_v3 = vsel %vm3876_vm4, %v4491_v55, 0.0  ;;  %v6134_v5 = vld [vmem:[%s6805_s28 + $0x6c0] sm:$0xf] }
 0x3b6   : > { %v2973_v34 = vpop.f32.mrf.mxu1  ;;  %v4844_v16 = vadd.f32 %v4843_v3, %v4842_v54  ;;  %3818 = vst.msk [vmem:[%s6874_s17 + $0x318] sm:$0xf] %vm3619_vm3, %v3561_v44  ;;  %v2571_v17 = vpop.f32.mrf.mxu2  ;;  %v6135_v3 = vor.u32 %v6676_v7, %v6134_v5  ;;  %v5744_v5 = vld [vmem:[%s6805_s28 + $0x3b8] sm:$0xf0] }
 0x3b7   : > { %v3220_v47 = vpop.f32.mrf.mxu3 }
 0x3b8   : > { %v2319_v42 = vpop.f32.mrf.mxu0  ;;  %v8152_v52 = vadd.f32 %v3220_v47, %v2571_v17  ;;  %v6577_v17 = vld [vmem:[%s6805_s28 + $0x3b4] sm:$0xf] }
 0x3b9   : > { %6386 = vmatmul.msk.bf16.gmra.mxu1 %vm1673_vm2, %v5739_v39  ;;  %v2969_v37 = vadd.f32 %v2968_v36, %v2319_v42  ;;  %v6675_v39 = vld [vmem:[%s6805_s28 + $0x6c4] sm:$0xf]  ;;  %v6136_v36 = vld [vmem:[%s6805_s28 + $0x6c8] sm:$0xf0] }
 0x3ba   : > { %9635 = vst [vmem:[#allocation40_spill] sm:$0xff] %v8152_v52  ;;  %v6139_v31 = vor.u32 %v6675_v39, %v6136_v36  ;;  %v5747_v39 = vor.u32 %v6577_v17, %v5744_v5  ;;  %v6576_v36 = vld [vmem:[%s6805_s28 + $0x3a4] sm:$0xf0] }
 0x3bb   : > { %v3461_v25 = vpack.c.bf16 %v2969_v37, %v2969_v37  ;;  %v4072_v54 = vsel %vm3876_vm4, %v2969_v37, 0.0  ;;  %v4492_v55 = vmul.f32 %v2969_v37, %v2969_v37  ;;  %2358 = vmatmul.bf16.gmra.mxu0 %v5727_v14  ;;  %v3562_v14 = vpack.c.bf16 %v8152_v52, %v8152_v52  ;;  %2613 = vmatmul.bf16.gmra.mxu2 %v6135_v3  ;;  %v5734_v3 = vld [vmem:[%s6805_s28 + $0x3a0] sm:$0xf] }
 0x3bc   : > { %v4073_v51 = vadd.f32 %v4072_v54, %v4071_v4  ;;  %6436 = vmatmul.msk.bf16.gmra.mxu3 %vm1673_vm2, %v6139_v31 }
 0x3bd   : > { %3718 = vst.msk [vmem:[%s6874_s17 + $0x188] sm:$0xf] %vm3619_vm3, %v3461_v25  ;;  %v4845_v42 = vsel %vm3876_vm4, %v4492_v55, 0.0 }
 0x3be   : > { %v2975_v44 = vpop.f32.mrf.mxu1  ;;  %v4846_v45 = vadd.f32 %v4845_v42, %v4844_v16  ;;  %3819 = vst.msk [vmem:[%s6874_s17 + $0x31c] sm:$0xf] %vm3619_vm3, %v3562_v14  ;;  %v2574_v25 = vpop.f32.mrf.mxu2 }
 0x3bf   : > { %v3223_v47 = vpop.f32.mrf.mxu3 }
 0x3c0   : > { %v2321_v4 = vpop.f32.mrf.mxu0  ;;  %v8171_v14 = vadd.f32 %v3223_v47, %v2574_v25  ;;  %v6678_v47 = vld [vmem:[%s6805_s28 + $0x6d4] sm:$0xf0] }
 0x3c1   : > { %v2971_v37 = vadd.f32 %v2970_v56, %v2321_v4  ;;  %v5735_v4 = vor.u32 %v6576_v36, %v5734_v3 }
 0x3c2   : > { %9636 = vst [vmem:[#allocation41_spill] sm:$0xff] %v8171_v14 }
 0x3c3   : > { %v3462_v54 = vpack.c.bf16 %v2971_v37, %v2971_v37  ;;  %v4074_v55 = vsel %vm3876_vm4, %v2971_v37, 0.0  ;;  %v4493_v16 = vmul.f32 %v2971_v37, %v2971_v37 }
 0x3c4   : > { %v4075_v7 = vadd.f32 %v4074_v55, %v4073_v51  ;;  %v3563_v51 = vpack.c.bf16 %v8171_v14, %v8171_v14 }
 0x3c5   : > { %3719 = vst.msk [vmem:[%s6874_s17 + $0x18c] sm:$0xf] %vm3619_vm3, %v3462_v54  ;;  %v4847_v42 = vsel %vm3876_vm4, %v4493_v16, 0.0  ;;  %v6142_v54 = vld [vmem:[%s6805_s28 + $0x6d0] sm:$0xf] }
 0x3c6   : > { %v2978_v31 = vpop.f32.mrf.mxu1  ;;  %v4848_v56 = vadd.f32 %v4847_v42, %v4846_v45  ;;  %3820 = vst.msk [vmem:[%s6874_s17 + $0x320] sm:$0xf] %vm3619_vm3, %v3563_v51  ;;  %v2576_v5 = vpop.f32.mrf.mxu2  ;;  %v6143_v42 = vor.u32 %v6678_v47, %v6142_v54  ;;  %v5752_v54 = vld [vmem:[%s6805_s28 + $0x3c8] sm:$0xf0] }
 0x3c7   : > { %v3225_v25 = vpop.f32.mrf.mxu3 }
 0x3c8   : > { %v2324_v37 = vpop.f32.mrf.mxu0  ;;  %v8182_v36 = vadd.f32 %v3225_v25, %v2576_v5  ;;  %v6579_v5 = vld [vmem:[%s6805_s28 + $0x3c4] sm:$0xf] }
 0x3c9   : > { %6387 = vmatmul.msk.bf16.gmra.mxu1 %vm1673_vm2, %v5747_v39  ;;  %v2974_v17 = vadd.f32 %v2973_v34, %v2324_v37  ;;  %v6677_v39 = vld [vmem:[%s6805_s28 + $0x6d4] sm:$0xf]  ;;  %v6144_v34 = vld [vmem:[%s6805_s28 + $0x6d8] sm:$0xf0] }
 0x3ca   : > { %9637 = vst [vmem:[#allocation42_spill] sm:$0xff] %v8182_v36  ;;  %v6147_v14 = vor.u32 %v6677_v39, %v6144_v34  ;;  %v5755_v39 = vor.u32 %v6579_v5, %v5752_v54  ;;  %v6578_v34 = vld [vmem:[%s6805_s28 + $0x3b4] sm:$0xf0] }
 0x3cb   : > { %v3463_v55 = vpack.c.bf16 %v2974_v17, %v2974_v17  ;;  %v4076_v45 = vsel %vm3876_vm4, %v2974_v17, 0.0  ;;  %v4494_v16 = vmul.f32 %v2974_v17, %v2974_v17  ;;  %2363 = vmatmul.bf16.gmra.mxu0 %v5735_v4  ;;  %v3564_v4 = vpack.c.bf16 %v8182_v36, %v8182_v36  ;;  %2618 = vmatmul.bf16.gmra.mxu2 %v6143_v42  ;;  %v5742_v42 = vld [vmem:[%s6805_s28 + $0x3b0] sm:$0xf] }
 0x3cc   : > { %v4077_v3 = vadd.f32 %v4076_v45, %v4075_v7  ;;  %6437 = vmatmul.msk.bf16.gmra.mxu3 %vm1673_vm2, %v6147_v14 }
 0x3cd   : > { %3720 = vst.msk [vmem:[%s6874_s17 + $0x190] sm:$0xf] %vm3619_vm3, %v3463_v55  ;;  %v4849_v37 = vsel %vm3876_vm4, %v4494_v16, 0.0 }
 0x3ce   : > { %v2980_v51 = vpop.f32.mrf.mxu1  ;;  %v4850_v52 = vadd.f32 %v4849_v37, %v4848_v56  ;;  %3821 = vst.msk [vmem:[%s6874_s17 + $0x324] sm:$0xf] %vm3619_vm3, %v3564_v4  ;;  %v2579_v55 = vpop.f32.mrf.mxu2 }
 0x3cf   : > { %v3228_v25 = vpop.f32.mrf.mxu3 }
 0x3d0   : > { %v2326_v7 = vpop.f32.mrf.mxu0  ;;  %v8201_v4 = vadd.f32 %v3228_v25, %v2579_v55  ;;  %v6680_v25 = vld [vmem:[%s6805_s28 + $0x6e4] sm:$0xf0] }
 0x3d1   : > { %v2976_v17 = vadd.f32 %v2975_v44, %v2326_v7  ;;  %v5743_v7 = vor.u32 %v6578_v34, %v5742_v42 }
 0x3d2   : > { %9638 = vst [vmem:[#allocation43_spill] sm:$0xff] %v8201_v4 }
 0x3d3   : > { %v3464_v45 = vpack.c.bf16 %v2976_v17, %v2976_v17  ;;  %v4078_v16 = vsel %vm3876_vm4, %v2976_v17, 0.0  ;;  %v4495_v56 = vmul.f32 %v2976_v17, %v2976_v17 }
 0x3d4   : > { %v4079_v47 = vadd.f32 %v4078_v16, %v4077_v3  ;;  %v3565_v3 = vpack.c.bf16 %v8201_v4, %v8201_v4 }
 0x3d5   : > { %3721 = vst.msk [vmem:[%s6874_s17 + $0x194] sm:$0xf] %vm3619_vm3, %v3464_v45  ;;  %v4851_v37 = vsel %vm3876_vm4, %v4495_v56, 0.0  ;;  %v6150_v45 = vld [vmem:[%s6805_s28 + $0x6e0] sm:$0xf] }
 0x3d6   : > { %v2983_v14 = vpop.f32.mrf.mxu1  ;;  %v4852_v44 = vadd.f32 %v4851_v37, %v4850_v52  ;;  %3822 = vst.msk [vmem:[%s6874_s17 + $0x328] sm:$0xf] %vm3619_vm3, %v3565_v3  ;;  %v2581_v54 = vpop.f32.mrf.mxu2  ;;  %v6151_v37 = vor.u32 %v6680_v25, %v6150_v45  ;;  %v5760_v45 = vld [vmem:[%s6805_s28 + $0x3d8] sm:$0xf0] }
 0x3d7   : > { %v3230_v55 = vpop.f32.mrf.mxu3 }
 0x3d8   : > { %v2329_v17 = vpop.f32.mrf.mxu0  ;;  %v8212_v34 = vadd.f32 %v3230_v55, %v2581_v54  ;;  %v6581_v54 = vld [vmem:[%s6805_s28 + $0x3d4] sm:$0xf] }
 0x3d9   : > { %6388 = vmatmul.msk.bf16.gmra.mxu1 %vm1673_vm2, %v5755_v39  ;;  %v2979_v5 = vadd.f32 %v2978_v31, %v2329_v17  ;;  %v6679_v39 = vld [vmem:[%s6805_s28 + $0x6e4] sm:$0xf]  ;;  %v6152_v31 = vld [vmem:[%s6805_s28 + $0x6e8] sm:$0xf0] }
 0x3da   : > { %9639 = vst [vmem:[#allocation44_spill] sm:$0xff] %v8212_v34  ;;  %v6155_v4 = vor.u32 %v6679_v39, %v6152_v31  ;;  %v5763_v39 = vor.u32 %v6581_v54, %v5760_v45  ;;  %v6580_v31 = vld [vmem:[%s6805_s28 + $0x3c4] sm:$0xf0] }
 0x3db   : > { %v3465_v16 = vpack.c.bf16 %v2979_v5, %v2979_v5  ;;  %v4080_v52 = vsel %vm3876_vm4, %v2979_v5, 0.0  ;;  %v4496_v56 = vmul.f32 %v2979_v5, %v2979_v5  ;;  %2368 = vmatmul.bf16.gmra.mxu0 %v5743_v7  ;;  %v3566_v7 = vpack.c.bf16 %v8212_v34, %v8212_v34  ;;  %2623 = vmatmul.bf16.gmra.mxu2 %v6151_v37  ;;  %v5750_v37 = vld [vmem:[%s6805_s28 + $0x3c0] sm:$0xf] }
 0x3dc   : > { %v4081_v42 = vadd.f32 %v4080_v52, %v4079_v47  ;;  %6438 = vmatmul.msk.bf16.gmra.mxu3 %vm1673_vm2, %v6155_v4 }
 0x3dd   : > { %3722 = vst.msk [vmem:[%s6874_s17 + $0x198] sm:$0xf] %vm3619_vm3, %v3465_v16  ;;  %v4853_v17 = vsel %vm3876_vm4, %v4496_v56, 0.0 }
 0x3de   : > { %v2985_v3 = vpop.f32.mrf.mxu1  ;;  %v4854_v36 = vadd.f32 %v4853_v17, %v4852_v44  ;;  %3823 = vst.msk [vmem:[%s6874_s17 + $0x32c] sm:$0xf] %vm3619_vm3, %v3566_v7  ;;  %v2584_v16 = vpop.f32.mrf.mxu2 }
 0x3df   : > { %v3233_v55 = vpop.f32.mrf.mxu3 }
 0x3e0   : > { %v2331_v47 = vpop.f32.mrf.mxu0  ;;  %v8231_v7 = vadd.f32 %v3233_v55, %v2584_v16  ;;  %v6682_v55 = vld [vmem:[%s6805_s28 + $0x6f4] sm:$0xf0] }
 0x3e1   : > { %v2981_v5 = vadd.f32 %v2980_v51, %v2331_v47  ;;  %v5751_v47 = vor.u32 %v6580_v31, %v5750_v37 }
 0x3e2   : > { %9640 = vst [vmem:[#allocation45_spill] sm:$0xff] %v8231_v7 }
 0x3e3   : > { %v3466_v52 = vpack.c.bf16 %v2981_v5, %v2981_v5  ;;  %v4082_v56 = vsel %vm3876_vm4, %v2981_v5, 0.0  ;;  %v4497_v44 = vmul.f32 %v2981_v5, %v2981_v5 }
 0x3e4   : > { %v4083_v25 = vadd.f32 %v4082_v56, %v4081_v42  ;;  %v3567_v42 = vpack.c.bf16 %v8231_v7, %v8231_v7 }
 0x3e5   : > { %3723 = vst.msk [vmem:[%s6874_s17 + $0x19c] sm:$0xf] %vm3619_vm3, %v3466_v52  ;;  %v4855_v17 = vsel %vm3876_vm4, %v4497_v44, 0.0  ;;  %v6158_v52 = vld [vmem:[%s6805_s28 + $0x6f0] sm:$0xf] }
 0x3e6   : > { %v2988_v4 = vpop.f32.mrf.mxu1  ;;  %v4856_v51 = vadd.f32 %v4855_v17, %v4854_v36  ;;  %3824 = vst.msk [vmem:[%s6874_s17 + $0x330] sm:$0xf] %vm3619_vm3, %v3567_v42  ;;  %v2586_v45 = vpop.f32.mrf.mxu2  ;;  %v6159_v17 = vor.u32 %v6682_v55, %v6158_v52  ;;  %v5768_v52 = vld [vmem:[%s6805_s28 + $0x3e8] sm:$0xf0] }
 0x3e7   : > { %v3235_v16 = vpop.f32.mrf.mxu3 }
 0x3e8   : > { %v2334_v5 = vpop.f32.mrf.mxu0  ;;  %v8242_v31 = vadd.f32 %v3235_v16, %v2586_v45  ;;  %v6583_v45 = vld [vmem:[%s6805_s28 + $0x3e4] sm:$0xf] }
 0x3e9   : > { %6389 = vmatmul.msk.bf16.gmra.mxu1 %vm1673_vm2, %v5763_v39  ;;  %v2984_v54 = vadd.f32 %v2983_v14, %v2334_v5  ;;  %v6681_v39 = vld [vmem:[%s6805_s28 + $0x6f4] sm:$0xf]  ;;  %v6160_v14 = vld [vmem:[%s6805_s28 + $0x6f8] sm:$0xf0] }
 0x3ea   : > { %9641 = vst [vmem:[#allocation46_spill] sm:$0xff] %v8242_v31  ;;  %v6163_v7 = vor.u32 %v6681_v39, %v6160_v14  ;;  %v5771_v39 = vor.u32 %v6583_v45, %v5768_v52  ;;  %v6582_v14 = vld [vmem:[%s6805_s28 + $0x3d4] sm:$0xf0] }
 0x3eb   : > { %v3467_v56 = vpack.c.bf16 %v2984_v54, %v2984_v54  ;;  %v4084_v36 = vsel %vm3876_vm4, %v2984_v54, 0.0  ;;  %v4498_v44 = vmul.f32 %v2984_v54, %v2984_v54  ;;  %2373 = vmatmul.bf16.gmra.mxu0 %v5751_v47  ;;  %v3568_v47 = vpack.c.bf16 %v8242_v31, %v8242_v31  ;;  %2628 = vmatmul.bf16.gmra.mxu2 %v6159_v17  ;;  %v5758_v17 = vld [vmem:[%s6805_s28 + $0x3d0] sm:$0xf] }
 0x3ec   : > { %v4085_v37 = vadd.f32 %v4084_v36, %v4083_v25  ;;  %6439 = vmatmul.msk.bf16.gmra.mxu3 %vm1673_vm2, %v6163_v7 }
 0x3ed   : > { %3724 = vst.msk [vmem:[%s6874_s17 + $0x1a0] sm:$0xf] %vm3619_vm3, %v3467_v56  ;;  %v4857_v5 = vsel %vm3876_vm4, %v4498_v44, 0.0 }
 0x3ee   : > { %v2990_v42 = vpop.f32.mrf.mxu1  ;;  %v4858_v34 = vadd.f32 %v4857_v5, %v4856_v51  ;;  %3825 = vst.msk [vmem:[%s6874_s17 + $0x334] sm:$0xf] %vm3619_vm3, %v3568_v47  ;;  %v2589_v56 = vpop.f32.mrf.mxu2 }
 0x3ef   : > { %v3238_v16 = vpop.f32.mrf.mxu3 }
 0x3f0   : > { %v2336_v25 = vpop.f32.mrf.mxu0  ;;  %v8261_v47 = vadd.f32 %v3238_v16, %v2589_v56  ;;  %v6684_v16 = vld [vmem:[%s6805_s28 + $0x704] sm:$0xf0] }
 0x3f1   : > { %v2986_v54 = vadd.f32 %v2985_v3, %v2336_v25  ;;  %v5759_v25 = vor.u32 %v6582_v14, %v5758_v17 }
 0x3f2   : > { %9642 = vst [vmem:[#allocation47_spill] sm:$0xff] %v8261_v47 }
 0x3f3   : > { %v3468_v36 = vpack.c.bf16 %v2986_v54, %v2986_v54  ;;  %v4086_v44 = vsel %vm3876_vm4, %v2986_v54, 0.0  ;;  %v4499_v51 = vmul.f32 %v2986_v54, %v2986_v54 }
 0x3f4   : > { %v4087_v55 = vadd.f32 %v4086_v44, %v4085_v37  ;;  %v3569_v37 = vpack.c.bf16 %v8261_v47, %v8261_v47 }
 0x3f5   : > { %3725 = vst.msk [vmem:[%s6874_s17 + $0x1a4] sm:$0xf] %vm3619_vm3, %v3468_v36  ;;  %v4859_v5 = vsel %vm3876_vm4, %v4499_v51, 0.0  ;;  %v6166_v36 = vld [vmem:[%s6805_s28 + $0x700] sm:$0xf] }
 0x3f6   : > { %v2993_v7 = vpop.f32.mrf.mxu1  ;;  %v4860_v3 = vadd.f32 %v4859_v5, %v4858_v34  ;;  %3826 = vst.msk [vmem:[%s6874_s17 + $0x338] sm:$0xf] %vm3619_vm3, %v3569_v37  ;;  %v2591_v52 = vpop.f32.mrf.mxu2  ;;  %v6167_v5 = vor.u32 %v6684_v16, %v6166_v36  ;;  %v5776_v36 = vld [vmem:[%s6805_s28 + $0x3f8] sm:$0xf0] }
 0x3f7   : > { %v3240_v56 = vpop.f32.mrf.mxu3 }
 0x3f8   : > { %v2339_v54 = vpop.f32.mrf.mxu0  ;;  %v8272_v14 = vadd.f32 %v3240_v56, %v2591_v52  ;;  %v6585_v52 = vld [vmem:[%s6805_s28 + $0x3f4] sm:$0xf] }
 0x3f9   : > { %6390 = vmatmul.msk.bf16.gmra.mxu1 %vm1673_vm2, %v5771_v39  ;;  %v2989_v45 = vadd.f32 %v2988_v4, %v2339_v54  ;;  %v6683_v39 = vld [vmem:[%s6805_s28 + $0x704] sm:$0xf]  ;;  %v6168_v4 = vld [vmem:[%s6805_s28 + $0x708] sm:$0xf0] }
 0x3fa   : > { %9643 = vst [vmem:[#allocation48_spill] sm:$0xff] %v8272_v14  ;;  %v6171_v47 = vor.u32 %v6683_v39, %v6168_v4  ;;  %v5779_v39 = vor.u32 %v6585_v52, %v5776_v36  ;;  %v6584_v4 = vld [vmem:[%s6805_s28 + $0x3e4] sm:$0xf0] }
 0x3fb   : > { %v3469_v44 = vpack.c.bf16 %v2989_v45, %v2989_v45  ;;  %v4088_v34 = vsel %vm3876_vm4, %v2989_v45, 0.0  ;;  %v4500_v51 = vmul.f32 %v2989_v45, %v2989_v45  ;;  %2378 = vmatmul.bf16.gmra.mxu0 %v5759_v25  ;;  %v3570_v25 = vpack.c.bf16 %v8272_v14, %v8272_v14  ;;  %2633 = vmatmul.bf16.gmra.mxu2 %v6167_v5  ;;  %v5766_v5 = vld [vmem:[%s6805_s28 + $0x3e0] sm:$0xf] }
 0x3fc   : > { %v4089_v17 = vadd.f32 %v4088_v34, %v4087_v55  ;;  %6440 = vmatmul.msk.bf16.gmra.mxu3 %vm1673_vm2, %v6171_v47 }
 0x3fd   : > { %3726 = vst.msk [vmem:[%s6874_s17 + $0x1a8] sm:$0xf] %vm3619_vm3, %v3469_v44  ;;  %v4861_v54 = vsel %vm3876_vm4, %v4500_v51, 0.0 }
 0x3fe   : > { %v2995_v37 = vpop.f32.mrf.mxu1  ;;  %v4862_v31 = vadd.f32 %v4861_v54, %v4860_v3  ;;  %3827 = vst.msk [vmem:[%s6874_s17 + $0x33c] sm:$0xf] %vm3619_vm3, %v3570_v25  ;;  %v2594_v44 = vpop.f32.mrf.mxu2 }
 0x3ff   : > { %v3243_v56 = vpop.f32.mrf.mxu3 }
 0x400   : > { %v2341_v55 = vpop.f32.mrf.mxu0  ;;  %v8291_v25 = vadd.f32 %v3243_v56, %v2594_v44  ;;  %v6686_v56 = vld [vmem:[%s6805_s28 + $0x714] sm:$0xf0] }
 0x401   : > { %v2991_v45 = vadd.f32 %v2990_v42, %v2341_v55  ;;  %v5767_v55 = vor.u32 %v6584_v4, %v5766_v5 }
 0x402   : > { %9644 = vst [vmem:[#allocation49_spill] sm:$0xff] %v8291_v25 }
 0x403   : > { %v3470_v34 = vpack.c.bf16 %v2991_v45, %v2991_v45  ;;  %v4090_v51 = vsel %vm3876_vm4, %v2991_v45, 0.0  ;;  %v4501_v3 = vmul.f32 %v2991_v45, %v2991_v45 }
 0x404   : > { %v4091_v16 = vadd.f32 %v4090_v51, %v4089_v17  ;;  %v3571_v17 = vpack.c.bf16 %v8291_v25, %v8291_v25 }
 0x405   : > { %3727 = vst.msk [vmem:[%s6874_s17 + $0x1ac] sm:$0xf] %vm3619_vm3, %v3470_v34  ;;  %v4863_v54 = vsel %vm3876_vm4, %v4501_v3, 0.0  ;;  %v6174_v34 = vld [vmem:[%s6805_s28 + $0x710] sm:$0xf] }
 0x406   : > { %v2998_v47 = vpop.f32.mrf.mxu1  ;;  %v4864_v42 = vadd.f32 %v4863_v54, %v4862_v31  ;;  %3828 = vst.msk [vmem:[%s6874_s17 + $0x340] sm:$0xf] %vm3619_vm3, %v3571_v17  ;;  %v2596_v36 = vpop.f32.mrf.mxu2  ;;  %v6175_v54 = vor.u32 %v6686_v56, %v6174_v34  ;;  %v5784_v34 = vld [vmem:[%s6805_s28 + $0x408] sm:$0xf0] }
 0x407   : > { %v3245_v44 = vpop.f32.mrf.mxu3 }
 0x408   : > { %v2344_v45 = vpop.f32.mrf.mxu0  ;;  %v8302_v4 = vadd.f32 %v3245_v44, %v2596_v36  ;;  %v6587_v36 = vld [vmem:[%s6805_s28 + $0x404] sm:$0xf] }
 0x409   : > { %6391 = vmatmul.msk.bf16.gmra.mxu1 %vm1673_vm2, %v5779_v39  ;;  %v2994_v52 = vadd.f32 %v2993_v7, %v2344_v45  ;;  %v6685_v39 = vld [vmem:[%s6805_s28 + $0x714] sm:$0xf]  ;;  %v6176_v7 = vld [vmem:[%s6805_s28 + $0x718] sm:$0xf0] }
 0x40a   : > { %9645 = vst [vmem:[#allocation50_spill] sm:$0xff] %v8302_v4  ;;  %v6179_v25 = vor.u32 %v6685_v39, %v6176_v7  ;;  %v5787_v39 = vor.u32 %v6587_v36, %v5784_v34  ;;  %v6586_v7 = vld [vmem:[%s6805_s28 + $0x3f4] sm:$0xf0] }
 0x40b   : > { %v3471_v51 = vpack.c.bf16 %v2994_v52, %v2994_v52  ;;  %v4092_v31 = vsel %vm3876_vm4, %v2994_v52, 0.0  ;;  %v4502_v3 = vmul.f32 %v2994_v52, %v2994_v52  ;;  %2383 = vmatmul.bf16.gmra.mxu0 %v5767_v55  ;;  %v3572_v55 = vpack.c.bf16 %v8302_v4, %v8302_v4  ;;  %2638 = vmatmul.bf16.gmra.mxu2 %v6175_v54  ;;  %v5774_v54 = vld [vmem:[%s6805_s28 + $0x3f0] sm:$0xf] }
 0x40c   : > { %v4093_v5 = vadd.f32 %v4092_v31, %v4091_v16  ;;  %6441 = vmatmul.msk.bf16.gmra.mxu3 %vm1673_vm2, %v6179_v25 }
 0x40d   : > { %3728 = vst.msk [vmem:[%s6874_s17 + $0x1b0] sm:$0xf] %vm3619_vm3, %v3471_v51  ;;  %v4865_v45 = vsel %vm3876_vm4, %v4502_v3, 0.0 }
 0x40e   : > { %v3000_v17 = vpop.f32.mrf.mxu1  ;;  %v4866_v14 = vadd.f32 %v4865_v45, %v4864_v42  ;;  %3829 = vst.msk [vmem:[%s6874_s17 + $0x344] sm:$0xf] %vm3619_vm3, %v3572_v55  ;;  %v2599_v51 = vpop.f32.mrf.mxu2 }
 0x40f   : > { %v3248_v44 = vpop.f32.mrf.mxu3 }
 0x410   : > { %v2346_v16 = vpop.f32.mrf.mxu0  ;;  %v8321_v55 = vadd.f32 %v3248_v44, %v2599_v51  ;;  %v6688_v44 = vld [vmem:[%s6805_s28 + $0x724] sm:$0xf0] }
 0x411   : > { %v2996_v52 = vadd.f32 %v2995_v37, %v2346_v16  ;;  %v5775_v16 = vor.u32 %v6586_v7, %v5774_v54 }
 0x412   : > { %9646 = vst [vmem:[#allocation51_spill] sm:$0xff] %v8321_v55 }
 0x413   : > { %v3472_v31 = vpack.c.bf16 %v2996_v52, %v2996_v52  ;;  %v4094_v3 = vsel %vm3876_vm4, %v2996_v52, 0.0  ;;  %v4503_v42 = vmul.f32 %v2996_v52, %v2996_v52 }
 0x414   : > { %v4095_v56 = vadd.f32 %v4094_v3, %v4093_v5  ;;  %v3573_v5 = vpack.c.bf16 %v8321_v55, %v8321_v55  ;;  %v6184_v55 = vld [vmem:[%s6805_s28 + $0x728] sm:$0xf0] }
 0x415   : > { %3729 = vst.msk [vmem:[%s6874_s17 + $0x1b4] sm:$0xf] %vm3619_vm3, %v3472_v31  ;;  %v4867_v45 = vsel %vm3876_vm4, %v4503_v42, 0.0  ;;  %v6182_v31 = vld [vmem:[%s6805_s28 + $0x720] sm:$0xf] }
 0x416   : > { %v3003_v25 = vpop.f32.mrf.mxu1  ;;  %v4868_v37 = vadd.f32 %v4867_v45, %v4866_v14  ;;  %3830 = vst.msk [vmem:[%s6874_s17 + $0x348] sm:$0xf] %vm3619_vm3, %v3573_v5  ;;  %v2601_v34 = vpop.f32.mrf.mxu2  ;;  %v6183_v45 = vor.u32 %v6688_v44, %v6182_v31 }
 0x417   : > { %v3250_v51 = vpop.f32.mrf.mxu3 }
 0x418   : > { %v2349_v52 = vpop.f32.mrf.mxu0  ;;  %v8332_v7 = vadd.f32 %v3250_v51, %v2601_v34 }
 0x419   : > { %6392 = vmatmul.msk.bf16.gmra.mxu1 %vm1673_vm2, %v5787_v39  ;;  %v2999_v36 = vadd.f32 %v2998_v47, %v2349_v52  ;;  %v6687_v39 = vld [vmem:[%s6805_s28 + $0x724] sm:$0xf] }
 0x41a   : > { %9647 = vst [vmem:[#allocation52_spill] sm:$0xff] %v8332_v7  ;;  %v6187_v5 = vor.u32 %v6687_v39, %v6184_v55 }
 0x41b   : > { %v3473_v3 = vpack.c.bf16 %v2999_v36, %v2999_v36  ;;  %v4096_v14 = vsel %vm3876_vm4, %v2999_v36, 0.0  ;;  %v4504_v42 = vmul.f32 %v2999_v36, %v2999_v36  ;;  %2388 = vmatmul.bf16.gmra.mxu0 %v5775_v16  ;;  %v3574_v16 = vpack.c.bf16 %v8332_v7, %v8332_v7  ;;  %2643 = vmatmul.bf16.gmra.mxu2 %v6183_v45 }
 0x41c   : > { %v4097_v54 = vadd.f32 %v4096_v14, %v4095_v56  ;;  %6442 = vmatmul.msk.bf16.gmra.mxu3 %vm1673_vm2, %v6187_v5  ;;  %v6190_v5 = vld [vmem:[%s6805_s28 + $0x730] sm:$0xf] }
 0x41d   : > { %3730 = vst.msk [vmem:[%s6874_s17 + $0x1b8] sm:$0xf] %vm3619_vm3, %v3473_v3  ;;  %v4869_v47 = vsel %vm3876_vm4, %v4504_v42, 0.0 }
 0x41e   : > { %v3005_v52 = vpop.f32.mrf.mxu1  ;;  %v4870_v4 = vadd.f32 %v4869_v47, %v4868_v37  ;;  %3831 = vst.msk [vmem:[%s6874_s17 + $0x34c] sm:$0xf] %vm3619_vm3, %v3574_v16  ;;  %v2604_v34 = vpop.f32.mrf.mxu2 }
 0x41f   : > { %v3253_v42 = vpop.f32.mrf.mxu3 }
 0x420   : > { %v2351_v36 = vpop.f32.mrf.mxu0  ;;  %v8347_v39 = vadd.f32 %v3253_v42, %v2604_v34  ;;  %v6689_v34 = vld [vmem:[%s6805_s28 + $0x734] sm:$0xf] }
 0x421   : > { %v3001_v56 = vadd.f32 %v3000_v17, %v2351_v36 }
 0x422   : > { %9648 = vst [vmem:[#allocation53_spill] sm:$0xff] %v8347_v39  ;;  %v3575_v45 = vpack.c.bf16 %v8347_v39, %v8347_v39 }
 0x423   : > { %v3474_v31 = vpack.c.bf16 %v3001_v56, %v3001_v56  ;;  %v4098_v3 = vsel %vm3876_vm4, %v3001_v56, 0.0  ;;  %v4505_v14 = vmul.f32 %v3001_v56, %v3001_v56 }
 0x424   : > { %v4099_v55 = vadd.f32 %v4098_v3, %v4097_v54  ;;  %3832 = vst.msk [vmem:[%s6874_s17 + $0x350] sm:$0xf] %vm3619_vm3, %v3575_v45 }
 0x425   : > { %3731 = vst.msk [vmem:[%s6874_s17 + $0x1bc] sm:$0xf] %vm3619_vm3, %v3474_v31  ;;  %v4871_v37 = vsel %vm3876_vm4, %v4505_v14, 0.0 }
 0x426   : > { %v3008_v51 = vpop.f32.mrf.mxu1  ;;  %v4872_v44 = vadd.f32 %v4871_v37, %v4870_v4  ;;  %v2606_v54 = vpop.f32.mrf.mxu2  ;;  %v6690_v4 = vld [vmem:[%s6805_s28 + $0x734] sm:$0xf0]  ;;  %v6192_v37 = vld [vmem:[%s6805_s28 + $0x738] sm:$0xf0] }
 0x427   : > { %v3255_v31 = vpop.f32.mrf.mxu3  ;;  %v6191_v42 = vor.u32 %v6690_v4, %v6190_v5  ;;  %v6195_v45 = vor.u32 %v6689_v34, %v6192_v37 }
 0x428   : > { %v2354_v17 = vpop.f32.mrf.mxu0  ;;  %v8357_v14 = vadd.f32 %v3255_v31, %v2606_v54 }
 0x429   : > { %v3004_v47 = vadd.f32 %v3003_v25, %v2354_v17 }
 0x42a   : > { %9649 = vst [vmem:[#allocation54_spill] sm:$0xff] %v8357_v14 }
 0x42b   : > { %v3475_v16 = vpack.c.bf16 %v3004_v47, %v3004_v47  ;;  %v4100_v36 = vsel %vm3876_vm4, %v3004_v47, 0.0  ;;  %v4506_v56 = vmul.f32 %v3004_v47, %v3004_v47  ;;  %v3576_v47 = vpack.c.bf16 %v8357_v14, %v8357_v14  ;;  %2648 = vmatmul.bf16.gmra.mxu2 %v6191_v42 }
 0x42c   : > { %v4101_v3 = vadd.f32 %v4100_v36, %v4099_v55  ;;  %6443 = vmatmul.msk.bf16.gmra.mxu3 %vm1673_vm2, %v6195_v45 }
 0x42d   : > { %3732 = vst.msk [vmem:[%s6874_s17 + $0x1c0] sm:$0xf] %vm3619_vm3, %v3475_v16  ;;  %v4873_v25 = vsel %vm3876_vm4, %v4506_v56, 0.0 }
 0x42e   : > { %v3010_v17 = vpop.f32.mrf.mxu1  ;;  %v4874_v39 = vadd.f32 %v4873_v25, %v4872_v44  ;;  %3833 = vst.msk [vmem:[%s6874_s17 + $0x354] sm:$0xf] %vm3619_vm3, %v3576_v47  ;;  %v2609_v54 = vpop.f32.mrf.mxu2  ;;  %v6198_v25 = vld [vmem:[%s6805_s28 + $0x740] sm:$0xf] }
 0x42f   : > { %v3258_v56 = vpop.f32.mrf.mxu3 }
 0x430   : > { %v2356_v7 = vpop.f32.mrf.mxu0  ;;  %v8372_v42 = vadd.f32 %v3258_v56, %v2609_v54  ;;  %v6691_v54 = vld [vmem:[%s6805_s28 + $0x744] sm:$0xf] }
 0x431   : > { %v3006_v55 = vadd.f32 %v3005_v52, %v2356_v7 }
 0x432   : > { %9650 = vst [vmem:[#allocation55_spill] sm:$0xff] %v8372_v42  ;;  %v3577_v52 = vpack.c.bf16 %v8372_v42, %v8372_v42 }
 0x433   : > { %v3476_v5 = vpack.c.bf16 %v3006_v55, %v3006_v55  ;;  %v4102_v16 = vsel %vm3876_vm4, %v3006_v55, 0.0  ;;  %v4507_v36 = vmul.f32 %v3006_v55, %v3006_v55 }
 0x434   : > { %v4103_v31 = vadd.f32 %v4102_v16, %v4101_v3  ;;  %3834 = vst.msk [vmem:[%s6874_s17 + $0x358] sm:$0xf] %vm3619_vm3, %v3577_v52 }
 0x435   : > { %3733 = vst.msk [vmem:[%s6874_s17 + $0x1c4] sm:$0xf] %vm3619_vm3, %v3476_v5  ;;  %v4875_v44 = vsel %vm3876_vm4, %v4507_v36, 0.0 }
 0x436   : > { %v3013_v4 = vpop.f32.mrf.mxu1  ;;  %v4876_v34 = vadd.f32 %v4875_v44, %v4874_v39  ;;  %v2611_v3 = vpop.f32.mrf.mxu2  ;;  %v6692_v39 = vld [vmem:[%s6805_s28 + $0x744] sm:$0xf0]  ;;  %v6200_v44 = vld [vmem:[%s6805_s28 + $0x748] sm:$0xf0] }
 0x437   : > { %v3260_v5 = vpop.f32.mrf.mxu3  ;;  %v6199_v56 = vor.u32 %v6692_v39, %v6198_v25  ;;  %v6203_v52 = vor.u32 %v6691_v54, %v6200_v44 }
 0x438   : > { %v2359_v7 = vpop.f32.mrf.mxu0  ;;  %v8382_v36 = vadd.f32 %v3260_v5, %v2611_v3 }
 0x439   : > { %v3009_v37 = vadd.f32 %v3008_v51, %v2359_v7 }
 0x43a   : > { %9651 = vst [vmem:[#allocation56_spill] sm:$0xff] %v8382_v36 }
 0x43b   : > { %v3477_v45 = vpack.c.bf16 %v3009_v37, %v3009_v37  ;;  %v4104_v47 = vsel %vm3876_vm4, %v3009_v37, 0.0  ;;  %v4508_v55 = vmul.f32 %v3009_v37, %v3009_v37  ;;  %v3578_v37 = vpack.c.bf16 %v8382_v36, %v8382_v36  ;;  %2653 = vmatmul.bf16.gmra.mxu2 %v6199_v56  ;;  %v6699_v36 = vld [vmem:[%s6805_s28 + $0x784] sm:$0xf] }
 0x43c   : > { %v4105_v16 = vadd.f32 %v4104_v47, %v4103_v31  ;;  %6444 = vmatmul.msk.bf16.gmra.mxu3 %vm1673_vm2, %v6203_v52 }
 0x43d   : > { %3734 = vst.msk [vmem:[%s6874_s17 + $0x1c8] sm:$0xf] %vm3619_vm3, %v3477_v45  ;;  %v4877_v51 = vsel %vm3876_vm4, %v4508_v55, 0.0 }
 0x43e   : > { %v3015_v7 = vpop.f32.mrf.mxu1  ;;  %v4878_v42 = vadd.f32 %v4877_v51, %v4876_v34  ;;  %3835 = vst.msk [vmem:[%s6874_s17 + $0x35c] sm:$0xf] %vm3619_vm3, %v3578_v37  ;;  %v2614_v3 = vpop.f32.mrf.mxu2  ;;  %v6206_v51 = vld [vmem:[%s6805_s28 + $0x750] sm:$0xf] }
 0x43f   : > { %v3263_v55 = vpop.f32.mrf.mxu3 }
 0x440   : > { %v2361_v14 = vpop.f32.mrf.mxu0  ;;  %v8397_v56 = vadd.f32 %v3263_v55, %v2614_v3  ;;  %v6693_v3 = vld [vmem:[%s6805_s28 + $0x754] sm:$0xf] }
 0x441   : > { %v3011_v31 = vadd.f32 %v3010_v17, %v2361_v14 }
 0x442   : > { %9652 = vst [vmem:[#allocation57_spill] sm:$0xff] %v8397_v56  ;;  %v3579_v17 = vpack.c.bf16 %v8397_v56, %v8397_v56 }
 0x443   : > { %v3478_v25 = vpack.c.bf16 %v3011_v31, %v3011_v31  ;;  %v4106_v45 = vsel %vm3876_vm4, %v3011_v31, 0.0  ;;  %v4509_v47 = vmul.f32 %v3011_v31, %v3011_v31 }
 0x444   : > { %v4107_v5 = vadd.f32 %v4106_v45, %v4105_v16  ;;  %3836 = vst.msk [vmem:[%s6874_s17 + $0x360] sm:$0xf] %vm3619_vm3, %v3579_v17 }
 0x445   : > { %3735 = vst.msk [vmem:[%s6874_s17 + $0x1cc] sm:$0xf] %vm3619_vm3, %v3478_v25  ;;  %v4879_v34 = vsel %vm3876_vm4, %v4509_v47, 0.0 }
 0x446   : > { %v3018_v39 = vpop.f32.mrf.mxu1  ;;  %v4880_v54 = vadd.f32 %v4879_v34, %v4878_v42  ;;  %v2616_v16 = vpop.f32.mrf.mxu2  ;;  %v6694_v42 = vld [vmem:[%s6805_s28 + $0x754] sm:$0xf0]  ;;  %v6208_v34 = vld [vmem:[%s6805_s28 + $0x758] sm:$0xf0] }
 0x447   : > { %v3265_v25 = vpop.f32.mrf.mxu3  ;;  %v6207_v55 = vor.u32 %v6694_v42, %v6206_v51  ;;  %v6211_v17 = vor.u32 %v6693_v3, %v6208_v34 }
 0x448   : > { %v2364_v14 = vpop.f32.mrf.mxu0  ;;  %v8409_v47 = vadd.f32 %v3265_v25, %v2616_v16 }
 0x449   : > { %v3014_v44 = vadd.f32 %v3013_v4, %v2364_v14 }
 0x44a   : > { %9653 = vst [vmem:[#allocation58_spill] sm:$0xff] %v8409_v47 }
 0x44b   : > { %v3479_v52 = vpack.c.bf16 %v3014_v44, %v3014_v44  ;;  %v4108_v37 = vsel %vm3876_vm4, %v3014_v44, 0.0  ;;  %v4510_v31 = vmul.f32 %v3014_v44, %v3014_v44  ;;  %v3580_v44 = vpack.c.bf16 %v8409_v47, %v8409_v47  ;;  %2658 = vmatmul.bf16.gmra.mxu2 %v6207_v55  ;;  %v6214_v55 = vld [vmem:[%s6805_s28 + $0x760] sm:$0xf]  ;;  %v6224_v47 = vld [vmem:[%s6805_s28 + $0x778] sm:$0xf0] }
 0x44c   : > { %v8407_v45 = vadd.f32 %v4108_v37, %v4107_v5  ;;  %6445 = vmatmul.msk.bf16.gmra.mxu3 %vm1673_vm2, %v6211_v17  ;;  %v6696_v17 = vld [vmem:[%s6805_s28 + $0x764] sm:$0xf0] }
 0x44d   : > { %3736 = vst.msk [vmem:[%s6874_s17 + $0x1d0] sm:$0xf] %vm3619_vm3, %v3479_v52  ;;  %v4881_v4 = vsel %vm3876_vm4, %v4510_v31, 0.0 }
 0x44e   : > { %v3020_v14 = vpop.f32.mrf.mxu1  ;;  %v8415_v56 = vadd.f32 %v4881_v4, %v4880_v54  ;;  %3837 = vst.msk [vmem:[%s6874_s17 + $0x364] sm:$0xf] %vm3619_vm3, %v3580_v44  ;;  %v2619_v51 = vpop.f32.mrf.mxu2  ;;  %v6695_v44 = vld [vmem:[%s6805_s28 + $0x764] sm:$0xf] }
 0x44f   : > { %v3268_v52 = vpop.f32.mrf.mxu3 }
 0x450   : > { %v2366_v5 = vpop.f32.mrf.mxu0  ;;  %v8428_v31 = vadd.f32 %v3268_v52, %v2619_v51  ;;  %v6215_v51 = vor.u32 %v6696_v17, %v6214_v55 }
 0x451   : > { %v8422_v16 = vadd.f32 %v3015_v7, %v2366_v5 }
 0x452   : > { %9654 = vst [vmem:[#allocation59_spill] sm:$0xff] %v8428_v31  ;;  %v3581_v42 = vpack.c.bf16 %v8428_v31, %v8428_v31  ;;  %v6697_v31 = vld [vmem:[%s6805_s28 + $0x774] sm:$0xf] }
 0x453   : > { %v3480_v54 = vpack.c.bf16 %v8422_v16, %v8422_v16 }
 0x454   : > { %3838 = vst.msk [vmem:[%s6874_s17 + $0x368] sm:$0xf] %vm3619_vm3, %v3581_v42 }
 0x455   : > { %3737 = vst.msk [vmem:[%s6874_s17 + $0x1d4] sm:$0xf] %vm3619_vm3, %v3480_v54  ;;  %v6216_v54 = vld [vmem:[%s6805_s28 + $0x768] sm:$0xf0] }
 0x456   : > { %v3023_v37 = vpop.f32.mrf.mxu1  ;;  %v2621_v7 = vpop.f32.mrf.mxu2  ;;  %v6219_v52 = vor.u32 %v6695_v44, %v6216_v54 }
 0x457   : > { %v3270_v4 = vpop.f32.mrf.mxu3 }
 0x458   : > { %v2369_v25 = vpop.f32.mrf.mxu0  ;;  %v8441_v5 = vadd.f32 %v3270_v4, %v2621_v7 }
 0x459   : > { %v8432_v3 = vadd.f32 %v3018_v39, %v2369_v25 }
 0x45a   : > { %9655 = vst [vmem:[#allocation60_spill] sm:$0xff] %v8441_v5  ;;  %v3582_v25 = vpack.c.bf16 %v8441_v5, %v8441_v5 }
 0x45b   : > { %v3481_v34 = vpack.c.bf16 %v8432_v3, %v8432_v3  ;;  %2663 = vmatmul.bf16.gmra.mxu2 %v6215_v51 }
 0x45c   : > { %3839 = vst.msk [vmem:[%s6874_s17 + $0x36c] sm:$0xf] %vm3619_vm3, %v3582_v25  ;;  %6446 = vmatmul.msk.bf16.gmra.mxu3 %vm1673_vm2, %v6219_v52  ;;  %v6222_v25 = vld [vmem:[%s6805_s28 + $0x770] sm:$0xf] }
 0x45d   : > { %3738 = vst.msk [vmem:[%s6874_s17 + $0x1d8] sm:$0xf] %vm3619_vm3, %v3481_v34 }
 0x45e   : > { %v3025_v39 = vpop.f32.mrf.mxu1  ;;  %v2624_v55 = vpop.f32.mrf.mxu2 }
 0x45f   : > { %v3273_v4 = vpop.f32.mrf.mxu3 }
 0x460   : > { %v2371_v42 = vpop.f32.mrf.mxu0  ;;  %v8457_v44 = vadd.f32 %v3273_v4, %v2624_v55 }
 0x461   : > { %v8451_v7 = vadd.f32 %v3020_v14, %v2371_v42 }
 0x462   : > { %9656 = vst [vmem:[#allocation61_spill] sm:$0xff] %v8457_v44  ;;  %v3583_v54 = vpack.c.bf16 %v8457_v44, %v8457_v44 }
 0x463   : > { %v3482_v34 = vpack.c.bf16 %v8451_v7, %v8451_v7 }
 0x464   : > { %3840 = vst.msk [vmem:[%s6874_s17 + $0x370] sm:$0xf] %vm3619_vm3, %v3583_v54 }
 0x465   : > { %3739 = vst.msk [vmem:[%s6874_s17 + $0x1dc] sm:$0xf] %vm3619_vm3, %v3482_v34  ;;  %v6698_v34 = vld [vmem:[%s6805_s28 + $0x774] sm:$0xf0] }
 0x466   : > { %v3028_v17 = vpop.f32.mrf.mxu1  ;;  %v2626_v14 = vpop.f32.mrf.mxu2  ;;  %v6223_v4 = vor.u32 %v6698_v34, %v6222_v25 }
 0x467   : > { %v3275_v5 = vpop.f32.mrf.mxu3 }
 0x468   : > { %v2374_v51 = vpop.f32.mrf.mxu0  ;;  %v8470_v55 = vadd.f32 %v3275_v5, %v2626_v14 }
 0x469   : > { %v8461_v52 = vadd.f32 %v3023_v37, %v2374_v51  ;;  %v6227_v51 = vor.u32 %v6697_v31, %v6224_v47 }
 0x46a   : > { %9657 = vst [vmem:[#allocation62_spill] sm:$0xff] %v8470_v55  ;;  %v3584_v54 = vpack.c.bf16 %v8470_v55, %v8470_v55 }
 0x46b   : > { %v3483_v42 = vpack.c.bf16 %v8461_v52, %v8461_v52  ;;  %2668 = vmatmul.bf16.gmra.mxu2 %v6223_v4 }
 0x46c   : > { %3841 = vst.msk [vmem:[%s6874_s17 + $0x374] sm:$0xf] %vm3619_vm3, %v3584_v54  ;;  %6447 = vmatmul.msk.bf16.gmra.mxu3 %vm1673_vm2, %v6227_v51 }
 0x46d   : > { %3740 = vst.msk [vmem:[%s6874_s17 + $0x1e0] sm:$0xf] %vm3619_vm3, %v3483_v42 }
 0x46e   : > { %v3030_v37 = vpop.f32.mrf.mxu1  ;;  %v2629_v14 = vpop.f32.mrf.mxu2 }
 0x46f   : > { %v3278_v47 = vpop.f32.mrf.mxu3 }
 0x470   : > { %v2376_v44 = vpop.f32.mrf.mxu0  ;;  %v8486_v42 = vadd.f32 %v3278_v47, %v2629_v14 }
 0x471   : > { %v8480_v5 = vadd.f32 %v3025_v39, %v2376_v44  ;;  %v6230_v44 = vld [vmem:[%s6805_s28 + $0x780] sm:$0xf] }
 0x472   : > { %9658 = vst [vmem:[#allocation63_spill] sm:$0xff] %v8486_v42  ;;  %v3585_v4 = vpack.c.bf16 %v8486_v42, %v8486_v42 }
 0x473   : > { %v3484_v25 = vpack.c.bf16 %v8480_v5, %v8480_v5 }
 0x474   : > { %3842 = vst.msk [vmem:[%s6874_s17 + $0x378] sm:$0xf] %vm3619_vm3, %v3585_v4 }
 0x475   : > { %3741 = vst.msk [vmem:[%s6874_s17 + $0x1e4] sm:$0xf] %vm3619_vm3, %v3484_v25  ;;  %v6700_v25 = vld [vmem:[%s6805_s28 + $0x784] sm:$0xf0] }
 0x476   : > { %v3033_v31 = vpop.f32.mrf.mxu1  ;;  %v2631_v39 = vpop.f32.mrf.mxu2  ;;  %v6231_v47 = vor.u32 %v6700_v25, %v6230_v44 }
 0x477   : > { %v3280_v55 = vpop.f32.mrf.mxu3 }
 0x478   : > { %v2379_v34 = vpop.f32.mrf.mxu0  ;;  %v8499_v14 = vadd.f32 %v3280_v55, %v2631_v39 }
 0x479   : > { %v8490_v51 = vadd.f32 %v3028_v17, %v2379_v34  ;;  %v6235_v34 = vor.u32 %v6699_v36, %v6232_v9 }
 0x47a   : > { %9659 = vst [vmem:[#allocation64_spill] sm:$0xff] %v8499_v14  ;;  %v3586_v4 = vpack.c.bf16 %v8499_v14, %v8499_v14  ;;  %v4511_v14 = vmul.f32 %v8422_v16, %v8422_v16 }
 0x47b   : > { %v3485_v54 = vpack.c.bf16 %v8490_v51, %v8490_v51  ;;  %2673 = vmatmul.bf16.gmra.mxu2 %v6231_v47 }
 0x47c   : > { %3843 = vst.msk [vmem:[%s6874_s17 + $0x37c] sm:$0xf] %vm3619_vm3, %v3586_v4  ;;  %6448 = vmatmul.msk.bf16.gmra.mxu3 %vm1673_vm2, %v6235_v34  ;;  %v6238_v34 = vld [vmem:[%s6805_s28 + $0x790] sm:$0xf] }
 0x47d   : > { %3742 = vst.msk [vmem:[%s6874_s17 + $0x1e8] sm:$0xf] %vm3619_vm3, %v3485_v54 }
 0x47e   : > { %v3035_v17 = vpop.f32.mrf.mxu1  ;;  %v2634_v39 = vpop.f32.mrf.mxu2 }
 0x47f   : > { %v3283_v9 = vpop.f32.mrf.mxu3 }
 0x480   : > { %v2381_v42 = vpop.f32.mrf.mxu0  ;;  %v8517_v47 = vadd.f32 %v3283_v9, %v2634_v39  ;;  %v4110_v39 = vsel %vm3876_vm4, %v8422_v16, 0.0  ;;  %v4512_v9 = vmul.f32 %v8432_v3, %v8432_v3  ;;  %v4513_v16 = vmul.f32 %v8451_v7, %v8451_v7 }
 0x481   : > { %v8509_v55 = vadd.f32 %v3030_v37, %v2381_v42  ;;  %v6702_v37 = vld [vmem:[%s6805_s28 + $0x794] sm:$0xf0]  ;;  %v6701_v42 = vld [vmem:[%s6805_s28 + $0x794] sm:$0xf] }
 0x482   : > { %9660 = vst [vmem:[#allocation65_spill] sm:$0xff] %v8517_v47  ;;  %v6239_v0 = vor.u32 %v6702_v37, %v6238_v34  ;;  %v6243_v35 = vor.u32 %v6701_v42, %v6240_v19  ;;  %v4885_v19 = vsel %vm3876_vm4, %v4512_v9, 0.0  ;;  %v4114_v34 = vsel %vm3876_vm4, %v8451_v7, 0.0 }
 0x483   : > { %v3486_v44 = vpack.c.bf16 %v8509_v55, %v8509_v55 }
 0x485   : > { %3743 = vst.msk [vmem:[%s6874_s17 + $0x1ec] sm:$0xf] %vm3619_vm3, %v3486_v44  ;;  %v3587_v44 = vpack.c.bf16 %v8517_v47, %v8517_v47 }
 0x486   : > { %v3038_v36 = vpop.f32.mrf.mxu1  ;;  %v2636_v4 = vpop.f32.mrf.mxu2 }
 0x487   : > { %v3285_v13 = vpop.f32.mrf.mxu3  ;;  %3844 = vst.msk [vmem:[%s6874_s17 + $0x380] sm:$0xf] %vm3619_vm3, %v3587_v44 }
 0x488   : > { %v2384_v54 = vpop.f32.mrf.mxu0 }
 0x489   : > { %v8515_v25 = vadd.f32 %v3033_v31, %v2384_v54  ;;  %v8529_v31 = vadd.f32 %v3285_v13, %v2636_v4  ;;  %v4883_v13 = vsel %vm3876_vm4, %v4511_v14, 0.0  ;;  %v4112_v4 = vsel %vm3876_vm4, %v8432_v3, 0.0 }
 0x48a   : > { %v4514_v3 = vmul.f32 %v8461_v52, %v8461_v52  ;;  %v4884_v37 = vadd.f32 %v4883_v13, %v8415_v56  ;;  %v4516_v56 = vmul.f32 %v8490_v51, %v8490_v51 }
 0x48b   : > { %v3487_v59 = vpack.c.bf16 %v8515_v25, %v8515_v25  ;;  %9661 = vst [vmem:[#allocation66_spill] sm:$0xff] %v8529_v31  ;;  %v3588_v47 = vpack.c.bf16 %v8529_v31, %v8529_v31  ;;  %2678 = vmatmul.bf16.gmra.mxu2 %v6239_v0 }
 0x48c   : > { %6449 = vmatmul.msk.bf16.gmra.mxu3 %vm1673_vm2, %v6243_v35  ;;  %v4515_v35 = vmul.f32 %v8480_v5, %v8480_v5  ;;  %v4886_v7 = vadd.f32 %v4885_v19, %v4884_v37  ;;  %v4889_v31 = vsel %vm3876_vm4, %v4514_v3, 0.0  ;;  %v4518_v3 = vmul.f32 %v8515_v25, %v8515_v25 }
 0x48d   : > { %3744 = vst.msk [vmem:[%s6874_s17 + $0x1f0] sm:$0xf] %vm3619_vm3, %v3487_v59  ;;  %v4111_v59 = vadd.f32 %v4110_v39, %v8407_v45  ;;  %v4887_v45 = vsel %vm3876_vm4, %v4513_v16, 0.0 }
 0x48e   : > { %v8537_v54 = vpop.f32.mrf.mxu1  ;;  %3845 = vst.msk [vmem:[%s6874_s17 + $0x384] sm:$0xf] %vm3619_vm3, %v3588_v47  ;;  %v2639_v42 = vpop.f32.mrf.mxu2  ;;  %v4116_v47 = vsel %vm3876_vm4, %v8461_v52, 0.0  ;;  %v4888_v13 = vadd.f32 %v4887_v45, %v4886_v7  ;;  %v4893_v45 = vsel %vm3876_vm4, %v4516_v56, 0.0 }
 0x48f   : > { %v4113_v0 = vadd.f32 %v4112_v4, %v4111_v59  ;;  %v3288_v39 = vpop.f32.mrf.mxu3  ;;  %v4517_v4 = vmul.f32 %v8509_v55, %v8509_v55  ;;  %v4891_v59 = vsel %vm3876_vm4, %v4515_v35, 0.0 }
 0x490   : > { %v2386_v11 = vpop.f32.mrf.mxu0  ;;  %v4890_v19 = vadd.f32 %v4889_v31, %v4888_v13  ;;  %v8585_v35 = vadd.f32 %v3288_v39, %v2639_v42  ;;  %v6704_v42 = vld [vmem:[%s6805_s28 + $0x7a4] sm:$0xf0]  ;;  %v6703_v39 = vld [vmem:[%s6805_s28 + $0x7a4] sm:$0xf] }
 0x491   : > { %v3036_v14 = vadd.f32 %v3035_v17, %v2386_v11  ;;  %v4115_v9 = vadd.f32 %v4114_v34, %v4113_v0  ;;  %v4118_v11 = vsel %vm3876_vm4, %v8480_v5, 0.0  ;;  %v4120_v5 = vsel %vm3876_vm4, %v8490_v51, 0.0 }
 0x492   : > { %9662 = vst [vmem:[#allocation67_spill] sm:$0xff] %v8585_v35  ;;  %v4892_v51 = vadd.f32 %v4891_v59, %v4890_v19 }
 0x493   : > { %v3488_v44 = vpack.c.bf16 %v3036_v14, %v3036_v14  ;;  %v4117_v52 = vadd.f32 %v4116_v47, %v4115_v9  ;;  %v6246_v9 = vld [vmem:[%s6805_s28 + $0x7a0] sm:$0xf]  ;;  %v4519_v56 = vmul.f32 %v3036_v14, %v3036_v14  ;;  %v4126_v19 = vsel %vm3876_vm4, %v3036_v14, 0.0 }
 0x494   : > { %v4894_v13 = vadd.f32 %v4893_v45, %v4892_v51 }
 0x495   : > { %3745 = vst.msk [vmem:[%s6874_s17 + $0x1f4] sm:$0xf] %vm3619_vm3, %v3488_v44  ;;  %v4119_v34 = vadd.f32 %v4118_v11, %v4117_v52  ;;  %v4895_v44 = vsel %vm3876_vm4, %v4517_v4, 0.0  ;;  %v4124_v11 = vsel %vm3876_vm4, %v8515_v25, 0.0  ;;  %v4897_v4 = vsel %vm3876_vm4, %v4518_v3, 0.0 }
 0x496   : > { %v3043_v17 = vpop.f32.mrf.mxu1  ;;  %v2641_v7 = vpop.f32.mrf.mxu2  ;;  %v4899_v45 = vsel %vm3876_vm4, %v4519_v56, 0.0 }
 0x497   : > { %v8573_v16 = vadd.f32 %v3043_v17, %v7091_v63  ;;  %v4122_v63 = vsel %vm3876_vm4, %v8509_v55, 0.0  ;;  %v4121_v31 = vadd.f32 %v4120_v5, %v4119_v34  ;;  %v3589_v55 = vpack.c.bf16 %v8585_v35, %v8585_v35  ;;  %v6248_v5 = vld [vmem:[%s6805_s28 + $0x7a8] sm:$0xf0] }
 0x498   : > { %v2389_v0 = vpop.f32.mrf.mxu0  ;;  %v4896_v35 = vadd.f32 %v4895_v44, %v4894_v13 }
 0x499   : > { %v3491_v37 = vpack.c.bf16 %v8573_v16, %v8573_v16  ;;  %v3039_v47 = vadd.f32 %v3038_v36, %v2389_v0  ;;  %v3290_v36 = vpop.f32.mrf.mxu3  ;;  %v4123_v52 = vadd.f32 %v4122_v63, %v4121_v31  ;;  %v6251_v0 = vor.u32 %v6703_v39, %v6248_v5  ;;  %3846 = vst.msk [vmem:[%s6874_s17 + $0x388] sm:$0xf] %vm3619_vm3, %v3589_v55 }
 0x49a   : > { %v8598_v59 = vadd.f32 %v3290_v36, %v2641_v7  ;;  %v4898_v63 = vadd.f32 %v4897_v4, %v4896_v35  ;;  %v4524_v39 = vmul.f32 %v7121_v46, %v7121_v46 }
 0x49b   : > { %3748 = vst.msk [vmem:[%s6874_s17 + $0x200] sm:$0xf] %vm3619_vm3, %v3491_v37  ;;  %v3489_v17 = vpack.c.bf16 %v3039_v47, %v3039_v47  ;;  %v4520_v25 = vmul.f32 %v3039_v47, %v3039_v47  ;;  %v6247_v37 = vor.u32 %v6704_v42, %v6246_v9  ;;  %v4125_v33 = vadd.f32 %v4124_v11, %v4123_v52 }
 0x49c   : > { %v3590_v3 = vpack.c.bf16 %v8598_v59, %v8598_v59  ;;  %v4128_v14 = vsel %vm3876_vm4, %v3039_v47, 0.0  ;;  %6450 = vmatmul.msk.bf16.gmra.mxu3 %vm1673_vm2, %v6251_v0  ;;  %v4900_v9 = vadd.f32 %v4899_v45, %v4898_v63  ;;  %v4522_v47 = vmul.f32 %v8573_v16, %v8573_v16 }
 0x49d   : > { %3746 = vst.msk [vmem:[%s6874_s17 + $0x1f8] sm:$0xf] %vm3619_vm3, %v3489_v17  ;;  %2683 = vmatmul.bf16.gmra.mxu2 %v6247_v37  ;;  %v4127_v51 = vadd.f32 %v4126_v19, %v4125_v33 }
 0x49e   : > { %v3045_v34 = vpop.f32.mrf.mxu1  ;;  %3847 = vst.msk [vmem:[%s6874_s17 + $0x38c] sm:$0xf] %vm3619_vm3, %v3590_v3  ;;  %v2644_v56 = vpop.f32.mrf.mxu2  ;;  %v4905_v19 = vsel %vm3876_vm4, %v4522_v47, 0.0  ;;  %v4525_v3 = vmul.f32 %v7128_v53, %v7128_v53 }
 0x49f   : > { %v3046_v50 = vadd.f32 %v3045_v34, %v7102_v15  ;;  %v4901_v15 = vsel %vm3876_vm4, %v4520_v25, 0.0  ;;  %v4129_v11 = vadd.f32 %v4128_v14, %v4127_v51  ;;  %v4136_v34 = vsel %vm3876_vm4, %v7121_v46, 0.0 }
 0x4a0   : > { %v2391_v7 = vpop.f32.mrf.mxu0  ;;  %v4902_v36 = vadd.f32 %v4901_v15, %v4900_v9  ;;  %v6705_v15 = vld [vmem:[%s6805_s28 + $0x7b4] sm:$0xf]  ;;  %v4138_v46 = vsel %vm3876_vm4, %v7128_v53, 0.0  ;;  %v4140_v53 = vsel %vm3876_vm4, %v7151_v22, 0.0 }
 0x4a1   : > { %v3492_v31 = vpack.c.bf16 %v3046_v50, %v3046_v50  ;;  %v3041_v44 = vadd.f32 %v8537_v54, %v2391_v7  ;;  %v3293_v55 = vpop.f32.mrf.mxu3  ;;  %v4132_v54 = vsel %vm3876_vm4, %v8573_v16, 0.0  ;;  %v4523_v13 = vmul.f32 %v3046_v50, %v3046_v50  ;;  %v6254_v7 = vld [vmem:[%s6805_s28 + $0x7b0] sm:$0xf] }
 0x4a2   : > { %v4134_v25 = vsel %vm3876_vm4, %v3046_v50, 0.0  ;;  %v4909_v16 = vsel %vm3876_vm4, %v4524_v39, 0.0  ;;  %v8636_v14 = vadd.f32 %v3293_v55, %v2644_v56  ;;  %v6706_v50 = vld [vmem:[%s6805_s28 + $0x7b4] sm:$0xf0]  ;;  %v6256_v56 = vld [vmem:[%s6805_s28 + $0x7b8] sm:$0xf0] }
 0x4a3   : > { %3749 = vst.msk [vmem:[%s6874_s17 + $0x204] sm:$0xf] %vm3619_vm3, %v3492_v31  ;;  %v3490_v33 = vpack.c.bf16 %v3041_v44, %v3041_v44  ;;  %v4130_v35 = vsel %vm3876_vm4, %v3041_v44, 0.0  ;;  %v4521_v17 = vmul.f32 %v3041_v44, %v3041_v44  ;;  %v4907_v45 = vsel %vm3876_vm4, %v4523_v13, 0.0 }
 0x4a4   : > { %v4131_v42 = vadd.f32 %v4130_v35, %v4129_v11  ;;  %v4526_v44 = vmul.f32 %v7151_v22, %v7151_v22  ;;  %v3591_v9 = vpack.c.bf16 %v8636_v14, %v8636_v14  ;;  %v6255_v47 = vor.u32 %v6706_v50, %v6254_v7 }
 0x4a5   : > { %3747 = vst.msk [vmem:[%s6874_s17 + $0x1fc] sm:$0xf] %vm3619_vm3, %v3490_v33  ;;  %v4903_v52 = vsel %vm3876_vm4, %v4521_v17, 0.0  ;;  %v6259_v55 = vor.u32 %v6705_v15, %v6256_v56  ;;  %v4148_v15 = vsel %vm3876_vm4, %v7211_v40, 0.0 }
 0x4a6   : > { %v4133_v4 = vadd.f32 %v4132_v54, %v4131_v42  ;;  %v4904_v5 = vadd.f32 %v4903_v52, %v4902_v36  ;;  %v2646_v31 = vpop.f32.mrf.mxu2  ;;  %v4911_v36 = vsel %vm3876_vm4, %v4525_v3, 0.0  ;;  %v4527_v42 = vmul.f32 %v7158_v29, %v7158_v29  ;;  %3848 = vst.msk [vmem:[%s6874_s17 + $0x390] sm:$0xf] %vm3619_vm3, %v3591_v9 }
 0x4a7   : > { %v4913_v52 = vsel %vm3876_vm4, %v4526_v44, 0.0 }
 0x4a8   : > { %v4135_v37 = vadd.f32 %v4134_v25, %v4133_v4  ;;  %v4906_v0 = vadd.f32 %v4905_v19, %v4904_v5  ;;  %v4142_v4 = vsel %vm3876_vm4, %v7158_v29, 0.0  ;;  %v4528_v5 = vmul.f32 %v7181_v62, %v7181_v62 }
 0x4a9   : > { %v3295_v11 = vpop.f32.mrf.mxu3  ;;  %v4915_v25 = vsel %vm3876_vm4, %v4527_v42, 0.0 }
 0x4aa   : > { %v4137_v63 = vadd.f32 %v4136_v34, %v4135_v37  ;;  %v4908_v51 = vadd.f32 %v4907_v45, %v4906_v0  ;;  %v8648_v17 = vadd.f32 %v3295_v11, %v2646_v31  ;;  %v4144_v34 = vsel %vm3876_vm4, %v7181_v62, 0.0 }
 0x4ab   : > { %v4529_v37 = vmul.f32 %v7188_v6, %v7188_v6  ;;  %v4917_v3 = vsel %vm3876_vm4, %v4528_v5, 0.0  ;;  %v4146_v45 = vsel %vm3876_vm4, %v7188_v6, 0.0  ;;  %v4531_v31 = vmul.f32 %v7218_v48, %v7218_v48 }
 0x4ac   : > { %v4139_v33 = vadd.f32 %v4138_v46, %v4137_v63  ;;  %v4910_v35 = vadd.f32 %v4909_v16, %v4908_v51  ;;  %v3592_v13 = vpack.c.bf16 %v8648_v17, %v8648_v17  ;;  %6451 = vmatmul.msk.bf16.gmra.mxu3 %vm1673_vm2, %v6259_v55  ;;  %v4530_v63 = vmul.f32 %v7211_v40, %v7211_v40 }
 0x4ad   : > { %2688 = vmatmul.bf16.gmra.mxu2 %v6255_v47  ;;  %v4919_v50 = vsel %vm3876_vm4, %v4529_v37, 0.0  ;;  %v4532_v46 = vmul.f32 %v7241_v18, %v7241_v18  ;;  %v4150_v11 = vsel %vm3876_vm4, %v7218_v48, 0.0  ;;  %v4923_v47 = vsel %vm3876_vm4, %v4531_v31, 0.0  ;;  %v6708_v48 = vld [vmem:[%s6805_s28 + $0x7c4] sm:$0xf0] }
 0x4ae   : > { %v4141_v39 = vadd.f32 %v4140_v53, %v4139_v33  ;;  %v4912_v54 = vadd.f32 %v4911_v36, %v4910_v35  ;;  %3849 = vst.msk [vmem:[%s6874_s17 + $0x394] sm:$0xf] %vm3619_vm3, %v3592_v13  ;;  %v2649_v16 = vpop.f32.mrf.mxu2  ;;  %v4921_v9 = vsel %vm3876_vm4, %v4530_v63, 0.0  ;;  %v4152_v40 = vsel %vm3876_vm4, %v7241_v18, 0.0  ;;  %v6707_v13 = vld [vmem:[%s6805_s28 + $0x7c4] sm:$0xf] }
 0x4af   : > { %v4925_v35 = vsel %vm3876_vm4, %v4532_v46, 0.0  ;;  %v4533_v55 = vmul.f32 %v7248_v28, %v7248_v28  ;;  %v4534_v18 = vmul.f32 %v7271_v60, %v7271_v60  ;;  %v4158_v31 = vsel %vm3876_vm4, %v7278_v10, 0.0 }
 0x4b0   : > { %v4143_v22 = vadd.f32 %v4142_v4, %v4141_v39  ;;  %v4914_v19 = vadd.f32 %v4913_v52, %v4912_v54  ;;  %v6262_v54 = vld [vmem:[%s6805_s28 + $0x7c0] sm:$0xf]  ;;  %v4154_v52 = vsel %vm3876_vm4, %v7248_v28, 0.0  ;;  %v4156_v28 = vsel %vm3876_vm4, %v7271_v60, 0.0 }
 0x4b1   : > { %v3298_v51 = vpop.f32.mrf.mxu3  ;;  %v4537_v46 = vmul.f32 %v7308_v57, %v7308_v57 }
 0x4b2   : > { %v4145_v0 = vadd.f32 %v4144_v34, %v4143_v22  ;;  %v4916_v29 = vadd.f32 %v4915_v25, %v4914_v19  ;;  %v8693_v36 = vadd.f32 %v3298_v51, %v2649_v16  ;;  %v6263_v22 = vor.u32 %v6708_v48, %v6262_v54  ;;  %v6264_v19 = vld [vmem:[%s6805_s28 + $0x7c8] sm:$0xf0] }
 0x4b3   : > { %v4535_v16 = vmul.f32 %v7278_v10, %v7278_v10  ;;  %v4929_v51 = vsel %vm3876_vm4, %v4534_v18, 0.0  ;;  %v4166_v54 = vsel %vm3876_vm4, %v7338_v43, 0.0 }
 0x4b4   : > { %v4147_v7 = vadd.f32 %v4146_v45, %v4145_v0  ;;  %v4918_v62 = vadd.f32 %v4917_v3, %v4916_v29  ;;  %v3593_v4 = vpack.c.bf16 %v8693_v36, %v8693_v36  ;;  %v6267_v0 = vor.u32 %v6707_v13, %v6264_v19 }
 0x4b5   : > { %v4927_v29 = vsel %vm3876_vm4, %v4533_v55, 0.0  ;;  %v4164_v55 = vsel %vm3876_vm4, %v7331_v24, 0.0 }
 0x4b6   : > { %v4149_v6 = vadd.f32 %v4148_v15, %v4147_v7  ;;  %v4920_v44 = vadd.f32 %v4919_v50, %v4918_v62  ;;  %v2651_v39 = vpop.f32.mrf.mxu2  ;;  %3850 = vst.msk [vmem:[%s6874_s17 + $0x398] sm:$0xf] %vm3619_vm3, %v3593_v4  ;;  %v4536_v7 = vmul.f32 %v7301_v41, %v7301_v41  ;;  %v4931_v50 = vsel %vm3876_vm4, %v4535_v16, 0.0 }
 0x4b7   : > { %v4160_v15 = vsel %vm3876_vm4, %v7301_v41, 0.0  ;;  %v4541_v4 = vmul.f32 %v7368_v32, %v7368_v32 }
 0x4b8   : > { %v4151_v56 = vadd.f32 %v4150_v11, %v4149_v6  ;;  %v4922_v33 = vadd.f32 %v4921_v9, %v4920_v44  ;;  %v4933_v9 = vsel %vm3876_vm4, %v4536_v7, 0.0  ;;  %v4162_v11 = vsel %vm3876_vm4, %v7308_v57, 0.0 }
 0x4b9   : > { %v3300_v5 = vpop.f32.mrf.mxu3 }
 0x4ba   : > { %v4153_v53 = vadd.f32 %v4152_v40, %v4151_v56  ;;  %v4924_v42 = vadd.f32 %v4923_v47, %v4922_v33  ;;  %v8705_v37 = vadd.f32 %v3300_v5, %v2651_v39  ;;  %v4538_v47 = vmul.f32 %v7331_v24, %v7331_v24 }
 0x4bb   : > { %v4539_v33 = vmul.f32 %v7338_v43, %v7338_v43  ;;  %v4168_v24 = vsel %vm3876_vm4, %v7361_v8, 0.0  ;;  %v6710_v43 = vld [vmem:[%s6805_s28 + $0x7d4] sm:$0xf0] }
 0x4bc   : > { %v4155_v25 = vadd.f32 %v4154_v52, %v4153_v53  ;;  %v4926_v34 = vadd.f32 %v4925_v35, %v4924_v42  ;;  %v3594_v63 = vpack.c.bf16 %v8705_v37, %v8705_v37  ;;  %6452 = vmatmul.msk.bf16.gmra.mxu3 %vm1673_vm2, %v6267_v0  ;;  %v4935_v35 = vsel %vm3876_vm4, %v4537_v46, 0.0  ;;  %v6709_v0 = vld [vmem:[%s6805_s28 + $0x7d4] sm:$0xf] }
 0x4bd   : > { %2693 = vmatmul.bf16.gmra.mxu2 %v6263_v22  ;;  %v4540_v53 = vmul.f32 %v7361_v8, %v7361_v8  ;;  %v4937_v39 = vsel %vm3876_vm4, %v4538_v47, 0.0  ;;  %v4939_v48 = vsel %vm3876_vm4, %v4539_v33, 0.0  ;;  %v4542_v8 = vmul.f32 %v7391_v12, %v7391_v12 }
 0x4be   : > { %v4157_v3 = vadd.f32 %v4156_v28, %v4155_v25  ;;  %v4928_v45 = vadd.f32 %v4927_v29, %v4926_v34  ;;  %3851 = vst.msk [vmem:[%s6874_s17 + $0x39c] sm:$0xf] %vm3619_vm3, %v3594_v63  ;;  %v2654_v44 = vpop.f32.mrf.mxu2  ;;  %v6270_v34 = vld [vmem:[%s6805_s28 + $0x7d0] sm:$0xf]  ;;  %v4170_v29 = vsel %vm3876_vm4, %v7368_v32, 0.0  ;;  %v4172_v32 = vsel %vm3876_vm4, %v7391_v12, 0.0 }
 0x4bf   : > { %v4941_v18 = vsel %vm3876_vm4, %v4540_v53, 0.0  ;;  %v4176_v47 = vsel %vm3876_vm4, %v7421_v1, 0.0 }
 0x4c0   : > { %v4159_v60 = vadd.f32 %v4158_v31, %v4157_v3  ;;  %v4930_v62 = vadd.f32 %v4929_v51, %v4928_v45  ;;  %v6271_v3 = vor.u32 %v6710_v43, %v6270_v34  ;;  %v6272_v45 = vld [vmem:[%s6805_s28 + $0x7d8] sm:$0xf0] }
 0x4c1   : > { %v3303_v56 = vpop.f32.mrf.mxu3  ;;  %v6275_v7 = vor.u32 %v6709_v0, %v6272_v45 }
 0x4c2   : > { %v4161_v6 = vadd.f32 %v4160_v15, %v4159_v60  ;;  %v4932_v10 = vadd.f32 %v4931_v50, %v4930_v62  ;;  %v8750_v5 = vadd.f32 %v3303_v56, %v2654_v44  ;;  %v4943_v60 = vsel %vm3876_vm4, %v4541_v4, 0.0 }
 0x4c3   : > { %v4543_v62 = vmul.f32 %v7400_v30, %v7400_v30  ;;  %v4544_v44 = vmul.f32 %v7421_v1, %v7421_v1  ;;  %v4545_v56 = vmul.f32 %v7430_v23, %v7430_v23 }
 0x4c4   : > { %v4163_v40 = vadd.f32 %v4162_v11, %v4161_v6  ;;  %v4934_v41 = vadd.f32 %v4933_v9, %v4932_v10  ;;  %v3595_v28 = vpack.c.bf16 %v8750_v5, %v8750_v5  ;;  %v4945_v6 = vsel %vm3876_vm4, %v4542_v8, 0.0  ;;  %v6278_v8 = vld [vmem:[%s6805_s28 + $0x7e0] sm:$0xf] }
 0x4c5   : > { %v4174_v10 = vsel %vm3876_vm4, %v7400_v30, 0.0  ;;  %v4947_v11 = vsel %vm3876_vm4, %v4543_v62, 0.0 }
 0x4c6   : > { %v4165_v57 = vadd.f32 %v4164_v55, %v4163_v40  ;;  %v4936_v42 = vadd.f32 %v4935_v35, %v4934_v41  ;;  %v2656_v25 = vpop.f32.mrf.mxu2  ;;  %3852 = vst.msk [vmem:[%s6874_s17 + $0x3a0] sm:$0xf] %vm3619_vm3, %v3595_v28  ;;  %v4949_v41 = vsel %vm3876_vm4, %v4544_v44, 0.0  ;;  %v4178_v35 = vsel %vm3876_vm4, %v7430_v23, 0.0  ;;  %v6711_v28 = vld [vmem:[%s6805_s28 + $0x7e4] sm:$0xf] }
 0x4c7   : > { %v4546_v55 = vmul.f32 %v7451_v2, %v7451_v2 }
 0x4c8   : > { %v4167_v13 = vadd.f32 %v4166_v54, %v4165_v57  ;;  %v4938_v52 = vadd.f32 %v4937_v39, %v4936_v42  ;;  %v4547_v57 = vmul.f32 %v7460_v20, %v7460_v20  ;;  %v4951_v39 = vsel %vm3876_vm4, %v4545_v56, 0.0 }
 0x4c9   : > { %v3305_v16 = vpop.f32.mrf.mxu3  ;;  %v4180_v54 = vsel %vm3876_vm4, %v7451_v2, 0.0  ;;  %v4184_v2 = vsel %vm3876_vm4, %v7481_v38, 0.0  ;;  %v4192_v56 = vsel %vm3876_vm4, %v7541_v58, 0.0 }
 0x4ca   : > { %v4169_v22 = vadd.f32 %v4168_v24, %v4167_v13  ;;  %v4940_v19 = vadd.f32 %v4939_v48, %v4938_v52  ;;  %v8762_v31 = vadd.f32 %v3305_v16, %v2656_v25  ;;  %v4548_v48 = vmul.f32 %v7481_v38, %v7481_v38 }
 0x4cb   : > { %v4953_v52 = vsel %vm3876_vm4, %v4546_v55, 0.0  ;;  %v4182_v24 = vsel %vm3876_vm4, %v7460_v20, 0.0  ;;  %v4549_v25 = vmul.f32 %v7490_v21, %v7490_v21  ;;  %v6712_v20 = vld [vmem:[%s6805_s28 + $0x7e4] sm:$0xf0]  ;;  %v4186_v16 = vsel %vm3876_vm4, %v7490_v21, 0.0 }
 0x4cc   : > { %v4171_v63 = vadd.f32 %v4170_v29, %v4169_v22  ;;  %v4942_v51 = vadd.f32 %v4941_v18, %v4940_v19  ;;  %v3596_v46 = vpack.c.bf16 %v8762_v31, %v8762_v31  ;;  %6453 = vmatmul.msk.bf16.gmra.mxu3 %vm1673_vm2, %v6275_v7  ;;  %v4955_v18 = vsel %vm3876_vm4, %v4547_v57, 0.0  ;;  %v9663_v57 = vld [vmem:[#allocation2_spill] sm:$0xff] }
 0x4cd   : > { %2698 = vmatmul.bf16.gmra.mxu2 %v6271_v3  ;;  %v4957_v19 = vsel %vm3876_vm4, %v4548_v48, 0.0  ;;  %v4550_v38 = vmul.f32 %v7511_v49, %v7511_v49  ;;  %v4188_v21 = vsel %vm3876_vm4, %v7511_v49, 0.0  ;;  %v4554_v55 = vmul.f32 %v7571_v26, %v7571_v26  ;;  %v9664_v48 = vld [vmem:[#allocation3_spill] sm:$0xff] }
 0x4ce   : > { %v4173_v50 = vadd.f32 %v4172_v32, %v4171_v63  ;;  %v4944_v15 = vadd.f32 %v4943_v60, %v4942_v51  ;;  %3853 = vst.msk [vmem:[%s6874_s17 + $0x3a4] sm:$0xf] %vm3619_vm3, %v3596_v46  ;;  %v2659_v40 = vpop.f32.mrf.mxu2  ;;  %v6279_v63 = vor.u32 %v6712_v20, %v6278_v8  ;;  %v6280_v51 = vld [vmem:[%s6805_s28 + $0x7e8] sm:$0xf0]  ;;  %v6286_v20 = vld [vmem:[%s6805_s28 + $0x7f0] sm:$0xf] }
 0x4cf   : > { %v6283_v62 = vor.u32 %v6711_v28, %v6280_v51  ;;  %v4961_v44 = vsel %vm3876_vm4, %v4550_v38, 0.0  ;;  %v6714_v28 = vld [vmem:[%s6805_s28 + $0x7f4] sm:$0xf0] }
 0x4d0   : > { %v4175_v12 = vadd.f32 %v4174_v10, %v4173_v50  ;;  %v4946_v9 = vadd.f32 %v4945_v6, %v4944_v15  ;;  %v4959_v50 = vsel %vm3876_vm4, %v4549_v25, 0.0  ;;  %v4551_v15 = vmul.f32 %v7520_v27, %v7520_v27 }
 0x4d1   : > { %v3308_v53 = vpop.f32.mrf.mxu3 }
 0x4d2   : > { %v4177_v33 = vadd.f32 %v4176_v47, %v4175_v12  ;;  %v4948_v30 = vadd.f32 %v4947_v11, %v4946_v9  ;;  %v8807_v34 = vadd.f32 %v3308_v53, %v2659_v40  ;;  %v4190_v12 = vsel %vm3876_vm4, %v7520_v27, 0.0 }
 0x4d3   : > { %v4552_v9 = vmul.f32 %v7541_v58, %v7541_v58  ;;  %v4963_v47 = vsel %vm3876_vm4, %v4551_v15, 0.0 }
 0x4d4   : > { %v4179_v42 = vadd.f32 %v4178_v35, %v4177_v33  ;;  %v4950_v1 = vadd.f32 %v4949_v41, %v4948_v30  ;;  %v3597_v3 = vpack.c.bf16 %v8807_v34, %v8807_v34  ;;  %v4553_v33 = vmul.f32 %v7550_v61, %v7550_v61 }
 0x4d5   : > { %v4965_v41 = vsel %vm3876_vm4, %v4552_v9, 0.0  ;;  %v4194_v35 = vsel %vm3876_vm4, %v7550_v61, 0.0 }
 0x4d6   : > { %v4181_v23 = vadd.f32 %v4180_v54, %v4179_v42  ;;  %v4952_v13 = vadd.f32 %v4951_v39, %v4950_v1  ;;  %v2661_v29 = vpop.f32.mrf.mxu2  ;;  %3854 = vst.msk [vmem:[%s6874_s17 + $0x3a8] sm:$0xf] %vm3619_vm3, %v3597_v3  ;;  %v4555_v42 = vmul.f32 %v9663_v57, %v9663_v57  ;;  %v4967_v39 = vsel %vm3876_vm4, %v4553_v33, 0.0  ;;  %v9666_v3 = vld [vmem:[#allocation5_spill] sm:$0xff] }
 0x4d7   : > { %v4196_v54 = vsel %vm3876_vm4, %v7571_v26, 0.0  ;;  %v4200_v26 = vsel %vm3876_vm4, %v9664_v48, 0.0 }
 0x4d8   : > { %v4183_v4 = vadd.f32 %v4182_v24, %v4181_v23  ;;  %v4954_v22 = vadd.f32 %v4953_v52, %v4952_v13  ;;  %v4556_v23 = vmul.f32 %v9664_v48, %v9664_v48  ;;  %v4969_v52 = vsel %vm3876_vm4, %v4554_v55, 0.0 }
 0x4d9   : > { %v3310_v45 = vpop.f32.mrf.mxu3  ;;  %v4198_v24 = vsel %vm3876_vm4, %v9663_v57, 0.0 }
 0x4da   : > { %v4185_v43 = vadd.f32 %v4184_v2, %v4183_v4  ;;  %v4956_v0 = vadd.f32 %v4955_v18, %v4954_v22  ;;  %v8819_v32 = vadd.f32 %v3310_v45, %v2661_v29  ;;  %v4971_v18 = vsel %vm3876_vm4, %v4555_v42, 0.0 }
 0x4db   : > { %v4973_v2 = vsel %vm3876_vm4, %v4556_v23, 0.0  ;;  %v4558_v45 = vmul.f32 %v9666_v3, %v9666_v3 }
 0x4dc   : > { %v4187_v7 = vadd.f32 %v4186_v16, %v4185_v43  ;;  %v4958_v60 = vadd.f32 %v4957_v19, %v4956_v0  ;;  %v3598_v10 = vpack.c.bf16 %v8819_v32, %v8819_v32  ;;  %6454 = vmatmul.msk.bf16.gmra.mxu3 %vm1673_vm2, %v6283_v62  ;;  %v9665_v19 = vld [vmem:[#allocation4_spill] sm:$0xff] }
 0x4dd   : > { %2703 = vmatmul.bf16.gmra.mxu2 %v6279_v63  ;;  %v4557_v25 = vmul.f32 %v9665_v19, %v9665_v19  ;;  %v6713_v16 = vld [vmem:[%s6805_s28 + $0x7f4] sm:$0xf]  ;;  %v4202_v38 = vsel %vm3876_vm4, %v9665_v19, 0.0  ;;  %v9672_v19 = vld [vmem:[#allocation11_spill] sm:$0xff] }
 0x4de   : > { %v4189_v46 = vadd.f32 %v4188_v21, %v4187_v7  ;;  %v4960_v6 = vadd.f32 %v4959_v50, %v4958_v60  ;;  %3855 = vst.msk [vmem:[%s6874_s17 + $0x3ac] sm:$0xf] %vm3619_vm3, %v3598_v10  ;;  %v2664_v40 = vpop.f32.mrf.mxu2  ;;  %v6287_v7 = vor.u32 %v6714_v28, %v6286_v20  ;;  %v6288_v60 = vld [vmem:[%s6805_s28 + $0x7f8] sm:$0xf0]  ;;  %v9667_v10 = vld [vmem:[#allocation6_spill] sm:$0xff]  ;;  %v4216_v20 = vsel %vm3876_vm4, %v9672_v19, 0.0 }
 0x4df   : > { %v6291_v15 = vor.u32 %v6713_v16, %v6288_v60  ;;  %v9673_v28 = vld [vmem:[#allocation12_spill] sm:$0xff]  ;;  %v9674_v60 = vld [vmem:[#allocation13_spill] sm:$0xff] }
 0x4e0   : > { %v4191_v49 = vadd.f32 %v4190_v12, %v4189_v46  ;;  %v4962_v11 = vadd.f32 %v4961_v44, %v4960_v6  ;;  %v4975_v46 = vsel %vm3876_vm4, %v4557_v25, 0.0  ;;  %v4204_v6 = vsel %vm3876_vm4, %v9666_v3, 0.0 }
 0x4e1   : > { %v3313_v53 = vpop.f32.mrf.mxu3  ;;  %v4559_v44 = vmul.f32 %v9667_v10, %v9667_v10  ;;  %v4564_v25 = vmul.f32 %v9672_v19, %v9672_v19  ;;  %v4565_v16 = vmul.f32 %v9673_v28, %v9673_v28 }
 0x4e2   : > { %v4193_v30 = vadd.f32 %v4192_v56, %v4191_v49  ;;  %v4964_v27 = vadd.f32 %v4963_v47, %v4962_v11  ;;  %v8864_v43 = vadd.f32 %v3313_v53, %v2664_v40  ;;  %v4977_v11 = vsel %vm3876_vm4, %v4558_v45, 0.0  ;;  %v9668_v56 = vld [vmem:[#allocation7_spill] sm:$0xff] }
 0x4e3   : > { %v4206_v47 = vsel %vm3876_vm4, %v9667_v10, 0.0  ;;  %v4560_v33 = vmul.f32 %v9668_v56, %v9668_v56  ;;  %v4979_v40 = vsel %vm3876_vm4, %v4559_v44, 0.0  ;;  %v4991_v44 = vsel %vm3876_vm4, %v4565_v16, 0.0 }
 0x4e4   : > { %v4195_v1 = vadd.f32 %v4194_v35, %v4193_v30  ;;  %v4966_v58 = vadd.f32 %v4965_v41, %v4964_v27  ;;  %v3599_v63 = vpack.c.bf16 %v8864_v43, %v8864_v43  ;;  %v4208_v41 = vsel %vm3876_vm4, %v9668_v56, 0.0  ;;  %v9669_v35 = vld [vmem:[#allocation8_spill] sm:$0xff] }
 0x4e5   : > { %v4561_v55 = vmul.f32 %v9669_v35, %v9669_v35 }
 0x4e6   : > { %v4197_v61 = vadd.f32 %v4196_v54, %v4195_v1  ;;  %v4968_v13 = vadd.f32 %v4967_v39, %v4966_v58  ;;  %v2666_v8 = vpop.f32.mrf.mxu2  ;;  %3856 = vst.msk [vmem:[%s6874_s17 + $0x3b0] sm:$0xf] %vm3619_vm3, %v3599_v63  ;;  %v4981_v1 = vsel %vm3876_vm4, %v4560_v33, 0.0  ;;  %v4210_v58 = vsel %vm3876_vm4, %v9669_v35, 0.0  ;;  %v9670_v39 = vld [vmem:[#allocation9_spill] sm:$0xff] }
 0x4e7   : > { %v4562_v54 = vmul.f32 %v9670_v39, %v9670_v39 }
 0x4e8   : > { %v4199_v4 = vadd.f32 %v4198_v24, %v4197_v61  ;;  %v4970_v22 = vadd.f32 %v4969_v52, %v4968_v13  ;;  %v4983_v13 = vsel %vm3876_vm4, %v4561_v55, 0.0  ;;  %v4212_v52 = vsel %vm3876_vm4, %v9670_v39, 0.0  ;;  %v9671_v24 = vld [vmem:[#allocation10_spill] sm:$0xff] }
 0x4e9   : > { %v3315_v51 = vpop.f32.mrf.mxu3 }
 0x4ea   : > { %v4201_v0 = vadd.f32 %v4200_v26, %v4199_v4  ;;  %v4972_v29 = vadd.f32 %v4971_v18, %v4970_v22  ;;  %v8876_v21 = vadd.f32 %v3315_v51, %v2666_v8  ;;  %v4563_v18 = vmul.f32 %v9671_v24, %v9671_v24 }
 0x4eb   : > { %v4985_v26 = vsel %vm3876_vm4, %v4562_v54, 0.0  ;;  %v4989_v51 = vsel %vm3876_vm4, %v4564_v25, 0.0 }
 0x4ec   : > { %v4203_v62 = vadd.f32 %v4202_v38, %v4201_v0  ;;  %v4974_v50 = vadd.f32 %v4973_v2, %v4972_v29  ;;  %v3600_v49 = vpack.c.bf16 %v8876_v21, %v8876_v21  ;;  %6455 = vmatmul.msk.bf16.gmra.mxu3 %vm1673_vm2, %v6291_v15  ;;  %v4214_v2 = vsel %vm3876_vm4, %v9671_v24, 0.0 }
 0x4ed   : > { %2708 = vmatmul.bf16.gmra.mxu2 %v6287_v7  ;;  %v4987_v8 = vsel %vm3876_vm4, %v4563_v18, 0.0  ;;  %v4218_v7 = vsel %vm3876_vm4, %v9673_v28, 0.0 }
 0x4ee   : > { %v4205_v12 = vadd.f32 %v4204_v6, %v4203_v62  ;;  %v4976_v9 = vadd.f32 %v4975_v46, %v4974_v50  ;;  %3857 = vst.msk [vmem:[%s6874_s17 + $0x3b4] sm:$0xf] %vm3619_vm3, %v3600_v49  ;;  %v2669_v42 = vpop.f32.mrf.mxu2  ;;  %v4566_v62 = vmul.f32 %v9674_v60, %v9674_v60 }
 0x4f0   : > { %v4207_v30 = vadd.f32 %v4206_v47, %v4205_v12  ;;  %v4978_v27 = vadd.f32 %v4977_v11, %v4976_v9  ;;  %v4220_v12 = vsel %vm3876_vm4, %v9674_v60, 0.0  ;;  %v9675_v9 = vld [vmem:[#allocation14_spill] sm:$0xff]  ;;  %v4993_v33 = vsel %vm3876_vm4, %v4566_v62, 0.0 }
 0x4f1   : > { %v3318_v48 = vpop.f32.mrf.mxu3  ;;  %v4567_v49 = vmul.f32 %v9675_v9, %v9675_v9 }
 0x4f2   : > { %v4209_v53 = vadd.f32 %v4208_v41, %v4207_v30  ;;  %v4980_v57 = vadd.f32 %v4979_v40, %v4978_v27  ;;  %v8920_v38 = vadd.f32 %v3318_v48, %v2669_v42  ;;  %v4222_v30 = vsel %vm3876_vm4, %v9675_v9, 0.0  ;;  %v9676_v27 = vld [vmem:[#allocation15_spill] sm:$0xff] }
 0x4f3   : > { %v4568_v40 = vmul.f32 %v9676_v27, %v9676_v27  ;;  %v4995_v55 = vsel %vm3876_vm4, %v4567_v49, 0.0 }
 0x4f4   : > { %v4211_v23 = vadd.f32 %v4210_v58, %v4209_v53  ;;  %v4982_v61 = vadd.f32 %v4981_v1, %v4980_v57  ;;  %v3601_v50 = vpack.c.bf16 %v8920_v38, %v8920_v38  ;;  %v4224_v53 = vsel %vm3876_vm4, %v9676_v27, 0.0  ;;  %v9677_v57 = vld [vmem:[#allocation16_spill] sm:$0xff] }
 0x4f5   : > { %v4569_v42 = vmul.f32 %v9677_v57, %v9677_v57  ;;  %v4997_v54 = vsel %vm3876_vm4, %v4568_v40, 0.0  ;;  %v4226_v48 = vsel %vm3876_vm4, %v9677_v57, 0.0 }
 0x4f6   : > { %v4213_v4 = vadd.f32 %v4212_v52, %v4211_v23  ;;  %v4984_v22 = vadd.f32 %v4983_v13, %v4982_v61  ;;  %v2671_v63 = vpop.f32.mrf.mxu2  ;;  %3858 = vst.msk [vmem:[%s6874_s17 + $0x3b8] sm:$0xf] %vm3619_vm3, %v3601_v50  ;;  %v9678_v23 = vld [vmem:[#allocation17_spill] sm:$0xff] }
 0x4f7   : > { %v4570_v61 = vmul.f32 %v9678_v23, %v9678_v23  ;;  %v4999_v18 = vsel %vm3876_vm4, %v4569_v42, 0.0 }
 0x4f8   : > { %v4215_v0 = vadd.f32 %v4214_v2, %v4213_v4  ;;  %v4986_v29 = vadd.f32 %v4985_v26, %v4984_v22  ;;  %v4228_v4 = vsel %vm3876_vm4, %v9678_v23, 0.0  ;;  %v9679_v22 = vld [vmem:[#allocation18_spill] sm:$0xff] }
 0x4f9   : > { %v3320_v15 = vpop.f32.mrf.mxu3  ;;  %v4571_v26 = vmul.f32 %v9679_v22, %v9679_v22  ;;  %v5001_v25 = vsel %vm3876_vm4, %v4570_v61, 0.0 }
 0x4fa   : > { %v4217_v3 = vadd.f32 %v4216_v20, %v4215_v0  ;;  %v4988_v45 = vadd.f32 %v4987_v8, %v4986_v29  ;;  %v8929_v10 = vadd.f32 %v3320_v15, %v2671_v63  ;;  %v4230_v0 = vsel %vm3876_vm4, %v9679_v22, 0.0  ;;  %v9680_v29 = vld [vmem:[#allocation19_spill] sm:$0xff] }
 0x4fb   : > { %v4572_v8 = vmul.f32 %v9680_v29, %v9680_v29  ;;  %v5003_v16 = vsel %vm3876_vm4, %v4571_v26, 0.0 }
 0x4fc   : > { %v4219_v46 = vadd.f32 %v4218_v7, %v4217_v3  ;;  %v4990_v6 = vadd.f32 %v4989_v51, %v4988_v45  ;;  %v3602_v56 = vpack.c.bf16 %v8929_v10, %v8929_v10  ;;  %v4232_v3 = vsel %vm3876_vm4, %v9680_v29, 0.0  ;;  %v9681_v45 = vld [vmem:[#allocation20_spill] sm:$0xff] }
 0x4fd   : > { %v4573_v63 = vmul.f32 %v9681_v45, %v9681_v45  ;;  %v5005_v50 = vsel %vm3876_vm4, %v4572_v8, 0.0  ;;  %v4234_v15 = vsel %vm3876_vm4, %v9681_v45, 0.0 }
 0x4fe   : > { %v4221_v11 = vadd.f32 %v4220_v12, %v4219_v46  ;;  %v4992_v47 = vadd.f32 %v4991_v44, %v4990_v6  ;;  %3859 = vst.msk [vmem:[%s6874_s17 + $0x3bc] sm:$0xf] %vm3619_vm3, %v3602_v56  ;;  %v2674_v39 = vpop.f32.mrf.mxu2  ;;  %v9682_v46 = vld [vmem:[#allocation21_spill] sm:$0xff] }
 0x4ff   : > { %v4574_v6 = vmul.f32 %v9682_v46, %v9682_v46  ;;  %v4236_v56 = vsel %vm3876_vm4, %v9682_v46, 0.0 }
 0x500   : > { %v4223_v41 = vadd.f32 %v4222_v30, %v4221_v11  ;;  %v4994_v35 = vadd.f32 %v4993_v33, %v4992_v47  ;;  %v5007_v47 = vsel %vm3876_vm4, %v4573_v63, 0.0  ;;  %v9683_v33 = vld [vmem:[#allocation22_spill] sm:$0xff] }
 0x501   : > { %v3323_v13 = vpop.f32.mrf.mxu3  ;;  %v4575_v30 = vmul.f32 %v9683_v33, %v9683_v33 }
 0x502   : > { %v4225_v1 = vadd.f32 %v4224_v53, %v4223_v41  ;;  %v4996_v58 = vadd.f32 %v4995_v55, %v4994_v35  ;;  %v8972_v51 = vadd.f32 %v3323_v13, %v2674_v39  ;;  %v5009_v35 = vsel %vm3876_vm4, %v4574_v6, 0.0  ;;  %v9684_v53 = vld [vmem:[#allocation23_spill] sm:$0xff] }
 0x503   : > { %v4238_v55 = vsel %vm3876_vm4, %v9683_v33, 0.0  ;;  %v4576_v57 = vmul.f32 %v9684_v53, %v9684_v53  ;;  %v4240_v39 = vsel %vm3876_vm4, %v9684_v53, 0.0  ;;  %v9691_v53 = vld [vmem:[#allocation30_spill] sm:$0xff] }
 0x504   : > { %v4227_v52 = vadd.f32 %v4226_v48, %v4225_v1  ;;  %v4998_v24 = vadd.f32 %v4997_v54, %v4996_v58  ;;  %v3603_v44 = vpack.c.bf16 %v8972_v51, %v8972_v51  ;;  %v5011_v58 = vsel %vm3876_vm4, %v4575_v30, 0.0  ;;  %v9685_v54 = vld [vmem:[#allocation24_spill] sm:$0xff] }
 0x505   : > { %v4577_v48 = vmul.f32 %v9685_v54, %v9685_v54 }
 0x506   : > { %v5000_v2 = vadd.f32 %v4999_v18, %v4998_v24  ;;  %v4229_v19 = vadd.f32 %v4228_v4, %v4227_v52  ;;  %v2676_v62 = vpop.f32.mrf.mxu2  ;;  %3860 = vst.msk [vmem:[%s6874_s17 + $0x3c0] sm:$0xf] %vm3619_vm3, %v3603_v44  ;;  %v5013_v52 = vsel %vm3876_vm4, %v4576_v57, 0.0  ;;  %v4242_v24 = vsel %vm3876_vm4, %v9685_v54, 0.0  ;;  %v9686_v18 = vld [vmem:[#allocation25_spill] sm:$0xff] }
 0x507   : > { %v4578_v4 = vmul.f32 %v9686_v18, %v9686_v18  ;;  %v4583_v57 = vmul.f32 %v9691_v53, %v9691_v53  ;;  %v4254_v54 = vsel %vm3876_vm4, %v9691_v53, 0.0  ;;  %v9698_v53 = vld [vmem:[#allocation37_spill] sm:$0xff] }
 0x508   : > { %v4231_v20 = vadd.f32 %v4230_v0, %v4229_v19  ;;  %v5002_v28 = vadd.f32 %v5001_v25, %v5000_v2  ;;  %v5015_v19 = vsel %vm3876_vm4, %v4577_v48, 0.0  ;;  %v4244_v25 = vsel %vm3876_vm4, %v9686_v18, 0.0  ;;  %v9687_v0 = vld [vmem:[#allocation26_spill] sm:$0xff]  ;;  %v9692_v48 = vld [vmem:[#allocation31_spill] sm:$0xff]  ;;  %v9693_v18 = vld [vmem:[#allocation32_spill] sm:$0xff] }
 0x509   : > { %v3325_v12 = vpop.f32.mrf.mxu3  ;;  %v4579_v29 = vmul.f32 %v9687_v0, %v9687_v0 }
 0x50a   : > { %v4233_v7 = vadd.f32 %v4232_v3, %v4231_v20  ;;  %v5004_v60 = vadd.f32 %v5003_v16, %v5002_v28  ;;  %v8981_v11 = vadd.f32 %v3325_v12, %v2676_v62  ;;  %v5017_v28 = vsel %vm3876_vm4, %v4578_v4, 0.0  ;;  %v9688_v3 = vld [vmem:[#allocation27_spill] sm:$0xff] }
 0x50b   : > { %v4246_v16 = vsel %vm3876_vm4, %v9687_v0, 0.0  ;;  %v4580_v45 = vmul.f32 %v9688_v3, %v9688_v3  ;;  %v4248_v62 = vsel %vm3876_vm4, %v9688_v3, 0.0  ;;  %v4585_v4 = vmul.f32 %v9693_v18, %v9693_v18  ;;  %v9694_v0 = vld [vmem:[#allocation33_spill] sm:$0xff] }
 0x50c   : > { %v4235_v9 = vadd.f32 %v4234_v15, %v4233_v7  ;;  %v5006_v49 = vadd.f32 %v5005_v50, %v5004_v60  ;;  %v3604_v41 = vpack.c.bf16 %v8981_v11, %v8981_v11  ;;  %v5019_v60 = vsel %vm3876_vm4, %v4579_v29, 0.0  ;;  %v9689_v50 = vld [vmem:[#allocation28_spill] sm:$0xff] }
 0x50d   : > { %v4581_v15 = vmul.f32 %v9689_v50, %v9689_v50  ;;  %v4586_v29 = vmul.f32 %v9694_v0, %v9694_v0  ;;  %v4260_v3 = vsel %vm3876_vm4, %v9694_v0, 0.0 }
 0x50e   : > { %v4237_v27 = vadd.f32 %v4236_v56, %v4235_v9  ;;  %v5008_v40 = vadd.f32 %v5007_v47, %v5006_v49  ;;  %3861 = vst.msk [vmem:[%s6874_s17 + $0x3c4] sm:$0xf] %vm3619_vm3, %v3604_v41  ;;  %v2679_v13 = vpop.f32.mrf.mxu2  ;;  %v5021_v9 = vsel %vm3876_vm4, %v4580_v45, 0.0  ;;  %v4250_v49 = vsel %vm3876_vm4, %v9689_v50, 0.0  ;;  %v9690_v47 = vld [vmem:[#allocation29_spill] sm:$0xff]  ;;  %v9695_v45 = vld [vmem:[#allocation34_spill] sm:$0xff] }
 0x50f   : > { %v4582_v56 = vmul.f32 %v9690_v47, %v9690_v47  ;;  %v4262_v50 = vsel %vm3876_vm4, %v9695_v45, 0.0 }
 0x510   : > { %v4239_v42 = vadd.f32 %v4238_v55, %v4237_v27  ;;  %v5010_v1 = vadd.f32 %v5009_v35, %v5008_v40  ;;  %v5023_v35 = vsel %vm3876_vm4, %v4581_v15, 0.0  ;;  %v4252_v55 = vsel %vm3876_vm4, %v9690_v47, 0.0  ;;  %v9696_v15 = vld [vmem:[#allocation35_spill] sm:$0xff]  ;;  %v9697_v47 = vld [vmem:[#allocation36_spill] sm:$0xff] }
 0x511   : > { %v3328_v22 = vpop.f32.mrf.mxu3 }
 0x512   : > { %v4241_v23 = vadd.f32 %v4240_v39, %v4239_v42  ;;  %v5012_v61 = vadd.f32 %v5011_v58, %v5010_v1  ;;  %v9024_v46 = vadd.f32 %v3328_v22, %v2679_v13  ;;  %v5025_v39 = vsel %vm3876_vm4, %v4582_v56, 0.0 }
 0x513   : > { %v4589_v56 = vmul.f32 %v9697_v47, %v9697_v47 }
 0x514   : > { %v4243_v26 = vadd.f32 %v4242_v24, %v4241_v23  ;;  %v5014_v2 = vadd.f32 %v5013_v52, %v5012_v61  ;;  %v3605_v33 = vpack.c.bf16 %v9024_v46, %v9024_v46  ;;  %v4584_v23 = vmul.f32 %v9692_v48, %v9692_v48 }
 0x515   : > { %v5027_v52 = vsel %vm3876_vm4, %v4583_v57, 0.0  ;;  %v4256_v24 = vsel %vm3876_vm4, %v9692_v48, 0.0  ;;  %v4590_v57 = vmul.f32 %v9698_v53, %v9698_v53  ;;  %v5039_v48 = vsel %vm3876_vm4, %v4589_v56, 0.0 }
 0x516   : > { %v4245_v8 = vadd.f32 %v4244_v25, %v4243_v26  ;;  %v5016_v20 = vadd.f32 %v5015_v19, %v5014_v2  ;;  %v2681_v12 = vpop.f32.mrf.mxu2  ;;  %3862 = vst.msk [vmem:[%s6874_s17 + $0x3c8] sm:$0xf] %vm3619_vm3, %v3605_v33  ;;  %v5029_v19 = vsel %vm3876_vm4, %v4584_v23, 0.0  ;;  %v4258_v25 = vsel %vm3876_vm4, %v9693_v18, 0.0 }
 0x517   : > { %v4268_v23 = vsel %vm3876_vm4, %v9698_v53, 0.0 }
 0x518   : > { %v4247_v63 = vadd.f32 %v4246_v16, %v4245_v8  ;;  %v5018_v7 = vadd.f32 %v5017_v28, %v5016_v20  ;;  %v5031_v16 = vsel %vm3876_vm4, %v4585_v4, 0.0  ;;  %v5041_v4 = vsel %vm3876_vm4, %v4590_v57, 0.0 }
 0x519   : > { %v3330_v30 = vpop.f32.mrf.mxu3 }
 0x51a   : > { %v4249_v6 = vadd.f32 %v4248_v62, %v4247_v63  ;;  %v5020_v44 = vadd.f32 %v5019_v60, %v5018_v7  ;;  %v9033_v41 = vadd.f32 %v3330_v30, %v2681_v12  ;;  %v4587_v63 = vmul.f32 %v9695_v45, %v9695_v45 }
 0x51b   : > { %v5033_v62 = vsel %vm3876_vm4, %v4586_v29, 0.0 }
 0x51c   : > { %v4251_v27 = vadd.f32 %v4250_v49, %v4249_v6  ;;  %v5022_v40 = vadd.f32 %v5021_v9, %v5020_v44  ;;  %v3606_v58 = vpack.c.bf16 %v9033_v41, %v9033_v41  ;;  %v4588_v6 = vmul.f32 %v9696_v15, %v9696_v15 }
 0x51d   : > { %v5035_v9 = vsel %vm3876_vm4, %v4587_v63, 0.0  ;;  %v4264_v49 = vsel %vm3876_vm4, %v9696_v15, 0.0 }
 0x51e   : > { %v4253_v42 = vadd.f32 %v4252_v55, %v4251_v27  ;;  %v5024_v1 = vadd.f32 %v5023_v35, %v5022_v40  ;;  %3863 = vst.msk [vmem:[%s6874_s17 + $0x3cc] sm:$0xf] %vm3619_vm3, %v3606_v58  ;;  %v5037_v35 = vsel %vm3876_vm4, %v4588_v6, 0.0  ;;  %v4266_v55 = vsel %vm3876_vm4, %v9697_v47, 0.0 }
 0x520   : > { %v4255_v61 = vadd.f32 %v4254_v54, %v4253_v42  ;;  %v5026_v13 = vadd.f32 %v5025_v39, %v5024_v1  ;;  %v2684_v2 = vpop.f32.mrf.mxu2 }
 0x521   : > { %v3333_v8 = vpop.f32.mrf.mxu3 }
 0x522   : > { %v4257_v22 = vadd.f32 %v4256_v24, %v4255_v61  ;;  %v5028_v26 = vadd.f32 %v5027_v52, %v5026_v13  ;;  %v9076_v33 = vadd.f32 %v3333_v8, %v2684_v2  ;;  %v9699_v61 = vld [vmem:[#allocation38_spill] sm:$0xff]  ;;  %v9701_v8 = vld [vmem:[#allocation40_spill] sm:$0xff] }
 0x523   : > { %v4591_v13 = vmul.f32 %v9699_v61, %v9699_v61  ;;  %v4274_v63 = vsel %vm3876_vm4, %v9701_v8, 0.0 }
 0x524   : > { %v4259_v20 = vadd.f32 %v4258_v25, %v4257_v22  ;;  %v5030_v28 = vadd.f32 %v5029_v19, %v5028_v26  ;;  %v3607_v42 = vpack.c.bf16 %v9076_v33, %v9076_v33  ;;  %v4270_v22 = vsel %vm3876_vm4, %v9699_v61, 0.0  ;;  %v9700_v26 = vld [vmem:[#allocation39_spill] sm:$0xff] }
 0x525   : > { %v4592_v2 = vmul.f32 %v9700_v26, %v9700_v26  ;;  %v5043_v0 = vsel %vm3876_vm4, %v4591_v13, 0.0  ;;  %v4272_v29 = vsel %vm3876_vm4, %v9700_v26, 0.0 }
 0x526   : > { %v4261_v7 = vadd.f32 %v4260_v3, %v4259_v20  ;;  %v5032_v60 = vadd.f32 %v5031_v16, %v5030_v28  ;;  %3864 = vst.msk [vmem:[%s6874_s17 + $0x3d0] sm:$0xf] %vm3619_vm3, %v3607_v42  ;;  %v4593_v20 = vmul.f32 %v9701_v8, %v9701_v8  ;;  %v9705_v42 = vld [vmem:[#allocation44_spill] sm:$0xff] }
 0x527   : > { %v5045_v45 = vsel %vm3876_vm4, %v4592_v2, 0.0  ;;  %v4282_v13 = vsel %vm3876_vm4, %v9705_v42, 0.0 }
 0x528   : > { %v4263_v44 = vadd.f32 %v4262_v50, %v4261_v7  ;;  %v5034_v12 = vadd.f32 %v5033_v62, %v5032_v60  ;;  %v2686_v40 = vpop.f32.mrf.mxu2  ;;  %v9702_v7 = vld [vmem:[#allocation41_spill] sm:$0xff]  ;;  %v5047_v6 = vsel %vm3876_vm4, %v4593_v20, 0.0 }
 0x529   : > { %v3335_v1 = vpop.f32.mrf.mxu3  ;;  %v4594_v60 = vmul.f32 %v9702_v7, %v9702_v7 }
 0x52a   : > { %v4265_v30 = vadd.f32 %v4264_v49, %v4263_v44  ;;  %v5036_v27 = vadd.f32 %v5035_v9, %v5034_v12  ;;  %v9085_v54 = vadd.f32 %v3335_v1, %v2686_v40  ;;  %v4276_v44 = vsel %vm3876_vm4, %v9702_v7, 0.0  ;;  %v9703_v12 = vld [vmem:[#allocation42_spill] sm:$0xff] }
 0x52b   : > { %v4595_v9 = vmul.f32 %v9703_v12, %v9703_v12  ;;  %v5049_v56 = vsel %vm3876_vm4, %v4594_v60, 0.0  ;;  %v4597_v1 = vmul.f32 %v9705_v42, %v9705_v42 }
 0x52c   : > { %v4267_v58 = vadd.f32 %v4266_v55, %v4265_v30  ;;  %v5038_v39 = vadd.f32 %v5037_v35, %v5036_v27  ;;  %v3608_v18 = vpack.c.bf16 %v9085_v54, %v9085_v54  ;;  %v4278_v30 = vsel %vm3876_vm4, %v9703_v12, 0.0  ;;  %v9704_v27 = vld [vmem:[#allocation43_spill] sm:$0xff] }
 0x52d   : > { %v4596_v40 = vmul.f32 %v9704_v27, %v9704_v27  ;;  %v5051_v53 = vsel %vm3876_vm4, %v4595_v9, 0.0  ;;  %v4280_v57 = vsel %vm3876_vm4, %v9704_v27, 0.0 }
 0x52e   : > { %v4269_v52 = vadd.f32 %v4268_v23, %v4267_v58  ;;  %v5040_v24 = vadd.f32 %v5039_v48, %v5038_v39  ;;  %3865 = vst.msk [vmem:[%s6874_s17 + $0x3d4] sm:$0xf] %vm3619_vm3, %v3608_v18 }
 0x52f   : > { %v5053_v61 = vsel %vm3876_vm4, %v4596_v40, 0.0 }
 0x530   : > { %v4271_v19 = vadd.f32 %v4270_v22, %v4269_v52  ;;  %v5042_v25 = vadd.f32 %v5041_v4, %v5040_v24  ;;  %v2689_v3 = vpop.f32.mrf.mxu2  ;;  %v9706_v52 = vld [vmem:[#allocation45_spill] sm:$0xff] }
 0x531   : > { %v3338_v62 = vpop.f32.mrf.mxu3  ;;  %v4598_v24 = vmul.f32 %v9706_v52, %v9706_v52 }
 0x532   : > { %v4273_v28 = vadd.f32 %v4272_v29, %v4271_v19  ;;  %v5044_v16 = vadd.f32 %v5043_v0, %v5042_v25  ;;  %v9128_v58 = vadd.f32 %v3338_v62, %v2689_v3  ;;  %v5055_v19 = vsel %vm3876_vm4, %v4597_v1, 0.0  ;;  %v9707_v0 = vld [vmem:[#allocation46_spill] sm:$0xff] }
 0x533   : > { %v4284_v25 = vsel %vm3876_vm4, %v9706_v52, 0.0  ;;  %v4599_v29 = vmul.f32 %v9707_v0, %v9707_v0  ;;  %v4286_v3 = vsel %vm3876_vm4, %v9707_v0, 0.0 }
 0x534   : > { %v4275_v50 = vadd.f32 %v4274_v63, %v4273_v28  ;;  %v5046_v15 = vadd.f32 %v5045_v45, %v5044_v16  ;;  %v3609_v18 = vpack.c.bf16 %v9128_v58, %v9128_v58  ;;  %v5057_v16 = vsel %vm3876_vm4, %v4598_v24, 0.0  ;;  %v9708_v45 = vld [vmem:[#allocation47_spill] sm:$0xff] }
 0x535   : > { %v4600_v63 = vmul.f32 %v9708_v45, %v9708_v45  ;;  %v5059_v62 = vsel %vm3876_vm4, %v4599_v29, 0.0 }
 0x536   : > { %v4277_v49 = vadd.f32 %v4276_v44, %v4275_v50  ;;  %v5048_v47 = vadd.f32 %v5047_v6, %v5046_v15  ;;  %3866 = vst.msk [vmem:[%s6874_s17 + $0x3d8] sm:$0xf] %vm3619_vm3, %v3609_v18  ;;  %v4288_v50 = vsel %vm3876_vm4, %v9708_v45, 0.0  ;;  %v9709_v15 = vld [vmem:[#allocation48_spill] sm:$0xff] }
 0x537   : > { %v4601_v6 = vmul.f32 %v9709_v15, %v9709_v15 }
 0x538   : > { %v4279_v35 = vadd.f32 %v4278_v30, %v4277_v49  ;;  %v5050_v55 = vadd.f32 %v5049_v56, %v5048_v47  ;;  %v2691_v23 = vpop.f32.mrf.mxu2  ;;  %v5061_v49 = vsel %vm3876_vm4, %v4600_v63, 0.0  ;;  %v4290_v47 = vsel %vm3876_vm4, %v9709_v15, 0.0  ;;  %v9710_v56 = vld [vmem:[#allocation49_spill] sm:$0xff]  ;;  %v9715_v15 = vld [vmem:[#allocation54_spill] sm:$0xff] }
 0x539   : > { %v3340_v4 = vpop.f32.mrf.mxu3  ;;  %v4602_v30 = vmul.f32 %v9710_v56, %v9710_v56 }
 0x53a   : > { %v4281_v39 = vadd.f32 %v4280_v57, %v4279_v35  ;;  %v5052_v48 = vadd.f32 %v5051_v53, %v5050_v55  ;;  %v9137_v2 = vadd.f32 %v3340_v4, %v2691_v23  ;;  %v5063_v55 = vsel %vm3876_vm4, %v4601_v6, 0.0  ;;  %v9711_v57 = vld [vmem:[#allocation50_spill] sm:$0xff] }
 0x53b   : > { %v4292_v53 = vsel %vm3876_vm4, %v9710_v56, 0.0  ;;  %v4603_v42 = vmul.f32 %v9711_v57, %v9711_v57  ;;  %v4294_v23 = vsel %vm3876_vm4, %v9711_v57, 0.0  ;;  %v4607_v6 = vmul.f32 %v9715_v15, %v9715_v15  ;;  %v9716_v56 = vld [vmem:[#allocation55_spill] sm:$0xff] }
 0x53c   : > { %v4283_v22 = vadd.f32 %v4282_v13, %v4281_v39  ;;  %v5054_v26 = vadd.f32 %v5053_v61, %v5052_v48  ;;  %v3610_v28 = vpack.c.bf16 %v9137_v2, %v9137_v2  ;;  %v5065_v48 = vsel %vm3876_vm4, %v4602_v30, 0.0  ;;  %v9712_v61 = vld [vmem:[#allocation51_spill] sm:$0xff] }
 0x53d   : > { %v4604_v13 = vmul.f32 %v9712_v61, %v9712_v61  ;;  %v5067_v18 = vsel %vm3876_vm4, %v4603_v42, 0.0  ;;  %v4296_v4 = vsel %vm3876_vm4, %v9712_v61, 0.0  ;;  %v4608_v30 = vmul.f32 %v9716_v56, %v9716_v56  ;;  %v9718_v61 = vld [vmem:[#allocation57_spill] sm:$0xff] }
 0x53e   : > { %v4285_v8 = vadd.f32 %v4284_v25, %v4283_v22  ;;  %v5056_v20 = vadd.f32 %v5055_v19, %v5054_v26  ;;  %3867 = vst.msk [vmem:[%s6874_s17 + $0x3dc] sm:$0xf] %vm3619_vm3, %v3610_v28  ;;  %v9713_v22 = vld [vmem:[#allocation52_spill] sm:$0xff]  ;;  %v9714_v28 = vld [vmem:[#allocation53_spill] sm:$0xff] }
 0x53f   : > { %v4605_v26 = vmul.f32 %v9713_v22, %v9713_v22 }
 0x540   : > { %v4287_v7 = vadd.f32 %v4286_v3, %v4285_v8  ;;  %v5058_v60 = vadd.f32 %v5057_v16, %v5056_v20  ;;  %v2694_v9 = vpop.f32.mrf.mxu2  ;;  %v5069_v8 = vsel %vm3876_vm4, %v4604_v13, 0.0  ;;  %v4298_v20 = vsel %vm3876_vm4, %v9713_v22, 0.0 }
 0x541   : > { %v3343_v27 = vpop.f32.mrf.mxu3  ;;  %v4606_v16 = vmul.f32 %v9714_v28, %v9714_v28  ;;  %v4610_v13 = vmul.f32 %v9718_v61, %v9718_v61  ;;  %v4308_v22 = vsel %vm3876_vm4, %v9718_v61, 0.0 }
 0x542   : > { %v4289_v44 = vadd.f32 %v4288_v50, %v4287_v7  ;;  %v5060_v12 = vadd.f32 %v5059_v62, %v5058_v60  ;;  %v9180_v19 = vadd.f32 %v3343_v27, %v2694_v9  ;;  %v5071_v62 = vsel %vm3876_vm4, %v4605_v26, 0.0  ;;  %v9719_v26 = vld [vmem:[#allocation58_spill] sm:$0xff] }
 0x543   : > { %v4300_v50 = vsel %vm3876_vm4, %v9714_v28, 0.0  ;;  %v9720_v28 = vld [vmem:[#allocation59_spill] sm:$0xff] }
 0x544   : > { %v4291_v40 = vadd.f32 %v4290_v47, %v4289_v44  ;;  %v5062_v35 = vadd.f32 %v5061_v49, %v5060_v12  ;;  %v3611_v3 = vpack.c.bf16 %v9180_v19, %v9180_v19  ;;  %v5073_v49 = vsel %vm3876_vm4, %v4606_v16, 0.0 }
 0x545   : > { %v4302_v47 = vsel %vm3876_vm4, %v9715_v15, 0.0  ;;  %v4612_v16 = vmul.f32 %v9720_v28, %v9720_v28 }
 0x546   : > { %v4293_v1 = vadd.f32 %v4292_v53, %v4291_v40  ;;  %v5064_v39 = vadd.f32 %v5063_v55, %v5062_v35  ;;  %3868 = vst.msk [vmem:[%s6874_s17 + $0x3e0] sm:$0xf] %vm3619_vm3, %v3611_v3  ;;  %v5075_v35 = vsel %vm3876_vm4, %v4607_v6, 0.0  ;;  %v4304_v55 = vsel %vm3876_vm4, %v9716_v56, 0.0  ;;  %v9717_v53 = vld [vmem:[#allocation56_spill] sm:$0xff] }
 0x547   : > { %v4609_v57 = vmul.f32 %v9717_v53, %v9717_v53 }
 0x548   : > { %v4295_v52 = vadd.f32 %v4294_v23, %v4293_v1  ;;  %v5066_v24 = vadd.f32 %v5065_v48, %v5064_v39  ;;  %v2696_v29 = vpop.f32.mrf.mxu2  ;;  %v5077_v48 = vsel %vm3876_vm4, %v4608_v30, 0.0  ;;  %v4306_v23 = vsel %vm3876_vm4, %v9717_v53, 0.0 }
 0x549   : > { %v3345_v45 = vpop.f32.mrf.mxu3 }
 0x54a   : > { %v4297_v25 = vadd.f32 %v4296_v4, %v4295_v52  ;;  %v5068_v0 = vadd.f32 %v5067_v18, %v5066_v24  ;;  %v9189_v60 = vadd.f32 %v3345_v45, %v2696_v29  ;;  %v5079_v4 = vsel %vm3876_vm4, %v4609_v57, 0.0 }
 0x54c   : > { %v4299_v63 = vadd.f32 %v4298_v20, %v4297_v25  ;;  %v5070_v7 = vadd.f32 %v5069_v8, %v5068_v0  ;;  %v3612_v9 = vpack.c.bf16 %v9189_v60, %v9189_v60  ;;  %v4611_v25 = vmul.f32 %v9719_v26, %v9719_v26 }
 0x54d   : > { %v5081_v8 = vsel %vm3876_vm4, %v4610_v13, 0.0  ;;  %v4310_v20 = vsel %vm3876_vm4, %v9719_v26, 0.0 }
 0x54e   : > { %v4301_v44 = vadd.f32 %v4300_v50, %v4299_v63  ;;  %v5072_v12 = vadd.f32 %v5071_v62, %v5070_v7  ;;  %3869 = vst.msk [vmem:[%s6874_s17 + $0x3e4] sm:$0xf] %vm3619_vm3, %v3612_v9  ;;  %v5083_v63 = vsel %vm3876_vm4, %v4611_v25, 0.0  ;;  %v4312_v7 = vsel %vm3876_vm4, %v9720_v28, 0.0  ;;  %v9721_v62 = vld [vmem:[#allocation60_spill] sm:$0xff] }
 0x54f   : > { %v4613_v50 = vmul.f32 %v9721_v62, %v9721_v62  ;;  %v5085_v9 = vsel %vm3876_vm4, %v4612_v16, 0.0  ;;  %v9725_v25 = vld [vmem:[#allocation64_spill] sm:$0xff] }
 0x550   : > { %v4303_v27 = vadd.f32 %v4302_v47, %v4301_v44  ;;  %v5074_v40 = vadd.f32 %v5073_v49, %v5072_v12  ;;  %v2699_v39 = vpop.f32.mrf.mxu2  ;;  %v4314_v49 = vsel %vm3876_vm4, %v9721_v62, 0.0  ;;  %v9722_v47 = vld [vmem:[#allocation61_spill] sm:$0xff]  ;;  %v4322_v16 = vsel %vm3876_vm4, %v9725_v25, 0.0 }
 0x551   : > { %v3348_v52 = vpop.f32.mrf.mxu3  ;;  %v4614_v56 = vmul.f32 %v9722_v47, %v9722_v47  ;;  %v5087_v53 = vsel %vm3876_vm4, %v4613_v50, 0.0  ;;  %v4316_v57 = vsel %vm3876_vm4, %v9722_v47, 0.0 }
 0x552   : > { %v4305_v42 = vadd.f32 %v4304_v55, %v4303_v27  ;;  %v5076_v1 = vadd.f32 %v5075_v35, %v5074_v40  ;;  %v9232_v15 = vadd.f32 %v3348_v52, %v2699_v39  ;;  %v9724_v52 = vld [vmem:[#allocation63_spill] sm:$0xff] }
 0x553   : > { %v5089_v61 = vsel %vm3876_vm4, %v4614_v56, 0.0  ;;  %v4320_v26 = vsel %vm3876_vm4, %v9724_v52, 0.0 }
 0x554   : > { %v4307_v24 = vadd.f32 %v4306_v23, %v4305_v42  ;;  %v5078_v18 = vadd.f32 %v5077_v48, %v5076_v1  ;;  %v3613_v30 = vpack.c.bf16 %v9232_v15, %v9232_v15  ;;  %v9723_v42 = vld [vmem:[#allocation62_spill] sm:$0xff] }
 0x555   : > { %v4615_v1 = vmul.f32 %v9723_v42, %v9723_v42  ;;  %v4318_v13 = vsel %vm3876_vm4, %v9723_v42, 0.0  ;;  %v4621_v42 = vmul.f32 %v8598_v59, %v8598_v59 }
 0x556   : > { %v4309_v0 = vadd.f32 %v4308_v22, %v4307_v24  ;;  %v5080_v29 = vadd.f32 %v5079_v4, %v5078_v18  ;;  %3870 = vst.msk [vmem:[%s6874_s17 + $0x3e8] sm:$0xf] %vm3619_vm3, %v3613_v30  ;;  %v4616_v24 = vmul.f32 %v9724_v52, %v9724_v52  ;;  %v9728_v30 = vld [vmem:[#allocation67_spill] sm:$0xff]  ;;  %v4622_v52 = vmul.f32 %v8636_v14, %v8636_v14 }
 0x557   : > { %v5091_v22 = vsel %vm3876_vm4, %v4615_v1, 0.0 }
 0x558   : > { %v4311_v3 = vadd.f32 %v4310_v20, %v4309_v0  ;;  %v5082_v45 = vadd.f32 %v5081_v8, %v5080_v29  ;;  %v2701_v12 = vpop.f32.mrf.mxu2  ;;  %v4617_v0 = vmul.f32 %v9725_v25, %v9725_v25  ;;  %v5093_v28 = vsel %vm3876_vm4, %v4616_v24, 0.0 }
 0x559   : > { %v3350_v27 = vpop.f32.mrf.mxu3  ;;  %v5103_v25 = vsel %vm3876_vm4, %v4621_v42, 0.0 }
 0x55a   : > { %v4313_v6 = vadd.f32 %v4312_v7, %v4311_v3  ;;  %v5084_v44 = vadd.f32 %v5083_v63, %v5082_v45  ;;  %v9241_v55 = vadd.f32 %v3350_v27, %v2701_v12  ;;  %v9726_v3 = vld [vmem:[#allocation65_spill] sm:$0xff]  ;;  %v5095_v50 = vsel %vm3876_vm4, %v4617_v0, 0.0 }
 0x55b   : > { %v4618_v45 = vmul.f32 %v9726_v3, %v9726_v3  ;;  %v4620_v27 = vmul.f32 %v9728_v30, %v9728_v30  ;;  %v4332_v0 = vsel %vm3876_vm4, %v8636_v14, 0.0 }
 0x55c   : > { %v4315_v40 = vadd.f32 %v4314_v49, %v4313_v6  ;;  %v5086_v35 = vadd.f32 %v5085_v9, %v5084_v44  ;;  %v3614_v23 = vpack.c.bf16 %v9241_v55, %v9241_v55  ;;  %v4324_v6 = vsel %vm3876_vm4, %v9726_v3, 0.0  ;;  %v9727_v44 = vld [vmem:[#allocation66_spill] sm:$0xff] }
 0x55d   : > { %v4619_v12 = vmul.f32 %v9727_v44, %v9727_v44  ;;  %v5097_v47 = vsel %vm3876_vm4, %v4618_v45, 0.0  ;;  %v4326_v56 = vsel %vm3876_vm4, %v9727_v44, 0.0  ;;  %v4624_v3 = vmul.f32 %v8693_v36, %v8693_v36 }
 0x55e   : > { %v4317_v39 = vadd.f32 %v4316_v57, %v4315_v40  ;;  %v5088_v48 = vadd.f32 %v5087_v53, %v5086_v35  ;;  %3871 = vst.msk [vmem:[%s6874_s17 + $0x3ec] sm:$0xf] %vm3619_vm3, %v3614_v23  ;;  %v4328_v57 = vsel %vm3876_vm4, %v9728_v30, 0.0 }
 0x55f   : > { %v5099_v53 = vsel %vm3876_vm4, %v4619_v12, 0.0  ;;  %v4338_v12 = vsel %vm3876_vm4, %v8705_v37, 0.0 }
 0x560   : > { %v4319_v18 = vadd.f32 %v4318_v13, %v4317_v39  ;;  %v5090_v4 = vadd.f32 %v5089_v61, %v5088_v48  ;;  %v2704_v20 = vpop.f32.mrf.mxu2  ;;  %v5101_v61 = vsel %vm3876_vm4, %v4620_v27, 0.0  ;;  %v4330_v13 = vsel %vm3876_vm4, %v8598_v59, 0.0 }
 0x561   : > { %v3353_v63 = vpop.f32.mrf.mxu3  ;;  %v4623_v59 = vmul.f32 %v8648_v17, %v8648_v17  ;;  %v4627_v27 = vmul.f32 %v8762_v31, %v8762_v31 }
 0x562   : > { %v4321_v29 = vadd.f32 %v4320_v26, %v4319_v18  ;;  %v5092_v8 = vadd.f32 %v5091_v22, %v5090_v4  ;;  %v9284_v1 = vadd.f32 %v3353_v63, %v2704_v20 }
 0x563   : > { %v5107_v63 = vsel %vm3876_vm4, %v4623_v59, 0.0 }
 0x564   : > { %v4323_v7 = vadd.f32 %v4322_v16, %v4321_v29  ;;  %v5094_v62 = vadd.f32 %v5093_v28, %v5092_v8  ;;  %v3615_v24 = vpack.c.bf16 %v9284_v1, %v9284_v1  ;;  %v5105_v28 = vsel %vm3876_vm4, %v4622_v52, 0.0 }
 0x565   : > { %v4334_v16 = vsel %vm3876_vm4, %v8648_v17, 0.0  ;;  %v5109_v17 = vsel %vm3876_vm4, %v4624_v3, 0.0 }
 0x566   : > { %v4325_v9 = vadd.f32 %v4324_v6, %v4323_v7  ;;  %v5096_v49 = vadd.f32 %v5095_v50, %v5094_v62  ;;  %3872 = vst.msk [vmem:[%s6874_s17 + $0x3f0] sm:$0xf] %vm3619_vm3, %v3615_v24  ;;  %v4336_v7 = vsel %vm3876_vm4, %v8693_v36, 0.0  ;;  %v4625_v62 = vmul.f32 %v8705_v37, %v8705_v37 }
 0x567   : > { %v4340_v36 = vsel %vm3876_vm4, %v8750_v5, 0.0  ;;  %v4342_v37 = vsel %vm3876_vm4, %v8762_v31, 0.0 }
 0x568   : > { %v5098_v40 = vadd.f32 %v5097_v47, %v5096_v49  ;;  %v4327_v35 = vadd.f32 %v4326_v56, %v4325_v9  ;;  %v2706_v23 = vpop.f32.mrf.mxu2  ;;  %v4626_v9 = vmul.f32 %v8750_v5, %v8750_v5  ;;  %v5111_v30 = vsel %vm3876_vm4, %v4625_v62, 0.0 }
 0x569   : > { %v3355_v18 = vpop.f32.mrf.mxu3  ;;  %v4344_v5 = vsel %vm3876_vm4, %v8807_v34, 0.0  ;;  %v4352_v62 = vsel %vm3876_vm4, %v8920_v38, 0.0 }
 0x56a   : > { %v5100_v39 = vadd.f32 %v5099_v53, %v5098_v40  ;;  %v4329_v48 = vadd.f32 %v4328_v57, %v4327_v35  ;;  %v9293_v26 = vadd.f32 %v3355_v18, %v2706_v23  ;;  %v5113_v53 = vsel %vm3876_vm4, %v4626_v9, 0.0 }
 0x56b   : > { %v4628_v57 = vmul.f32 %v8807_v34, %v8807_v34  ;;  %v4629_v23 = vmul.f32 %v8819_v32, %v8819_v32  ;;  %v4346_v18 = vsel %vm3876_vm4, %v8819_v32, 0.0  ;;  %v4631_v32 = vmul.f32 %v8876_v21, %v8876_v21 }
 0x56c   : > { %v5102_v4 = vadd.f32 %v5101_v61, %v5100_v39  ;;  %v4331_v22 = vadd.f32 %v4330_v13, %v4329_v48  ;;  %v3616_v20 = vpack.c.bf16 %v9293_v26, %v9293_v26  ;;  %v5115_v48 = vsel %vm3876_vm4, %v4627_v27, 0.0 }
 0x56d   : > { %v5117_v31 = vsel %vm3876_vm4, %v4628_v57, 0.0  ;;  %v4637_v57 = vmul.f32 %v9033_v41, %v9033_v41 }
 0x56e   : > { %v5104_v29 = vadd.f32 %v5103_v25, %v5102_v4  ;;  %v4333_v8 = vadd.f32 %v4332_v0, %v4331_v22  ;;  %3873 = vst.msk [vmem:[%s6874_s17 + $0x3f4] sm:$0xf] %vm3619_vm3, %v3616_v20  ;;  %v4630_v4 = vmul.f32 %v8864_v43, %v8864_v43 }
 0x570   : > { %v5106_v45 = vadd.f32 %v5105_v28, %v5104_v29  ;;  %v4335_v14 = vadd.f32 %v4334_v16, %v4333_v8  ;;  %v2709_v44 = vpop.f32.mrf.mxu2  ;;  %v5119_v29 = vsel %vm3876_vm4, %v4629_v23, 0.0  ;;  %v4348_v8 = vsel %vm3876_vm4, %v8864_v43, 0.0 }
 0x571   : > { %v3358_v49 = vpop.f32.mrf.mxu3  ;;  %v5121_v3 = vsel %vm3876_vm4, %v4630_v4, 0.0 }
 0x572   : > { %v5108_v50 = vadd.f32 %v5107_v63, %v5106_v45  ;;  %v4337_v6 = vadd.f32 %v4336_v7, %v4335_v14  ;;  %v9336_v61 = vadd.f32 %v3358_v49, %v2709_v44  ;;  %v4350_v45 = vsel %vm3876_vm4, %v8876_v21, 0.0 }
 0x573   : > { %v4632_v14 = vmul.f32 %v8920_v38, %v8920_v38  ;;  %v5123_v7 = vsel %vm3876_vm4, %v4631_v32, 0.0  ;;  %v4354_v21 = vsel %vm3876_vm4, %v8929_v10, 0.0  ;;  %v4356_v38 = vsel %vm3876_vm4, %v8972_v51, 0.0 }
 0x574   : > { %v5110_v47 = vadd.f32 %v5109_v17, %v5108_v50  ;;  %v4339_v56 = vadd.f32 %v4338_v12, %v4337_v6  ;;  %v3617_v34 = vpack.c.bf16 %v9336_v61, %v9336_v61  ;;  %v4633_v50 = vmul.f32 %v8929_v10, %v8929_v10 }
 0x575   : > { %v5125_v17 = vsel %vm3876_vm4, %v4632_v14, 0.0  ;;  %v4634_v12 = vmul.f32 %v8972_v51, %v8972_v51  ;;  %v4358_v10 = vsel %vm3876_vm4, %v8981_v11, 0.0  ;;  %v4360_v51 = vsel %vm3876_vm4, %v9024_v46, 0.0 }
 0x576   : > { %v5112_v40 = vadd.f32 %v5111_v30, %v5110_v47  ;;  %v4341_v35 = vadd.f32 %v4340_v36, %v4339_v56  ;;  %3874 = vst.msk [vmem:[%s6874_s17 + $0x3f8] sm:$0xf] %vm3619_vm3, %v3617_v34  ;;  %v5127_v47 = vsel %vm3876_vm4, %v4633_v50, 0.0  ;;  %v4635_v56 = vmul.f32 %v8981_v11, %v8981_v11 }
 0x577   : > { %v5129_v27 = vsel %vm3876_vm4, %v4634_v12, 0.0  ;;  %v4362_v11 = vsel %vm3876_vm4, %v9033_v41, 0.0  ;;  %v4366_v41 = vsel %vm3876_vm4, %v9085_v54, 0.0  ;;  %v4640_v34 = vmul.f32 %v9128_v58, %v9128_v58 }
 0x578   : > { %v5114_v42 = vadd.f32 %v5113_v53, %v5112_v40  ;;  %v4343_v39 = vadd.f32 %v4342_v37, %v4341_v35  ;;  %v2711_v24 = vpop.f32.mrf.mxu2  ;;  %v4636_v40 = vmul.f32 %v9024_v46, %v9024_v46  ;;  %v5131_v37 = vsel %vm3876_vm4, %v4635_v56, 0.0 }
 0x579   : > { %v3360_v22 = vpop.f32.mrf.mxu3  ;;  %v4364_v46 = vsel %vm3876_vm4, %v9076_v33, 0.0  ;;  %v4643_v14 = vmul.f32 %v9189_v60, %v9189_v60 }
 0x57a   : > { %v5116_v13 = vadd.f32 %v5115_v48, %v5114_v42  ;;  %v4345_v52 = vadd.f32 %v4344_v5, %v4343_v39  ;;  %v9345_v59 = vadd.f32 %v3360_v22, %v2711_v24  ;;  %v5133_v48 = vsel %vm3876_vm4, %v4636_v40, 0.0 }
 0x57b   : > { %v4638_v5 = vmul.f32 %v9076_v33, %v9076_v33  ;;  %v4639_v24 = vmul.f32 %v9085_v54, %v9085_v54  ;;  %v4368_v33 = vsel %vm3876_vm4, %v9128_v58, 0.0  ;;  %v4370_v54 = vsel %vm3876_vm4, %v9137_v2, 0.0 }
 0x57c   : > { %v5118_v25 = vadd.f32 %v5117_v31, %v5116_v13  ;;  %v4347_v0 = vadd.f32 %v4346_v18, %v4345_v52  ;;  %v3618_v16 = vpack.c.bf16 %v9345_v59, %v9345_v59  ;;  %v5135_v52 = vsel %vm3876_vm4, %v4637_v57, 0.0 }
 0x57d   : > { %v5137_v4 = vsel %vm3876_vm4, %v4638_v5, 0.0  ;;  %v4372_v58 = vsel %vm3876_vm4, %v9180_v19, 0.0  ;;  %v4648_v40 = vmul.f32 %v9336_v61, %v9336_v61 }
 0x57e   : > { %v5120_v20 = vadd.f32 %v5119_v29, %v5118_v25  ;;  %v4349_v28 = vadd.f32 %v4348_v8, %v4347_v0  ;;  %3875 = vst.msk [vmem:[%s6874_s17 + $0x3fc] sm:$0xf] %vm3619_vm3, %v3618_v16  ;;  %v5139_v0 = vsel %vm3876_vm4, %v4639_v24, 0.0  ;;  %v4641_v29 = vmul.f32 %v9137_v2, %v9137_v2 }
 0x57f   : > { %v4374_v2 = vsel %vm3876_vm4, %v9189_v60, 0.0  ;;  %v4378_v60 = vsel %vm3876_vm4, %v9241_v55, 0.0 }
 0x580   : > { %v5122_v63 = vadd.f32 %v5121_v3, %v5120_v20  ;;  %v4351_v43 = vadd.f32 %v4350_v45, %v4349_v28  ;;  %v5141_v20 = vsel %vm3876_vm4, %v4640_v34, 0.0  ;;  %v4642_v28 = vmul.f32 %v9180_v19, %v9180_v19 }
 0x581   : > { %v5143_v45 = vsel %vm3876_vm4, %v4641_v29, 0.0  ;;  %v4376_v19 = vsel %vm3876_vm4, %v9232_v15, 0.0 }
 0x582   : > { %v5124_v6 = vadd.f32 %v5123_v7, %v5122_v63  ;;  %v4353_v44 = vadd.f32 %v4352_v62, %v4351_v43  ;;  %v5145_v7 = vsel %vm3876_vm4, %v4642_v28, 0.0  ;;  %v4644_v62 = vmul.f32 %v9232_v15, %v9232_v15 }
 0x583   : > { %v4380_v15 = vsel %vm3876_vm4, %v9284_v1, 0.0 }
 0x584   : > { %v5126_v9 = vadd.f32 %v5125_v17, %v5124_v6  ;;  %v4355_v49 = vadd.f32 %v4354_v21, %v4353_v44  ;;  %v5147_v44 = vsel %vm3876_vm4, %v4643_v14, 0.0  ;;  %v4645_v17 = vmul.f32 %v9241_v55, %v9241_v55 }
 0x585   : > { %v4382_v55 = vsel %vm3876_vm4, %v9293_v26, 0.0 }
 0x586   : > { %v5128_v30 = vadd.f32 %v5127_v47, %v5126_v9  ;;  %v4357_v36 = vadd.f32 %v4356_v38, %v4355_v49  ;;  %v5149_v9 = vsel %vm3876_vm4, %v4644_v62, 0.0  ;;  %v4646_v49 = vmul.f32 %v9284_v1, %v9284_v1 }
 0x587   : > { %v5151_v56 = vsel %vm3876_vm4, %v4645_v17, 0.0  ;;  %v4384_v1 = vsel %vm3876_vm4, %v9336_v61, 0.0 }
 0x588   : > { %v5130_v35 = vadd.f32 %v5129_v27, %v5128_v30  ;;  %v4359_v53 = vadd.f32 %v4358_v10, %v4357_v36  ;;  %v4647_v30 = vmul.f32 %v9293_v26, %v9293_v26  ;;  %v5153_v10 = vsel %vm3876_vm4, %v4646_v49, 0.0 }
 0x589   : > { %v4386_v26 = vsel %vm3876_vm4, %v9345_v59, 0.0 }
 0x58a   : > { %v5132_v42 = vadd.f32 %v5131_v37, %v5130_v35  ;;  %v4361_v39 = vadd.f32 %v4360_v51, %v4359_v53  ;;  %v5155_v37 = vsel %vm3876_vm4, %v4647_v30, 0.0  ;;  %v4649_v51 = vmul.f32 %v9345_v59, %v9345_v59 }
 0x58c   : > { %v5134_v23 = vadd.f32 %v5133_v48, %v5132_v42  ;;  %v4363_v13 = vadd.f32 %v4362_v11, %v4361_v39  ;;  %v5157_v39 = vsel %vm3876_vm4, %v4648_v40, 0.0  ;;  %v5159_v5 = vsel %vm3876_vm4, %v4649_v51, 0.0 }
 0x58e   : > { %v5136_v31 = vadd.f32 %v5135_v52, %v5134_v23  ;;  %v4365_v18 = vadd.f32 %v4364_v46, %v4363_v13 }
 0x590   : > { %v5138_v22 = vadd.f32 %v5137_v4, %v5136_v31  ;;  %v4367_v25 = vadd.f32 %v4366_v41, %v4365_v18 }
 0x592   : > { %v5140_v8 = vadd.f32 %v5139_v0, %v5138_v22  ;;  %v4369_v32 = vadd.f32 %v4368_v33, %v4367_v25 }
 0x594   : > { %v5142_v16 = vadd.f32 %v5141_v20, %v5140_v8  ;;  %v4371_v3 = vadd.f32 %v4370_v54, %v4369_v32 }
 0x596   : > { %v5144_v63 = vadd.f32 %v5143_v45, %v5142_v16  ;;  %v4373_v43 = vadd.f32 %v4372_v58, %v4371_v3 }
 0x598   : > { %v5146_v50 = vadd.f32 %v5145_v7, %v5144_v63  ;;  %v4375_v6 = vadd.f32 %v4374_v2, %v4373_v43 }
 0x59a   : > { %v5148_v21 = vadd.f32 %v5147_v44, %v5146_v50  ;;  %v4377_v12 = vadd.f32 %v4376_v19, %v4375_v6 }
 0x59c   : > { %v5150_v47 = vadd.f32 %v5149_v9, %v5148_v21  ;;  %v4379_v38 = vadd.f32 %v4378_v60, %v4377_v12 }
 0x59e   : > { %v5152_v36 = vadd.f32 %v5151_v56, %v5150_v47  ;;  %v4381_v27 = vadd.f32 %v4380_v15, %v4379_v38 }
 0x5a0   : > { %v5154_v35 = vadd.f32 %v5153_v10, %v5152_v36  ;;  %v4383_v53 = vadd.f32 %v4382_v55, %v4381_v27 }
 0x5a2   : > { %v5156_v57 = vadd.f32 %v5155_v37, %v5154_v35  ;;  %v4385_v42 = vadd.f32 %v4384_v1, %v4383_v53 }
 0x5a4   : > { %v5158_v48 = vadd.f32 %v5157_v39, %v5156_v57  ;;  %v4387_v11 = vadd.f32 %v4386_v26, %v4385_v42 }
 0x5a6   : > { %v4388_v23 = vrot.slane %v4387_v11, 4  ;;  %v5160_v13 = vadd.f32 %v5159_v5, %v5158_v48 }
 0x5a8   : > { %v4389_v52 = vadd.f32 %v4388_v23, %v4387_v11  ;;  %v5161_v61 = vrot.slane %v5160_v13, 4 }
 0x5aa   : > { %v4390_v46 = vrot.slane %v4389_v52, 2  ;;  %v5162_v24 = vadd.f32 %v5161_v61, %v5160_v13 }
 0x5ac   : > { %v4391_v31 = vadd.f32 %v4390_v46, %v4389_v52  ;;  %v5163_v18 = vrot.slane %v5162_v24, 2 }
 0x5ae   : > { %v4392_v4 = vrot.slane %v4391_v31, 1  ;;  %v5164_v41 = vadd.f32 %v5163_v18, %v5162_v24 }
 0x5b0   : > { %v5165_v34 = vrot.slane %v5164_v41, 1  ;;  %v4393_v59 = vadd.f32 %v4392_v4, %v4391_v31 }
 0x5b2   : > { %v5166_v22 = vadd.f32 %v5165_v34, %v5164_v41 }
 0x5b4   : > { %v5167_v25 = vsel %vm2058_vm0, %v4393_v59, %v5166_v22 }
 0x5b5   : > { %5169 = vst.msk [vmem:[%s187_s21] sm:$0x3] %vm5168_vm5, %v5167_v25 }
 0x5b6 PF: > { %s14_s12 = sadd.s32 1, %s6749_s12  }
 0x5b7   : > { %p11_p5 = scmp.ge.s32.totalorder %s14_s12, 15  }
 0x5b9   :  { %13 = sbr.rel (!%p11_p5) target bundleno = 1 (0x1), region = 70 }

</bundles_post_ra>
